<compile_context>
chip_gen: v6e
topology: v6e:2x2x1
jax: 0.10.0
libtpu: 0.0.40
codegen_flags: <defaults>
</compile_context>

<pallas_src>
import functools

import jax
import jax.numpy as jnp
from jax.experimental import pallas as pl
from jax.experimental.pallas import tpu as pltpu

OUTPUT_SIZE = 10  # args.output_size is external to the module; fixed here.

# (out_channels, kernel_size) per layer — static config (kept out of the pytree).
_LAYER_CFG = {
    "conv1": (64, 4),     # 32 // 8
    "conv2": (128, 3),    # 32 // 10
    "conv3": (256, 2),
    "fc1": (2048, 1),
    "fc2": (2048, 1),
    "last": (OUTPUT_SIZE, 1),
}


def _round_up(x, m):
    return (x + m - 1) // m * m


# ---------------------------------------------------------------------------
# Pallas kernels
# ---------------------------------------------------------------------------
def _matmul_bias_act_kernel(x_ref, w_ref, b_ref, o_ref, *, apply_relu):
    """Y = act(X @ W + b), one full-K block per grid step (no accumulator)."""
    acc = jnp.dot(x_ref[...], w_ref[...], preferred_element_type=jnp.float32)
    r = acc + b_ref[...]            # f32 epilogue (v5e has no bf16 VPU)
    if apply_relu:
        r = jnp.maximum(r, 0.0)
    o_ref[...] = r.astype(o_ref.dtype)


def _max4_kernel(a_ref, b_ref, c_ref, d_ref, o_ref):
    """Elementwise max of 4 arrays (the 4 taps of a 2x2/stride-2 max pool)."""
    o_ref[...] = jnp.maximum(jnp.maximum(a_ref[...], b_ref[...]),
                             jnp.maximum(c_ref[...], d_ref[...]))


# ---------------------------------------------------------------------------
# Wrappers around pallas_call
# ---------------------------------------------------------------------------
def matmul_bias_act(x, w_pad, b_pad, n_out, apply_relu):
    """act(x @ W + b) with a pre-padded bf16 weight.

    x:      (M, K) float                    — activations (cast to bf16 here)
    w_pad:  (Kp, Np) bf16, Kp = rup(K, 8), Np = rup(N, 128)  — prepared once
    b_pad:  (1, Np) f32                                      — prepared once
    Returns (M, n_out) f32.
    """
    M, K = x.shape
    Kp, Np = w_pad.shape

    # Tile selection: full-K block (K-grid extent 1, no accumulator), modest M
    # tiles, lane-wide N tiles (256 on conv3, 512 on fc1/fc2, 128 otherwise).
    if M >= 256:
        tm = 256
    elif M >= 128:
        tm = 128
    else:
        tm = _round_up(max(M, 1), 8)
    Mp = _round_up(M, tm)
    tn = min(Np, 512)

    xp = x.astype(jnp.bfloat16)
    if (Mp, Kp) != (M, K):
        xp = jnp.pad(xp, ((0, Mp - M), (0, Kp - K)))

    grid = (Mp // tm, Np // tn)
    out = pl.pallas_call(
        functools.partial(_matmul_bias_act_kernel, apply_relu=apply_relu),
        out_shape=jax.ShapeDtypeStruct((Mp, Np), jnp.float32),
        grid_spec=pltpu.PrefetchScalarGridSpec(
            num_scalar_prefetch=0,
            grid=grid,
            in_specs=[
                pl.BlockSpec((tm, Kp), lambda i, j: (i, 0)),
                pl.BlockSpec((Kp, tn), lambda i, j: (0, j)),
                pl.BlockSpec((1, tn), lambda i, j: (0, j)),
            ],
            out_specs=pl.BlockSpec((tm, tn), lambda i, j: (i, j)),
        ),
        compiler_params=pltpu.CompilerParams(
            dimension_semantics=("parallel", "parallel")),
    )(xp, w_pad, b_pad)
    return out[:M, :n_out]


def maxpool2x2(x):
    """2x2 max pool, stride 2, floor (matches nn.MaxPool2d(2)). x: NHWC f32."""
    B, H, W, C = x.shape
    OH, OW = H // 2, W // 2
    xc = x[:, : 2 * OH, : 2 * OW, :]
    taps = [
        xc[:, 0::2, 0::2, :],
        xc[:, 0::2, 1::2, :],
        xc[:, 1::2, 0::2, :],
        xc[:, 1::2, 1::2, :],
    ]
    total = B * OH * OW * C
    # Lane-dense layout: full 8x128 vregs and unmasked stores when possible.
    shp = (total // 128, 128) if total % 128 == 0 else (B * OH * OW, C)
    taps = [t.reshape(shp) for t in taps]
    out = pl.pallas_call(
        _max4_kernel,
        out_shape=jax.ShapeDtypeStruct(shp, x.dtype),
    )(*taps)
    return out.reshape(B, OH, OW, C)


def conv2d_relu(x_nhwc, w_pad, b_pad, cout, k, apply_relu=True):
    """Valid conv (stride 1, pad 0) via im2col + Pallas matmul. x: NHWC.

    w_pad is the pre-padded (Kp, Np) bf16 matrix with contraction ordered
    (kh, kw, Cin) — matching the im2col patch ordering below.
    """
    # TODO(synk): fold the kh*kw tap loop / following max-pool into the matmul
    # grid to avoid materializing the im2col patches matrix in HBM.
    B, H, W, Cin = x_nhwc.shape
    OH, OW = H - k + 1, W - k + 1
    slices = []
    for di in range(k):
        for dj in range(k):
            slices.append(x_nhwc[:, di:di + OH, dj:dj + OW, :])
    patches = jnp.stack(slices, axis=-2)                    # (B,OH,OW,k*k,Cin)
    patches = patches.reshape(B * OH * OW, k * k * Cin)
    y = matmul_bias_act(patches, w_pad, b_pad, cout, apply_relu)
    return y.reshape(B, OH, OW, cout)


# ---------------------------------------------------------------------------
# Parameter init (deterministic, torch.nn.Conv2d-style uniform bounds)
# ---------------------------------------------------------------------------
def _init_conv(key, cout, cin, k):
    kw_key, kb_key = jax.random.split(key)
    fan_in = cin * k * k
    bound = 1.0 / (fan_in ** 0.5)
    w = jax.random.uniform(kw_key, (cout, cin, k, k), jnp.float32, -bound, bound)
    b = jax.random.uniform(kb_key, (cout,), jnp.float32, -bound, bound)
    return w, b


def init_alexnet_params(key):
    ks = jax.random.split(key, 6)
    params = {}
    params["conv1"] = _init_conv(ks[0], 64, 3, 4)
    params["conv2"] = _init_conv(ks[1], 128, 64, 3)
    params["conv3"] = _init_conv(ks[2], 256, 128, 2)
    params["fc1"] = _init_conv(ks[3], 2048, 256 * 2 * 2, 1)
    params["fc2"] = _init_conv(ks[4], 2048, 2048, 1)
    params["last"] = _init_conv(ks[5], OUTPUT_SIZE, 2048, 1)
    return params


def prepare_params(raw_params):
    """One-time weight prep: transpose -> (K, N), pad to (rup(K,8), rup(N,128)),
    cast weight to bf16, bias to (1, Np) f32. Hoisted out of the forward pass
    so no per-forward HBM weight copies are made."""
    prepared = {}
    for name, (w, b) in raw_params.items():
        cout, cin, kh, kw = w.shape
        K = kh * kw * cin
        # (Cout,Cin,kh,kw) -> (kh,kw,Cin,Cout) -> (K, Cout); for conv1x1 this is
        # exactly w.reshape(out, in).T, i.e. the Linear weight layout.
        w_mat = jnp.transpose(w, (2, 3, 1, 0)).reshape(K, cout)
        Kp = _round_up(K, 8)
        Np = _round_up(cout, 128)
        w_pad = jnp.pad(w_mat, ((0, Kp - K), (0, Np - cout))).astype(jnp.bfloat16)
        b_pad = jnp.pad(b.astype(jnp.float32), (0, Np - cout)).reshape(1, Np)
        prepared[name] = {"w": w_pad, "b": b_pad}
    return prepared


# ---------------------------------------------------------------------------
# Forward pass (mirrors Alexnet.forward; dropout = identity at eval time)
# ---------------------------------------------------------------------------
def alexnet_forward(prepared, x_nchw):
    x = jnp.transpose(x_nchw.astype(jnp.float32), (0, 2, 3, 1))  # NCHW -> NHWC
    B = x.shape[0]

    for name in ("conv1", "conv2", "conv3"):
        cout, k = _LAYER_CFG[name]
        p = prepared[name]
        x = conv2d_relu(x, p["w"], p["b"], cout, k, apply_relu=True)  # drop = id
        x = maxpool2x2(x)

    # h.view(B, -1, 1, 1) in NCHW flattens channels-first: (C, H, W) order.
    h = jnp.transpose(x, (0, 3, 1, 2)).reshape(B, -1)            # (B, 1024)

    for name, relu in (("fc1", True), ("fc2", True), ("last", False)):
        cout, _ = _LAYER_CFG[name]
        p = prepared[name]
        h = matmul_bias_act(h, p["w"], p["b"], cout, relu)        # drop = id

    # h.squeeze(): (B, OUTPUT_SIZE, 1, 1) -> (B, OUTPUT_SIZE)
    return h


if __name__ == "__main__":
    key = jax.random.PRNGKey(0)
    pkey, xkey = jax.random.split(key)
    raw_params = init_alexnet_params(pkey)
    prepared = prepare_params(raw_params)          # one-time weight prep
    # The module hard-codes (ncha=3, size=32); batch=2 keeps it small.
    x = jax.random.normal(xkey, (2, 3, 32, 32), jnp.float32)

    fwd = jax.jit(alexnet_forward)
    out = jax.block_until_ready(fwd(prepared, x))
    assert out.shape == (2, OUTPUT_SIZE), out.shape
    assert bool(jnp.all(jnp.isfinite(out)))
    print("KERNEL_OK")
</pallas_src>

<mosaic_0001>
module attributes {stable_mosaic.version = 11 : i64} {
  func.func @_matmul_bias_act_kernel(%arg0: i32, %arg1: i32, %arg2: memref<256x48xbf16, #tpu.memory_space<vmem>>, %arg3: memref<48x128xbf16, #tpu.memory_space<vmem>>, %arg4: memref<1x128xf32, #tpu.memory_space<vmem>>, %arg5: memref<256x128xf32, #tpu.memory_space<vmem>>) attributes {dimension_semantics = [#tpu.dimension_semantics<parallel>, #tpu.dimension_semantics<parallel>], iteration_bounds = array<i64: 7, 1>, scalar_prefetch = 0 : i64, scratch_operands = 0 : i64, tpu.core_type = #tpu.core_type<tc>, window_params = [{transform_indices = @transform_0, window_bounds = array<i64: 256, 48>}, {transform_indices = @transform_1, window_bounds = array<i64: 48, 128>}, {transform_indices = @transform_2, window_bounds = array<i64: 1, 128>}, {transform_indices = @transform_3, window_bounds = array<i64: 256, 128>}]} {
    %c0 = arith.constant 0 : index
    %c0_0 = arith.constant 0 : index
    %0 = vector.load %arg2[%c0, %c0_0] : memref<256x48xbf16, #tpu.memory_space<vmem>>, vector<256x48xbf16>
    %c0_1 = arith.constant 0 : index
    %c0_2 = arith.constant 0 : index
    %1 = vector.load %arg3[%c0_1, %c0_2] : memref<48x128xbf16, #tpu.memory_space<vmem>>, vector<48x128xbf16>
    %cst = arith.constant dense<0.000000e+00> : vector<256x128xf32>
    %2 = tpu.matmul %0, %1, %cst {dimension_numbers = #tpu.dot_dimension_numbers<[1], [0], [0], [1], [0, 0, 1, 1], [], []>} : vector<256x48xbf16>, vector<48x128xbf16>, vector<256x128xf32> -> vector<256x128xf32>
    %c0_3 = arith.constant 0 : index
    %c0_4 = arith.constant 0 : index
    %3 = vector.load %arg4[%c0_3, %c0_4] : memref<1x128xf32, #tpu.memory_space<vmem>>, vector<1x128xf32>
    %4 = vector.broadcast %3 : vector<1x128xf32> to vector<256x128xf32>
    %5 = arith.addf %2, %4 : vector<256x128xf32>
    %cst_5 = arith.constant 0.000000e+00 : f32
    %6 = vector.broadcast %cst_5 : f32 to vector<256x128xf32>
    %7 = arith.maximumf %5, %6 : vector<256x128xf32>
    %c0_6 = arith.constant 0 : index
    %c0_7 = arith.constant 0 : index
    %8 = vector.load %arg5[%c0_6, %c0_7] : memref<256x128xf32, #tpu.memory_space<vmem>>, vector<256x128xf32>
    tpu.vector_store %arg5[%c0_6, %c0_7], %7 {strides = array<i32>} : memref<256x128xf32, #tpu.memory_space<vmem>>, vector<256x128xf32>,
    return
  }
  func.func @transform_0(%arg0: i32, %arg1: i32) -> (i32, i32) {
    %c0_i32 = arith.constant 0 : i32
    %c0_i32_0 = arith.constant 0 : i32
    return %arg0, %c0_i32 : i32, i32
  }
  func.func @transform_1(%arg0: i32, %arg1: i32) -> (i32, i32) {
    %c0_i32 = arith.constant 0 : i32
    %c0_i32_0 = arith.constant 0 : i32
    return %c0_i32, %arg1 : i32, i32
  }
  func.func @transform_2(%arg0: i32, %arg1: i32) -> (i32, i32) {
    %c0_i32 = arith.constant 0 : i32
    %c0_i32_0 = arith.constant 0 : i32
    return %c0_i32, %arg1 : i32, i32
  }
  func.func @transform_3(%arg0: i32, %arg1: i32) -> (i32, i32) {
    %c0_i32 = arith.constant 0 : i32
    return %arg0, %arg1 : i32, i32
  }
}

module attributes {stable_mosaic.version = 11 : i64} {
  func.func @_max4_kernel(%arg0: memref<196x128xf32, #tpu.memory_space<vmem>>, %arg1: memref<196x128xf32, #tpu.memory_space<vmem>>, %arg2: memref<196x128xf32, #tpu.memory_space<vmem>>, %arg3: memref<196x128xf32, #tpu.memory_space<vmem>>, %arg4: memref<196x128xf32, #tpu.memory_space<vmem>>) attributes {dimension_semantics = [], scalar_prefetch = 0 : i64, scratch_operands = 0 : i64, tpu.core_type = #tpu.core_type<tc>} {
    %c0 = arith.constant 0 : index
    %c0_0 = arith.constant 0 : index
    %0 = vector.load %arg0[%c0, %c0_0] : memref<196x128xf32, #tpu.memory_space<vmem>>, vector<196x128xf32>
    %c0_1 = arith.constant 0 : index
    %c0_2 = arith.constant 0 : index
    %1 = vector.load %arg1[%c0_1, %c0_2] : memref<196x128xf32, #tpu.memory_space<vmem>>, vector<196x128xf32>
    %2 = arith.maximumf %0, %1 : vector<196x128xf32>
    %c0_3 = arith.constant 0 : index
    %c0_4 = arith.constant 0 : index
    %3 = vector.load %arg2[%c0_3, %c0_4] : memref<196x128xf32, #tpu.memory_space<vmem>>, vector<196x128xf32>
    %c0_5 = arith.constant 0 : index
    %c0_6 = arith.constant 0 : index
    %4 = vector.load %arg3[%c0_5, %c0_6] : memref<196x128xf32, #tpu.memory_space<vmem>>, vector<196x128xf32>
    %5 = arith.maximumf %3, %4 : vector<196x128xf32>
    %6 = arith.maximumf %2, %5 : vector<196x128xf32>
    %c0_7 = arith.constant 0 : index
    %c0_8 = arith.constant 0 : index
    %7 = vector.load %arg4[%c0_7, %c0_8] : memref<196x128xf32, #tpu.memory_space<vmem>>, vector<196x128xf32>
    tpu.vector_store %arg4[%c0_7, %c0_8], %6 {strides = array<i32>} : memref<196x128xf32, #tpu.memory_space<vmem>>, vector<196x128xf32>,
    return
  }
}

module attributes {stable_mosaic.version = 11 : i64} {
  func.func @_matmul_bias_act_kernel(%arg0: i32, %arg1: i32, %arg2: memref<256x576xbf16, #tpu.memory_space<vmem>>, %arg3: memref<576x128xbf16, #tpu.memory_space<vmem>>, %arg4: memref<1x128xf32, #tpu.memory_space<vmem>>, %arg5: memref<256x128xf32, #tpu.memory_space<vmem>>) attributes {dimension_semantics = [#tpu.dimension_semantics<parallel>, #tpu.dimension_semantics<parallel>], iteration_bounds = array<i64: 2, 1>, scalar_prefetch = 0 : i64, scratch_operands = 0 : i64, tpu.core_type = #tpu.core_type<tc>, window_params = [{transform_indices = @transform_0, window_bounds = array<i64: 256, 576>}, {transform_indices = @transform_1, window_bounds = array<i64: 576, 128>}, {transform_indices = @transform_2, window_bounds = array<i64: 1, 128>}, {transform_indices = @transform_3, window_bounds = array<i64: 256, 128>}]} {
    %c0 = arith.constant 0 : index
    %c0_0 = arith.constant 0 : index
    %0 = vector.load %arg2[%c0, %c0_0] : memref<256x576xbf16, #tpu.memory_space<vmem>>, vector<256x576xbf16>
    %c0_1 = arith.constant 0 : index
    %c0_2 = arith.constant 0 : index
    %1 = vector.load %arg3[%c0_1, %c0_2] : memref<576x128xbf16, #tpu.memory_space<vmem>>, vector<576x128xbf16>
    %cst = arith.constant dense<0.000000e+00> : vector<256x128xf32>
    %2 = tpu.matmul %0, %1, %cst {dimension_numbers = #tpu.dot_dimension_numbers<[1], [0], [0], [1], [0, 0, 1, 1], [], []>} : vector<256x576xbf16>, vector<576x128xbf16>, vector<256x128xf32> -> vector<256x128xf32>
    %c0_3 = arith.constant 0 : index
    %c0_4 = arith.constant 0 : index
    %3 = vector.load %arg4[%c0_3, %c0_4] : memref<1x128xf32, #tpu.memory_space<vmem>>, vector<1x128xf32>
    %4 = vector.broadcast %3 : vector<1x128xf32> to vector<256x128xf32>
    %5 = arith.addf %2, %4 : vector<256x128xf32>
    %cst_5 = arith.constant 0.000000e+00 : f32
    %6 = vector.broadcast %cst_5 : f32 to vector<256x128xf32>
    %7 = arith.maximumf %5, %6 : vector<256x128xf32>
    %c0_6 = arith.constant 0 : index
    %c0_7 = arith.constant 0 : index
    %8 = vector.load %arg5[%c0_6, %c0_7] : memref<256x128xf32, #tpu.memory_space<vmem>>, vector<256x128xf32>
    tpu.vector_store %arg5[%c0_6, %c0_7], %7 {strides = array<i32>} : memref<256x128xf32, #tpu.memory_space<vmem>>, vector<256x128xf32>,
    return
  }
  func.func @transform_0(%arg0: i32, %arg1: i32) -> (i32, i32) {
    %c0_i32 = arith.constant 0 : i32
    %c0_i32_0 = arith.constant 0 : i32
    return %arg0, %c0_i32 : i32, i32
  }
  func.func @transform_1(%arg0: i32, %arg1: i32) -> (i32, i32) {
    %c0_i32 = arith.constant 0 : i32
    %c0_i32_0 = arith.constant 0 : i32
    return %c0_i32, %arg1 : i32, i32
  }
  func.func @transform_2(%arg0: i32, %arg1: i32) -> (i32, i32) {
    %c0_i32 = arith.constant 0 : i32
    %c0_i32_0 = arith.constant 0 : i32
    return %c0_i32, %arg1 : i32, i32
  }
  func.func @transform_3(%arg0: i32, %arg1: i32) -> (i32, i32) {
    %c0_i32 = arith.constant 0 : i32
    return %arg0, %arg1 : i32, i32
  }
}

module attributes {stable_mosaic.version = 11 : i64} {
  func.func @_max4_kernel(%arg0: memref<72x128xf32, #tpu.memory_space<vmem>>, %arg1: memref<72x128xf32, #tpu.memory_space<vmem>>, %arg2: memref<72x128xf32, #tpu.memory_space<vmem>>, %arg3: memref<72x128xf32, #tpu.memory_space<vmem>>, %arg4: memref<72x128xf32, #tpu.memory_space<vmem>>) attributes {dimension_semantics = [], scalar_prefetch = 0 : i64, scratch_operands = 0 : i64, tpu.core_type = #tpu.core_type<tc>} {
    %c0 = arith.constant 0 : index
    %c0_0 = arith.constant 0 : index
    %0 = vector.load %arg0[%c0, %c0_0] : memref<72x128xf32, #tpu.memory_space<vmem>>, vector<72x128xf32>
    %c0_1 = arith.constant 0 : index
    %c0_2 = arith.constant 0 : index
    %1 = vector.load %arg1[%c0_1, %c0_2] : memref<72x128xf32, #tpu.memory_space<vmem>>, vector<72x128xf32>
    %2 = arith.maximumf %0, %1 : vector<72x128xf32>
    %c0_3 = arith.constant 0 : index
    %c0_4 = arith.constant 0 : index
    %3 = vector.load %arg2[%c0_3, %c0_4] : memref<72x128xf32, #tpu.memory_space<vmem>>, vector<72x128xf32>
    %c0_5 = arith.constant 0 : index
    %c0_6 = arith.constant 0 : index
    %4 = vector.load %arg3[%c0_5, %c0_6] : memref<72x128xf32, #tpu.memory_space<vmem>>, vector<72x128xf32>
    %5 = arith.maximumf %3, %4 : vector<72x128xf32>
    %6 = arith.maximumf %2, %5 : vector<72x128xf32>
    %c0_7 = arith.constant 0 : index
    %c0_8 = arith.constant 0 : index
    %7 = vector.load %arg4[%c0_7, %c0_8] : memref<72x128xf32, #tpu.memory_space<vmem>>, vector<72x128xf32>
    tpu.vector_store %arg4[%c0_7, %c0_8], %6 {strides = array<i32>} : memref<72x128xf32, #tpu.memory_space<vmem>>, vector<72x128xf32>,
    return
  }
}

module attributes {stable_mosaic.version = 11 : i64} {
  func.func @_matmul_bias_act_kernel(%arg0: i32, %arg1: i32, %arg2: memref<56x512xbf16, #tpu.memory_space<vmem>>, %arg3: memref<512x256xbf16, #tpu.memory_space<vmem>>, %arg4: memref<1x256xf32, #tpu.memory_space<vmem>>, %arg5: memref<56x256xf32, #tpu.memory_space<vmem>>) attributes {dimension_semantics = [#tpu.dimension_semantics<parallel>, #tpu.dimension_semantics<parallel>], iteration_bounds = array<i64: 1, 1>, scalar_prefetch = 0 : i64, scratch_operands = 0 : i64, tpu.core_type = #tpu.core_type<tc>, window_params = [{transform_indices = @transform_0, window_bounds = array<i64: 56, 512>}, {transform_indices = @transform_1, window_bounds = array<i64: 512, 256>}, {transform_indices = @transform_2, window_bounds = array<i64: 1, 256>}, {transform_indices = @transform_3, window_bounds = array<i64: 56, 256>}]} {
    %c0 = arith.constant 0 : index
    %c0_0 = arith.constant 0 : index
    %0 = vector.load %arg2[%c0, %c0_0] : memref<56x512xbf16, #tpu.memory_space<vmem>>, vector<56x512xbf16>
    %c0_1 = arith.constant 0 : index
    %c0_2 = arith.constant 0 : index
    %1 = vector.load %arg3[%c0_1, %c0_2] : memref<512x256xbf16, #tpu.memory_space<vmem>>, vector<512x256xbf16>
    %cst = arith.constant dense<0.000000e+00> : vector<56x256xf32>
    %2 = tpu.matmul %0, %1, %cst {dimension_numbers = #tpu.dot_dimension_numbers<[1], [0], [0], [1], [0, 0, 1, 1], [], []>} : vector<56x512xbf16>, vector<512x256xbf16>, vector<56x256xf32> -> vector<56x256xf32>
    %c0_3 = arith.constant 0 : index
    %c0_4 = arith.constant 0 : index
    %3 = vector.load %arg4[%c0_3, %c0_4] : memref<1x256xf32, #tpu.memory_space<vmem>>, vector<1x256xf32>
    %4 = vector.broadcast %3 : vector<1x256xf32> to vector<56x256xf32>
    %5 = arith.addf %2, %4 : vector<56x256xf32>
    %cst_5 = arith.constant 0.000000e+00 : f32
    %6 = vector.broadcast %cst_5 : f32 to vector<56x256xf32>
    %7 = arith.maximumf %5, %6 : vector<56x256xf32>
    %c0_6 = arith.constant 0 : index
    %c0_7 = arith.constant 0 : index
    %8 = vector.load %arg5[%c0_6, %c0_7] : memref<56x256xf32, #tpu.memory_space<vmem>>, vector<56x256xf32>
    tpu.vector_store %arg5[%c0_6, %c0_7], %7 {strides = array<i32>} : memref<56x256xf32, #tpu.memory_space<vmem>>, vector<56x256xf32>,
    return
  }
  func.func @transform_0(%arg0: i32, %arg1: i32) -> (i32, i32) {
    %c0_i32 = arith.constant 0 : i32
    %c0_i32_0 = arith.constant 0 : i32
    return %arg0, %c0_i32 : i32, i32
  }
  func.func @transform_1(%arg0: i32, %arg1: i32) -> (i32, i32) {
    %c0_i32 = arith.constant 0 : i32
    %c0_i32_0 = arith.constant 0 : i32
    return %c0_i32, %arg1 : i32, i32
  }
  func.func @transform_2(%arg0: i32, %arg1: i32) -> (i32, i32) {
    %c0_i32 = arith.constant 0 : i32
    %c0_i32_0 = arith.constant 0 : i32
    return %c0_i32, %arg1 : i32, i32
  }
  func.func @transform_3(%arg0: i32, %arg1: i32) -> (i32, i32) {
    %c0_i32 = arith.constant 0 : i32
    return %arg0, %arg1 : i32, i32
  }
}

module attributes {stable_mosaic.version = 11 : i64} {
  func.func @_max4_kernel(%arg0: memref<16x128xf32, #tpu.memory_space<vmem>>, %arg1: memref<16x128xf32, #tpu.memory_space<vmem>>, %arg2: memref<16x128xf32, #tpu.memory_space<vmem>>, %arg3: memref<16x128xf32, #tpu.memory_space<vmem>>, %arg4: memref<16x128xf32, #tpu.memory_space<vmem>>) attributes {dimension_semantics = [], scalar_prefetch = 0 : i64, scratch_operands = 0 : i64, tpu.core_type = #tpu.core_type<tc>} {
    %c0 = arith.constant 0 : index
    %c0_0 = arith.constant 0 : index
    %0 = vector.load %arg0[%c0, %c0_0] : memref<16x128xf32, #tpu.memory_space<vmem>>, vector<16x128xf32>
    %c0_1 = arith.constant 0 : index
    %c0_2 = arith.constant 0 : index
    %1 = vector.load %arg1[%c0_1, %c0_2] : memref<16x128xf32, #tpu.memory_space<vmem>>, vector<16x128xf32>
    %2 = arith.maximumf %0, %1 : vector<16x128xf32>
    %c0_3 = arith.constant 0 : index
    %c0_4 = arith.constant 0 : index
    %3 = vector.load %arg2[%c0_3, %c0_4] : memref<16x128xf32, #tpu.memory_space<vmem>>, vector<16x128xf32>
    %c0_5 = arith.constant 0 : index
    %c0_6 = arith.constant 0 : index
    %4 = vector.load %arg3[%c0_5, %c0_6] : memref<16x128xf32, #tpu.memory_space<vmem>>, vector<16x128xf32>
    %5 = arith.maximumf %3, %4 : vector<16x128xf32>
    %6 = arith.maximumf %2, %5 : vector<16x128xf32>
    %c0_7 = arith.constant 0 : index
    %c0_8 = arith.constant 0 : index
    %7 = vector.load %arg4[%c0_7, %c0_8] : memref<16x128xf32, #tpu.memory_space<vmem>>, vector<16x128xf32>
    tpu.vector_store %arg4[%c0_7, %c0_8], %6 {strides = array<i32>} : memref<16x128xf32, #tpu.memory_space<vmem>>, vector<16x128xf32>,
    return
  }
}

module attributes {stable_mosaic.version = 11 : i64} {
  func.func @_matmul_bias_act_kernel(%arg0: i32, %arg1: i32, %arg2: memref<8x1024xbf16, #tpu.memory_space<vmem>>, %arg3: memref<1024x512xbf16, #tpu.memory_space<vmem>>, %arg4: memref<1x512xf32, #tpu.memory_space<vmem>>, %arg5: memref<8x512xf32, #tpu.memory_space<vmem>>) attributes {dimension_semantics = [#tpu.dimension_semantics<parallel>, #tpu.dimension_semantics<parallel>], iteration_bounds = array<i64: 1, 4>, scalar_prefetch = 0 : i64, scratch_operands = 0 : i64, tpu.core_type = #tpu.core_type<tc>, window_params = [{transform_indices = @transform_0, window_bounds = array<i64: 8, 1024>}, {transform_indices = @transform_1, window_bounds = array<i64: 1024, 512>}, {transform_indices = @transform_2, window_bounds = array<i64: 1, 512>}, {transform_indices = @transform_3, window_bounds = array<i64: 8, 512>}]} {
    %c0 = arith.constant 0 : index
    %c0_0 = arith.constant 0 : index
    %0 = vector.load %arg2[%c0, %c0_0] : memref<8x1024xbf16, #tpu.memory_space<vmem>>, vector<8x1024xbf16>
    %c0_1 = arith.constant 0 : index
    %c0_2 = arith.constant 0 : index
    %1 = vector.load %arg3[%c0_1, %c0_2] : memref<1024x512xbf16, #tpu.memory_space<vmem>>, vector<1024x512xbf16>
    %cst = arith.constant dense<0.000000e+00> : vector<8x512xf32>
    %2 = tpu.matmul %0, %1, %cst {dimension_numbers = #tpu.dot_dimension_numbers<[1], [0], [0], [1], [0, 0, 1, 1], [], []>} : vector<8x1024xbf16>, vector<1024x512xbf16>, vector<8x512xf32> -> vector<8x512xf32>
    %c0_3 = arith.constant 0 : index
    %c0_4 = arith.constant 0 : index
    %3 = vector.load %arg4[%c0_3, %c0_4] : memref<1x512xf32, #tpu.memory_space<vmem>>, vector<1x512xf32>
    %4 = vector.broadcast %3 : vector<1x512xf32> to vector<8x512xf32>
    %5 = arith.addf %2, %4 : vector<8x512xf32>
    %cst_5 = arith.constant 0.000000e+00 : f32
    %6 = vector.broadcast %cst_5 : f32 to vector<8x512xf32>
    %7 = arith.maximumf %5, %6 : vector<8x512xf32>
    %c0_6 = arith.constant 0 : index
    %c0_7 = arith.constant 0 : index
    %8 = vector.load %arg5[%c0_6, %c0_7] : memref<8x512xf32, #tpu.memory_space<vmem>>, vector<8x512xf32>
    tpu.vector_store %arg5[%c0_6, %c0_7], %7 {strides = array<i32>} : memref<8x512xf32, #tpu.memory_space<vmem>>, vector<8x512xf32>,
    return
  }
  func.func @transform_0(%arg0: i32, %arg1: i32) -> (i32, i32) {
    %c0_i32 = arith.constant 0 : i32
    %c0_i32_0 = arith.constant 0 : i32
    return %arg0, %c0_i32 : i32, i32
  }
  func.func @transform_1(%arg0: i32, %arg1: i32) -> (i32, i32) {
    %c0_i32 = arith.constant 0 : i32
    %c0_i32_0 = arith.constant 0 : i32
    return %c0_i32, %arg1 : i32, i32
  }
  func.func @transform_2(%arg0: i32, %arg1: i32) -> (i32, i32) {
    %c0_i32 = arith.constant 0 : i32
    %c0_i32_0 = arith.constant 0 : i32
    return %c0_i32, %arg1 : i32, i32
  }
  func.func @transform_3(%arg0: i32, %arg1: i32) -> (i32, i32) {
    %c0_i32 = arith.constant 0 : i32
    return %arg0, %arg1 : i32, i32
  }
}

module attributes {stable_mosaic.version = 11 : i64} {
  func.func @_matmul_bias_act_kernel(%arg0: i32, %arg1: i32, %arg2: memref<8x2048xbf16, #tpu.memory_space<vmem>>, %arg3: memref<2048x512xbf16, #tpu.memory_space<vmem>>, %arg4: memref<1x512xf32, #tpu.memory_space<vmem>>, %arg5: memref<8x512xf32, #tpu.memory_space<vmem>>) attributes {dimension_semantics = [#tpu.dimension_semantics<parallel>, #tpu.dimension_semantics<parallel>], iteration_bounds = array<i64: 1, 4>, scalar_prefetch = 0 : i64, scratch_operands = 0 : i64, tpu.core_type = #tpu.core_type<tc>, window_params = [{transform_indices = @transform_0, window_bounds = array<i64: 8, 2048>}, {transform_indices = @transform_1, window_bounds = array<i64: 2048, 512>}, {transform_indices = @transform_2, window_bounds = array<i64: 1, 512>}, {transform_indices = @transform_3, window_bounds = array<i64: 8, 512>}]} {
    %c0 = arith.constant 0 : index
    %c0_0 = arith.constant 0 : index
    %0 = vector.load %arg2[%c0, %c0_0] : memref<8x2048xbf16, #tpu.memory_space<vmem>>, vector<8x2048xbf16>
    %c0_1 = arith.constant 0 : index
    %c0_2 = arith.constant 0 : index
    %1 = vector.load %arg3[%c0_1, %c0_2] : memref<2048x512xbf16, #tpu.memory_space<vmem>>, vector<2048x512xbf16>
    %cst = arith.constant dense<0.000000e+00> : vector<8x512xf32>
    %2 = tpu.matmul %0, %1, %cst {dimension_numbers = #tpu.dot_dimension_numbers<[1], [0], [0], [1], [0, 0, 1, 1], [], []>} : vector<8x2048xbf16>, vector<2048x512xbf16>, vector<8x512xf32> -> vector<8x512xf32>
    %c0_3 = arith.constant 0 : index
    %c0_4 = arith.constant 0 : index
    %3 = vector.load %arg4[%c0_3, %c0_4] : memref<1x512xf32, #tpu.memory_space<vmem>>, vector<1x512xf32>
    %4 = vector.broadcast %3 : vector<1x512xf32> to vector<8x512xf32>
    %5 = arith.addf %2, %4 : vector<8x512xf32>
    %cst_5 = arith.constant 0.000000e+00 : f32
    %6 = vector.broadcast %cst_5 : f32 to vector<8x512xf32>
    %7 = arith.maximumf %5, %6 : vector<8x512xf32>
    %c0_6 = arith.constant 0 : index
    %c0_7 = arith.constant 0 : index
    %8 = vector.load %arg5[%c0_6, %c0_7] : memref<8x512xf32, #tpu.memory_space<vmem>>, vector<8x512xf32>
    tpu.vector_store %arg5[%c0_6, %c0_7], %7 {strides = array<i32>} : memref<8x512xf32, #tpu.memory_space<vmem>>, vector<8x512xf32>,
    return
  }
  func.func @transform_0(%arg0: i32, %arg1: i32) -> (i32, i32) {
    %c0_i32 = arith.constant 0 : i32
    %c0_i32_0 = arith.constant 0 : i32
    return %arg0, %c0_i32 : i32, i32
  }
  func.func @transform_1(%arg0: i32, %arg1: i32) -> (i32, i32) {
    %c0_i32 = arith.constant 0 : i32
    %c0_i32_0 = arith.constant 0 : i32
    return %c0_i32, %arg1 : i32, i32
  }
  func.func @transform_2(%arg0: i32, %arg1: i32) -> (i32, i32) {
    %c0_i32 = arith.constant 0 : i32
    %c0_i32_0 = arith.constant 0 : i32
    return %c0_i32, %arg1 : i32, i32
  }
  func.func @transform_3(%arg0: i32, %arg1: i32) -> (i32, i32) {
    %c0_i32 = arith.constant 0 : i32
    return %arg0, %arg1 : i32, i32
  }
}

module attributes {stable_mosaic.version = 11 : i64} {
  func.func @_matmul_bias_act_kernel(%arg0: i32, %arg1: i32, %arg2: memref<8x2048xbf16, #tpu.memory_space<vmem>>, %arg3: memref<2048x128xbf16, #tpu.memory_space<vmem>>, %arg4: memref<1x128xf32, #tpu.memory_space<vmem>>, %arg5: memref<8x128xf32, #tpu.memory_space<vmem>>) attributes {dimension_semantics = [#tpu.dimension_semantics<parallel>, #tpu.dimension_semantics<parallel>], iteration_bounds = array<i64: 1, 1>, scalar_prefetch = 0 : i64, scratch_operands = 0 : i64, tpu.core_type = #tpu.core_type<tc>, window_params = [{transform_indices = @transform_0, window_bounds = array<i64: 8, 2048>}, {transform_indices = @transform_1, window_bounds = array<i64: 2048, 128>}, {transform_indices = @transform_2, window_bounds = array<i64: 1, 128>}, {transform_indices = @transform_3, window_bounds = array<i64: 8, 128>}]} {
    %c0 = arith.constant 0 : index
    %c0_0 = arith.constant 0 : index
    %0 = vector.load %arg2[%c0, %c0_0] : memref<8x2048xbf16, #tpu.memory_space<vmem>>, vector<8x2048xbf16>
    %c0_1 = arith.constant 0 : index
    %c0_2 = arith.constant 0 : index
    %1 = vector.load %arg3[%c0_1, %c0_2] : memref<2048x128xbf16, #tpu.memory_space<vmem>>, vector<2048x128xbf16>
    %cst = arith.constant dense<0.000000e+00> : vector<8x128xf32>
    %2 = tpu.matmul %0, %1, %cst {dimension_numbers = #tpu.dot_dimension_numbers<[1], [0], [0], [1], [0, 0, 1, 1], [], []>} : vector<8x2048xbf16>, vector<2048x128xbf16>, vector<8x128xf32> -> vector<8x128xf32>
    %c0_3 = arith.constant 0 : index
    %c0_4 = arith.constant 0 : index
    %3 = vector.load %arg4[%c0_3, %c0_4] : memref<1x128xf32, #tpu.memory_space<vmem>>, vector<1x128xf32>
    %4 = vector.broadcast %3 : vector<1x128xf32> to vector<8x128xf32>
    %5 = arith.addf %2, %4 : vector<8x128xf32>
    %c0_5 = arith.constant 0 : index
    %c0_6 = arith.constant 0 : index
    %6 = vector.load %arg5[%c0_5, %c0_6] : memref<8x128xf32, #tpu.memory_space<vmem>>, vector<8x128xf32>
    tpu.vector_store %arg5[%c0_5, %c0_6], %5 {strides = array<i32>} : memref<8x128xf32, #tpu.memory_space<vmem>>, vector<8x128xf32>,
    return
  }
  func.func @transform_0(%arg0: i32, %arg1: i32) -> (i32, i32) {
    %c0_i32 = arith.constant 0 : i32
    %c0_i32_0 = arith.constant 0 : i32
    return %arg0, %c0_i32 : i32, i32
  }
  func.func @transform_1(%arg0: i32, %arg1: i32) -> (i32, i32) {
    %c0_i32 = arith.constant 0 : i32
    %c0_i32_0 = arith.constant 0 : i32
    return %c0_i32, %arg1 : i32, i32
  }
  func.func @transform_2(%arg0: i32, %arg1: i32) -> (i32, i32) {
    %c0_i32 = arith.constant 0 : i32
    %c0_i32_0 = arith.constant 0 : i32
    return %c0_i32, %arg1 : i32, i32
  }
  func.func @transform_3(%arg0: i32, %arg1: i32) -> (i32, i32) {
    %c0_i32 = arith.constant 0 : i32
    return %arg0, %arg1 : i32, i32
  }
}

</mosaic_0001>

<bundles_post_ra>
// kernel: alexnet_forward.9
= control target key start
LH: loop header
LB: loop body
LE: loop exit
PB: predicated region body
PF: predicated region fallthrough
CT: control target
= control target key end

     0   :  { %s944_s12 = smov 0   ;;  %s946_s13 = smov 0   ;;  %s1095_s0 = inlined_call_operand.vmem [shape: bf16[1792,48], index: 0, kind: input, shape index: {}]   ;;  %s1096_s1 = inlined_call_operand.vmem [shape: bf16[48,128], index: 1, kind: input, shape index: {}]   ;;  %s1097_s2 = inlined_call_operand.vmem [shape: f32[1,128], index: 2, kind: input, shape index: {}]   ;;  %s1098_s3 = inlined_call_operand.vmem [shape: f32[1792,128], index: 3, kind: output, shape index: {}]  }
   0x1   :  { %s948_s14 = smov 0  }
   0x2 LB: > { %s25_s15 = sadd.s32 1, %s918_s13  ;;  %p751_p0 = scmp.ge.s32.totalorder %s922_s14, 1  ;;  %s922_s14 = sphi %s948_s14, %s13_s14   ;;  %s918_s13 = sphi %s946_s13, %s1100_s13   ;;  %s914_s12 = sphi %s944_s12, %s1099_s12  }
   0x3   : > { %p27_p1 = scmp.ge.s32.totalorder %s25_s15, 7  ;;  %p169_p2 = scmp.lt.s32.totalorder %s922_s14, 8 }
   0x5   : > { %s1102_s15 = smov (%p27_p1, %s25_s15), 0  ;;  %p170_p3 = pnand %p751_p0, %p169_p2 }
   0x6   : > { %s752_s18 = sshll.u32 (!%p170_p3), %s914_s12, 5 }
   0x7   : > { %173 = sbr.rel (%p170_p3) target bundleno = 253 (0xfd), region = 32  ;;  %p204_p4 = scmp.lt.s32.totalorder (!%p170_p3), %s752_s18, 223 }
   0xc   : > { %v881_v0 = vld [vmem:[%s1096_s1 + $0x10] sm:$0xff]   ;;  %v882_v1 = vld [vmem:[%s1096_s1 + $0x8] sm:$0xff]   ;;  %s1104_s18 = smov (!%p204_p4, %s752_s18), 223  ;;  %v883_v2 = vld [vmem:[%s1096_s1] sm:$0xff]   ;;  %vm369_vm0 = vcmask 392192  }
   0xd   : > { %813 = vmatprep.subr.bf16.mxu0 %v881_v0  ;;  %851 = vmatprep.subr.bf16.mxu1 %v881_v0  ;;  %s753_s23 = sshll.u32 %s1104_s18, 2  ;;  %v1014_v19 = vld [vmem:[%s1097_s2] ss:$0 sm:$0xff]  ;;  %s755_s29 = sshll.u32 %s1104_s18, 3 }
   0xe   : > { %814 = vmatpush3.bf16.msra.mxu0 %v881_v0  ;;  %854 = vmatpush3.bf16.msra.mxu1 %v881_v0  ;;  %s977_s26 = scalar_lea.vmem %s1095_s0, %s753_s23  ;;  %s1022_s5 = scalar_lea.vmem %s1098_s3, %s755_s29 }
   0xf   : > { %815 = vmatprep.subr.bf16.mxu0 %v882_v1  ;;  %852 = vmatprep.subr.bf16.mxu1 %v882_v1  ;;  %v884_v3 = vld [vmem:[%s977_s26] sm:$0xff]   ;;  %v886_v5 = vld [vmem:[%s977_s26 + $0x8] sm:$0xff]   ;;  %v888_v7 = vld [vmem:[%s977_s26 + $0x10] sm:$0xff]  }
  0x10   : > { %v885_v4 = vld [vmem:[%s977_s26 + $0x40] sm:$0xff]   ;;  %819 = vmatprep.mubr.msk.bf16.mxu0 %vm369_vm0, %v884_v3  ;;  %v887_v6 = vld [vmem:[%s977_s26 + $0x48] sm:$0xff]   ;;  %v889_v8 = vld [vmem:[%s977_s26 + $0x50] sm:$0xff]  }
  0x11   : > { %835 = vmatprep.mubr.msk.bf16.mxu1 %vm369_vm0, %v885_v4  ;;  %v890_v9 = vld [vmem:[%s977_s26 + $0x18] sm:$0xff]   ;;  %v892_v11 = vld [vmem:[%s977_s26 + $0x20] sm:$0xff]   ;;  %v894_v13 = vld [vmem:[%s977_s26 + $0x28] sm:$0xff]  }
  0x12   : > { %816 = vmatpush3.bf16.msra.mxu0 %v882_v1  ;;  %855 = vmatpush3.bf16.msra.mxu1 %v882_v1  ;;  %v891_v10 = vld [vmem:[%s977_s26 + $0x58] sm:$0xff]   ;;  %v893_v12 = vld [vmem:[%s977_s26 + $0x60] sm:$0xff]   ;;  %v895_v14 = vld [vmem:[%s977_s26 + $0x68] sm:$0xff]  }
  0x13   : > { %817 = vmatprep.subr.bf16.mxu0 %v883_v2  ;;  %853 = vmatprep.subr.bf16.mxu1 %v883_v2  ;;  %v896_v15 = vld [vmem:[%s977_s26 + $0x30] sm:$0xff]   ;;  %v898_v17 = vld [vmem:[%s977_s26 + $0x38] sm:$0xff]  }
  0x14   : > { %v897_v16 = vld [vmem:[%s977_s26 + $0x70] sm:$0xff]   ;;  %v899_v18 = vld [vmem:[%s977_s26 + $0x78] sm:$0xff]  }
  0x16   : > { %818 = vmatpush3.bf16.msra.mxu0 %v883_v2  ;;  %856 = vmatpush3.bf16.msra.mxu1 %v883_v2 }
  0x19   : > { %820 = vmatmul.mubr.msk.bf16.vlgmr.msra.gmra.mxu0 %vm369_vm0, %v886_v5  ;;  %836 = vmatmul.mubr.msk.bf16.vlgmr.msra.gmra.mxu1 %vm369_vm0, %v887_v6 }
  0x1a   : > { %823 = vmatprep.mubr.msk.bf16.mxu0 %vm369_vm0, %v888_v7  ;;  %839 = vmatprep.mubr.msk.bf16.mxu1 %vm369_vm0, %v889_v8 }
  0x21   : > { %824 = vmatmul.mubr.msk.bf16.gmra.mxu0 %vm369_vm0, %v890_v9  ;;  %840 = vmatmul.mubr.msk.bf16.gmra.mxu1 %vm369_vm0, %v891_v10 }
  0x22   : > { %827 = vmatprep.mubr.msk.bf16.mxu0 %vm369_vm0, %v892_v11  ;;  %843 = vmatprep.mubr.msk.bf16.mxu1 %vm369_vm0, %v893_v12 }
  0x29   : > { %828 = vmatmul.mubr.msk.bf16.gmra.mxu0 %vm369_vm0, %v894_v13  ;;  %844 = vmatmul.mubr.msk.bf16.gmra.mxu1 %vm369_vm0, %v895_v14 }
  0x2a   : > { %831 = vmatprep.mubr.msk.bf16.mxu0 %vm369_vm0, %v896_v15  ;;  %847 = vmatprep.mubr.msk.bf16.mxu1 %vm369_vm0, %v897_v16 }
  0x31   : > { %832 = vmatmul.mubr.msk.bf16.gmra.mxu0 %vm369_vm0, %v898_v17  ;;  %848 = vmatmul.mubr.msk.bf16.gmra.mxu1 %vm369_vm0, %v899_v18 }
  0xd9   : > { %v821_v20 = vpop.f32.mrf.mxu0  ;;  %v837_v21 = vpop.f32.mrf.mxu1 }
  0xda   : > { %v461_v22 = vadd.f32 %v821_v20, %v1014_v19  ;;  %v525_v23 = vadd.f32 %v837_v21, %v1014_v19 }
  0xdb   : > { %v452_v24 = vpop.f32.mrf.mxu0  ;;  %v516_v25 = vpop.f32.mrf.mxu1 }
  0xdc   : > { %v581_v26 = vmax.f32 %v461_v22, 0.0  ;;  %v597_v27 = vmax.f32 %v525_v23, 0.0  ;;  %v453_v28 = vadd.f32 %v1014_v19, %v452_v24  ;;  %v517_v29 = vadd.f32 %v1014_v19, %v516_v25 }
  0xdd   : > { %v822_v30 = vpop.f32.mrf.mxu0  ;;  %v838_v31 = vpop.f32.mrf.mxu1 }
  0xde   : > { %613 = vst [vmem:[%s1022_s5 + $0x10] sm:$0xff] %v581_v26  ;;  %629 = vst [vmem:[%s1022_s5 + $0x90] sm:$0xff] %v597_v27  ;;  %v579_v32 = vmax.f32 %v453_v28, 0.0  ;;  %v595_v33 = vmax.f32 %v517_v29, 0.0  ;;  %v464_v34 = vadd.f32 %v822_v30, %v1014_v19  ;;  %v528_v35 = vadd.f32 %v838_v31, %v1014_v19 }
  0xdf   : > { %v455_v36 = vpop.f32.mrf.mxu0  ;;  %v519_v37 = vpop.f32.mrf.mxu1 }
  0xe0   : > { %611 = vst [vmem:[%s1022_s5] sm:$0xff] %v579_v32  ;;  %627 = vst [vmem:[%s1022_s5 + $0x80] sm:$0xff] %v595_v33  ;;  %v582_v38 = vmax.f32 %v464_v34, 0.0  ;;  %v598_v39 = vmax.f32 %v528_v35, 0.0  ;;  %v456_v40 = vadd.f32 %v1014_v19, %v455_v36  ;;  %v520_v41 = vadd.f32 %v1014_v19, %v519_v37 }
  0xe1   : > { %v825_v42 = vpop.f32.mrf.mxu0  ;;  %v841_v43 = vpop.f32.mrf.mxu1 }
  0xe2   : > { %614 = vst [vmem:[%s1022_s5 + $0x18] sm:$0xff] %v582_v38  ;;  %630 = vst [vmem:[%s1022_s5 + $0x98] sm:$0xff] %v598_v39  ;;  %v580_v44 = vmax.f32 %v456_v40, 0.0  ;;  %v596_v45 = vmax.f32 %v520_v41, 0.0  ;;  %v477_v46 = vadd.f32 %v825_v42, %v1014_v19  ;;  %v541_v47 = vadd.f32 %v841_v43, %v1014_v19 }
  0xe3   : > { %v468_v48 = vpop.f32.mrf.mxu0  ;;  %v532_v49 = vpop.f32.mrf.mxu1 }
  0xe4   : > { %612 = vst [vmem:[%s1022_s5 + $0x8] sm:$0xff] %v580_v44  ;;  %628 = vst [vmem:[%s1022_s5 + $0x88] sm:$0xff] %v596_v45  ;;  %v585_v50 = vmax.f32 %v477_v46, 0.0  ;;  %v601_v51 = vmax.f32 %v541_v47, 0.0  ;;  %v469_v52 = vadd.f32 %v1014_v19, %v468_v48  ;;  %v533_v53 = vadd.f32 %v1014_v19, %v532_v49 }
  0xe5   : > { %v826_v54 = vpop.f32.mrf.mxu0  ;;  %v842_v55 = vpop.f32.mrf.mxu1 }
  0xe6   : > { %617 = vst [vmem:[%s1022_s5 + $0x30] sm:$0xff] %v585_v50  ;;  %633 = vst [vmem:[%s1022_s5 + $0xb0] sm:$0xff] %v601_v51  ;;  %v583_v56 = vmax.f32 %v469_v52, 0.0  ;;  %v599_v57 = vmax.f32 %v533_v53, 0.0  ;;  %v480_v58 = vadd.f32 %v826_v54, %v1014_v19  ;;  %v544_v59 = vadd.f32 %v842_v55, %v1014_v19 }
  0xe7   : > { %v471_v60 = vpop.f32.mrf.mxu0  ;;  %v535_v61 = vpop.f32.mrf.mxu1 }
  0xe8   : > { %615 = vst [vmem:[%s1022_s5 + $0x20] sm:$0xff] %v583_v56  ;;  %631 = vst [vmem:[%s1022_s5 + $0xa0] sm:$0xff] %v599_v57  ;;  %v586_v62 = vmax.f32 %v480_v58, 0.0  ;;  %v602_v63 = vmax.f32 %v544_v59, 0.0  ;;  %v472_v0 = vadd.f32 %v1014_v19, %v471_v60  ;;  %v536_v1 = vadd.f32 %v1014_v19, %v535_v61 }
  0xe9   : > { %v829_v2 = vpop.f32.mrf.mxu0  ;;  %v845_v3 = vpop.f32.mrf.mxu1 }
  0xea   : > { %618 = vst [vmem:[%s1022_s5 + $0x38] sm:$0xff] %v586_v62  ;;  %634 = vst [vmem:[%s1022_s5 + $0xb8] sm:$0xff] %v602_v63  ;;  %v584_v4 = vmax.f32 %v472_v0, 0.0  ;;  %v600_v5 = vmax.f32 %v536_v1, 0.0  ;;  %v493_v6 = vadd.f32 %v829_v2, %v1014_v19  ;;  %v557_v7 = vadd.f32 %v845_v3, %v1014_v19 }
  0xeb   : > { %v484_v8 = vpop.f32.mrf.mxu0  ;;  %v548_v9 = vpop.f32.mrf.mxu1 }
  0xec   : > { %616 = vst [vmem:[%s1022_s5 + $0x28] sm:$0xff] %v584_v4  ;;  %632 = vst [vmem:[%s1022_s5 + $0xa8] sm:$0xff] %v600_v5  ;;  %v589_v10 = vmax.f32 %v493_v6, 0.0  ;;  %v605_v11 = vmax.f32 %v557_v7, 0.0  ;;  %v485_v12 = vadd.f32 %v1014_v19, %v484_v8  ;;  %v549_v13 = vadd.f32 %v1014_v19, %v548_v9 }
  0xed   : > { %v830_v14 = vpop.f32.mrf.mxu0  ;;  %v846_v15 = vpop.f32.mrf.mxu1 }
  0xee   : > { %621 = vst [vmem:[%s1022_s5 + $0x50] sm:$0xff] %v589_v10  ;;  %637 = vst [vmem:[%s1022_s5 + $0xd0] sm:$0xff] %v605_v11  ;;  %v587_v16 = vmax.f32 %v485_v12, 0.0  ;;  %v603_v17 = vmax.f32 %v549_v13, 0.0  ;;  %v496_v18 = vadd.f32 %v830_v14, %v1014_v19  ;;  %v560_v20 = vadd.f32 %v846_v15, %v1014_v19 }
  0xef   : > { %v487_v21 = vpop.f32.mrf.mxu0  ;;  %v551_v22 = vpop.f32.mrf.mxu1 }
  0xf0   : > { %619 = vst [vmem:[%s1022_s5 + $0x40] sm:$0xff] %v587_v16  ;;  %635 = vst [vmem:[%s1022_s5 + $0xc0] sm:$0xff] %v603_v17  ;;  %v590_v23 = vmax.f32 %v496_v18, 0.0  ;;  %v606_v24 = vmax.f32 %v560_v20, 0.0  ;;  %v488_v25 = vadd.f32 %v1014_v19, %v487_v21  ;;  %v552_v26 = vadd.f32 %v1014_v19, %v551_v22 }
  0xf1   : > { %v833_v27 = vpop.f32.mrf.mxu0  ;;  %v849_v28 = vpop.f32.mrf.mxu1 }
  0xf2   : > { %622 = vst [vmem:[%s1022_s5 + $0x58] sm:$0xff] %v590_v23  ;;  %638 = vst [vmem:[%s1022_s5 + $0xd8] sm:$0xff] %v606_v24  ;;  %v588_v29 = vmax.f32 %v488_v25, 0.0  ;;  %v604_v30 = vmax.f32 %v552_v26, 0.0  ;;  %v509_v31 = vadd.f32 %v833_v27, %v1014_v19  ;;  %v573_v32 = vadd.f32 %v849_v28, %v1014_v19 }
  0xf3   : > { %v500_v33 = vpop.f32.mrf.mxu0  ;;  %v564_v34 = vpop.f32.mrf.mxu1 }
  0xf4   : > { %620 = vst [vmem:[%s1022_s5 + $0x48] sm:$0xff] %v588_v29  ;;  %636 = vst [vmem:[%s1022_s5 + $0xc8] sm:$0xff] %v604_v30  ;;  %v593_v35 = vmax.f32 %v509_v31, 0.0  ;;  %v609_v36 = vmax.f32 %v573_v32, 0.0  ;;  %v501_v37 = vadd.f32 %v1014_v19, %v500_v33  ;;  %v565_v38 = vadd.f32 %v1014_v19, %v564_v34 }
  0xf5   : > { %v834_v39 = vpop.f32.mrf.mxu0  ;;  %v850_v40 = vpop.f32.mrf.mxu1 }
  0xf6   : > { %625 = vst [vmem:[%s1022_s5 + $0x70] sm:$0xff] %v593_v35  ;;  %641 = vst [vmem:[%s1022_s5 + $0xf0] sm:$0xff] %v609_v36  ;;  %v591_v41 = vmax.f32 %v501_v37, 0.0  ;;  %v607_v42 = vmax.f32 %v565_v38, 0.0  ;;  %v512_v43 = vadd.f32 %v834_v39, %v1014_v19  ;;  %v576_v44 = vadd.f32 %v850_v40, %v1014_v19 }
  0xf7   : > { %v503_v45 = vpop.f32.mrf.mxu0  ;;  %v567_v46 = vpop.f32.mrf.mxu1 }
  0xf8   : > { %623 = vst [vmem:[%s1022_s5 + $0x60] sm:$0xff] %v591_v41  ;;  %639 = vst [vmem:[%s1022_s5 + $0xe0] sm:$0xff] %v607_v42  ;;  %v594_v47 = vmax.f32 %v512_v43, 0.0  ;;  %v610_v48 = vmax.f32 %v576_v44, 0.0  ;;  %v504_v49 = vadd.f32 %v1014_v19, %v503_v45  ;;  %v568_v50 = vadd.f32 %v1014_v19, %v567_v46 }
  0xfa   : > { %626 = vst [vmem:[%s1022_s5 + $0x78] sm:$0xff] %v594_v47  ;;  %642 = vst [vmem:[%s1022_s5 + $0xf8] sm:$0xff] %v610_v48  ;;  %v592_v51 = vmax.f32 %v504_v49, 0.0  ;;  %v608_v52 = vmax.f32 %v568_v50, 0.0 }
  0xfc   : > { %624 = vst [vmem:[%s1022_s5 + $0x68] sm:$0xff] %v592_v51  ;;  %640 = vst [vmem:[%s1022_s5 + $0xe8] sm:$0xff] %v608_v52 }
  0xfd PF: > { %s13_s14 = sadd.s32 1, %s922_s14   ;;  %s1099_s12 = smov %s918_s13 }
  0xfe   : > { %p10_p5 = scmp.ge.s32.totalorder %s13_s14, 9   ;;  %s1100_s13 = smov %s1102_s15 }
 0x100   :  { %12 = sbr.rel (!%p10_p5) target bundleno = 2 (0x2), region = 68 }

// kernel: alexnet_forward.10
= control target key start
LH: loop header
LB: loop body
LE: loop exit
PB: predicated region body
PF: predicated region fallthrough
CT: control target
= control target key end

     0   :  { %s621_s0 = inlined_call_operand.vmem [shape: f32[196,128], index: 0, kind: input, shape index: {}]   ;;  %s622_s1 = inlined_call_operand.vmem [shape: f32[196,128], index: 1, kind: input, shape index: {}]   ;;  %s623_s2 = inlined_call_operand.vmem [shape: f32[196,128], index: 2, kind: input, shape index: {}]   ;;  %s624_s3 = inlined_call_operand.vmem [shape: f32[196,128], index: 3, kind: input, shape index: {}]   ;;  %s625_s4 = inlined_call_operand.vmem [shape: f32[196,128], index: 4, kind: output, shape index: {}]  }
   0x1   :  { %v17_v0 = vld [vmem:[%s621_s0] sm:$0xff]  ;;  %v18_v5 = vld [vmem:[%s621_s0 + $0x8] sm:$0xff]  ;;  %v19_v11 = vld [vmem:[%s621_s0 + $0x10] sm:$0xff] }
   0x2   :  { %v42_v1 = vld [vmem:[%s622_s1] sm:$0xff]  ;;  %v43_v6 = vld [vmem:[%s622_s1 + $0x8] sm:$0xff]  ;;  %v44_v13 = vld [vmem:[%s622_s1 + $0x10] sm:$0xff] }
   0x3   :  { %v92_v2 = vld [vmem:[%s623_s2] sm:$0xff]  ;;  %v67_v3 = vmax.f32 %v17_v0, %v42_v1  ;;  %v68_v8 = vmax.f32 %v18_v5, %v43_v6  ;;  %v93_v9 = vld [vmem:[%s623_s2 + $0x8] sm:$0xff]  ;;  %v94_v14 = vld [vmem:[%s623_s2 + $0x10] sm:$0xff]  ;;  %v69_v17 = vmax.f32 %v19_v11, %v44_v13 }
   0x4   :  { %v117_v4 = vld [vmem:[%s624_s3] sm:$0xff]  ;;  %v118_v10 = vld [vmem:[%s624_s3 + $0x8] sm:$0xff]  ;;  %v119_v15 = vld [vmem:[%s624_s3 + $0x10] sm:$0xff] }
   0x5   :  { %v142_v7 = vmax.f32 %v92_v2, %v117_v4  ;;  %v143_v12 = vmax.f32 %v93_v9, %v118_v10  ;;  %v144_v18 = vmax.f32 %v94_v14, %v119_v15  ;;  %v20_v19 = vld [vmem:[%s621_s0 + $0x18] sm:$0xff]  ;;  %v21_v25 = vld [vmem:[%s621_s0 + $0x20] sm:$0xff]  ;;  %v22_v32 = vld [vmem:[%s621_s0 + $0x28] sm:$0xff] }
   0x6   :  { %v45_v20 = vld [vmem:[%s622_s1 + $0x18] sm:$0xff]  ;;  %v46_v26 = vld [vmem:[%s622_s1 + $0x20] sm:$0xff]  ;;  %v47_v34 = vld [vmem:[%s622_s1 + $0x28] sm:$0xff] }
   0x7   :  { %v167_v16 = vmax.f32 %v67_v3, %v142_v7  ;;  %v95_v21 = vld [vmem:[%s623_s2 + $0x18] sm:$0xff]  ;;  %v168_v22 = vmax.f32 %v68_v8, %v143_v12  ;;  %v70_v23 = vmax.f32 %v20_v19, %v45_v20  ;;  %v169_v27 = vmax.f32 %v69_v17, %v144_v18  ;;  %v96_v30 = vld [vmem:[%s623_s2 + $0x20] sm:$0xff]  ;;  %v97_v35 = vld [vmem:[%s623_s2 + $0x28] sm:$0xff] }
   0x8   :  { %v120_v24 = vld [vmem:[%s624_s3 + $0x18] sm:$0xff]  ;;  %v71_v29 = vmax.f32 %v21_v25, %v46_v26  ;;  %v121_v31 = vld [vmem:[%s624_s3 + $0x20] sm:$0xff]  ;;  %v122_v36 = vld [vmem:[%s624_s3 + $0x28] sm:$0xff]  ;;  %v72_v38 = vmax.f32 %v22_v32, %v47_v34 }
   0x9   :  { %192 = vst [vmem:[%s625_s4] sm:$0xff] %v167_v16  ;;  %v145_v28 = vmax.f32 %v95_v21, %v120_v24  ;;  %193 = vst [vmem:[%s625_s4 + $0x8] sm:$0xff] %v168_v22  ;;  %v146_v33 = vmax.f32 %v96_v30, %v121_v31  ;;  %v147_v39 = vmax.f32 %v97_v35, %v122_v36  ;;  %v23_v40 = vld [vmem:[%s621_s0 + $0x30] sm:$0xff]  ;;  %v24_v46 = vld [vmem:[%s621_s0 + $0x38] sm:$0xff] }
   0xa   :  { %194 = vst [vmem:[%s625_s4 + $0x10] sm:$0xff] %v169_v27  ;;  %v48_v41 = vld [vmem:[%s622_s1 + $0x30] sm:$0xff]  ;;  %v49_v47 = vld [vmem:[%s622_s1 + $0x38] sm:$0xff]  ;;  %v25_v53 = vld [vmem:[%s621_s0 + $0x40] sm:$0xff] }
   0xb   :  { %v170_v37 = vmax.f32 %v70_v23, %v145_v28  ;;  %v98_v42 = vld [vmem:[%s623_s2 + $0x30] sm:$0xff]  ;;  %v171_v43 = vmax.f32 %v71_v29, %v146_v33  ;;  %v73_v44 = vmax.f32 %v23_v40, %v48_v41  ;;  %v172_v48 = vmax.f32 %v72_v38, %v147_v39  ;;  %v99_v51 = vld [vmem:[%s623_s2 + $0x38] sm:$0xff]  ;;  %v50_v55 = vld [vmem:[%s622_s1 + $0x40] sm:$0xff] }
   0xc   :  { %v123_v45 = vld [vmem:[%s624_s3 + $0x30] sm:$0xff]  ;;  %v74_v50 = vmax.f32 %v24_v46, %v49_v47  ;;  %v124_v52 = vld [vmem:[%s624_s3 + $0x38] sm:$0xff]  ;;  %v100_v56 = vld [vmem:[%s623_s2 + $0x40] sm:$0xff]  ;;  %v75_v59 = vmax.f32 %v25_v53, %v50_v55 }
   0xd   :  { %195 = vst [vmem:[%s625_s4 + $0x18] sm:$0xff] %v170_v37  ;;  %v148_v49 = vmax.f32 %v98_v42, %v123_v45  ;;  %196 = vst [vmem:[%s625_s4 + $0x20] sm:$0xff] %v171_v43  ;;  %v149_v54 = vmax.f32 %v99_v51, %v124_v52  ;;  %v125_v57 = vld [vmem:[%s624_s3 + $0x40] sm:$0xff]  ;;  %v26_v61 = vld [vmem:[%s621_s0 + $0x48] sm:$0xff] }
   0xe   :  { %197 = vst [vmem:[%s625_s4 + $0x28] sm:$0xff] %v172_v48  ;;  %v150_v60 = vmax.f32 %v100_v56, %v125_v57  ;;  %v51_v62 = vld [vmem:[%s622_s1 + $0x48] sm:$0xff]  ;;  %v27_v3 = vld [vmem:[%s621_s0 + $0x50] sm:$0xff]  ;;  %v28_v10 = vld [vmem:[%s621_s0 + $0x58] sm:$0xff] }
   0xf   :  { %v173_v58 = vmax.f32 %v73_v44, %v148_v49  ;;  %v101_v63 = vld [vmem:[%s623_s2 + $0x48] sm:$0xff]  ;;  %v174_v0 = vmax.f32 %v74_v50, %v149_v54  ;;  %v76_v1 = vmax.f32 %v26_v61, %v51_v62  ;;  %v52_v4 = vld [vmem:[%s622_s1 + $0x50] sm:$0xff]  ;;  %v53_v12 = vld [vmem:[%s622_s1 + $0x58] sm:$0xff] }
  0x10   :  { %v126_v2 = vld [vmem:[%s624_s3 + $0x48] sm:$0xff]  ;;  %v175_v5 = vmax.f32 %v75_v59, %v150_v60  ;;  %v77_v7 = vmax.f32 %v27_v3, %v52_v4  ;;  %v102_v8 = vld [vmem:[%s623_s2 + $0x50] sm:$0xff]  ;;  %v103_v13 = vld [vmem:[%s623_s2 + $0x58] sm:$0xff]  ;;  %v78_v16 = vmax.f32 %v28_v10, %v53_v12 }
  0x11   :  { %198 = vst [vmem:[%s625_s4 + $0x30] sm:$0xff] %v173_v58  ;;  %v151_v6 = vmax.f32 %v101_v63, %v126_v2  ;;  %v127_v9 = vld [vmem:[%s624_s3 + $0x50] sm:$0xff]  ;;  %199 = vst [vmem:[%s625_s4 + $0x38] sm:$0xff] %v174_v0  ;;  %v128_v14 = vld [vmem:[%s624_s3 + $0x58] sm:$0xff] }
  0x12   :  { %v152_v11 = vmax.f32 %v102_v8, %v127_v9  ;;  %200 = vst [vmem:[%s625_s4 + $0x40] sm:$0xff] %v175_v5  ;;  %v153_v17 = vmax.f32 %v103_v13, %v128_v14  ;;  %v29_v18 = vld [vmem:[%s621_s0 + $0x60] sm:$0xff]  ;;  %v30_v24 = vld [vmem:[%s621_s0 + $0x68] sm:$0xff]  ;;  %v31_v31 = vld [vmem:[%s621_s0 + $0x70] sm:$0xff] }
  0x13   :  { %v176_v15 = vmax.f32 %v76_v1, %v151_v6  ;;  %v54_v19 = vld [vmem:[%s622_s1 + $0x60] sm:$0xff]  ;;  %v55_v25 = vld [vmem:[%s622_s1 + $0x68] sm:$0xff]  ;;  %v56_v33 = vld [vmem:[%s622_s1 + $0x70] sm:$0xff] }
  0x14   :  { %v104_v20 = vld [vmem:[%s623_s2 + $0x60] sm:$0xff]  ;;  %v177_v21 = vmax.f32 %v77_v7, %v152_v11  ;;  %v79_v22 = vmax.f32 %v29_v18, %v54_v19  ;;  %v178_v26 = vmax.f32 %v78_v16, %v153_v17  ;;  %v80_v28 = vmax.f32 %v30_v24, %v55_v25  ;;  %v105_v29 = vld [vmem:[%s623_s2 + $0x68] sm:$0xff]  ;;  %v106_v34 = vld [vmem:[%s623_s2 + $0x70] sm:$0xff] }
  0x15   :  { %v129_v23 = vld [vmem:[%s624_s3 + $0x60] sm:$0xff]  ;;  %201 = vst [vmem:[%s625_s4 + $0x48] sm:$0xff] %v176_v15  ;;  %v130_v30 = vld [vmem:[%s624_s3 + $0x68] sm:$0xff]  ;;  %v131_v35 = vld [vmem:[%s624_s3 + $0x70] sm:$0xff]  ;;  %v81_v37 = vmax.f32 %v31_v31, %v56_v33 }
  0x16   :  { %v154_v27 = vmax.f32 %v104_v20, %v129_v23  ;;  %202 = vst [vmem:[%s625_s4 + $0x50] sm:$0xff] %v177_v21  ;;  %v155_v32 = vmax.f32 %v105_v29, %v130_v30  ;;  %203 = vst [vmem:[%s625_s4 + $0x58] sm:$0xff] %v178_v26  ;;  %v156_v38 = vmax.f32 %v106_v34, %v131_v35  ;;  %v32_v39 = vld [vmem:[%s621_s0 + $0x78] sm:$0xff]  ;;  %v33_v45 = vld [vmem:[%s621_s0 + $0x80] sm:$0xff] }
  0x17   :  { %v57_v40 = vld [vmem:[%s622_s1 + $0x78] sm:$0xff]  ;;  %v58_v46 = vld [vmem:[%s622_s1 + $0x80] sm:$0xff]  ;;  %v34_v52 = vld [vmem:[%s621_s0 + $0x88] sm:$0xff] }
  0x18   :  { %v179_v36 = vmax.f32 %v79_v22, %v154_v27  ;;  %v107_v41 = vld [vmem:[%s623_s2 + $0x78] sm:$0xff]  ;;  %v180_v42 = vmax.f32 %v80_v28, %v155_v32  ;;  %v82_v43 = vmax.f32 %v32_v39, %v57_v40  ;;  %v181_v47 = vmax.f32 %v81_v37, %v156_v38  ;;  %v108_v50 = vld [vmem:[%s623_s2 + $0x80] sm:$0xff]  ;;  %v59_v54 = vld [vmem:[%s622_s1 + $0x88] sm:$0xff] }
  0x19   :  { %v132_v44 = vld [vmem:[%s624_s3 + $0x78] sm:$0xff]  ;;  %v83_v49 = vmax.f32 %v33_v45, %v58_v46  ;;  %v133_v51 = vld [vmem:[%s624_s3 + $0x80] sm:$0xff]  ;;  %v109_v55 = vld [vmem:[%s623_s2 + $0x88] sm:$0xff]  ;;  %v84_v58 = vmax.f32 %v34_v52, %v59_v54 }
  0x1a   :  { %204 = vst [vmem:[%s625_s4 + $0x60] sm:$0xff] %v179_v36  ;;  %v157_v48 = vmax.f32 %v107_v41, %v132_v44  ;;  %205 = vst [vmem:[%s625_s4 + $0x68] sm:$0xff] %v180_v42  ;;  %v158_v53 = vmax.f32 %v108_v50, %v133_v51  ;;  %v134_v56 = vld [vmem:[%s624_s3 + $0x88] sm:$0xff]  ;;  %v35_v60 = vld [vmem:[%s621_s0 + $0x90] sm:$0xff] }
  0x1b   :  { %206 = vst [vmem:[%s625_s4 + $0x70] sm:$0xff] %v181_v47  ;;  %v159_v59 = vmax.f32 %v109_v55, %v134_v56  ;;  %v60_v61 = vld [vmem:[%s622_s1 + $0x90] sm:$0xff]  ;;  %v36_v2 = vld [vmem:[%s621_s0 + $0x98] sm:$0xff]  ;;  %v37_v9 = vld [vmem:[%s621_s0 + $0xa0] sm:$0xff] }
  0x1c   :  { %v182_v57 = vmax.f32 %v82_v43, %v157_v48  ;;  %v110_v62 = vld [vmem:[%s623_s2 + $0x90] sm:$0xff]  ;;  %v183_v63 = vmax.f32 %v83_v49, %v158_v53  ;;  %v85_v0 = vmax.f32 %v35_v60, %v60_v61  ;;  %v61_v3 = vld [vmem:[%s622_s1 + $0x98] sm:$0xff]  ;;  %v62_v11 = vld [vmem:[%s622_s1 + $0xa0] sm:$0xff] }
  0x1d   :  { %v135_v1 = vld [vmem:[%s624_s3 + $0x90] sm:$0xff]  ;;  %v184_v4 = vmax.f32 %v84_v58, %v159_v59  ;;  %v86_v6 = vmax.f32 %v36_v2, %v61_v3  ;;  %v111_v7 = vld [vmem:[%s623_s2 + $0x98] sm:$0xff]  ;;  %v112_v12 = vld [vmem:[%s623_s2 + $0xa0] sm:$0xff]  ;;  %v87_v15 = vmax.f32 %v37_v9, %v62_v11 }
  0x1e   :  { %207 = vst [vmem:[%s625_s4 + $0x78] sm:$0xff] %v182_v57  ;;  %v160_v5 = vmax.f32 %v110_v62, %v135_v1  ;;  %v136_v8 = vld [vmem:[%s624_s3 + $0x98] sm:$0xff]  ;;  %208 = vst [vmem:[%s625_s4 + $0x80] sm:$0xff] %v183_v63  ;;  %v137_v13 = vld [vmem:[%s624_s3 + $0xa0] sm:$0xff] }
  0x1f   :  { %v161_v10 = vmax.f32 %v111_v7, %v136_v8  ;;  %209 = vst [vmem:[%s625_s4 + $0x88] sm:$0xff] %v184_v4  ;;  %v162_v16 = vmax.f32 %v112_v12, %v137_v13  ;;  %v38_v17 = vld [vmem:[%s621_s0 + $0xa8] sm:$0xff]  ;;  %v39_v23 = vld [vmem:[%s621_s0 + $0xb0] sm:$0xff]  ;;  %v40_v30 = vld [vmem:[%s621_s0 + $0xb8] sm:$0xff] }
  0x20   :  { %v185_v14 = vmax.f32 %v85_v0, %v160_v5  ;;  %v63_v18 = vld [vmem:[%s622_s1 + $0xa8] sm:$0xff]  ;;  %v64_v24 = vld [vmem:[%s622_s1 + $0xb0] sm:$0xff]  ;;  %v65_v32 = vld [vmem:[%s622_s1 + $0xb8] sm:$0xff] }
  0x21   :  { %v113_v19 = vld [vmem:[%s623_s2 + $0xa8] sm:$0xff]  ;;  %v186_v20 = vmax.f32 %v86_v6, %v161_v10  ;;  %v88_v21 = vmax.f32 %v38_v17, %v63_v18  ;;  %v187_v25 = vmax.f32 %v87_v15, %v162_v16  ;;  %v89_v27 = vmax.f32 %v39_v23, %v64_v24  ;;  %v114_v28 = vld [vmem:[%s623_s2 + $0xb0] sm:$0xff]  ;;  %v115_v33 = vld [vmem:[%s623_s2 + $0xb8] sm:$0xff] }
  0x22   :  { %v138_v22 = vld [vmem:[%s624_s3 + $0xa8] sm:$0xff]  ;;  %210 = vst [vmem:[%s625_s4 + $0x90] sm:$0xff] %v185_v14  ;;  %v139_v29 = vld [vmem:[%s624_s3 + $0xb0] sm:$0xff]  ;;  %v140_v34 = vld [vmem:[%s624_s3 + $0xb8] sm:$0xff]  ;;  %v90_v36 = vmax.f32 %v40_v30, %v65_v32 }
  0x23   :  { %v163_v26 = vmax.f32 %v113_v19, %v138_v22  ;;  %211 = vst [vmem:[%s625_s4 + $0x98] sm:$0xff] %v186_v20  ;;  %v164_v31 = vmax.f32 %v114_v28, %v139_v29  ;;  %212 = vst [vmem:[%s625_s4 + $0xa0] sm:$0xff] %v187_v25  ;;  %v165_v37 = vmax.f32 %v115_v33, %v140_v34  ;;  %v41_v38 = vld [vmem:[%s621_s0 + $0xc0] sm:$0xf] }
  0x24   :  { %v66_v39 = vld [vmem:[%s622_s1 + $0xc0] sm:$0xf] }
  0x25   :  { %v188_v35 = vmax.f32 %v88_v21, %v163_v26  ;;  %v116_v40 = vld [vmem:[%s623_s2 + $0xc0] sm:$0xf]  ;;  %v189_v41 = vmax.f32 %v89_v27, %v164_v31  ;;  %v91_v42 = vmax.f32 %v41_v38, %v66_v39  ;;  %v190_v44 = vmax.f32 %v90_v36, %v165_v37 }
  0x26   :  { %v141_v43 = vld [vmem:[%s624_s3 + $0xc0] sm:$0xf] }
  0x27   :  { %213 = vst [vmem:[%s625_s4 + $0xa8] sm:$0xff] %v188_v35  ;;  %v166_v45 = vmax.f32 %v116_v40, %v141_v43  ;;  %214 = vst [vmem:[%s625_s4 + $0xb0] sm:$0xff] %v189_v41 }
  0x28   :  { %215 = vst [vmem:[%s625_s4 + $0xb8] sm:$0xff] %v190_v44 }
  0x29   :  { %v191_v46 = vmax.f32 %v91_v42, %v166_v45 }
  0x2b   :  { %216 = vst [vmem:[%s625_s4 + $0xc0] sm:$0xf] %v191_v46 }

// kernel: alexnet_forward.11
= control target key start
LH: loop header
LB: loop body
LE: loop exit
PB: predicated region body
PF: predicated region fallthrough
CT: control target
= control target key end

     0   :  { %s2381_s12 = smov 0   ;;  %s2383_s13 = smov 0   ;;  %s2935_s0 = inlined_call_operand.vmem [shape: bf16[512,576], index: 0, kind: input, shape index: {}]   ;;  %s2936_s1 = inlined_call_operand.vmem [shape: bf16[576,128], index: 1, kind: input, shape index: {}]   ;;  %s2937_s2 = inlined_call_operand.vmem [shape: f32[1,128], index: 2, kind: input, shape index: {}]   ;;  %s2938_s3 = inlined_call_operand.vmem [shape: f32[512,128], index: 3, kind: output, shape index: {}]  }
   0x1   :  { %s2385_s14 = smov 0  }
   0x2 LB: > { %s25_s15 = sadd.s32 1, %s2355_s13  ;;  %p1724_p0 = scmp.ge.s32.totalorder %s2359_s14, 1  ;;  %s2359_s14 = sphi %s2385_s14, %s13_s14   ;;  %s2355_s13 = sphi %s2383_s13, %s2978_s13   ;;  %s2351_s12 = sphi %s2381_s12, %s2977_s12  }
   0x3   : > { %p27_p1 = scmp.ge.s32.totalorder %s25_s15, 2  ;;  %p170_p2 = scmp.lt.s32.totalorder %s2359_s14, 3 }
   0x5   : > { %s2980_s15 = smov (%p27_p1, %s25_s15), 0  ;;  %p171_p3 = pnand %p1724_p0, %p170_p2 }
   0x7   : > { %174 = sbr.rel (%p171_p3) target bundleno = 405 (0x195), region = 32 }
   0xc   : > { %v2189_v0 = vld [vmem:[%s2936_s1 + $0x78] sm:$0xff]   ;;  %s1725_s18 = sshll.u32 %s2351_s12, 5  ;;  %v2191_v2 = vld [vmem:[%s2936_s1 + $0x70] sm:$0xff]   ;;  %v2193_v4 = vld [vmem:[%s2936_s1 + $0x68] sm:$0xff]   ;;  %vm1020_vm0 = vcmask 523264  }
   0xd   : > { %v2190_v1 = vld [vmem:[%s2936_s1 + $0x38] sm:$0xff]   ;;  %1864 = vmatprep.subr.bf16.mxu0 %v2189_v0  ;;  %2148 = vmatprep.subr.bf16.mxu1 %v2189_v0  ;;  %p206_p4 = scmp.lt.s32.totalorder %s1725_s18, 63  ;;  %v2192_v3 = vld [vmem:[%s2936_s1 + $0x30] sm:$0xff]   ;;  %v2194_v5 = vld [vmem:[%s2936_s1 + $0x28] sm:$0xff]  }
   0xe   : > { %1865 = vmatpush3.bf16.msra.mxu0 %v2190_v1  ;;  %2156 = vmatpush3.bf16.msra.mxu1 %v2190_v1  ;;  %v2195_v6 = vld [vmem:[%s2936_s1 + $0x60] sm:$0xff]   ;;  %v2197_v8 = vld [vmem:[%s2936_s1 + $0x58] sm:$0xff]   ;;  %v2199_v10 = vld [vmem:[%s2936_s1 + $0x50] sm:$0xff]  }
   0xf   : > { %1866 = vmatprep.subr.bf16.mxu0 %v2191_v2  ;;  %2149 = vmatprep.subr.bf16.mxu1 %v2191_v2  ;;  %s2982_s18 = smov (!%p206_p4, %s1725_s18), 63  ;;  %v2196_v7 = vld [vmem:[%s2936_s1 + $0x20] sm:$0xff]   ;;  %v2198_v9 = vld [vmem:[%s2936_s1 + $0x18] sm:$0xff]   ;;  %v2200_v13 = vld [vmem:[%s2936_s1 + $0x10] sm:$0xff]  }
  0x10   : > { %s2164_s4 = smul.u32 20, %s2982_s18  ;;  %v2201_v14 = vld [vmem:[%s2936_s1 + $0x48] sm:$0xff]   ;;  %v2203_v16 = vld [vmem:[%s2936_s1 + $0x40] sm:$0xff]   ;;  %v2211_v18 = vld [vmem:[%s2936_s1 + $0xf8] sm:$0xff]   ;;  %s1728_s27 = sshll.u32 %s2982_s18, 3 }
  0x11   : > { %v2202_v15 = vld [vmem:[%s2936_s1 + $0x8] sm:$0xff]   ;;  %v2204_v17 = vld [vmem:[%s2936_s1] sm:$0xff]   ;;  %v2214_v19 = vld [vmem:[%s2936_s1 + $0x118] sm:$0xff]   ;;  %s2770_s30 = scalar_lea.vmem %s2938_s3, %s1728_s27 }
  0x12   : > { %1867 = vmatpush3.bf16.msra.mxu0 %v2192_v3  ;;  %2157 = vmatpush3.bf16.msra.mxu1 %v2192_v3  ;;  %s2432_s11 = scalar_lea.vmem %s2935_s0, %s2164_s4  ;;  %v2212_v22 = vld [vmem:[%s2936_s1 + $0xb8] sm:$0xff]   ;;  %v2213_v23 = vld [vmem:[%s2936_s1 + $0xf0] sm:$0xff]   ;;  %v2222_v28 = vld [vmem:[%s2936_s1 + $0xe8] sm:$0xff]  }
  0x13   : > { %1868 = vmatprep.subr.bf16.mxu0 %v2193_v4  ;;  %2150 = vmatprep.subr.bf16.mxu1 %v2193_v4  ;;  %v2207_v11 = vld [vmem:[%s2432_s11 + $0x4] ss:$20 sps:$4 sm:$0xff]   ;;  %v2205_v20 = vld [vmem:[%s2432_s11] ss:$20 sps:$4 sm:$0xff]   ;;  %v2220_v27 = vld [vmem:[%s2432_s11 + $0x28] ss:$20 sps:$4 sm:$0xff]  }
  0x14   : > { %v2210_v12 = vld [vmem:[%s2432_s11 + $0x1e4] ss:$20 sps:$4 sm:$0xff]   ;;  %1101 = vmatprep.mubr.bf16.mxu0 %v2207_v11  ;;  %v2208_v21 = vld [vmem:[%s2432_s11 + $0x1e0] ss:$20 sps:$4 sm:$0xff]   ;;  %v2221_v29 = vld [vmem:[%s2432_s11 + $0x208] ss:$20 sps:$4 sm:$0xff]  }
  0x15   : > { %1197 = vmatprep.mubr.bf16.mxu1 %v2210_v12  ;;  %v2216_v24 = vld [vmem:[%s2432_s11 + $0x2c] ss:$20 sps:$4 sm:$0xff]   ;;  %v2215_v26 = vld [vmem:[%s2936_s1 + $0xb0] sm:$0xff]   ;;  %v2232_v37 = vld [vmem:[%s2936_s1 + $0xd8] sm:$0xff]  }
  0x16   : > { %1869 = vmatpush3.bf16.msra.mxu0 %v2194_v5  ;;  %2158 = vmatpush3.bf16.msra.mxu1 %v2194_v5  ;;  %v2218_v25 = vld [vmem:[%s2432_s11 + $0x20c] ss:$20 sps:$4 sm:$0xff]   ;;  %v2226_v32 = vld [vmem:[%s2432_s11 + $0x54] ss:$20 sps:$4 sm:$0xff]   ;;  %v2230_v36 = vld [vmem:[%s2432_s11 + $0x50] ss:$20 sps:$4 sm:$0xff]  }
  0x17   : > { %1870 = vmatprep.subr.bf16.mxu0 %v2195_v6  ;;  %2151 = vmatprep.subr.bf16.mxu1 %v2195_v6  ;;  %v2223_v30 = vld [vmem:[%s2936_s1 + $0xa8] sm:$0xff]   ;;  %v2224_v31 = vld [vmem:[%s2936_s1 + $0xe0] sm:$0xff]   ;;  %v2245_v35 = vld [vmem:[%s2936_s1 + $0x110] sm:$0xff]  }
  0x18   : > { %v2228_v33 = vld [vmem:[%s2432_s11 + $0x234] ss:$20 sps:$4 sm:$0xff]   ;;  %v2225_v34 = vld [vmem:[%s2936_s1 + $0xa0] sm:$0xff]   ;;  %v2233_v39 = vld [vmem:[%s2936_s1 + $0x98] sm:$0xff]  }
  0x19   : > { %v2231_v38 = vld [vmem:[%s2432_s11 + $0x230] ss:$20 sps:$4 sm:$0xff]   ;;  %v2240_v44 = vld [vmem:[%s2432_s11 + $0x78] ss:$20 sps:$4 sm:$0xff]   ;;  %v2249_v53 = vld [vmem:[%s2432_s11 + $0x8] ss:$20 sps:$4 sm:$0xff]  }
  0x1a   : > { %1871 = vmatpush3.bf16.msra.mxu0 %v2196_v7  ;;  %2159 = vmatpush3.bf16.msra.mxu1 %v2196_v7  ;;  %v2234_v40 = vld [vmem:[%s2936_s1 + $0xd0] sm:$0xff]   ;;  %v2241_v45 = vld [vmem:[%s2432_s11 + $0x258] ss:$20 sps:$4 sm:$0xff]   ;;  %v2244_v49 = vld [vmem:[%s2936_s1 + $0xc0] sm:$0xff]  }
  0x1b   : > { %1872 = vmatprep.subr.bf16.mxu0 %v2197_v8  ;;  %2152 = vmatprep.subr.bf16.mxu1 %v2197_v8  ;;  %v2236_v41 = vld [vmem:[%s2432_s11 + $0x7c] ss:$20 sps:$4 sm:$0xff]   ;;  %v2242_v46 = vld [vmem:[%s2936_s1 + $0xc8] sm:$0xff]   ;;  %v2247_v50 = vld [vmem:[%s2432_s11 + $0xa4] ss:$20 sps:$4 sm:$0xff]  }
  0x1c   : > { %v2238_v42 = vld [vmem:[%s2432_s11 + $0x25c] ss:$20 sps:$4 sm:$0xff]   ;;  %v2265_v47 = vld [vmem:[%s2936_s1 + $0x108] sm:$0xff]   ;;  %v2246_v52 = vld [vmem:[%s2936_s1 + $0x80] sm:$0xff]  }
  0x1d   : > { %v2235_v43 = vld [vmem:[%s2936_s1 + $0x90] sm:$0xff]   ;;  %v2243_v48 = vld [vmem:[%s2936_s1 + $0x88] sm:$0xff]   ;;  %v2284_v56 = vld [vmem:[%s2936_s1 + $0x100] sm:$0xff]  }
  0x1e   : > { %1873 = vmatpush3.bf16.msra.mxu0 %v2198_v9  ;;  %2160 = vmatpush3.bf16.msra.mxu1 %v2198_v9  ;;  %v2251_v51 = vld [vmem:[%s2432_s11 + $0xc] ss:$20 sps:$4 sm:$0xff]   ;;  %v2255_v57 = vld [vmem:[%s2432_s11 + $0x34] ss:$20 sps:$4 sm:$0xff]   ;;  %v2258_v59 = vld [vmem:[%s2432_s11 + $0x30] ss:$20 sps:$4 sm:$0xff]  }
  0x1f   : > { %1874 = vmatprep.subr.bf16.mxu0 %v2199_v10  ;;  %2153 = vmatprep.subr.bf16.mxu1 %v2199_v10  ;;  %v2252_v54 = vld [vmem:[%s2432_s11 + $0xa0] ss:$20 sps:$4 sm:$0xff]   ;;  %v2257_v58 = vld [vmem:[%s2432_s11 + $0xc8] ss:$20 sps:$4 sm:$0xff]   ;;  %v2263_v62 = vld [vmem:[%s2432_s11 + $0xf0] ss:$20 sps:$4 sm:$0xff]  }
  0x20   : > { %v2253_v55 = vld [vmem:[%s2432_s11 + $0xcc] ss:$20 sps:$4 sm:$0xff]   ;;  %v2259_v60 = vld [vmem:[%s2432_s11 + $0xf4] ss:$20 sps:$4 sm:$0xff]   ;;  %v2261_v61 = vld [vmem:[%s2432_s11 + $0x5c] ss:$20 sps:$4 sm:$0xff]  }
  0x21   : > { %v2264_v63 = vld [vmem:[%s2432_s11 + $0x58] ss:$20 sps:$4 sm:$0xff]   ;;  %v2266_v0 = vld [vmem:[%s2432_s11 + $0x11c] ss:$20 sps:$4 sm:$0xff]   ;;  %v2271_v3 = vld [vmem:[%s2432_s11 + $0x80] ss:$20 sps:$4 sm:$0xff]  }
  0x22   : > { %1875 = vmatpush3.bf16.msra.mxu0 %v2200_v13  ;;  %2161 = vmatpush3.bf16.msra.mxu1 %v2200_v13  ;;  %v2268_v1 = vld [vmem:[%s2432_s11 + $0x84] ss:$20 sps:$4 sm:$0xff]   ;;  %v2274_v5 = vld [vmem:[%s2432_s11 + $0xac] ss:$20 sps:$4 sm:$0xff]   ;;  %v2277_v7 = vld [vmem:[%s2432_s11 + $0xa8] ss:$20 sps:$4 sm:$0xff]  }
  0x23   : > { %1876 = vmatprep.subr.bf16.mxu0 %v2201_v14  ;;  %2154 = vmatprep.subr.bf16.mxu1 %v2201_v14  ;;  %v2270_v2 = vld [vmem:[%s2432_s11 + $0x118] ss:$20 sps:$4 sm:$0xff]   ;;  %v2276_v6 = vld [vmem:[%s2432_s11 + $0x140] ss:$20 sps:$4 sm:$0xff]   ;;  %v2282_v10 = vld [vmem:[%s2432_s11 + $0x168] ss:$20 sps:$4 sm:$0xff]  }
  0x24   : > { %v2272_v4 = vld [vmem:[%s2432_s11 + $0x144] ss:$20 sps:$4 sm:$0xff]   ;;  %v2278_v8 = vld [vmem:[%s2432_s11 + $0x16c] ss:$20 sps:$4 sm:$0xff]   ;;  %v2280_v9 = vld [vmem:[%s2432_s11 + $0xd4] ss:$20 sps:$4 sm:$0xff]  }
  0x25   : > { %v2283_v11 = vld [vmem:[%s2432_s11 + $0xd0] ss:$20 sps:$4 sm:$0xff]   ;;  %v2285_v12 = vld [vmem:[%s2432_s11 + $0x194] ss:$20 sps:$4 sm:$0xff]  }
  0x26   : > { %1877 = vmatpush3.bf16.msra.mxu0 %v2202_v15  ;;  %2162 = vmatpush3.bf16.msra.mxu1 %v2202_v15  ;;  %v2287_v13 = vld [vmem:[%s2432_s11 + $0xfc] ss:$20 sps:$4 sm:$0xff]   ;;  %v2290_v15 = vld [vmem:[%s2432_s11 + $0xf8] ss:$20 sps:$4 sm:$0xff]  }
  0x27   : > { %1878 = vmatprep.subr.bf16.mxu0 %v2203_v16  ;;  %2155 = vmatprep.subr.bf16.mxu1 %v2203_v16  ;;  %v2289_v14 = vld [vmem:[%s2432_s11 + $0x190] ss:$20 sps:$4 sm:$0xff]  }
  0x28   : > { %v2291_v16 = vld [vmem:[%s2432_s11 + $0x1bc] ss:$20 sps:$4 sm:$0xff]  }
  0x2a   : > { %1879 = vmatpush3.bf16.msra.mxu0 %v2204_v17  ;;  %2163 = vmatpush3.bf16.msra.mxu1 %v2204_v17  ;;  %v2293_v17 = vld [vmem:[%s2432_s11 + $0x124] ss:$20 sps:$4 sm:$0xff]  }
  0x2b   : > { %1976 = vmatprep.subr.bf16.mxu1 %v2211_v18  ;;  %2108 = vmatprep.subr.bf16.mxu0 %v2214_v19  ;;  %v2295_v18 = vld [vmem:[%s2432_s11 + $0x1b8] ss:$20 sps:$4 sm:$0xff]  }
  0x2d   : > { %1102 = vmatmul.mubr.bf16.vlgmr.msra.gmra.mxu0 %v2205_v20  ;;  %1198 = vmatmul.mubr.bf16.vlgmr.msra.gmra.mxu1 %v2208_v21  ;;  %v2297_v20 = vld [vmem:[%s2432_s11 + $0x14c] ss:$20 sps:$4 sm:$0xff]   ;;  %v2299_v21 = vld [vmem:[%s2432_s11 + $0x10] ss:$20 sps:$4 sm:$0xff]  }
  0x2e   : > { %1977 = vmatpush3.bf16.msra.mxu1 %v2212_v22  ;;  %2109 = vmatpush3.bf16.msra.mxu0 %v2214_v19  ;;  %v2296_v19 = vld [vmem:[%s2432_s11 + $0x120] ss:$20 sps:$4 sm:$0xff]   ;;  %v2300_v22 = vld [vmem:[%s2432_s11 + $0x148] ss:$20 sps:$4 sm:$0xff]  }
  0x2f   : > { %1978 = vmatprep.subr.bf16.mxu1 %v2213_v23  ;;  %1109 = vmatprep.mubr.bf16.mxu0 %v2216_v24  ;;  %v2301_v23 = vld [vmem:[%s2432_s11 + $0x38] ss:$20 sps:$4 sm:$0xff]   ;;  %v2302_v24 = vld [vmem:[%s2432_s11 + $0x174] ss:$20 sps:$4 sm:$0xff]  }
  0x30   : > { %1205 = vmatprep.mubr.bf16.mxu1 %v2218_v25  ;;  %2110 = vmatprep.subr.bf16.mxu0 %v2245_v35  ;;  %v2304_v25 = vld [vmem:[%s2432_s11 + $0x60] ss:$20 sps:$4 sm:$0xff]  }
  0x32   : > { %1979 = vmatpush3.bf16.msra.mxu1 %v2215_v26  ;;  %2111 = vmatpush3.bf16.msra.mxu0 %v2245_v35  ;;  %v2305_v26 = vld [vmem:[%s2432_s11 + $0x170] ss:$20 sps:$4 sm:$0xff]   ;;  %v2316_v35 = vld [vmem:[%s2432_s11 + $0x128] ss:$20 sps:$4 sm:$0xff]  }
  0x33   : > { %1980 = vmatprep.subr.bf16.mxu1 %v2222_v28  ;;  %2112 = vmatprep.subr.bf16.mxu0 %v2265_v47  ;;  %v2307_v28 = vld [vmem:[%s2432_s11 + $0x19c] ss:$20 sps:$4 sm:$0xff]  }
  0x35   : > { %1110 = vmatmul.mubr.bf16.gmra.mxu0 %v2220_v27  ;;  %1206 = vmatmul.mubr.bf16.gmra.mxu1 %v2221_v29  ;;  %v2306_v27 = vld [vmem:[%s2432_s11 + $0x88] ss:$20 sps:$4 sm:$0xff]   ;;  %v2309_v29 = vld [vmem:[%s2432_s11 + $0xb0] ss:$20 sps:$4 sm:$0xff]  }
  0x36   : > { %1981 = vmatpush3.bf16.msra.mxu1 %v2223_v30  ;;  %1117 = vmatprep.mubr.bf16.mxu0 %v2226_v32  ;;  %v2310_v30 = vld [vmem:[%s2432_s11 + $0x198] ss:$20 sps:$4 sm:$0xff]  }
  0x37   : > { %1982 = vmatprep.subr.bf16.mxu1 %v2224_v31  ;;  %1213 = vmatprep.mubr.bf16.mxu1 %v2228_v33  ;;  %v2311_v31 = vld [vmem:[%s2432_s11 + $0xd8] ss:$20 sps:$4 sm:$0xff]   ;;  %v2314_v33 = vld [vmem:[%s2432_s11 + $0x100] ss:$20 sps:$4 sm:$0xff]  }
  0x38   : > { %2113 = vmatpush3.bf16.msra.mxu0 %v2265_v47  ;;  %v2312_v32 = vld [vmem:[%s2432_s11 + $0x1c4] ss:$20 sps:$4 sm:$0xff]  }
  0x39   : > { %2114 = vmatprep.subr.bf16.mxu0 %v2284_v56  ;;  %v2331_v47 = vld [vmem:[%s2432_s11 + $0x218] ss:$20 sps:$4 sm:$0xff]  }
  0x3a   : > { %1983 = vmatpush3.bf16.msra.mxu1 %v2225_v34  ;;  %v2315_v34 = vld [vmem:[%s2432_s11 + $0x1c0] ss:$20 sps:$4 sm:$0xff]  }
  0x3b   : > { %1984 = vmatprep.subr.bf16.mxu1 %v2232_v37  ;;  %v2319_v37 = vld [vmem:[%s2432_s11 + $0x150] ss:$20 sps:$4 sm:$0xff]  }
  0x3c   : > { %2115 = vmatpush3.bf16.msra.mxu0 %v2284_v56 }
  0x3d   : > { %1118 = vmatmul.mubr.bf16.gmra.mxu0 %v2230_v36  ;;  %1214 = vmatmul.mubr.bf16.gmra.mxu1 %v2231_v38  ;;  %v2317_v36 = vld [vmem:[%s2432_s11 + $0x1ec] ss:$20 sps:$4 sm:$0xff]   ;;  %v2320_v38 = vld [vmem:[%s2432_s11 + $0x1e8] ss:$20 sps:$4 sm:$0xff]  }
  0x3e   : > { %1985 = vmatpush3.bf16.msra.mxu1 %v2233_v39  ;;  %1125 = vmatprep.mubr.bf16.mxu0 %v2236_v41  ;;  %v2321_v39 = vld [vmem:[%s2432_s11 + $0x178] ss:$20 sps:$4 sm:$0xff]   ;;  %v2324_v41 = vld [vmem:[%s2432_s11 + $0x1a0] ss:$20 sps:$4 sm:$0xff]  }
  0x3f   : > { %1986 = vmatprep.subr.bf16.mxu1 %v2234_v40  ;;  %1221 = vmatprep.mubr.bf16.mxu1 %v2238_v42  ;;  %v2322_v40 = vld [vmem:[%s2432_s11 + $0x214] ss:$20 sps:$4 sm:$0xff]   ;;  %v2325_v42 = vld [vmem:[%s2432_s11 + $0x210] ss:$20 sps:$4 sm:$0xff]  }
  0x42   : > { %1987 = vmatpush3.bf16.msra.mxu1 %v2235_v43  ;;  %v2326_v43 = vld [vmem:[%s2432_s11 + $0x1c8] ss:$20 sps:$4 sm:$0xff]  }
  0x43   : > { %1988 = vmatprep.subr.bf16.mxu1 %v2242_v46  ;;  %v2330_v46 = vld [vmem:[%s2432_s11 + $0x238] ss:$20 sps:$4 sm:$0xff]  }
  0x45   : > { %1126 = vmatmul.mubr.bf16.gmra.mxu0 %v2240_v44  ;;  %1222 = vmatmul.mubr.bf16.gmra.mxu1 %v2241_v45  ;;  %v2327_v44 = vld [vmem:[%s2432_s11 + $0x23c] ss:$20 sps:$4 sm:$0xff]  }
  0x46   : > { %1989 = vmatpush3.bf16.msra.mxu1 %v2243_v48  ;;  %1133 = vmatprep.mubr.bf16.mxu0 %v2247_v50  ;;  %v2329_v45 = vld [vmem:[%s2432_s11 + $0x1f0] ss:$20 sps:$4 sm:$0xff]   ;;  %v2335_v50 = vld [vmem:[%s2432_s11 + $0x260] ss:$20 sps:$4 sm:$0xff]  }
  0x47   : > { %1990 = vmatprep.subr.bf16.mxu1 %v2244_v49  ;;  %1262 = vmatprep.mubr.bf16.mxu1 %v2251_v51  ;;  %v2332_v48 = vld [vmem:[%s2432_s11 + $0x264] ss:$20 sps:$4 sm:$0xff]   ;;  %v2334_v49 = vld [vmem:[%s2432_s11 + $0x240] ss:$20 sps:$4 sm:$0xff]   ;;  %v2336_v51 = vld [vmem:[%s2432_s11 + $0x268] ss:$20 sps:$4 sm:$0xff]  }
  0x4a   : > { %1991 = vmatpush3.bf16.msra.mxu1 %v2246_v52 }
  0x4d   : > { %1134 = vmatmul.mubr.bf16.gmra.mxu0 %v2252_v54  ;;  %1263 = vmatmul.mubr.bf16.vlgmr.msra.gmra.mxu1 %v2249_v53 }
  0x4e   : > { %1141 = vmatprep.mubr.bf16.mxu0 %v2253_v55  ;;  %1270 = vmatprep.mubr.bf16.mxu1 %v2255_v57 }
  0x55   : > { %1142 = vmatmul.mubr.bf16.gmra.mxu0 %v2257_v58  ;;  %1271 = vmatmul.mubr.bf16.gmra.mxu1 %v2258_v59 }
  0x56   : > { %1149 = vmatprep.mubr.bf16.mxu0 %v2259_v60  ;;  %1278 = vmatprep.mubr.bf16.mxu1 %v2261_v61 }
  0x5d   : > { %1150 = vmatmul.mubr.bf16.gmra.mxu0 %v2263_v62  ;;  %1279 = vmatmul.mubr.bf16.gmra.mxu1 %v2264_v63 }
  0x5e   : > { %1157 = vmatprep.mubr.bf16.mxu0 %v2266_v0  ;;  %1286 = vmatprep.mubr.bf16.mxu1 %v2268_v1 }
  0x65   : > { %1158 = vmatmul.mubr.bf16.gmra.mxu0 %v2270_v2  ;;  %1287 = vmatmul.mubr.bf16.gmra.mxu1 %v2271_v3 }
  0x66   : > { %1165 = vmatprep.mubr.bf16.mxu0 %v2272_v4  ;;  %1294 = vmatprep.mubr.bf16.mxu1 %v2274_v5 }
  0x6d   : > { %1166 = vmatmul.mubr.bf16.gmra.mxu0 %v2276_v6  ;;  %1295 = vmatmul.mubr.bf16.gmra.mxu1 %v2277_v7 }
  0x6e   : > { %1173 = vmatprep.mubr.bf16.mxu0 %v2278_v8  ;;  %1302 = vmatprep.mubr.bf16.mxu1 %v2280_v9 }
  0x75   : > { %1174 = vmatmul.mubr.bf16.gmra.mxu0 %v2282_v10  ;;  %1303 = vmatmul.mubr.bf16.gmra.mxu1 %v2283_v11 }
  0x76   : > { %1181 = vmatprep.mubr.bf16.mxu0 %v2285_v12  ;;  %1310 = vmatprep.mubr.bf16.mxu1 %v2287_v13 }
  0x7d   : > { %1182 = vmatmul.mubr.bf16.gmra.mxu0 %v2289_v14  ;;  %1311 = vmatmul.mubr.bf16.gmra.mxu1 %v2290_v15 }
  0x7e   : > { %1189 = vmatprep.mubr.bf16.mxu0 %v2291_v16  ;;  %1318 = vmatprep.mubr.bf16.mxu1 %v2293_v17 }
  0x85   : > { %1190 = vmatmul.mubr.bf16.gmra.mxu0 %v2295_v18  ;;  %1319 = vmatmul.mubr.bf16.gmra.mxu1 %v2296_v19 }
  0x86   : > { %1326 = vmatprep.mubr.bf16.mxu1 %v2297_v20  ;;  %2116 = vmatprep.mubr.msk.bf16.mxu0 %vm1020_vm0, %v2299_v21 }
  0x8d   : > { %1327 = vmatmul.mubr.bf16.gmra.mxu1 %v2300_v22  ;;  %2117 = vmatmul.mubr.msk.bf16.vlgmr.msra.gmra.mxu0 %vm1020_vm0, %v2301_v23 }
  0x8e   : > { %1334 = vmatprep.mubr.bf16.mxu1 %v2302_v24  ;;  %2120 = vmatprep.mubr.msk.bf16.mxu0 %vm1020_vm0, %v2304_v25 }
  0x95   : > { %1335 = vmatmul.mubr.bf16.gmra.mxu1 %v2305_v26  ;;  %2121 = vmatmul.mubr.msk.bf16.gmra.mxu0 %vm1020_vm0, %v2306_v27 }
  0x96   : > { %1342 = vmatprep.mubr.bf16.mxu1 %v2307_v28  ;;  %2124 = vmatprep.mubr.msk.bf16.mxu0 %vm1020_vm0, %v2309_v29 }
  0x9d   : > { %1343 = vmatmul.mubr.bf16.gmra.mxu1 %v2310_v30  ;;  %2125 = vmatmul.mubr.msk.bf16.gmra.mxu0 %vm1020_vm0, %v2311_v31 }
  0x9e   : > { %1350 = vmatprep.mubr.bf16.mxu1 %v2312_v32  ;;  %2128 = vmatprep.mubr.msk.bf16.mxu0 %vm1020_vm0, %v2314_v33 }
  0xa5   : > { %1351 = vmatmul.mubr.bf16.gmra.mxu1 %v2315_v34  ;;  %2129 = vmatmul.mubr.msk.bf16.gmra.mxu0 %vm1020_vm0, %v2316_v35 }
  0xa6   : > { %1358 = vmatprep.mubr.bf16.mxu1 %v2317_v36  ;;  %2132 = vmatprep.mubr.msk.bf16.mxu0 %vm1020_vm0, %v2319_v37 }
  0xad   : > { %1359 = vmatmul.mubr.bf16.gmra.mxu1 %v2320_v38  ;;  %2133 = vmatmul.mubr.msk.bf16.gmra.mxu0 %vm1020_vm0, %v2321_v39 }
  0xae   : > { %1366 = vmatprep.mubr.bf16.mxu1 %v2322_v40  ;;  %2136 = vmatprep.mubr.msk.bf16.mxu0 %vm1020_vm0, %v2324_v41 }
  0xb5   : > { %1367 = vmatmul.mubr.bf16.gmra.mxu1 %v2325_v42  ;;  %2137 = vmatmul.mubr.msk.bf16.gmra.mxu0 %vm1020_vm0, %v2326_v43 }
  0xb6   : > { %1374 = vmatprep.mubr.bf16.mxu1 %v2327_v44  ;;  %2140 = vmatprep.mubr.msk.bf16.mxu0 %vm1020_vm0, %v2329_v45 }
  0xbd   : > { %1375 = vmatmul.mubr.bf16.gmra.mxu1 %v2330_v46  ;;  %2141 = vmatmul.mubr.msk.bf16.gmra.mxu0 %vm1020_vm0, %v2331_v47 }
  0xbe   : > { %1382 = vmatprep.mubr.bf16.mxu1 %v2332_v48  ;;  %2144 = vmatprep.mubr.msk.bf16.mxu0 %vm1020_vm0, %v2334_v49 }
  0xc5   : > { %1383 = vmatmul.mubr.bf16.gmra.mxu1 %v2335_v50  ;;  %2145 = vmatmul.mubr.msk.bf16.gmra.mxu0 %vm1020_vm0, %v2336_v51 }
  0xed   : > { %v1880_v52 = vpop.f32.mrf.mxu0  ;;  %v1952_v53 = vpop.f32.mrf.mxu1 }
  0xef   : > { %v1881_v54 = vpop.f32.mrf.mxu0  ;;  %v1953_v55 = vpop.f32.mrf.mxu1 }
  0xf0   : > { %v2611_v56 = vadd.f32 %v1881_v54, %v1880_v52  ;;  %v2613_v57 = vadd.f32 %v1953_v55, %v1952_v53 }
  0xf1   : > { %v1883_v58 = vpop.f32.mrf.mxu0  ;;  %v1955_v59 = vpop.f32.mrf.mxu1 }
  0xf2   : > { %2939 = vst [vmem:[#allocation2_spill] sm:$0xff] %v2613_v57 }
  0xf3   : > { %v1884_v60 = vpop.f32.mrf.mxu0  ;;  %v1956_v61 = vpop.f32.mrf.mxu1 }
  0xf4   : > { %v2615_v62 = vadd.f32 %v1884_v60, %v1883_v58  ;;  %v2617_v63 = vadd.f32 %v1956_v61, %v1955_v59 }
  0xf5   : > { %v1886_v0 = vpop.f32.mrf.mxu0  ;;  %v1958_v1 = vpop.f32.mrf.mxu1 }
  0xf6   : > { %2940 = vst [vmem:[#allocation3_spill] sm:$0xff] %v2617_v63 }
  0xf7   : > { %v1887_v2 = vpop.f32.mrf.mxu0  ;;  %v1959_v3 = vpop.f32.mrf.mxu1 }
  0xf8   : > { %v2619_v4 = vadd.f32 %v1887_v2, %v1886_v0  ;;  %v2621_v5 = vadd.f32 %v1959_v3, %v1958_v1 }
  0xf9   : > { %v1889_v6 = vpop.f32.mrf.mxu0  ;;  %v1961_v7 = vpop.f32.mrf.mxu1 }
  0xfa   : > { %2941 = vst [vmem:[#allocation4_spill] sm:$0xff] %v2621_v5  ;;  %v2742_v5 = vld [vmem:[%s2937_s2] ss:$0 sm:$0xff] }
  0xfb   : > { %v1890_v8 = vpop.f32.mrf.mxu0  ;;  %v1962_v9 = vpop.f32.mrf.mxu1 }
  0xfc   : > { %v2623_v10 = vadd.f32 %v1890_v8, %v1889_v6  ;;  %v2625_v11 = vadd.f32 %v1962_v9, %v1961_v7 }
  0xfd   : > { %v1892_v12 = vpop.f32.mrf.mxu0  ;;  %v1964_v13 = vpop.f32.mrf.mxu1 }
  0xfe   : > { %2942 = vst [vmem:[#allocation5_spill] sm:$0xff] %v2625_v11 }
  0xff   : > { %v1893_v14 = vpop.f32.mrf.mxu0  ;;  %v1965_v15 = vpop.f32.mrf.mxu1 }
 0x100   : > { %v2627_v16 = vadd.f32 %v1893_v14, %v1892_v12  ;;  %v2629_v17 = vadd.f32 %v1965_v15, %v1964_v13 }
 0x101   : > { %v1895_v18 = vpop.f32.mrf.mxu0  ;;  %v1967_v19 = vpop.f32.mrf.mxu1 }
 0x102   : > { %2943 = vst [vmem:[#allocation6_spill] sm:$0xff] %v2629_v17 }
 0x103   : > { %v1896_v20 = vpop.f32.mrf.mxu0  ;;  %v1968_v21 = vpop.f32.mrf.mxu1 }
 0x104   : > { %v2631_v22 = vadd.f32 %v1896_v20, %v1895_v18  ;;  %v2633_v23 = vadd.f32 %v1968_v21, %v1967_v19 }
 0x105   : > { %v1898_v24 = vpop.f32.mrf.mxu0  ;;  %v1970_v25 = vpop.f32.mrf.mxu1 }
 0x106   : > { %2944 = vst [vmem:[#allocation7_spill] sm:$0xff] %v2633_v23 }
 0x107   : > { %v1899_v26 = vpop.f32.mrf.mxu0  ;;  %v1971_v27 = vpop.f32.mrf.mxu1 }
 0x108   : > { %v2635_v28 = vadd.f32 %v1899_v26, %v1898_v24  ;;  %v2637_v29 = vadd.f32 %v1971_v27, %v1970_v25 }
 0x109   : > { %v1901_v30 = vpop.f32.mrf.mxu0  ;;  %v1973_v31 = vpop.f32.mrf.mxu1 }
 0x10a   : > { %2945 = vst [vmem:[#allocation8_spill] sm:$0xff] %v2637_v29 }
 0x10b   : > { %v1902_v32 = vpop.f32.mrf.mxu0  ;;  %v1974_v33 = vpop.f32.mrf.mxu1 }
 0x10c   : > { %v2639_v34 = vadd.f32 %v1902_v32, %v1901_v30  ;;  %v2641_v35 = vadd.f32 %v1974_v33, %v1973_v31 }
 0x10d   : > { %v1904_v36 = vpop.f32.mrf.mxu0  ;;  %v2643_v37 = vpop.f32.mrf.mxu1 }
 0x10e   : > { %2946 = vst [vmem:[#allocation9_spill] sm:$0xff] %v2641_v35 }
 0x10f   : > { %v1905_v38 = vpop.f32.mrf.mxu0  ;;  %v2645_v39 = vpop.f32.mrf.mxu1 }
 0x110   : > { %v2647_v40 = vadd.f32 %v1905_v38, %v1904_v36 }
 0x111   : > { %v1907_v41 = vpop.f32.mrf.mxu0  ;;  %v2649_v42 = vpop.f32.mrf.mxu1 }
 0x113   : > { %v1908_v43 = vpop.f32.mrf.mxu0  ;;  %v2651_v44 = vpop.f32.mrf.mxu1 }
 0x114   : > { %v2653_v45 = vadd.f32 %v1908_v43, %v1907_v41 }
 0x115   : > { %v1910_v46 = vpop.f32.mrf.mxu0  ;;  %v1998_v47 = vpop.f32.mrf.mxu1 }
 0x117   : > { %v1911_v48 = vpop.f32.mrf.mxu0  ;;  %v1999_v49 = vpop.f32.mrf.mxu1 }
 0x118   : > { %v2655_v50 = vadd.f32 %v1911_v48, %v1910_v46  ;;  %v2000_v57 = vadd.f32 %v1999_v49, %v1998_v47  ;;  %v1104_v47 = vadd.f32 %v2611_v56, %v2742_v5 }
 0x119   : > { %v1913_v51 = vpop.f32.mrf.mxu0  ;;  %v2001_v52 = vpop.f32.mrf.mxu1 }
 0x11b   : > { %v1914_v53 = vpop.f32.mrf.mxu0  ;;  %v2002_v54 = vpop.f32.mrf.mxu1 }
 0x11c   : > { %v2657_v55 = vadd.f32 %v1914_v53, %v1913_v51  ;;  %v2003_v49 = vadd.f32 %v2002_v54, %v2001_v52 }
 0x11d   : > { %v1916_v58 = vpop.f32.mrf.mxu0  ;;  %v2659_v59 = vpop.f32.mrf.mxu1 }
 0x11f   : > { %v1917_v60 = vpop.f32.mrf.mxu0  ;;  %v2661_v61 = vpop.f32.mrf.mxu1 }
 0x120   : > { %v2663_v0 = vadd.f32 %v1917_v60, %v1916_v58 }
 0x121   : > { %v1919_v1 = vpop.f32.mrf.mxu0  ;;  %v2665_v2 = vpop.f32.mrf.mxu1 }
 0x123   : > { %v1920_v3 = vpop.f32.mrf.mxu0  ;;  %v2667_v6 = vpop.f32.mrf.mxu1 }
 0x124   : > { %v2669_v7 = vadd.f32 %v1920_v3, %v1919_v1 }
 0x125   : > { %v2671_v8 = vpop.f32.mrf.mxu0  ;;  %v2010_v9 = vpop.f32.mrf.mxu1 }
 0x127   : > { %v2673_v12 = vpop.f32.mrf.mxu0  ;;  %v2011_v13 = vpop.f32.mrf.mxu1 }
 0x128   : > { %v2012_v52 = vadd.f32 %v2011_v13, %v2010_v9  ;;  %v1120_v9 = vadd.f32 %v2627_v16, %v2742_v5  ;;  %v2009_v16 = vadd.f32 %v2667_v6, %v2665_v2  ;;  %v1144_v2 = vadd.f32 %v2655_v50, %v2742_v5 }
 0x129   : > { %v2675_v14 = vpop.f32.mrf.mxu0  ;;  %v2677_v15 = vpop.f32.mrf.mxu1 }
 0x12b   : > { %v2679_v18 = vpop.f32.mrf.mxu0  ;;  %v2681_v19 = vpop.f32.mrf.mxu1 }
 0x12d   : > { %v2683_v20 = vpop.f32.mrf.mxu0  ;;  %v2685_v21 = vpop.f32.mrf.mxu1 }
 0x12f   : > { %v2687_v24 = vpop.f32.mrf.mxu0  ;;  %v2689_v25 = vpop.f32.mrf.mxu1 }
 0x131   : > { %v2691_v26 = vpop.f32.mrf.mxu0  ;;  %v2693_v27 = vpop.f32.mrf.mxu1 }
 0x132   : > { %2947 = vst [vmem:[#allocation10_spill] sm:$0xff] %v2691_v26 }
 0x133   : > { %v2695_v30 = vpop.f32.mrf.mxu0  ;;  %v2697_v31 = vpop.f32.mrf.mxu1 }
 0x134   : > { %2948 = vst [vmem:[#allocation11_spill] sm:$0xff] %v2695_v30 }
 0x135   : > { %v2699_v32 = vpop.f32.mrf.mxu0  ;;  %v2701_v33 = vpop.f32.mrf.mxu1 }
 0x137   : > { %v2703_v36 = vpop.f32.mrf.mxu0  ;;  %v2705_v38 = vpop.f32.mrf.mxu1 }
 0x139   : > { %v2707_v41 = vpop.f32.mrf.mxu0  ;;  %v2709_v43 = vpop.f32.mrf.mxu1 }
 0x13b   : > { %v2711_v46 = vpop.f32.mrf.mxu0  ;;  %v2713_v48 = vpop.f32.mrf.mxu1 }
 0x13c   : > { %2949 = vst [vmem:[#allocation12_spill] sm:$0xff] %v2711_v46  ;;  %v1115_v46 = vadd.f32 %v2623_v10, %v2742_v5  ;;  %v2027_v50 = vadd.f32 %v2713_v48, %v2709_v43 }
 0x13d   : > { %v2715_v51 = vpop.f32.mrf.mxu0  ;;  %v2717_v53 = vpop.f32.mrf.mxu1 }
 0x13e   : > { %2950 = vst [vmem:[#allocation13_spill] sm:$0xff] %v2715_v51  ;;  %v1994_v51 = vadd.f32 %v2645_v39, %v2643_v37 }
 0x13f   : > { %v2719_v58 = vpop.f32.mrf.mxu0  ;;  %v2721_v60 = vpop.f32.mrf.mxu1 }
 0x140   : > { %2951 = vst [vmem:[#allocation14_spill] sm:$0xff] %v2719_v58  ;;  %v1112_v58 = vadd.f32 %v2619_v4, %v2742_v5  ;;  %v1997_v4 = vadd.f32 %v2651_v44, %v2649_v42  ;;  %v1265_v39 = vadd.f32 %v1994_v51, %v1104_v47  ;;  %v1128_v42 = vadd.f32 %v2635_v28, %v2742_v5 }
 0x141   : > { %v2723_v1 = vpop.f32.mrf.mxu0  ;;  %v2725_v3 = vpop.f32.mrf.mxu1  ;;  %v2015_v28 = vadd.f32 %v2681_v19, %v2677_v15  ;;  %v1123_v15 = vadd.f32 %v2631_v22, %v2742_v5  ;;  %v2018_v22 = vadd.f32 %v2689_v25, %v2685_v21  ;;  %v1147_v21 = vadd.f32 %v2657_v55, %v2742_v5 }
 0x142   : > { %2952 = vst [vmem:[#allocation15_spill] sm:$0xff] %v2723_v1  ;;  %v1273_v30 = vadd.f32 %v2000_v57, %v1112_v58  ;;  %v1276_v58 = vadd.f32 %v2003_v49, %v1115_v46  ;;  %v1924_v25 = vadd.f32 %v2673_v12, %v2671_v8 }
 0x143   : > { %v2727_v35 = vpop.f32.mrf.mxu0  ;;  %v2729_v29 = vpop.f32.mrf.mxu1 }
 0x144   : > { %2953 = vst [vmem:[#allocation16_spill] sm:$0xff] %v2727_v35 }
 0x145   : > { %v2731_v23 = vpop.f32.mrf.mxu0  ;;  %v2733_v17 = vpop.f32.mrf.mxu1 }
 0x146   : > { %2954 = vst [vmem:[#allocation17_spill] sm:$0xff] %v2731_v23 }
 0x147   : > { %v2735_v63 = vpop.f32.mrf.mxu0  ;;  %v2737_v11 = vpop.f32.mrf.mxu1 }
 0x148   : > { %2955 = vst [vmem:[#allocation18_spill] sm:$0xff] %v2735_v63  ;;  %v2036_v8 = vadd.f32 %v2737_v11, %v2733_v17 }
 0x149   : > { %v2744_v1 = vpop.f32.mrf.mxu0  ;;  %v2746_v35 = vpop.f32.mrf.mxu1 }
 0x14a   : > { %2956 = vst [vmem:[#allocation19_spill] sm:$0xff] %v2744_v1 }
 0x14b   : > { %v2752_v23 = vpop.f32.mrf.mxu0  ;;  %v2754_v63 = vpop.f32.mrf.mxu1 }
 0x14c   : > { %2957 = vst [vmem:[#allocation20_spill] sm:$0xff] %v2752_v23  ;;  %v1107_v23 = vadd.f32 %v2615_v62, %v2742_v5 }
 0x14d   : > { %v2759_v26 = vpop.f32.mrf.mxu1  ;;  %v2118_v1 = vpop.f32.mrf.mxu0 }
 0x14e   : > { %v1434_v37 = vadd.f32 %v2118_v1, %v1273_v30  ;;  %v2006_v30 = vadd.f32 %v2661_v61, %v2659_v59  ;;  %v1268_v47 = vadd.f32 %v1997_v4, %v1107_v23  ;;  %v1131_v59 = vadd.f32 %v2639_v34, %v2742_v5 }
 0x14f   : > { %v2772_v56 = vpop.f32.mrf.mxu1  ;;  %v1425_v57 = vpop.f32.mrf.mxu0  ;;  %v2024_v34 = vadd.f32 %v2705_v38, %v2701_v33  ;;  %v1136_v33 = vadd.f32 %v2647_v40, %v2742_v5 }
 0x150   : > { %v1554_v10 = vmax.f32 %v1434_v37, 0.0  ;;  %v1426_v54 = vadd.f32 %v1425_v57, %v1265_v39  ;;  %v1289_v39 = vadd.f32 %v2012_v52, %v1128_v42  ;;  %v1292_v42 = vadd.f32 %v2015_v28, %v1131_v59 }
 0x151   : > { %v2776_v44 = vpop.f32.mrf.mxu1  ;;  %v2119_v62 = vpop.f32.mrf.mxu0  ;;  %v1305_v28 = vadd.f32 %v2024_v34, %v1144_v2  ;;  %v1297_v48 = vadd.f32 %v2018_v22, %v1136_v33  ;;  %v1139_v59 = vadd.f32 %v2653_v45, %v2742_v5  ;;  %v2030_v45 = vadd.f32 %v2721_v60, %v2717_v53 }
 0x152   : > { %1586 = vst [vmem:[%s2770_s30 + $0x10] sm:$0xff] %v1554_v10  ;;  %v1552_v51 = vmax.f32 %v1426_v54, 0.0  ;;  %v1437_v1 = vadd.f32 %v2119_v62, %v1276_v58  ;;  %v1281_v10 = vadd.f32 %v2006_v30, %v1120_v9  ;;  %v1936_v60 = vadd.f32 %v2703_v36, %v2699_v32 }
 0x153   : > { %v2783_v13 = vpop.f32.mrf.mxu1  ;;  %v1428_v46 = vpop.f32.mrf.mxu0 }
 0x154   : > { %1584 = vst [vmem:[%s2770_s30] sm:$0xff] %v1552_v51  ;;  %v1555_v49 = vmax.f32 %v1437_v1, 0.0  ;;  %v1429_v37 = vadd.f32 %v1428_v46, %v1268_v47  ;;  %v1284_v1 = vadd.f32 %v2009_v16, %v1123_v15 }
 0x155   : > { %v2790_v61 = vpop.f32.mrf.mxu1  ;;  %v2122_v23 = vpop.f32.mrf.mxu0 }
 0x156   : > { %1587 = vst [vmem:[%s2770_s30 + $0x18] sm:$0xff] %v1555_v49  ;;  %v1553_v4 = vmax.f32 %v1429_v37, 0.0  ;;  %v1450_v57 = vadd.f32 %v2122_v23, %v1289_v39  ;;  %v2021_v37 = vadd.f32 %v2697_v31, %v2693_v27  ;;  %v1160_v27 = vadd.f32 %v1924_v25, %v2742_v5  ;;  %v2960_v25 = vld [vmem:[#allocation11_spill] sm:$0xff] }
 0x157   : > { %v2797_v19 = vpop.f32.mrf.mxu1  ;;  %v1441_v52 = vpop.f32.mrf.mxu0  ;;  %v1927_v31 = vadd.f32 %v2679_v18, %v2675_v14  ;;  %v2039_v14 = vadd.f32 %v2754_v63, %v2746_v35  ;;  %v1155_v35 = vadd.f32 %v2669_v7, %v2742_v5 }
 0x158   : > { %1585 = vst [vmem:[%s2770_s30 + $0x8] sm:$0xff] %v1553_v4  ;;  %v1558_v54 = vmax.f32 %v1450_v57, 0.0  ;;  %v1442_v58 = vadd.f32 %v1441_v52, %v1281_v10  ;;  %v1308_v4 = vadd.f32 %v2027_v50, %v1147_v21  ;;  %v1300_v17 = vadd.f32 %v2021_v37, %v1139_v59  ;;  %v2958_v50 = vld [vmem:[#allocation12_spill] sm:$0xff]  ;;  %v2959_v21 = vld [vmem:[#allocation10_spill] sm:$0xff]  ;;  %v2961_v59 = vld [vmem:[#allocation17_spill] sm:$0xff] }
 0x159   : > { %v2804_v6 = vpop.f32.mrf.mxu1  ;;  %v2123_v62 = vpop.f32.mrf.mxu0  ;;  %v1152_v52 = vadd.f32 %v2663_v0, %v2742_v5  ;;  %v1163_v53 = vadd.f32 %v1927_v31, %v2742_v5  ;;  %v2033_v0 = vadd.f32 %v2729_v29, %v2725_v3  ;;  %v2048_v32 = vadd.f32 %v2797_v19, %v2790_v61 }
 0x15a   : > { %1590 = vst [vmem:[%s2770_s30 + $0x30] sm:$0xff] %v1558_v54  ;;  %v1556_v30 = vmax.f32 %v1442_v58, 0.0  ;;  %v1453_v51 = vadd.f32 %v2123_v62, %v1292_v42  ;;  %v1321_v42 = vadd.f32 %v2036_v8, %v1160_v27  ;;  %v1176_v3 = vadd.f32 %v1936_v60, %v2742_v5 }
 0x15b   : > { %v2811_v38 = vpop.f32.mrf.mxu1  ;;  %v1444_v47 = vpop.f32.mrf.mxu0  ;;  %v1313_v63 = vadd.f32 %v2030_v45, %v1152_v52  ;;  %v1324_v29 = vadd.f32 %v2039_v14, %v1163_v53  ;;  %v1316_v61 = vadd.f32 %v2033_v0, %v1155_v35  ;;  %v2964_v45 = vld [vmem:[#allocation14_spill] sm:$0xff]  ;;  %v2968_v35 = vld [vmem:[#allocation16_spill] sm:$0xff] }
 0x15c   : > { %1588 = vst [vmem:[%s2770_s30 + $0x20] sm:$0xff] %v1556_v30  ;;  %v1559_v9 = vmax.f32 %v1453_v51, 0.0  ;;  %v1445_v46 = vadd.f32 %v1444_v47, %v1284_v1  ;;  %v1930_v51 = vadd.f32 %v2687_v24, %v2683_v20  ;;  %v2042_v20 = vadd.f32 %v2772_v56, %v2759_v26 }
 0x15d   : > { %v2820_v49 = vpop.f32.mrf.mxu1  ;;  %v2126_v40 = vpop.f32.mrf.mxu0  ;;  %v1337_v26 = vadd.f32 %v2048_v32, %v1176_v3 }
 0x15e   : > { %1591 = vst [vmem:[%s2770_s30 + $0x38] sm:$0xff] %v1559_v9  ;;  %v1557_v39 = vmax.f32 %v1445_v46, 0.0  ;;  %v1466_v43 = vadd.f32 %v2126_v40, %v1305_v28  ;;  %v1939_v9 = vadd.f32 %v2958_v50, %v2707_v41  ;;  %v1168_v19 = vadd.f32 %v1930_v51, %v2742_v5 }
 0x15f   : > { %v2827_v23 = vpop.f32.mrf.mxu1  ;;  %v1457_v55 = vpop.f32.mrf.mxu0  ;;  %v1933_v40 = vadd.f32 %v2960_v25, %v2959_v21  ;;  %v2051_v41 = vadd.f32 %v2811_v38, %v2804_v6 }
 0x160   : > { %1589 = vst [vmem:[%s2770_s30 + $0x28] sm:$0xff] %v1557_v39  ;;  %v1562_v12 = vmax.f32 %v1466_v43, 0.0  ;;  %v1458_v16 = vadd.f32 %v1457_v55, %v1297_v48  ;;  %v1179_v56 = vadd.f32 %v1939_v9, %v2742_v5  ;;  %v2962_v55 = vld [vmem:[#allocation18_spill] sm:$0xff]  ;;  %v1329_v6 = vadd.f32 %v2042_v20, %v1168_v19 }
 0x161   : > { %v2835_v57 = vpop.f32.mrf.mxu1  ;;  %v2127_v10 = vpop.f32.mrf.mxu0  ;;  %v1948_v8 = vadd.f32 %v2962_v55, %v2961_v59  ;;  %v1171_v38 = vadd.f32 %v1933_v40, %v2742_v5  ;;  %v2969_v40 = vld [vmem:[#allocation4_spill] sm:$0xff] }
 0x162   : > { %1594 = vst [vmem:[%s2770_s30 + $0x50] sm:$0xff] %v1562_v12  ;;  %v1560_v15 = vmax.f32 %v1458_v16, 0.0  ;;  %v1469_v11 = vadd.f32 %v2127_v10, %v1308_v4  ;;  %v2045_v4 = vadd.f32 %v2783_v13, %v2776_v44  ;;  %v2963_v10 = vld [vmem:[#allocation13_spill] sm:$0xff]  ;;  %v2965_v13 = vld [vmem:[#allocation19_spill] sm:$0xff] }
 0x163   : > { %v2842_v34 = vpop.f32.mrf.mxu1  ;;  %v1460_v54 = vpop.f32.mrf.mxu0  ;;  %v1192_v44 = vadd.f32 %v1948_v8, %v2742_v5 }
 0x164   : > { %1592 = vst [vmem:[%s2770_s30 + $0x40] sm:$0xff] %v1560_v15  ;;  %v1563_v18 = vmax.f32 %v1469_v11, 0.0  ;;  %v1461_v58 = vadd.f32 %v1460_v54, %v1300_v17  ;;  %v1942_v15 = vadd.f32 %v2964_v45, %v2963_v10  ;;  %v2057_v50 = vadd.f32 %v2842_v34, %v2835_v57 }
 0x165   : > { %v2058_v2 = vpop.f32.mrf.mxu1  ;;  %v2130_v62 = vpop.f32.mrf.mxu0 }
 0x166   : > { %1595 = vst [vmem:[%s2770_s30 + $0x58] sm:$0xff] %v1563_v18  ;;  %v1561_v22 = vmax.f32 %v1461_v58, 0.0  ;;  %v1482_v30 = vadd.f32 %v2130_v62, %v1321_v42  ;;  %v1340_v18 = vadd.f32 %v2051_v41, %v1179_v56  ;;  %v2966_v58 = vld [vmem:[#allocation20_spill] sm:$0xff]  ;;  %v2054_v62 = vadd.f32 %v2827_v23, %v2820_v49 }
 0x167   : > { %v2059_v1 = vpop.f32.mrf.mxu1  ;;  %v1473_v33 = vpop.f32.mrf.mxu0  ;;  %v1951_v42 = vadd.f32 %v2966_v58, %v2965_v13 }
 0x168   : > { %1593 = vst [vmem:[%s2770_s30 + $0x48] sm:$0xff] %v1561_v22  ;;  %v1566_v36 = vmax.f32 %v1482_v30, 0.0  ;;  %v1474_v47 = vadd.f32 %v1473_v33, %v1313_v63  ;;  %v2060_v52 = vadd.f32 %v2059_v1, %v2058_v2  ;;  %v1332_v2 = vadd.f32 %v2045_v4, %v1171_v38  ;;  %v2967_v63 = vld [vmem:[#allocation15_spill] sm:$0xff] }
 0x169   : > { %v2061_v46 = vpop.f32.mrf.mxu1  ;;  %v2131_v7 = vpop.f32.mrf.mxu0  ;;  %v1184_v30 = vadd.f32 %v1942_v15, %v2742_v5  ;;  %v1945_v51 = vadd.f32 %v2968_v35, %v2967_v63  ;;  %v1195_v49 = vadd.f32 %v1951_v42, %v2742_v5 }
 0x16a   : > { %1598 = vst [vmem:[%s2770_s30 + $0x70] sm:$0xff] %v1566_v36  ;;  %v1564_v24 = vmax.f32 %v1474_v47, 0.0  ;;  %v1485_v28 = vadd.f32 %v2131_v7, %v1324_v29  ;;  %v1353_v29 = vadd.f32 %v2060_v52, %v1192_v44 }
 0x16b   : > { %v2062_v37 = vpop.f32.mrf.mxu1  ;;  %v1476_v39 = vpop.f32.mrf.mxu0  ;;  %v1345_v20 = vadd.f32 %v2054_v62, %v1184_v30  ;;  %v2973_v30 = vld [vmem:[#allocation6_spill] sm:$0xff] }
 0x16c   : > { %1596 = vst [vmem:[%s2770_s30 + $0x60] sm:$0xff] %v1564_v24  ;;  %v1567_v43 = vmax.f32 %v1485_v28, 0.0  ;;  %v1477_v48 = vadd.f32 %v1476_v39, %v1316_v61  ;;  %v2063_v32 = vadd.f32 %v2062_v37, %v2061_v46  ;;  %v1187_v24 = vadd.f32 %v1945_v51, %v2742_v5 }
 0x16d   : > { %v2064_v12 = vpop.f32.mrf.mxu1  ;;  %v2134_v16 = vpop.f32.mrf.mxu0  ;;  %v1208_v37 = vadd.f32 %v2969_v40, %v2742_v5  ;;  %v1216_v63 = vadd.f32 %v2973_v30, %v2742_v5  ;;  %v2976_v40 = vld [vmem:[#allocation9_spill] sm:$0xff] }
 0x16e   : > { %1599 = vst [vmem:[%s2770_s30 + $0x78] sm:$0xff] %v1567_v43  ;;  %v1565_v27 = vmax.f32 %v1477_v48, 0.0  ;;  %v1498_v31 = vadd.f32 %v2134_v16, %v1337_v26  ;;  %v1356_v25 = vadd.f32 %v2063_v32, %v1195_v49  ;;  %v1348_v48 = vadd.f32 %v2057_v50, %v1187_v24  ;;  %v2970_v26 = vld [vmem:[#allocation2_spill] sm:$0xff]  ;;  %v2975_v50 = vld [vmem:[#allocation8_spill] sm:$0xff] }
 0x16f   : > { %v2065_v11 = vpop.f32.mrf.mxu1  ;;  %v1489_v17 = vpop.f32.mrf.mxu0  ;;  %v1200_v56 = vadd.f32 %v2970_v26, %v2742_v5 }
 0x170   : > { %1597 = vst [vmem:[%s2770_s30 + $0x68] sm:$0xff] %v1565_v27  ;;  %v1570_v54 = vmax.f32 %v1498_v31, 0.0  ;;  %v1490_v14 = vadd.f32 %v1489_v17, %v1329_v6  ;;  %v2066_v34 = vadd.f32 %v2065_v11, %v2064_v12  ;;  %v2971_v31 = vld [vmem:[#allocation5_spill] sm:$0xff] }
 0x171   : > { %v2067_v53 = vpop.f32.mrf.mxu1  ;;  %v2135_v60 = vpop.f32.mrf.mxu0  ;;  %v1211_v6 = vadd.f32 %v2971_v31, %v2742_v5 }
 0x172   : > { %1602 = vst [vmem:[%s2770_s30 + $0x90] sm:$0xff] %v1570_v54  ;;  %v1568_v0 = vmax.f32 %v1490_v14, 0.0  ;;  %v1501_v22 = vadd.f32 %v2135_v60, %v1340_v18  ;;  %v1361_v11 = vadd.f32 %v2066_v34, %v1200_v56  ;;  %v2972_v54 = vld [vmem:[#allocation3_spill] sm:$0xff] }
 0x173   : > { %v2068_v1 = vpop.f32.mrf.mxu1  ;;  %v1492_v33 = vpop.f32.mrf.mxu0  ;;  %v1203_v14 = vadd.f32 %v2972_v54, %v2742_v5 }
 0x174   : > { %1600 = vst [vmem:[%s2770_s30 + $0x80] sm:$0xff] %v1568_v0  ;;  %v1571_v36 = vmax.f32 %v1501_v22, 0.0  ;;  %v1493_v47 = vadd.f32 %v1492_v33, %v1332_v2  ;;  %v2069_v10 = vadd.f32 %v2068_v1, %v2067_v53 }
 0x175   : > { %v2070_v23 = vpop.f32.mrf.mxu1  ;;  %v2138_v3 = vpop.f32.mrf.mxu0 }
 0x176   : > { %1603 = vst [vmem:[%s2770_s30 + $0x98] sm:$0xff] %v1571_v36  ;;  %v1569_v9 = vmax.f32 %v1493_v47, 0.0  ;;  %v1514_v7 = vadd.f32 %v2138_v3, %v1353_v29  ;;  %v1364_v0 = vadd.f32 %v2069_v10, %v1203_v14 }
 0x177   : > { %v2071_v46 = vpop.f32.mrf.mxu1  ;;  %v1505_v28 = vpop.f32.mrf.mxu0 }
 0x178   : > { %1601 = vst [vmem:[%s2770_s30 + $0x88] sm:$0xff] %v1569_v9  ;;  %v1574_v61 = vmax.f32 %v1514_v7, 0.0  ;;  %v2072_v19 = vadd.f32 %v2071_v46, %v2070_v23  ;;  %v1506_v21 = vadd.f32 %v1505_v28, %v1345_v20  ;;  %v2974_v23 = vld [vmem:[#allocation7_spill] sm:$0xff]  ;;  %v1224_v9 = vadd.f32 %v2975_v50, %v2742_v5 }
 0x179   : > { %v2073_v39 = vpop.f32.mrf.mxu1  ;;  %v2139_v57 = vpop.f32.mrf.mxu0  ;;  %v1219_v3 = vadd.f32 %v2974_v23, %v2742_v5 }
 0x17a   : > { %1606 = vst [vmem:[%s2770_s30 + $0xb0] sm:$0xff] %v1574_v61  ;;  %v1572_v41 = vmax.f32 %v1506_v21, 0.0  ;;  %v1517_v43 = vadd.f32 %v2139_v57, %v1356_v25  ;;  %v1369_v27 = vadd.f32 %v2072_v19, %v1208_v37  ;;  %v1227_v37 = vadd.f32 %v2976_v40, %v2742_v5 }
 0x17b   : > { %v2074_v59 = vpop.f32.mrf.mxu1  ;;  %v1508_v55 = vpop.f32.mrf.mxu0 }
 0x17c   : > { %1604 = vst [vmem:[%s2770_s30 + $0xa0] sm:$0xff] %v1572_v41  ;;  %v1575_v8 = vmax.f32 %v1517_v43, 0.0  ;;  %v2075_v16 = vadd.f32 %v2074_v59, %v2073_v39  ;;  %v1509_v4 = vadd.f32 %v1508_v55, %v1348_v48 }
 0x17d   : > { %v2076_v12 = vpop.f32.mrf.mxu1  ;;  %v2142_v38 = vpop.f32.mrf.mxu0 }
 0x17e   : > { %1607 = vst [vmem:[%s2770_s30 + $0xb8] sm:$0xff] %v1575_v8  ;;  %v1573_v45 = vmax.f32 %v1509_v4, 0.0  ;;  %v1530_v15 = vadd.f32 %v2142_v38, %v1369_v27  ;;  %v1372_v13 = vadd.f32 %v2075_v16, %v1211_v6 }
 0x17f   : > { %v2077_v17 = vpop.f32.mrf.mxu1  ;;  %v1521_v52 = vpop.f32.mrf.mxu0 }
 0x180   : > { %1605 = vst [vmem:[%s2770_s30 + $0xa8] sm:$0xff] %v1573_v45  ;;  %v1578_v18 = vmax.f32 %v1530_v15, 0.0  ;;  %v1522_v44 = vadd.f32 %v1521_v52, %v1361_v11  ;;  %v2078_v60 = vadd.f32 %v2077_v17, %v2076_v12 }
 0x181   : > { %v2079_v58 = vpop.f32.mrf.mxu1  ;;  %v2143_v42 = vpop.f32.mrf.mxu0 }
 0x182   : > { %1610 = vst [vmem:[%s2770_s30 + $0xd0] sm:$0xff] %v1578_v18  ;;  %v1576_v53 = vmax.f32 %v1522_v44, 0.0  ;;  %v1533_v62 = vadd.f32 %v2143_v42, %v1372_v13  ;;  %v1377_v47 = vadd.f32 %v2078_v60, %v1216_v63 }
 0x183   : > { %v2080_v22 = vpop.f32.mrf.mxu1  ;;  %v1524_v2 = vpop.f32.mrf.mxu0 }
 0x184   : > { %1608 = vst [vmem:[%s2770_s30 + $0xc0] sm:$0xff] %v1576_v53  ;;  %v1579_v35 = vmax.f32 %v1533_v62, 0.0  ;;  %v1525_v51 = vadd.f32 %v1524_v2, %v1364_v0  ;;  %v2081_v32 = vadd.f32 %v2080_v22, %v2079_v58 }
 0x185   : > { %v2082_v1 = vpop.f32.mrf.mxu1  ;;  %v2146_v33 = vpop.f32.mrf.mxu0 }
 0x186   : > { %1611 = vst [vmem:[%s2770_s30 + $0xd8] sm:$0xff] %v1579_v35  ;;  %v1577_v36 = vmax.f32 %v1525_v51, 0.0  ;;  %v1380_v19 = vadd.f32 %v2081_v32, %v1219_v3 }
 0x187   : > { %v2083_v29 = vpop.f32.mrf.mxu1  ;;  %v1537_v49 = vpop.f32.mrf.mxu0 }
 0x188   : > { %1609 = vst [vmem:[%s2770_s30 + $0xc8] sm:$0xff] %v1577_v36  ;;  %v2084_v7 = vadd.f32 %v2083_v29, %v2082_v1  ;;  %v1538_v20 = vadd.f32 %v1537_v49, %v1377_v47 }
 0x189   : > { %v2085_v24 = vpop.f32.mrf.mxu1  ;;  %v2147_v46 = vpop.f32.mrf.mxu0 }
 0x18a   : > { %v1385_v28 = vadd.f32 %v2084_v7, %v1224_v9  ;;  %v1580_v61 = vmax.f32 %v1538_v20, 0.0 }
 0x18b   : > { %v2086_v21 = vpop.f32.mrf.mxu1  ;;  %v1540_v25 = vpop.f32.mrf.mxu0 }
 0x18c   : > { %v1546_v39 = vadd.f32 %v2146_v33, %v1385_v28  ;;  %1612 = vst [vmem:[%s2770_s30 + $0xe0] sm:$0xff] %v1580_v61  ;;  %v2087_v57 = vadd.f32 %v2086_v21, %v2085_v24  ;;  %v1541_v34 = vadd.f32 %v1540_v25, %v1380_v19 }
 0x18e   : > { %v1582_v41 = vmax.f32 %v1546_v39, 0.0  ;;  %v1388_v43 = vadd.f32 %v2087_v57, %v1227_v37  ;;  %v1581_v48 = vmax.f32 %v1541_v34, 0.0 }
 0x190   : > { %1614 = vst [vmem:[%s2770_s30 + $0xf0] sm:$0xff] %v1582_v41  ;;  %v1549_v26 = vadd.f32 %v2147_v46, %v1388_v43  ;;  %1613 = vst [vmem:[%s2770_s30 + $0xe8] sm:$0xff] %v1581_v48 }
 0x192   : > { %v1583_v56 = vmax.f32 %v1549_v26, 0.0 }
 0x194   : > { %1615 = vst [vmem:[%s2770_s30 + $0xf8] sm:$0xff] %v1583_v56 }
 0x195 PF: > { %s13_s14 = sadd.s32 1, %s2359_s14   ;;  %s2977_s12 = smov %s2355_s13 }
 0x196   : > { %p10_p5 = scmp.ge.s32.totalorder %s13_s14, 4   ;;  %s2978_s13 = smov %s2980_s15 }
 0x198   :  { %12 = sbr.rel (!%p10_p5) target bundleno = 2 (0x2), region = 68 }

// kernel: alexnet_forward.12
= control target key start
LH: loop header
LB: loop body
LE: loop exit
PB: predicated region body
PF: predicated region fallthrough
CT: control target
= control target key end

     0   :  { %s253_s0 = inlined_call_operand.vmem [shape: f32[72,128], index: 0, kind: input, shape index: {}]   ;;  %s254_s1 = inlined_call_operand.vmem [shape: f32[72,128], index: 1, kind: input, shape index: {}]   ;;  %s255_s2 = inlined_call_operand.vmem [shape: f32[72,128], index: 2, kind: input, shape index: {}]   ;;  %s256_s3 = inlined_call_operand.vmem [shape: f32[72,128], index: 3, kind: input, shape index: {}]   ;;  %s257_s4 = inlined_call_operand.vmem [shape: f32[72,128], index: 4, kind: output, shape index: {}]  }
   0x1   :  { %v17_v0 = vld [vmem:[%s253_s0] sm:$0xff]  ;;  %v18_v5 = vld [vmem:[%s253_s0 + $0x8] sm:$0xff]  ;;  %v19_v11 = vld [vmem:[%s253_s0 + $0x10] sm:$0xff] }
   0x2   :  { %v26_v1 = vld [vmem:[%s254_s1] sm:$0xff]  ;;  %v27_v6 = vld [vmem:[%s254_s1 + $0x8] sm:$0xff]  ;;  %v28_v13 = vld [vmem:[%s254_s1 + $0x10] sm:$0xff] }
   0x3   :  { %v44_v2 = vld [vmem:[%s255_s2] sm:$0xff]  ;;  %v35_v3 = vmax.f32 %v17_v0, %v26_v1  ;;  %v36_v8 = vmax.f32 %v18_v5, %v27_v6  ;;  %v45_v9 = vld [vmem:[%s255_s2 + $0x8] sm:$0xff]  ;;  %v46_v14 = vld [vmem:[%s255_s2 + $0x10] sm:$0xff]  ;;  %v37_v17 = vmax.f32 %v19_v11, %v28_v13 }
   0x4   :  { %v53_v4 = vld [vmem:[%s256_s3] sm:$0xff]  ;;  %v54_v10 = vld [vmem:[%s256_s3 + $0x8] sm:$0xff]  ;;  %v55_v15 = vld [vmem:[%s256_s3 + $0x10] sm:$0xff] }
   0x5   :  { %v62_v7 = vmax.f32 %v44_v2, %v53_v4  ;;  %v63_v12 = vmax.f32 %v45_v9, %v54_v10  ;;  %v64_v18 = vmax.f32 %v46_v14, %v55_v15  ;;  %v20_v19 = vld [vmem:[%s253_s0 + $0x18] sm:$0xff]  ;;  %v21_v25 = vld [vmem:[%s253_s0 + $0x20] sm:$0xff]  ;;  %v22_v32 = vld [vmem:[%s253_s0 + $0x28] sm:$0xff] }
   0x6   :  { %v29_v20 = vld [vmem:[%s254_s1 + $0x18] sm:$0xff]  ;;  %v30_v26 = vld [vmem:[%s254_s1 + $0x20] sm:$0xff]  ;;  %v31_v34 = vld [vmem:[%s254_s1 + $0x28] sm:$0xff] }
   0x7   :  { %v71_v16 = vmax.f32 %v35_v3, %v62_v7  ;;  %v47_v21 = vld [vmem:[%s255_s2 + $0x18] sm:$0xff]  ;;  %v72_v22 = vmax.f32 %v36_v8, %v63_v12  ;;  %v38_v23 = vmax.f32 %v20_v19, %v29_v20  ;;  %v73_v27 = vmax.f32 %v37_v17, %v64_v18  ;;  %v48_v30 = vld [vmem:[%s255_s2 + $0x20] sm:$0xff]  ;;  %v49_v35 = vld [vmem:[%s255_s2 + $0x28] sm:$0xff] }
   0x8   :  { %v56_v24 = vld [vmem:[%s256_s3 + $0x18] sm:$0xff]  ;;  %v39_v29 = vmax.f32 %v21_v25, %v30_v26  ;;  %v57_v31 = vld [vmem:[%s256_s3 + $0x20] sm:$0xff]  ;;  %v58_v36 = vld [vmem:[%s256_s3 + $0x28] sm:$0xff]  ;;  %v40_v38 = vmax.f32 %v22_v32, %v31_v34 }
   0x9   :  { %80 = vst [vmem:[%s257_s4] sm:$0xff] %v71_v16  ;;  %v65_v28 = vmax.f32 %v47_v21, %v56_v24  ;;  %81 = vst [vmem:[%s257_s4 + $0x8] sm:$0xff] %v72_v22  ;;  %v66_v33 = vmax.f32 %v48_v30, %v57_v31  ;;  %v67_v39 = vmax.f32 %v49_v35, %v58_v36  ;;  %v23_v40 = vld [vmem:[%s253_s0 + $0x30] sm:$0xff]  ;;  %v24_v46 = vld [vmem:[%s253_s0 + $0x38] sm:$0xff] }
   0xa   :  { %82 = vst [vmem:[%s257_s4 + $0x10] sm:$0xff] %v73_v27  ;;  %v32_v41 = vld [vmem:[%s254_s1 + $0x30] sm:$0xff]  ;;  %v33_v47 = vld [vmem:[%s254_s1 + $0x38] sm:$0xff]  ;;  %v25_v53 = vld [vmem:[%s253_s0 + $0x40] sm:$0xff] }
   0xb   :  { %v74_v37 = vmax.f32 %v38_v23, %v65_v28  ;;  %v50_v42 = vld [vmem:[%s255_s2 + $0x30] sm:$0xff]  ;;  %v75_v43 = vmax.f32 %v39_v29, %v66_v33  ;;  %v41_v44 = vmax.f32 %v23_v40, %v32_v41  ;;  %v76_v48 = vmax.f32 %v40_v38, %v67_v39  ;;  %v51_v51 = vld [vmem:[%s255_s2 + $0x38] sm:$0xff]  ;;  %v34_v55 = vld [vmem:[%s254_s1 + $0x40] sm:$0xff] }
   0xc   :  { %v59_v45 = vld [vmem:[%s256_s3 + $0x30] sm:$0xff]  ;;  %v42_v50 = vmax.f32 %v24_v46, %v33_v47  ;;  %v60_v52 = vld [vmem:[%s256_s3 + $0x38] sm:$0xff]  ;;  %v52_v56 = vld [vmem:[%s255_s2 + $0x40] sm:$0xff]  ;;  %v43_v59 = vmax.f32 %v25_v53, %v34_v55 }
   0xd   :  { %83 = vst [vmem:[%s257_s4 + $0x18] sm:$0xff] %v74_v37  ;;  %v68_v49 = vmax.f32 %v50_v42, %v59_v45  ;;  %84 = vst [vmem:[%s257_s4 + $0x20] sm:$0xff] %v75_v43  ;;  %v69_v54 = vmax.f32 %v51_v51, %v60_v52  ;;  %v61_v57 = vld [vmem:[%s256_s3 + $0x40] sm:$0xff] }
   0xe   :  { %85 = vst [vmem:[%s257_s4 + $0x28] sm:$0xff] %v76_v48  ;;  %v70_v60 = vmax.f32 %v52_v56, %v61_v57 }
   0xf   :  { %v77_v58 = vmax.f32 %v41_v44, %v68_v49  ;;  %v78_v61 = vmax.f32 %v42_v50, %v69_v54 }
  0x10   :  { %v79_v62 = vmax.f32 %v43_v59, %v70_v60 }
  0x11   :  { %86 = vst [vmem:[%s257_s4 + $0x30] sm:$0xff] %v77_v58  ;;  %87 = vst [vmem:[%s257_s4 + $0x38] sm:$0xff] %v78_v61 }
  0x12   :  { %88 = vst [vmem:[%s257_s4 + $0x40] sm:$0xff] %v79_v62 }

// kernel: alexnet_forward.14
= control target key start
LH: loop header
LB: loop body
LE: loop exit
PB: predicated region body
PF: predicated region fallthrough
CT: control target
= control target key end

     0   :  { %s92_s0 = inlined_call_operand.vmem [shape: f32[16,128], index: 0, kind: input, shape index: {}]   ;;  %s93_s1 = inlined_call_operand.vmem [shape: f32[16,128], index: 1, kind: input, shape index: {}]   ;;  %s94_s2 = inlined_call_operand.vmem [shape: f32[16,128], index: 2, kind: input, shape index: {}]   ;;  %s95_s3 = inlined_call_operand.vmem [shape: f32[16,128], index: 3, kind: input, shape index: {}]   ;;  %s96_s4 = inlined_call_operand.vmem [shape: f32[16,128], index: 4, kind: output, shape index: {}]  }
   0x1   :  { %v17_v0 = vld [vmem:[%s92_s0] sm:$0xff]  ;;  %v18_v5 = vld [vmem:[%s92_s0 + $0x8] sm:$0xff] }
   0x2   :  { %v19_v1 = vld [vmem:[%s93_s1] sm:$0xff]  ;;  %v20_v6 = vld [vmem:[%s93_s1 + $0x8] sm:$0xff] }
   0x3   :  { %v23_v2 = vld [vmem:[%s94_s2] sm:$0xff]  ;;  %v21_v3 = vmax.f32 %v17_v0, %v19_v1  ;;  %v22_v8 = vmax.f32 %v18_v5, %v20_v6  ;;  %v24_v9 = vld [vmem:[%s94_s2 + $0x8] sm:$0xff] }
   0x4   :  { %v25_v4 = vld [vmem:[%s95_s3] sm:$0xff]  ;;  %v26_v10 = vld [vmem:[%s95_s3 + $0x8] sm:$0xff] }
   0x5   :  { %v27_v7 = vmax.f32 %v23_v2, %v25_v4  ;;  %v28_v11 = vmax.f32 %v24_v9, %v26_v10 }
   0x7   :  { %v29_v12 = vmax.f32 %v21_v3, %v27_v7  ;;  %v30_v13 = vmax.f32 %v22_v8, %v28_v11 }
   0x9   :  { %31 = vst [vmem:[%s96_s4] sm:$0xff] %v29_v12  ;;  %32 = vst [vmem:[%s96_s4 + $0x8] sm:$0xff] %v30_v13 }

// kernel: alexnet_forward.13
= control target key start
LH: loop header
LB: loop body
LE: loop exit
PB: predicated region body
PF: predicated region fallthrough
CT: control target
= control target key end

     0   :  { %s1187_s1 = inlined_call_operand.vmem [shape: bf16[512,256], index: 1, kind: input, shape index: {}]   ;;  %s1188_s0 = inlined_call_operand.vmem [shape: bf16[56,512], index: 0, kind: input, shape index: {}]   ;;  %s1189_s2 = inlined_call_operand.vmem [shape: f32[1,256], index: 2, kind: input, shape index: {}]   ;;  %s1190_s3 = inlined_call_operand.vmem [shape: f32[56,256], index: 3, kind: output, shape index: {}]  }
   0x1   :  { %v752_v0 = vld [vmem:[%s1187_s1 + $0x74] ss:$8 sps:$4 sm:$0xff]   ;;  %v756_v2 = vld [vmem:[%s1187_s1 + $0x70] ss:$8 sps:$4 sm:$0xff]   ;;  %v758_v4 = vld [vmem:[%s1187_s1 + $0x64] ss:$8 sps:$4 sm:$0xff]  }
   0x2   :  { %v754_v1 = vld [vmem:[%s1187_s1 + $0x174] ss:$8 sps:$4 sm:$0xff]   ;;  %498 = vmatprep.subr.bf16.mxu0 %v752_v0  ;;  %v757_v3 = vld [vmem:[%s1187_s1 + $0x170] ss:$8 sps:$4 sm:$0xff]   ;;  %v760_v5 = vld [vmem:[%s1187_s1 + $0x164] ss:$8 sps:$4 sm:$0xff]  }
   0x3   :  { %569 = vmatprep.subr.bf16.mxu1 %v754_v1  ;;  %499 = vmatpush1.bf16.msra.mxu0 %v756_v2  ;;  %v762_v6 = vld [vmem:[%s1187_s1 + $0x60] ss:$8 sps:$4 sm:$0xff]   ;;  %v764_v8 = vld [vmem:[%s1187_s1 + $0x54] ss:$8 sps:$4 sm:$0xff]   ;;  %v768_v10 = vld [vmem:[%s1187_s1 + $0x50] ss:$8 sps:$4 sm:$0xff]  }
   0x4   :  { %570 = vmatpush1.bf16.msra.mxu1 %v757_v3  ;;  %500 = vmatprep.subr.bf16.mxu0 %v758_v4  ;;  %v763_v7 = vld [vmem:[%s1187_s1 + $0x160] ss:$8 sps:$4 sm:$0xff]   ;;  %v766_v9 = vld [vmem:[%s1187_s1 + $0x154] ss:$8 sps:$4 sm:$0xff]   ;;  %v769_v11 = vld [vmem:[%s1187_s1 + $0x150] ss:$8 sps:$4 sm:$0xff]  }
   0x5   :  { %571 = vmatprep.subr.bf16.mxu1 %v760_v5  ;;  %v770_v12 = vld [vmem:[%s1187_s1 + $0x44] ss:$8 sps:$4 sm:$0xff]   ;;  %v774_v14 = vld [vmem:[%s1187_s1 + $0x40] ss:$8 sps:$4 sm:$0xff]   ;;  %v776_v16 = vld [vmem:[%s1187_s1 + $0x34] ss:$8 sps:$4 sm:$0xff]  }
   0x6   :  { %v772_v13 = vld [vmem:[%s1187_s1 + $0x144] ss:$8 sps:$4 sm:$0xff]   ;;  %v775_v15 = vld [vmem:[%s1187_s1 + $0x140] ss:$8 sps:$4 sm:$0xff]   ;;  %v778_v17 = vld [vmem:[%s1187_s1 + $0x134] ss:$8 sps:$4 sm:$0xff]  }
   0x7   :  { %501 = vmatpush1.bf16.msra.mxu0 %v762_v6  ;;  %v780_v18 = vld [vmem:[%s1187_s1 + $0x30] ss:$8 sps:$4 sm:$0xff]   ;;  %v782_v20 = vld [vmem:[%s1187_s1 + $0x24] ss:$8 sps:$4 sm:$0xff]   ;;  %v786_v22 = vld [vmem:[%s1187_s1 + $0x20] ss:$8 sps:$4 sm:$0xff]  }
   0x8   :  { %572 = vmatpush1.bf16.msra.mxu1 %v763_v7  ;;  %502 = vmatprep.subr.bf16.mxu0 %v764_v8  ;;  %v781_v19 = vld [vmem:[%s1187_s1 + $0x130] ss:$8 sps:$4 sm:$0xff]   ;;  %v784_v21 = vld [vmem:[%s1187_s1 + $0x124] ss:$8 sps:$4 sm:$0xff]   ;;  %v787_v23 = vld [vmem:[%s1187_s1 + $0x120] ss:$8 sps:$4 sm:$0xff]  }
   0x9   :  { %573 = vmatprep.subr.bf16.mxu1 %v766_v9  ;;  %v788_v24 = vld [vmem:[%s1187_s1 + $0x14] ss:$8 sps:$4 sm:$0xff]   ;;  %v792_v26 = vld [vmem:[%s1187_s1 + $0x10] ss:$8 sps:$4 sm:$0xff]   ;;  %v794_v28 = vld [vmem:[%s1187_s1 + $0x4] ss:$8 sps:$4 sm:$0xff]  }
   0xa   :  { %v790_v25 = vld [vmem:[%s1187_s1 + $0x114] ss:$8 sps:$4 sm:$0xff]   ;;  %v793_v27 = vld [vmem:[%s1187_s1 + $0x110] ss:$8 sps:$4 sm:$0xff]   ;;  %v796_v29 = vld [vmem:[%s1187_s1 + $0x104] ss:$8 sps:$4 sm:$0xff]  }
   0xb   :  { %503 = vmatpush1.bf16.msra.mxu0 %v768_v10  ;;  %v798_v30 = vld [vmem:[%s1187_s1] ss:$8 sps:$4 sm:$0xff]   ;;  %v800_v32 = vld [vmem:[%s1187_s1 + $0xf4] ss:$8 sps:$4 sm:$0xff]   ;;  %v804_v34 = vld [vmem:[%s1187_s1 + $0xf0] ss:$8 sps:$4 sm:$0xff]  }
   0xc   :  { %574 = vmatpush1.bf16.msra.mxu1 %v769_v11  ;;  %504 = vmatprep.subr.bf16.mxu0 %v770_v12  ;;  %v799_v31 = vld [vmem:[%s1187_s1 + $0x100] ss:$8 sps:$4 sm:$0xff]   ;;  %v802_v33 = vld [vmem:[%s1187_s1 + $0x1f4] ss:$8 sps:$4 sm:$0xff]   ;;  %v805_v35 = vld [vmem:[%s1187_s1 + $0x1f0] ss:$8 sps:$4 sm:$0xff]  }
   0xd   :  { %575 = vmatprep.subr.bf16.mxu1 %v772_v13  ;;  %v806_v36 = vld [vmem:[%s1187_s1 + $0xe4] ss:$8 sps:$4 sm:$0xff]   ;;  %v810_v38 = vld [vmem:[%s1187_s1 + $0xe0] ss:$8 sps:$4 sm:$0xff]   ;;  %v812_v40 = vld [vmem:[%s1187_s1 + $0xd4] ss:$8 sps:$4 sm:$0xff]  }
   0xe   :  { %v808_v37 = vld [vmem:[%s1187_s1 + $0x1e4] ss:$8 sps:$4 sm:$0xff]   ;;  %v811_v39 = vld [vmem:[%s1187_s1 + $0x1e0] ss:$8 sps:$4 sm:$0xff]   ;;  %v814_v41 = vld [vmem:[%s1187_s1 + $0x1d4] ss:$8 sps:$4 sm:$0xff]  }
   0xf   :  { %505 = vmatpush1.bf16.msra.mxu0 %v774_v14  ;;  %v816_v42 = vld [vmem:[%s1187_s1 + $0xd0] ss:$8 sps:$4 sm:$0xff]   ;;  %v818_v44 = vld [vmem:[%s1187_s1 + $0xc4] ss:$8 sps:$4 sm:$0xff]   ;;  %v822_v46 = vld [vmem:[%s1187_s1 + $0xc0] ss:$8 sps:$4 sm:$0xff]  }
  0x10   :  { %576 = vmatpush1.bf16.msra.mxu1 %v775_v15  ;;  %506 = vmatprep.subr.bf16.mxu0 %v776_v16  ;;  %v817_v43 = vld [vmem:[%s1187_s1 + $0x1d0] ss:$8 sps:$4 sm:$0xff]   ;;  %v820_v45 = vld [vmem:[%s1187_s1 + $0x1c4] ss:$8 sps:$4 sm:$0xff]   ;;  %v823_v47 = vld [vmem:[%s1187_s1 + $0x1c0] ss:$8 sps:$4 sm:$0xff]  }
  0x11   :  { %577 = vmatprep.subr.bf16.mxu1 %v778_v17  ;;  %v824_v48 = vld [vmem:[%s1187_s1 + $0xb4] ss:$8 sps:$4 sm:$0xff]   ;;  %v828_v52 = vld [vmem:[%s1187_s1 + $0xb0] ss:$8 sps:$4 sm:$0xff]   ;;  %v830_v54 = vld [vmem:[%s1187_s1 + $0xa4] ss:$8 sps:$4 sm:$0xff]  }
  0x12   :  { %v850_v49 = vld [vmem:[%s1188_s0 + $0x4] ss:$16 sps:$4 sm:$0xff]   ;;  %v853_v51 = vld [vmem:[%s1188_s0 + $0xc] ss:$16 sps:$4 sm:$0xff]   ;;  %v829_v53 = vld [vmem:[%s1187_s1 + $0x1b0] ss:$8 sps:$4 sm:$0xff]  }
  0x13   :  { %507 = vmatpush1.bf16.msra.mxu0 %v780_v18  ;;  %v826_v50 = vld [vmem:[%s1187_s1 + $0x1b4] ss:$8 sps:$4 sm:$0xff]   ;;  %530 = vmatprep.mubr.bf16.mxu0 %v850_v49  ;;  %v832_v55 = vld [vmem:[%s1187_s1 + $0x1a4] ss:$8 sps:$4 sm:$0xff]   ;;  %v834_v56 = vld [vmem:[%s1187_s1 + $0xa0] ss:$8 sps:$4 sm:$0xff]   ;;  %v94_v18 = vlaneseq }
  0x14   :  { %578 = vmatpush1.bf16.msra.mxu1 %v781_v19  ;;  %508 = vmatprep.subr.bf16.mxu0 %v782_v20  ;;  %v835_v57 = vld [vmem:[%s1187_s1 + $0x1a0] ss:$8 sps:$4 sm:$0xff]   ;;  %v836_v58 = vld [vmem:[%s1187_s1 + $0x94] ss:$8 sps:$4 sm:$0xff]   ;;  %v840_v60 = vld [vmem:[%s1187_s1 + $0x90] ss:$8 sps:$4 sm:$0xff]  }
  0x15   :  { %579 = vmatprep.subr.bf16.mxu1 %v784_v21  ;;  %601 = vmatprep.mubr.bf16.mxu1 %v853_v51  ;;  %v838_v59 = vld [vmem:[%s1187_s1 + $0x194] ss:$8 sps:$4 sm:$0xff]   ;;  %v841_v61 = vld [vmem:[%s1187_s1 + $0x190] ss:$8 sps:$4 sm:$0xff]   ;;  %v842_v62 = vld [vmem:[%s1187_s1 + $0x84] ss:$8 sps:$4 sm:$0xff]  }
  0x16   :  { %v844_v63 = vld [vmem:[%s1187_s1 + $0x184] ss:$8 sps:$4 sm:$0xff]   ;;  %v846_v0 = vld [vmem:[%s1187_s1 + $0x80] ss:$8 sps:$4 sm:$0xff]   ;;  %v95_v19 = vshrl.u32 %v94_v18, 7 }
  0x17   :  { %509 = vmatpush1.bf16.msra.mxu0 %v786_v22  ;;  %v847_v1 = vld [vmem:[%s1187_s1 + $0x180] ss:$8 sps:$4 sm:$0xff]   ;;  %v854_v4 = vld [vmem:[%s1188_s0 + $0x24] ss:$16 sps:$4 sm:$0xff]   ;;  %v856_v5 = vld [vmem:[%s1188_s0 + $0x2c] ss:$16 sps:$4 sm:$0xff]  }
  0x18   :  { %580 = vmatpush1.bf16.msra.mxu1 %v787_v23  ;;  %510 = vmatprep.subr.bf16.mxu0 %v788_v24  ;;  %v848_v2 = vld [vmem:[%s1188_s0] ss:$16 sps:$4 sm:$0xff]   ;;  %v851_v3 = vld [vmem:[%s1188_s0 + $0x8] ss:$16 sps:$4 sm:$0xff]   ;;  %v860_v8 = vld [vmem:[%s1188_s0 + $0x44] ss:$16 sps:$4 sm:$0xff]  }
  0x19   :  { %581 = vmatprep.subr.bf16.mxu1 %v790_v25  ;;  %v858_v6 = vld [vmem:[%s1188_s0 + $0x20] ss:$16 sps:$4 sm:$0xff]   ;;  %v859_v7 = vld [vmem:[%s1188_s0 + $0x28] ss:$16 sps:$4 sm:$0xff]   ;;  %v862_v9 = vld [vmem:[%s1188_s0 + $0x4c] ss:$16 sps:$4 sm:$0xff]  }
  0x1a   :  { %v26_v10 = vld [vmem:[%s1188_s0 + $0x60] sm:$0xff]  ;;  %v27_v11 = vld [vmem:[%s1188_s0 + $0x68] sm:$0xff]  ;;  %v96_v20 = vsub.s32 0, %v95_v19  ;;  %v100_v22 = vsub.s32 1, %v95_v19 }
  0x1b   :  { %511 = vmatpush1.bf16.msra.mxu0 %v792_v26  ;;  %v864_v12 = vld [vmem:[%s1188_s0 + $0x40] ss:$16 sps:$4 sm:$0xff]   ;;  %v865_v13 = vld [vmem:[%s1188_s0 + $0x48] ss:$16 sps:$4 sm:$0xff]   ;;  %v685_v14 = vcombine.high %v26_v10, %v26_v10  ;;  %v687_v15 = vcombine.high %v27_v11, %v27_v11  ;;  %v684_v16 = vcombine.low %v26_v10, %v26_v10  ;;  %v686_v17 = vcombine.low %v27_v11, %v27_v11 }
  0x1c   :  { %582 = vmatpush1.bf16.msra.mxu1 %v793_v27  ;;  %512 = vmatprep.subr.bf16.mxu0 %v794_v28  ;;  %v92_v21 = vld [vmem:[%s1189_s2] sm:$0x3] }
  0x1d   :  { %583 = vmatprep.subr.bf16.mxu1 %v796_v29  ;;  %v1127_v23 = vrot.slane %v92_v21, %v96_v20  ;;  %v1129_v24 = vrot.slane %v92_v21, %v100_v22 }
  0x1f   :  { %513 = vmatpush1.bf16.msra.mxu0 %v798_v30 }
  0x20   :  { %584 = vmatpush1.bf16.msra.mxu1 %v799_v31  ;;  %514 = vmatprep.subr.bf16.mxu0 %v800_v32 }
  0x21   :  { %585 = vmatprep.subr.bf16.mxu1 %v802_v33 }
  0x23   :  { %515 = vmatpush2.bf16.msra.mxu0 %v804_v34 }
  0x24   :  { %586 = vmatpush2.bf16.msra.mxu1 %v805_v35  ;;  %516 = vmatprep.subr.bf16.mxu0 %v806_v36 }
  0x25   :  { %587 = vmatprep.subr.bf16.mxu1 %v808_v37 }
  0x27   :  { %517 = vmatpush2.bf16.msra.mxu0 %v810_v38 }
  0x28   :  { %588 = vmatpush2.bf16.msra.mxu1 %v811_v39  ;;  %518 = vmatprep.subr.bf16.mxu0 %v812_v40 }
  0x29   :  { %589 = vmatprep.subr.bf16.mxu1 %v814_v41 }
  0x2b   :  { %519 = vmatpush2.bf16.msra.mxu0 %v816_v42 }
  0x2c   :  { %590 = vmatpush2.bf16.msra.mxu1 %v817_v43  ;;  %520 = vmatprep.subr.bf16.mxu0 %v818_v44 }
  0x2d   :  { %591 = vmatprep.subr.bf16.mxu1 %v820_v45 }
  0x2f   :  { %521 = vmatpush2.bf16.msra.mxu0 %v822_v46 }
  0x30   :  { %592 = vmatpush2.bf16.msra.mxu1 %v823_v47  ;;  %522 = vmatprep.subr.bf16.mxu0 %v824_v48 }
  0x31   :  { %593 = vmatprep.subr.bf16.mxu1 %v826_v50 }
  0x33   :  { %523 = vmatpush2.bf16.msra.mxu0 %v828_v52 }
  0x34   :  { %594 = vmatpush2.bf16.msra.mxu1 %v829_v53  ;;  %524 = vmatprep.subr.bf16.mxu0 %v830_v54 }
  0x35   :  { %595 = vmatprep.subr.bf16.mxu1 %v832_v55 }
  0x37   :  { %525 = vmatpush2.bf16.msra.mxu0 %v834_v56 }
  0x38   :  { %596 = vmatpush2.bf16.msra.mxu1 %v835_v57  ;;  %526 = vmatprep.subr.bf16.mxu0 %v836_v58 }
  0x39   :  { %597 = vmatprep.subr.bf16.mxu1 %v838_v59 }
  0x3b   :  { %527 = vmatpush2.bf16.msra.mxu0 %v840_v60 }
  0x3c   :  { %598 = vmatpush2.bf16.msra.mxu1 %v841_v61  ;;  %528 = vmatprep.subr.bf16.mxu0 %v842_v62 }
  0x3d   :  { %599 = vmatprep.subr.bf16.mxu1 %v844_v63 }
  0x3f   :  { %529 = vmatpush2.bf16.msra.mxu0 %v846_v0 }
  0x40   :  { %600 = vmatpush2.bf16.msra.mxu1 %v847_v1 }
  0x42   :  { %531 = vmatmul.mubr.bf16.vlgmr.msra.gmra.mxu0 %v848_v2 }
  0x43   :  { %602 = vmatmul.mubr.bf16.vlgmr.msra.gmra.mxu1 %v851_v3  ;;  %540 = vmatprep.mubr.bf16.mxu0 %v854_v4 }
  0x44   :  { %611 = vmatprep.mubr.bf16.mxu1 %v856_v5 }
  0x4a   :  { %541 = vmatmul.mubr.bf16.gmra.mxu0 %v858_v6 }
  0x4b   :  { %612 = vmatmul.mubr.bf16.gmra.mxu1 %v859_v7  ;;  %550 = vmatprep.mubr.bf16.mxu0 %v860_v8 }
  0x4c   :  { %621 = vmatprep.mubr.bf16.mxu1 %v862_v9 }
  0x52   :  { %551 = vmatmul.mubr.bf16.gmra.mxu0 %v864_v12 }
  0x53   :  { %622 = vmatmul.mubr.bf16.gmra.mxu1 %v865_v13  ;;  %560 = vmatprep.mubr.bf16.mxu0 %v685_v14 }
  0x54   :  { %631 = vmatprep.mubr.bf16.mxu1 %v687_v15 }
  0x5a   :  { %561 = vmatmul.mubr.bf16.gmra.mxu0 %v684_v16 }
  0x5b   :  { %632 = vmatmul.mubr.bf16.gmra.mxu1 %v686_v17 }
 0x102   :  { %v532_v25 = vpop.f32.mrf.mxu0 }
 0x103   :  { %v603_v26 = vpop.f32.mrf.mxu1  ;;  %v533_v27 = vadd.f32 %v532_v25, %v1127_v23 }
 0x104   :  { %v534_v28 = vpop.f32.mrf.mxu0 }
 0x105   :  { %v605_v29 = vpop.f32.mrf.mxu1  ;;  %v604_v30 = vadd.f32 %v603_v26, %v533_v27  ;;  %v535_v31 = vadd.f32 %v534_v28, %v1129_v24 }
 0x106   :  { %v536_v32 = vpop.f32.mrf.mxu0 }
 0x107   :  { %v607_v33 = vpop.f32.mrf.mxu1  ;;  %v640_v34 = vmax.f32 %v604_v30, 0.0  ;;  %v606_v35 = vadd.f32 %v605_v29, %v535_v31  ;;  %v537_v36 = vadd.f32 %v536_v32, %v1127_v23 }
 0x108   :  { %v538_v37 = vpop.f32.mrf.mxu0 }
 0x109   :  { %v609_v38 = vpop.f32.mrf.mxu1  ;;  %654 = vst [vmem:[%s1190_s3] sm:$0xff] %v640_v34  ;;  %v641_v39 = vmax.f32 %v606_v35, 0.0  ;;  %v608_v40 = vadd.f32 %v607_v33, %v537_v36  ;;  %v539_v41 = vadd.f32 %v538_v37, %v1129_v24 }
 0x10a   :  { %v542_v42 = vpop.f32.mrf.mxu0 }
 0x10b   :  { %v613_v43 = vpop.f32.mrf.mxu1  ;;  %655 = vst [vmem:[%s1190_s3 + $0x8] sm:$0xff] %v641_v39  ;;  %v642_v44 = vmax.f32 %v608_v40, 0.0  ;;  %v610_v45 = vadd.f32 %v609_v38, %v539_v41  ;;  %v543_v46 = vadd.f32 %v542_v42, %v1127_v23 }
 0x10c   :  { %v544_v47 = vpop.f32.mrf.mxu0 }
 0x10d   :  { %v615_v48 = vpop.f32.mrf.mxu1  ;;  %656 = vst [vmem:[%s1190_s3 + $0x10] sm:$0xff] %v642_v44  ;;  %v643_v49 = vmax.f32 %v610_v45, 0.0  ;;  %v614_v50 = vadd.f32 %v613_v43, %v543_v46  ;;  %v545_v51 = vadd.f32 %v544_v47, %v1129_v24 }
 0x10e   :  { %v546_v52 = vpop.f32.mrf.mxu0 }
 0x10f   :  { %v617_v53 = vpop.f32.mrf.mxu1  ;;  %657 = vst [vmem:[%s1190_s3 + $0x18] sm:$0xff] %v643_v49  ;;  %v644_v54 = vmax.f32 %v614_v50, 0.0  ;;  %v616_v55 = vadd.f32 %v615_v48, %v545_v51  ;;  %v547_v56 = vadd.f32 %v546_v52, %v1127_v23 }
 0x110   :  { %v548_v57 = vpop.f32.mrf.mxu0 }
 0x111   :  { %v619_v58 = vpop.f32.mrf.mxu1  ;;  %658 = vst [vmem:[%s1190_s3 + $0x20] sm:$0xff] %v644_v54  ;;  %v645_v59 = vmax.f32 %v616_v55, 0.0  ;;  %v618_v60 = vadd.f32 %v617_v53, %v547_v56  ;;  %v549_v61 = vadd.f32 %v548_v57, %v1129_v24 }
 0x112   :  { %v552_v62 = vpop.f32.mrf.mxu0 }
 0x113   :  { %v623_v63 = vpop.f32.mrf.mxu1  ;;  %659 = vst [vmem:[%s1190_s3 + $0x28] sm:$0xff] %v645_v59  ;;  %v646_v0 = vmax.f32 %v618_v60, 0.0  ;;  %v620_v1 = vadd.f32 %v619_v58, %v549_v61  ;;  %v553_v2 = vadd.f32 %v552_v62, %v1127_v23 }
 0x114   :  { %v554_v3 = vpop.f32.mrf.mxu0 }
 0x115   :  { %v625_v4 = vpop.f32.mrf.mxu1  ;;  %660 = vst [vmem:[%s1190_s3 + $0x30] sm:$0xff] %v646_v0  ;;  %v647_v5 = vmax.f32 %v620_v1, 0.0  ;;  %v624_v6 = vadd.f32 %v623_v63, %v553_v2  ;;  %v555_v7 = vadd.f32 %v554_v3, %v1129_v24 }
 0x116   :  { %v556_v8 = vpop.f32.mrf.mxu0 }
 0x117   :  { %v627_v9 = vpop.f32.mrf.mxu1  ;;  %661 = vst [vmem:[%s1190_s3 + $0x38] sm:$0xff] %v647_v5  ;;  %v648_v10 = vmax.f32 %v624_v6, 0.0  ;;  %v626_v11 = vadd.f32 %v625_v4, %v555_v7  ;;  %v557_v12 = vadd.f32 %v556_v8, %v1127_v23 }
 0x118   :  { %v558_v13 = vpop.f32.mrf.mxu0 }
 0x119   :  { %v629_v14 = vpop.f32.mrf.mxu1  ;;  %662 = vst [vmem:[%s1190_s3 + $0x40] sm:$0xff] %v648_v10  ;;  %v649_v15 = vmax.f32 %v626_v11, 0.0  ;;  %v628_v16 = vadd.f32 %v627_v9, %v557_v12  ;;  %v559_v17 = vadd.f32 %v558_v13, %v1129_v24 }
 0x11a   :  { %v562_v18 = vpop.f32.mrf.mxu0 }
 0x11b   :  { %v633_v19 = vpop.f32.mrf.mxu1  ;;  %663 = vst [vmem:[%s1190_s3 + $0x48] sm:$0xff] %v649_v15  ;;  %v650_v20 = vmax.f32 %v628_v16, 0.0  ;;  %v630_v21 = vadd.f32 %v629_v14, %v559_v17  ;;  %v563_v22 = vadd.f32 %v562_v18, %v1127_v23 }
 0x11c   :  { %v564_v25 = vpop.f32.mrf.mxu0 }
 0x11d   :  { %v635_v26 = vpop.f32.mrf.mxu1  ;;  %664 = vst [vmem:[%s1190_s3 + $0x50] sm:$0xff] %v650_v20  ;;  %v651_v27 = vmax.f32 %v630_v21, 0.0  ;;  %v634_v28 = vadd.f32 %v633_v19, %v563_v22  ;;  %v565_v29 = vadd.f32 %v564_v25, %v1129_v24 }
 0x11e   :  { %v566_v30 = vpop.f32.mrf.mxu0 }
 0x11f   :  { %v637_v31 = vpop.f32.mrf.mxu1  ;;  %665 = vst [vmem:[%s1190_s3 + $0x58] sm:$0xff] %v651_v27  ;;  %v652_v32 = vmax.f32 %v634_v28, 0.0  ;;  %v636_v33 = vadd.f32 %v635_v26, %v565_v29 }
 0x120   :  { %v567_v34 = vpop.f32.mrf.mxu0 }
 0x121   :  { %v638_v23 = vpop.f32.mrf.mxu1  ;;  %666 = vst [vmem:[%s1190_s3 + $0x60] sm:$0xff] %v652_v32  ;;  %v653_v35 = vmax.f32 %v636_v33, 0.0 }
 0x123   :  { %667 = vst [vmem:[%s1190_s3 + $0x68] sm:$0xff] %v653_v35 }

// kernel: alexnet_forward.15
= control target key start
LH: loop header
LB: loop body
LE: loop exit
PB: predicated region body
PF: predicated region fallthrough
CT: control target
= control target key end

     0   :  { %s3573_s12 = smov 0   ;;  %s3575_s13 = smov 0   ;;  %s4489_s0 = inlined_call_operand.vmem [shape: bf16[8,1024], index: 0, kind: input, shape index: {}]   ;;  %s4490_s1 = inlined_call_operand.vmem [shape: bf16[1024,2048], index: 1, kind: input, shape index: {}]   ;;  %s4491_s2 = inlined_call_operand.vmem [shape: f32[1,2048], index: 2, kind: input, shape index: {}]   ;;  %s4492_s3 = inlined_call_operand.vmem [shape: f32[8,2048], index: 3, kind: output, shape index: {}]  }
   0x1   :  { %s3577_s14 = smov 0   ;;  %s3579_s15 = smov 0  }
   0x2   :  { %s3581_s16 = smov 0  }
   0x3 LB: > { %s22_s17 = sadd.s32 1, %s3547_s15  ;;  %p65_p1 = scmp.ne.s32.totalorder %s3539_s13, %s3535_s12  ;;  %s3551_s16 = sphi %s3581_s16, %s13_s16   ;;  %s3547_s15 = sphi %s3579_s15, %s4496_s15   ;;  %s3543_s14 = sphi %s3577_s14, %s4495_s14   ;;  %s3539_s13 = sphi %s3575_s13, %s4494_s13   ;;  %s3535_s12 = sphi %s3573_s12, %s4493_s12  }
   0x4   : > { %p23_p0 = scmp.ge.s32.totalorder %s22_s17, 4  ;;  %p66_p2 = scmp.eq.s32.totalorder %s3551_s16, 0 }
   0x5   : > { %s58_s19 = sadd.s32 1, %s3539_s13  ;;  %p2805_p5 = scmp.ge.s32.totalorder %s3551_s16, 4 }
   0x6   : > { %s4498_s17 = smov (%p23_p0, %s22_s17), 0  ;;  %p67_p3 = por %p66_p2, %p65_p1 }
   0x7   : > { %s55_s18 = ssub.s32 %s3547_s15, %s4498_s17  ;;  %153 = sbr.rel (%p2805_p5) target bundleno = 144 (0x90), region = 20 }
   0x8   : > { %p56_p4 = scmp.eq.s32.totalorder %s55_s18, 0 }
   0xa   : > { %s3608_s20 = scalar_select %p56_p4, %s3539_s13, %s58_s19  }
   0xc   : > { %156 = sbr.rel (!%p67_p3) target bundleno = 144 (0x90), region = 24  ;;  %s158_s21 = sand.u32 (%p67_p3), 1, %s3539_s13  }
   0xd   : > { %s3080_s22 = sshll.u32 (%p67_p3), %s3547_s15, 4  ;;  %s2806_s23 = sshll.u32 (%p67_p3), %s158_s21, 11 }
   0xe   : > { %s3616_s26 = scalar_lea.vmem (%p67_p3), %s4490_s1, %s3080_s22  ;;  %s3621_s27 = scalar_lea.vmem (%p67_p3), [#allocation2], %s2806_s23 }
   0xf   : > { %v176_v0 = vld [vmem:[%s3616_s26] sm:$0xff] (%p67_p3)  ;;  %v178_v1 = vld [vmem:[%s3616_s26 + $0x8] sm:$0xff] (%p67_p3) }
  0x10   : > { %v180_v2 = vld [vmem:[%s3616_s26 + $0x40] sm:$0xff] (%p67_p3)  ;;  %177 = vst [vmem:[%s3621_s27] sm:$0xff] (%p67_p3), %v176_v0  ;;  %179 = vst [vmem:[%s3621_s27 + $0x8] sm:$0xff] (%p67_p3), %v178_v1  ;;  %v182_v3 = vld [vmem:[%s3616_s26 + $0x48] sm:$0xff] (%p67_p3) }
  0x11   : > { %181 = vst [vmem:[%s3621_s27 + $0x10] sm:$0xff] %v180_v2  ;;  %v184_v4 = vld [vmem:[%s3616_s26 + $0x80] sm:$0xff]  ;;  %v186_v5 = vld [vmem:[%s3616_s26 + $0x88] sm:$0xff]  ;;  %183 = vst [vmem:[%s3621_s27 + $0x18] sm:$0xff] %v182_v3 }
  0x12   : > { %185 = vst [vmem:[%s3621_s27 + $0x20] sm:$0xff] %v184_v4  ;;  %187 = vst [vmem:[%s3621_s27 + $0x28] sm:$0xff] %v186_v5  ;;  %v188_v6 = vld [vmem:[%s3616_s26 + $0xc0] sm:$0xff]  ;;  %v190_v7 = vld [vmem:[%s3616_s26 + $0xc8] sm:$0xff] }
  0x13   : > { %v192_v8 = vld [vmem:[%s3616_s26 + $0x100] sm:$0xff]  ;;  %189 = vst [vmem:[%s3621_s27 + $0x30] sm:$0xff] %v188_v6  ;;  %191 = vst [vmem:[%s3621_s27 + $0x38] sm:$0xff] %v190_v7  ;;  %v194_v9 = vld [vmem:[%s3616_s26 + $0x108] sm:$0xff] }
  0x14   : > { %193 = vst [vmem:[%s3621_s27 + $0x40] sm:$0xff] %v192_v8  ;;  %v196_v10 = vld [vmem:[%s3616_s26 + $0x140] sm:$0xff]  ;;  %v198_v11 = vld [vmem:[%s3616_s26 + $0x148] sm:$0xff]  ;;  %195 = vst [vmem:[%s3621_s27 + $0x48] sm:$0xff] %v194_v9 }
  0x15   : > { %197 = vst [vmem:[%s3621_s27 + $0x50] sm:$0xff] %v196_v10  ;;  %199 = vst [vmem:[%s3621_s27 + $0x58] sm:$0xff] %v198_v11  ;;  %v200_v12 = vld [vmem:[%s3616_s26 + $0x180] sm:$0xff]  ;;  %v202_v13 = vld [vmem:[%s3616_s26 + $0x188] sm:$0xff] }
  0x16   : > { %v204_v14 = vld [vmem:[%s3616_s26 + $0x1c0] sm:$0xff]  ;;  %201 = vst [vmem:[%s3621_s27 + $0x60] sm:$0xff] %v200_v12  ;;  %203 = vst [vmem:[%s3621_s27 + $0x68] sm:$0xff] %v202_v13  ;;  %v206_v15 = vld [vmem:[%s3616_s26 + $0x1c8] sm:$0xff] }
  0x17   : > { %205 = vst [vmem:[%s3621_s27 + $0x70] sm:$0xff] %v204_v14  ;;  %v208_v16 = vld [vmem:[%s3616_s26 + $0x200] sm:$0xff]  ;;  %v210_v17 = vld [vmem:[%s3616_s26 + $0x208] sm:$0xff]  ;;  %207 = vst [vmem:[%s3621_s27 + $0x78] sm:$0xff] %v206_v15 }
  0x18   : > { %209 = vst [vmem:[%s3621_s27 + $0x80] sm:$0xff] %v208_v16  ;;  %211 = vst [vmem:[%s3621_s27 + $0x88] sm:$0xff] %v210_v17  ;;  %v212_v18 = vld [vmem:[%s3616_s26 + $0x240] sm:$0xff]  ;;  %v214_v19 = vld [vmem:[%s3616_s26 + $0x248] sm:$0xff] }
  0x19   : > { %v216_v20 = vld [vmem:[%s3616_s26 + $0x280] sm:$0xff]  ;;  %213 = vst [vmem:[%s3621_s27 + $0x90] sm:$0xff] %v212_v18  ;;  %215 = vst [vmem:[%s3621_s27 + $0x98] sm:$0xff] %v214_v19  ;;  %v218_v21 = vld [vmem:[%s3616_s26 + $0x288] sm:$0xff] }
  0x1a   : > { %217 = vst [vmem:[%s3621_s27 + $0xa0] sm:$0xff] %v216_v20  ;;  %v220_v22 = vld [vmem:[%s3616_s26 + $0x2c0] sm:$0xff]  ;;  %v222_v23 = vld [vmem:[%s3616_s26 + $0x2c8] sm:$0xff]  ;;  %219 = vst [vmem:[%s3621_s27 + $0xa8] sm:$0xff] %v218_v21 }
  0x1b   : > { %221 = vst [vmem:[%s3621_s27 + $0xb0] sm:$0xff] %v220_v22  ;;  %223 = vst [vmem:[%s3621_s27 + $0xb8] sm:$0xff] %v222_v23  ;;  %v224_v24 = vld [vmem:[%s3616_s26 + $0x300] sm:$0xff]  ;;  %v226_v25 = vld [vmem:[%s3616_s26 + $0x308] sm:$0xff] }
  0x1c   : > { %v228_v26 = vld [vmem:[%s3616_s26 + $0x340] sm:$0xff]  ;;  %225 = vst [vmem:[%s3621_s27 + $0xc0] sm:$0xff] %v224_v24  ;;  %227 = vst [vmem:[%s3621_s27 + $0xc8] sm:$0xff] %v226_v25  ;;  %v230_v27 = vld [vmem:[%s3616_s26 + $0x348] sm:$0xff] }
  0x1d   : > { %229 = vst [vmem:[%s3621_s27 + $0xd0] sm:$0xff] %v228_v26  ;;  %v232_v28 = vld [vmem:[%s3616_s26 + $0x380] sm:$0xff]  ;;  %v234_v29 = vld [vmem:[%s3616_s26 + $0x388] sm:$0xff]  ;;  %231 = vst [vmem:[%s3621_s27 + $0xd8] sm:$0xff] %v230_v27 }
  0x1e   : > { %233 = vst [vmem:[%s3621_s27 + $0xe0] sm:$0xff] %v232_v28  ;;  %235 = vst [vmem:[%s3621_s27 + $0xe8] sm:$0xff] %v234_v29  ;;  %v236_v30 = vld [vmem:[%s3616_s26 + $0x3c0] sm:$0xff]  ;;  %v238_v31 = vld [vmem:[%s3616_s26 + $0x3c8] sm:$0xff] }
  0x1f   : > { %v240_v32 = vld [vmem:[%s3616_s26 + $0x400] sm:$0xff]  ;;  %237 = vst [vmem:[%s3621_s27 + $0xf0] sm:$0xff] %v236_v30  ;;  %239 = vst [vmem:[%s3621_s27 + $0xf8] sm:$0xff] %v238_v31  ;;  %v242_v33 = vld [vmem:[%s3616_s26 + $0x408] sm:$0xff] }
  0x20   : > { %241 = vst [vmem:[%s3621_s27 + $0x100] sm:$0xff] %v240_v32  ;;  %v244_v34 = vld [vmem:[%s3616_s26 + $0x440] sm:$0xff]  ;;  %v246_v35 = vld [vmem:[%s3616_s26 + $0x448] sm:$0xff]  ;;  %243 = vst [vmem:[%s3621_s27 + $0x108] sm:$0xff] %v242_v33 }
  0x21   : > { %245 = vst [vmem:[%s3621_s27 + $0x110] sm:$0xff] %v244_v34  ;;  %247 = vst [vmem:[%s3621_s27 + $0x118] sm:$0xff] %v246_v35  ;;  %v248_v36 = vld [vmem:[%s3616_s26 + $0x480] sm:$0xff]  ;;  %v250_v37 = vld [vmem:[%s3616_s26 + $0x488] sm:$0xff] }
  0x22   : > { %v252_v38 = vld [vmem:[%s3616_s26 + $0x4c0] sm:$0xff]  ;;  %249 = vst [vmem:[%s3621_s27 + $0x120] sm:$0xff] %v248_v36  ;;  %251 = vst [vmem:[%s3621_s27 + $0x128] sm:$0xff] %v250_v37  ;;  %v254_v39 = vld [vmem:[%s3616_s26 + $0x4c8] sm:$0xff] }
  0x23   : > { %253 = vst [vmem:[%s3621_s27 + $0x130] sm:$0xff] %v252_v38  ;;  %v256_v40 = vld [vmem:[%s3616_s26 + $0x500] sm:$0xff]  ;;  %v258_v41 = vld [vmem:[%s3616_s26 + $0x508] sm:$0xff]  ;;  %255 = vst [vmem:[%s3621_s27 + $0x138] sm:$0xff] %v254_v39 }
  0x24   : > { %257 = vst [vmem:[%s3621_s27 + $0x140] sm:$0xff] %v256_v40  ;;  %259 = vst [vmem:[%s3621_s27 + $0x148] sm:$0xff] %v258_v41  ;;  %v260_v42 = vld [vmem:[%s3616_s26 + $0x540] sm:$0xff]  ;;  %v262_v43 = vld [vmem:[%s3616_s26 + $0x548] sm:$0xff] }
  0x25   : > { %v264_v44 = vld [vmem:[%s3616_s26 + $0x580] sm:$0xff]  ;;  %261 = vst [vmem:[%s3621_s27 + $0x150] sm:$0xff] %v260_v42  ;;  %263 = vst [vmem:[%s3621_s27 + $0x158] sm:$0xff] %v262_v43  ;;  %v266_v45 = vld [vmem:[%s3616_s26 + $0x588] sm:$0xff] }
  0x26   : > { %265 = vst [vmem:[%s3621_s27 + $0x160] sm:$0xff] %v264_v44  ;;  %v268_v46 = vld [vmem:[%s3616_s26 + $0x5c0] sm:$0xff]  ;;  %v270_v47 = vld [vmem:[%s3616_s26 + $0x5c8] sm:$0xff]  ;;  %267 = vst [vmem:[%s3621_s27 + $0x168] sm:$0xff] %v266_v45 }
  0x27   : > { %269 = vst [vmem:[%s3621_s27 + $0x170] sm:$0xff] %v268_v46  ;;  %271 = vst [vmem:[%s3621_s27 + $0x178] sm:$0xff] %v270_v47  ;;  %v272_v48 = vld [vmem:[%s3616_s26 + $0x600] sm:$0xff]  ;;  %v274_v49 = vld [vmem:[%s3616_s26 + $0x608] sm:$0xff] }
  0x28   : > { %v276_v50 = vld [vmem:[%s3616_s26 + $0x640] sm:$0xff]  ;;  %273 = vst [vmem:[%s3621_s27 + $0x180] sm:$0xff] %v272_v48  ;;  %275 = vst [vmem:[%s3621_s27 + $0x188] sm:$0xff] %v274_v49  ;;  %v278_v51 = vld [vmem:[%s3616_s26 + $0x648] sm:$0xff] }
  0x29   : > { %277 = vst [vmem:[%s3621_s27 + $0x190] sm:$0xff] %v276_v50  ;;  %v280_v52 = vld [vmem:[%s3616_s26 + $0x680] sm:$0xff]  ;;  %v282_v53 = vld [vmem:[%s3616_s26 + $0x688] sm:$0xff]  ;;  %279 = vst [vmem:[%s3621_s27 + $0x198] sm:$0xff] %v278_v51 }
  0x2a   : > { %281 = vst [vmem:[%s3621_s27 + $0x1a0] sm:$0xff] %v280_v52  ;;  %283 = vst [vmem:[%s3621_s27 + $0x1a8] sm:$0xff] %v282_v53  ;;  %v284_v54 = vld [vmem:[%s3616_s26 + $0x6c0] sm:$0xff]  ;;  %v286_v55 = vld [vmem:[%s3616_s26 + $0x6c8] sm:$0xff] }
  0x2b   : > { %v288_v56 = vld [vmem:[%s3616_s26 + $0x700] sm:$0xff]  ;;  %285 = vst [vmem:[%s3621_s27 + $0x1b0] sm:$0xff] %v284_v54  ;;  %287 = vst [vmem:[%s3621_s27 + $0x1b8] sm:$0xff] %v286_v55  ;;  %v290_v57 = vld [vmem:[%s3616_s26 + $0x708] sm:$0xff] }
  0x2c   : > { %289 = vst [vmem:[%s3621_s27 + $0x1c0] sm:$0xff] %v288_v56  ;;  %v292_v58 = vld [vmem:[%s3616_s26 + $0x740] sm:$0xff]  ;;  %v294_v59 = vld [vmem:[%s3616_s26 + $0x748] sm:$0xff]  ;;  %291 = vst [vmem:[%s3621_s27 + $0x1c8] sm:$0xff] %v290_v57 }
  0x2d   : > { %293 = vst [vmem:[%s3621_s27 + $0x1d0] sm:$0xff] %v292_v58  ;;  %295 = vst [vmem:[%s3621_s27 + $0x1d8] sm:$0xff] %v294_v59  ;;  %v296_v60 = vld [vmem:[%s3616_s26 + $0x780] sm:$0xff]  ;;  %v298_v61 = vld [vmem:[%s3616_s26 + $0x788] sm:$0xff] }
  0x2e   : > { %v300_v62 = vld [vmem:[%s3616_s26 + $0x7c0] sm:$0xff]  ;;  %297 = vst [vmem:[%s3621_s27 + $0x1e0] sm:$0xff] %v296_v60  ;;  %299 = vst [vmem:[%s3621_s27 + $0x1e8] sm:$0xff] %v298_v61  ;;  %v302_v63 = vld [vmem:[%s3616_s26 + $0x7c8] sm:$0xff] }
  0x2f   : > { %301 = vst [vmem:[%s3621_s27 + $0x1f0] sm:$0xff] %v300_v62  ;;  %v304_v0 = vld [vmem:[%s3616_s26 + $0x800] sm:$0xff]  ;;  %v306_v1 = vld [vmem:[%s3616_s26 + $0x808] sm:$0xff]  ;;  %303 = vst [vmem:[%s3621_s27 + $0x1f8] sm:$0xff] %v302_v63 }
  0x30   : > { %305 = vst [vmem:[%s3621_s27 + $0x200] sm:$0xff] %v304_v0  ;;  %307 = vst [vmem:[%s3621_s27 + $0x208] sm:$0xff] %v306_v1  ;;  %v308_v2 = vld [vmem:[%s3616_s26 + $0x840] sm:$0xff]  ;;  %v310_v3 = vld [vmem:[%s3616_s26 + $0x848] sm:$0xff] }
  0x31   : > { %v312_v4 = vld [vmem:[%s3616_s26 + $0x880] sm:$0xff]  ;;  %309 = vst [vmem:[%s3621_s27 + $0x210] sm:$0xff] %v308_v2  ;;  %311 = vst [vmem:[%s3621_s27 + $0x218] sm:$0xff] %v310_v3  ;;  %v314_v5 = vld [vmem:[%s3616_s26 + $0x888] sm:$0xff] }
  0x32   : > { %313 = vst [vmem:[%s3621_s27 + $0x220] sm:$0xff] %v312_v4  ;;  %v316_v6 = vld [vmem:[%s3616_s26 + $0x8c0] sm:$0xff]  ;;  %v318_v7 = vld [vmem:[%s3616_s26 + $0x8c8] sm:$0xff]  ;;  %315 = vst [vmem:[%s3621_s27 + $0x228] sm:$0xff] %v314_v5 }
  0x33   : > { %317 = vst [vmem:[%s3621_s27 + $0x230] sm:$0xff] %v316_v6  ;;  %319 = vst [vmem:[%s3621_s27 + $0x238] sm:$0xff] %v318_v7  ;;  %v320_v8 = vld [vmem:[%s3616_s26 + $0x900] sm:$0xff]  ;;  %v322_v9 = vld [vmem:[%s3616_s26 + $0x908] sm:$0xff] }
  0x34   : > { %v324_v10 = vld [vmem:[%s3616_s26 + $0x940] sm:$0xff]  ;;  %321 = vst [vmem:[%s3621_s27 + $0x240] sm:$0xff] %v320_v8  ;;  %323 = vst [vmem:[%s3621_s27 + $0x248] sm:$0xff] %v322_v9  ;;  %v326_v11 = vld [vmem:[%s3616_s26 + $0x948] sm:$0xff] }
  0x35   : > { %325 = vst [vmem:[%s3621_s27 + $0x250] sm:$0xff] %v324_v10  ;;  %v328_v12 = vld [vmem:[%s3616_s26 + $0x980] sm:$0xff]  ;;  %v330_v13 = vld [vmem:[%s3616_s26 + $0x988] sm:$0xff]  ;;  %327 = vst [vmem:[%s3621_s27 + $0x258] sm:$0xff] %v326_v11 }
  0x36   : > { %329 = vst [vmem:[%s3621_s27 + $0x260] sm:$0xff] %v328_v12  ;;  %331 = vst [vmem:[%s3621_s27 + $0x268] sm:$0xff] %v330_v13  ;;  %v332_v14 = vld [vmem:[%s3616_s26 + $0x9c0] sm:$0xff]  ;;  %v334_v15 = vld [vmem:[%s3616_s26 + $0x9c8] sm:$0xff] }
  0x37   : > { %v336_v16 = vld [vmem:[%s3616_s26 + $0xa00] sm:$0xff]  ;;  %333 = vst [vmem:[%s3621_s27 + $0x270] sm:$0xff] %v332_v14  ;;  %335 = vst [vmem:[%s3621_s27 + $0x278] sm:$0xff] %v334_v15  ;;  %v338_v17 = vld [vmem:[%s3616_s26 + $0xa08] sm:$0xff] }
  0x38   : > { %337 = vst [vmem:[%s3621_s27 + $0x280] sm:$0xff] %v336_v16  ;;  %v340_v18 = vld [vmem:[%s3616_s26 + $0xa40] sm:$0xff]  ;;  %v342_v19 = vld [vmem:[%s3616_s26 + $0xa48] sm:$0xff]  ;;  %339 = vst [vmem:[%s3621_s27 + $0x288] sm:$0xff] %v338_v17 }
  0x39   : > { %341 = vst [vmem:[%s3621_s27 + $0x290] sm:$0xff] %v340_v18  ;;  %343 = vst [vmem:[%s3621_s27 + $0x298] sm:$0xff] %v342_v19  ;;  %v344_v20 = vld [vmem:[%s3616_s26 + $0xa80] sm:$0xff]  ;;  %v346_v21 = vld [vmem:[%s3616_s26 + $0xa88] sm:$0xff] }
  0x3a   : > { %v348_v22 = vld [vmem:[%s3616_s26 + $0xac0] sm:$0xff]  ;;  %345 = vst [vmem:[%s3621_s27 + $0x2a0] sm:$0xff] %v344_v20  ;;  %347 = vst [vmem:[%s3621_s27 + $0x2a8] sm:$0xff] %v346_v21  ;;  %v350_v23 = vld [vmem:[%s3616_s26 + $0xac8] sm:$0xff] }
  0x3b   : > { %349 = vst [vmem:[%s3621_s27 + $0x2b0] sm:$0xff] %v348_v22  ;;  %v352_v24 = vld [vmem:[%s3616_s26 + $0xb00] sm:$0xff]  ;;  %v354_v25 = vld [vmem:[%s3616_s26 + $0xb08] sm:$0xff]  ;;  %351 = vst [vmem:[%s3621_s27 + $0x2b8] sm:$0xff] %v350_v23 }
  0x3c   : > { %353 = vst [vmem:[%s3621_s27 + $0x2c0] sm:$0xff] %v352_v24  ;;  %355 = vst [vmem:[%s3621_s27 + $0x2c8] sm:$0xff] %v354_v25  ;;  %v356_v26 = vld [vmem:[%s3616_s26 + $0xb40] sm:$0xff]  ;;  %v358_v27 = vld [vmem:[%s3616_s26 + $0xb48] sm:$0xff] }
  0x3d   : > { %v360_v28 = vld [vmem:[%s3616_s26 + $0xb80] sm:$0xff]  ;;  %357 = vst [vmem:[%s3621_s27 + $0x2d0] sm:$0xff] %v356_v26  ;;  %359 = vst [vmem:[%s3621_s27 + $0x2d8] sm:$0xff] %v358_v27  ;;  %v362_v29 = vld [vmem:[%s3616_s26 + $0xb88] sm:$0xff] }
  0x3e   : > { %361 = vst [vmem:[%s3621_s27 + $0x2e0] sm:$0xff] %v360_v28  ;;  %v364_v30 = vld [vmem:[%s3616_s26 + $0xbc0] sm:$0xff]  ;;  %v366_v31 = vld [vmem:[%s3616_s26 + $0xbc8] sm:$0xff]  ;;  %363 = vst [vmem:[%s3621_s27 + $0x2e8] sm:$0xff] %v362_v29 }
  0x3f   : > { %365 = vst [vmem:[%s3621_s27 + $0x2f0] sm:$0xff] %v364_v30  ;;  %367 = vst [vmem:[%s3621_s27 + $0x2f8] sm:$0xff] %v366_v31  ;;  %v368_v32 = vld [vmem:[%s3616_s26 + $0xc00] sm:$0xff]  ;;  %v370_v33 = vld [vmem:[%s3616_s26 + $0xc08] sm:$0xff] }
  0x40   : > { %v372_v34 = vld [vmem:[%s3616_s26 + $0xc40] sm:$0xff]  ;;  %369 = vst [vmem:[%s3621_s27 + $0x300] sm:$0xff] %v368_v32  ;;  %371 = vst [vmem:[%s3621_s27 + $0x308] sm:$0xff] %v370_v33  ;;  %v374_v35 = vld [vmem:[%s3616_s26 + $0xc48] sm:$0xff] }
  0x41   : > { %373 = vst [vmem:[%s3621_s27 + $0x310] sm:$0xff] %v372_v34  ;;  %v376_v36 = vld [vmem:[%s3616_s26 + $0xc80] sm:$0xff]  ;;  %v378_v37 = vld [vmem:[%s3616_s26 + $0xc88] sm:$0xff]  ;;  %375 = vst [vmem:[%s3621_s27 + $0x318] sm:$0xff] %v374_v35 }
  0x42   : > { %377 = vst [vmem:[%s3621_s27 + $0x320] sm:$0xff] %v376_v36  ;;  %379 = vst [vmem:[%s3621_s27 + $0x328] sm:$0xff] %v378_v37  ;;  %v380_v38 = vld [vmem:[%s3616_s26 + $0xcc0] sm:$0xff]  ;;  %v382_v39 = vld [vmem:[%s3616_s26 + $0xcc8] sm:$0xff] }
  0x43   : > { %v384_v40 = vld [vmem:[%s3616_s26 + $0xd00] sm:$0xff]  ;;  %381 = vst [vmem:[%s3621_s27 + $0x330] sm:$0xff] %v380_v38  ;;  %383 = vst [vmem:[%s3621_s27 + $0x338] sm:$0xff] %v382_v39  ;;  %v386_v41 = vld [vmem:[%s3616_s26 + $0xd08] sm:$0xff] }
  0x44   : > { %385 = vst [vmem:[%s3621_s27 + $0x340] sm:$0xff] %v384_v40  ;;  %v388_v42 = vld [vmem:[%s3616_s26 + $0xd40] sm:$0xff]  ;;  %v390_v43 = vld [vmem:[%s3616_s26 + $0xd48] sm:$0xff]  ;;  %387 = vst [vmem:[%s3621_s27 + $0x348] sm:$0xff] %v386_v41 }
  0x45   : > { %389 = vst [vmem:[%s3621_s27 + $0x350] sm:$0xff] %v388_v42  ;;  %391 = vst [vmem:[%s3621_s27 + $0x358] sm:$0xff] %v390_v43  ;;  %v392_v44 = vld [vmem:[%s3616_s26 + $0xd80] sm:$0xff]  ;;  %v394_v45 = vld [vmem:[%s3616_s26 + $0xd88] sm:$0xff] }
  0x46   : > { %v396_v46 = vld [vmem:[%s3616_s26 + $0xdc0] sm:$0xff]  ;;  %393 = vst [vmem:[%s3621_s27 + $0x360] sm:$0xff] %v392_v44  ;;  %395 = vst [vmem:[%s3621_s27 + $0x368] sm:$0xff] %v394_v45  ;;  %v398_v47 = vld [vmem:[%s3616_s26 + $0xdc8] sm:$0xff] }
  0x47   : > { %397 = vst [vmem:[%s3621_s27 + $0x370] sm:$0xff] %v396_v46  ;;  %v400_v48 = vld [vmem:[%s3616_s26 + $0xe00] sm:$0xff]  ;;  %v402_v49 = vld [vmem:[%s3616_s26 + $0xe08] sm:$0xff]  ;;  %399 = vst [vmem:[%s3621_s27 + $0x378] sm:$0xff] %v398_v47 }
  0x48   : > { %401 = vst [vmem:[%s3621_s27 + $0x380] sm:$0xff] %v400_v48  ;;  %403 = vst [vmem:[%s3621_s27 + $0x388] sm:$0xff] %v402_v49  ;;  %v404_v50 = vld [vmem:[%s3616_s26 + $0xe40] sm:$0xff]  ;;  %v406_v51 = vld [vmem:[%s3616_s26 + $0xe48] sm:$0xff] }
  0x49   : > { %v408_v52 = vld [vmem:[%s3616_s26 + $0xe80] sm:$0xff]  ;;  %405 = vst [vmem:[%s3621_s27 + $0x390] sm:$0xff] %v404_v50  ;;  %407 = vst [vmem:[%s3621_s27 + $0x398] sm:$0xff] %v406_v51  ;;  %v410_v53 = vld [vmem:[%s3616_s26 + $0xe88] sm:$0xff] }
  0x4a   : > { %409 = vst [vmem:[%s3621_s27 + $0x3a0] sm:$0xff] %v408_v52  ;;  %v412_v54 = vld [vmem:[%s3616_s26 + $0xec0] sm:$0xff]  ;;  %v414_v55 = vld [vmem:[%s3616_s26 + $0xec8] sm:$0xff]  ;;  %411 = vst [vmem:[%s3621_s27 + $0x3a8] sm:$0xff] %v410_v53 }
  0x4b   : > { %413 = vst [vmem:[%s3621_s27 + $0x3b0] sm:$0xff] %v412_v54  ;;  %415 = vst [vmem:[%s3621_s27 + $0x3b8] sm:$0xff] %v414_v55  ;;  %v416_v56 = vld [vmem:[%s3616_s26 + $0xf00] sm:$0xff]  ;;  %v418_v57 = vld [vmem:[%s3616_s26 + $0xf08] sm:$0xff] }
  0x4c   : > { %v420_v58 = vld [vmem:[%s3616_s26 + $0xf40] sm:$0xff]  ;;  %417 = vst [vmem:[%s3621_s27 + $0x3c0] sm:$0xff] %v416_v56  ;;  %419 = vst [vmem:[%s3621_s27 + $0x3c8] sm:$0xff] %v418_v57  ;;  %v422_v59 = vld [vmem:[%s3616_s26 + $0xf48] sm:$0xff] }
  0x4d   : > { %421 = vst [vmem:[%s3621_s27 + $0x3d0] sm:$0xff] %v420_v58  ;;  %v424_v60 = vld [vmem:[%s3616_s26 + $0xf80] sm:$0xff]  ;;  %v426_v61 = vld [vmem:[%s3616_s26 + $0xf88] sm:$0xff]  ;;  %423 = vst [vmem:[%s3621_s27 + $0x3d8] sm:$0xff] %v422_v59 }
  0x4e   : > { %425 = vst [vmem:[%s3621_s27 + $0x3e0] sm:$0xff] %v424_v60  ;;  %427 = vst [vmem:[%s3621_s27 + $0x3e8] sm:$0xff] %v426_v61  ;;  %v428_v62 = vld [vmem:[%s3616_s26 + $0xfc0] sm:$0xff]  ;;  %v430_v63 = vld [vmem:[%s3616_s26 + $0xfc8] sm:$0xff] }
  0x4f   : > { %v432_v0 = vld [vmem:[%s3616_s26 + $0x1000] sm:$0xff]  ;;  %429 = vst [vmem:[%s3621_s27 + $0x3f0] sm:$0xff] %v428_v62  ;;  %431 = vst [vmem:[%s3621_s27 + $0x3f8] sm:$0xff] %v430_v63  ;;  %v434_v1 = vld [vmem:[%s3616_s26 + $0x1008] sm:$0xff] }
  0x50   : > { %433 = vst [vmem:[%s3621_s27 + $0x400] sm:$0xff] %v432_v0  ;;  %v436_v2 = vld [vmem:[%s3616_s26 + $0x1040] sm:$0xff]  ;;  %v438_v3 = vld [vmem:[%s3616_s26 + $0x1048] sm:$0xff]  ;;  %435 = vst [vmem:[%s3621_s27 + $0x408] sm:$0xff] %v434_v1 }
  0x51   : > { %437 = vst [vmem:[%s3621_s27 + $0x410] sm:$0xff] %v436_v2  ;;  %439 = vst [vmem:[%s3621_s27 + $0x418] sm:$0xff] %v438_v3  ;;  %v440_v4 = vld [vmem:[%s3616_s26 + $0x1080] sm:$0xff]  ;;  %v442_v5 = vld [vmem:[%s3616_s26 + $0x1088] sm:$0xff] }
  0x52   : > { %v444_v6 = vld [vmem:[%s3616_s26 + $0x10c0] sm:$0xff]  ;;  %441 = vst [vmem:[%s3621_s27 + $0x420] sm:$0xff] %v440_v4  ;;  %443 = vst [vmem:[%s3621_s27 + $0x428] sm:$0xff] %v442_v5  ;;  %v446_v7 = vld [vmem:[%s3616_s26 + $0x10c8] sm:$0xff] }
  0x53   : > { %445 = vst [vmem:[%s3621_s27 + $0x430] sm:$0xff] %v444_v6  ;;  %v448_v8 = vld [vmem:[%s3616_s26 + $0x1100] sm:$0xff]  ;;  %v450_v9 = vld [vmem:[%s3616_s26 + $0x1108] sm:$0xff]  ;;  %447 = vst [vmem:[%s3621_s27 + $0x438] sm:$0xff] %v446_v7 }
  0x54   : > { %449 = vst [vmem:[%s3621_s27 + $0x440] sm:$0xff] %v448_v8  ;;  %451 = vst [vmem:[%s3621_s27 + $0x448] sm:$0xff] %v450_v9  ;;  %v452_v10 = vld [vmem:[%s3616_s26 + $0x1140] sm:$0xff]  ;;  %v454_v11 = vld [vmem:[%s3616_s26 + $0x1148] sm:$0xff] }
  0x55   : > { %v456_v12 = vld [vmem:[%s3616_s26 + $0x1180] sm:$0xff]  ;;  %453 = vst [vmem:[%s3621_s27 + $0x450] sm:$0xff] %v452_v10  ;;  %455 = vst [vmem:[%s3621_s27 + $0x458] sm:$0xff] %v454_v11  ;;  %v458_v13 = vld [vmem:[%s3616_s26 + $0x1188] sm:$0xff] }
  0x56   : > { %457 = vst [vmem:[%s3621_s27 + $0x460] sm:$0xff] %v456_v12  ;;  %v460_v14 = vld [vmem:[%s3616_s26 + $0x11c0] sm:$0xff]  ;;  %v462_v15 = vld [vmem:[%s3616_s26 + $0x11c8] sm:$0xff]  ;;  %459 = vst [vmem:[%s3621_s27 + $0x468] sm:$0xff] %v458_v13 }
  0x57   : > { %461 = vst [vmem:[%s3621_s27 + $0x470] sm:$0xff] %v460_v14  ;;  %463 = vst [vmem:[%s3621_s27 + $0x478] sm:$0xff] %v462_v15  ;;  %v464_v16 = vld [vmem:[%s3616_s26 + $0x1200] sm:$0xff]  ;;  %v466_v17 = vld [vmem:[%s3616_s26 + $0x1208] sm:$0xff] }
  0x58   : > { %v468_v18 = vld [vmem:[%s3616_s26 + $0x1240] sm:$0xff]  ;;  %465 = vst [vmem:[%s3621_s27 + $0x480] sm:$0xff] %v464_v16  ;;  %467 = vst [vmem:[%s3621_s27 + $0x488] sm:$0xff] %v466_v17  ;;  %v470_v19 = vld [vmem:[%s3616_s26 + $0x1248] sm:$0xff] }
  0x59   : > { %469 = vst [vmem:[%s3621_s27 + $0x490] sm:$0xff] %v468_v18  ;;  %v472_v20 = vld [vmem:[%s3616_s26 + $0x1280] sm:$0xff]  ;;  %v474_v21 = vld [vmem:[%s3616_s26 + $0x1288] sm:$0xff]  ;;  %471 = vst [vmem:[%s3621_s27 + $0x498] sm:$0xff] %v470_v19 }
  0x5a   : > { %473 = vst [vmem:[%s3621_s27 + $0x4a0] sm:$0xff] %v472_v20  ;;  %475 = vst [vmem:[%s3621_s27 + $0x4a8] sm:$0xff] %v474_v21  ;;  %v476_v22 = vld [vmem:[%s3616_s26 + $0x12c0] sm:$0xff]  ;;  %v478_v23 = vld [vmem:[%s3616_s26 + $0x12c8] sm:$0xff] }
  0x5b   : > { %v480_v24 = vld [vmem:[%s3616_s26 + $0x1300] sm:$0xff]  ;;  %477 = vst [vmem:[%s3621_s27 + $0x4b0] sm:$0xff] %v476_v22  ;;  %479 = vst [vmem:[%s3621_s27 + $0x4b8] sm:$0xff] %v478_v23  ;;  %v482_v25 = vld [vmem:[%s3616_s26 + $0x1308] sm:$0xff] }
  0x5c   : > { %481 = vst [vmem:[%s3621_s27 + $0x4c0] sm:$0xff] %v480_v24  ;;  %v484_v26 = vld [vmem:[%s3616_s26 + $0x1340] sm:$0xff]  ;;  %v486_v27 = vld [vmem:[%s3616_s26 + $0x1348] sm:$0xff]  ;;  %483 = vst [vmem:[%s3621_s27 + $0x4c8] sm:$0xff] %v482_v25 }
  0x5d   : > { %485 = vst [vmem:[%s3621_s27 + $0x4d0] sm:$0xff] %v484_v26  ;;  %487 = vst [vmem:[%s3621_s27 + $0x4d8] sm:$0xff] %v486_v27  ;;  %v488_v28 = vld [vmem:[%s3616_s26 + $0x1380] sm:$0xff]  ;;  %v490_v29 = vld [vmem:[%s3616_s26 + $0x1388] sm:$0xff] }
  0x5e   : > { %v492_v30 = vld [vmem:[%s3616_s26 + $0x13c0] sm:$0xff]  ;;  %489 = vst [vmem:[%s3621_s27 + $0x4e0] sm:$0xff] %v488_v28  ;;  %491 = vst [vmem:[%s3621_s27 + $0x4e8] sm:$0xff] %v490_v29  ;;  %v494_v31 = vld [vmem:[%s3616_s26 + $0x13c8] sm:$0xff] }
  0x5f   : > { %493 = vst [vmem:[%s3621_s27 + $0x4f0] sm:$0xff] %v492_v30  ;;  %v496_v32 = vld [vmem:[%s3616_s26 + $0x1400] sm:$0xff]  ;;  %v498_v33 = vld [vmem:[%s3616_s26 + $0x1408] sm:$0xff]  ;;  %495 = vst [vmem:[%s3621_s27 + $0x4f8] sm:$0xff] %v494_v31 }
  0x60   : > { %497 = vst [vmem:[%s3621_s27 + $0x500] sm:$0xff] %v496_v32  ;;  %499 = vst [vmem:[%s3621_s27 + $0x508] sm:$0xff] %v498_v33  ;;  %v500_v34 = vld [vmem:[%s3616_s26 + $0x1440] sm:$0xff]  ;;  %v502_v35 = vld [vmem:[%s3616_s26 + $0x1448] sm:$0xff] }
  0x61   : > { %v504_v36 = vld [vmem:[%s3616_s26 + $0x1480] sm:$0xff]  ;;  %501 = vst [vmem:[%s3621_s27 + $0x510] sm:$0xff] %v500_v34  ;;  %503 = vst [vmem:[%s3621_s27 + $0x518] sm:$0xff] %v502_v35  ;;  %v506_v37 = vld [vmem:[%s3616_s26 + $0x1488] sm:$0xff] }
  0x62   : > { %505 = vst [vmem:[%s3621_s27 + $0x520] sm:$0xff] %v504_v36  ;;  %v508_v38 = vld [vmem:[%s3616_s26 + $0x14c0] sm:$0xff]  ;;  %v510_v39 = vld [vmem:[%s3616_s26 + $0x14c8] sm:$0xff]  ;;  %507 = vst [vmem:[%s3621_s27 + $0x528] sm:$0xff] %v506_v37 }
  0x63   : > { %509 = vst [vmem:[%s3621_s27 + $0x530] sm:$0xff] %v508_v38  ;;  %511 = vst [vmem:[%s3621_s27 + $0x538] sm:$0xff] %v510_v39  ;;  %v512_v40 = vld [vmem:[%s3616_s26 + $0x1500] sm:$0xff]  ;;  %v514_v41 = vld [vmem:[%s3616_s26 + $0x1508] sm:$0xff] }
  0x64   : > { %v516_v42 = vld [vmem:[%s3616_s26 + $0x1540] sm:$0xff]  ;;  %513 = vst [vmem:[%s3621_s27 + $0x540] sm:$0xff] %v512_v40  ;;  %515 = vst [vmem:[%s3621_s27 + $0x548] sm:$0xff] %v514_v41  ;;  %v518_v43 = vld [vmem:[%s3616_s26 + $0x1548] sm:$0xff] }
  0x65   : > { %517 = vst [vmem:[%s3621_s27 + $0x550] sm:$0xff] %v516_v42  ;;  %v520_v44 = vld [vmem:[%s3616_s26 + $0x1580] sm:$0xff]  ;;  %v522_v45 = vld [vmem:[%s3616_s26 + $0x1588] sm:$0xff]  ;;  %519 = vst [vmem:[%s3621_s27 + $0x558] sm:$0xff] %v518_v43 }
  0x66   : > { %521 = vst [vmem:[%s3621_s27 + $0x560] sm:$0xff] %v520_v44  ;;  %523 = vst [vmem:[%s3621_s27 + $0x568] sm:$0xff] %v522_v45  ;;  %v524_v46 = vld [vmem:[%s3616_s26 + $0x15c0] sm:$0xff]  ;;  %v526_v47 = vld [vmem:[%s3616_s26 + $0x15c8] sm:$0xff] }
  0x67   : > { %v528_v48 = vld [vmem:[%s3616_s26 + $0x1600] sm:$0xff]  ;;  %525 = vst [vmem:[%s3621_s27 + $0x570] sm:$0xff] %v524_v46  ;;  %527 = vst [vmem:[%s3621_s27 + $0x578] sm:$0xff] %v526_v47  ;;  %v530_v49 = vld [vmem:[%s3616_s26 + $0x1608] sm:$0xff] }
  0x68   : > { %529 = vst [vmem:[%s3621_s27 + $0x580] sm:$0xff] %v528_v48  ;;  %v532_v50 = vld [vmem:[%s3616_s26 + $0x1640] sm:$0xff]  ;;  %v534_v51 = vld [vmem:[%s3616_s26 + $0x1648] sm:$0xff]  ;;  %531 = vst [vmem:[%s3621_s27 + $0x588] sm:$0xff] %v530_v49 }
  0x69   : > { %533 = vst [vmem:[%s3621_s27 + $0x590] sm:$0xff] %v532_v50  ;;  %535 = vst [vmem:[%s3621_s27 + $0x598] sm:$0xff] %v534_v51  ;;  %v536_v52 = vld [vmem:[%s3616_s26 + $0x1680] sm:$0xff]  ;;  %v538_v53 = vld [vmem:[%s3616_s26 + $0x1688] sm:$0xff] }
  0x6a   : > { %v540_v54 = vld [vmem:[%s3616_s26 + $0x16c0] sm:$0xff]  ;;  %537 = vst [vmem:[%s3621_s27 + $0x5a0] sm:$0xff] %v536_v52  ;;  %539 = vst [vmem:[%s3621_s27 + $0x5a8] sm:$0xff] %v538_v53  ;;  %v542_v55 = vld [vmem:[%s3616_s26 + $0x16c8] sm:$0xff] }
  0x6b   : > { %541 = vst [vmem:[%s3621_s27 + $0x5b0] sm:$0xff] %v540_v54  ;;  %v544_v56 = vld [vmem:[%s3616_s26 + $0x1700] sm:$0xff]  ;;  %v546_v57 = vld [vmem:[%s3616_s26 + $0x1708] sm:$0xff]  ;;  %543 = vst [vmem:[%s3621_s27 + $0x5b8] sm:$0xff] %v542_v55 }
  0x6c   : > { %545 = vst [vmem:[%s3621_s27 + $0x5c0] sm:$0xff] %v544_v56  ;;  %547 = vst [vmem:[%s3621_s27 + $0x5c8] sm:$0xff] %v546_v57  ;;  %v548_v58 = vld [vmem:[%s3616_s26 + $0x1740] sm:$0xff]  ;;  %v550_v59 = vld [vmem:[%s3616_s26 + $0x1748] sm:$0xff] }
  0x6d   : > { %v552_v60 = vld [vmem:[%s3616_s26 + $0x1780] sm:$0xff]  ;;  %549 = vst [vmem:[%s3621_s27 + $0x5d0] sm:$0xff] %v548_v58  ;;  %551 = vst [vmem:[%s3621_s27 + $0x5d8] sm:$0xff] %v550_v59  ;;  %v554_v61 = vld [vmem:[%s3616_s26 + $0x1788] sm:$0xff] }
  0x6e   : > { %553 = vst [vmem:[%s3621_s27 + $0x5e0] sm:$0xff] %v552_v60  ;;  %v556_v62 = vld [vmem:[%s3616_s26 + $0x17c0] sm:$0xff]  ;;  %v558_v63 = vld [vmem:[%s3616_s26 + $0x17c8] sm:$0xff]  ;;  %555 = vst [vmem:[%s3621_s27 + $0x5e8] sm:$0xff] %v554_v61 }
  0x6f   : > { %557 = vst [vmem:[%s3621_s27 + $0x5f0] sm:$0xff] %v556_v62  ;;  %559 = vst [vmem:[%s3621_s27 + $0x5f8] sm:$0xff] %v558_v63  ;;  %v560_v0 = vld [vmem:[%s3616_s26 + $0x1800] sm:$0xff]  ;;  %v562_v1 = vld [vmem:[%s3616_s26 + $0x1808] sm:$0xff] }
  0x70   : > { %v564_v2 = vld [vmem:[%s3616_s26 + $0x1840] sm:$0xff]  ;;  %561 = vst [vmem:[%s3621_s27 + $0x600] sm:$0xff] %v560_v0  ;;  %563 = vst [vmem:[%s3621_s27 + $0x608] sm:$0xff] %v562_v1  ;;  %v566_v3 = vld [vmem:[%s3616_s26 + $0x1848] sm:$0xff] }
  0x71   : > { %565 = vst [vmem:[%s3621_s27 + $0x610] sm:$0xff] %v564_v2  ;;  %v568_v4 = vld [vmem:[%s3616_s26 + $0x1880] sm:$0xff]  ;;  %v570_v5 = vld [vmem:[%s3616_s26 + $0x1888] sm:$0xff]  ;;  %567 = vst [vmem:[%s3621_s27 + $0x618] sm:$0xff] %v566_v3 }
  0x72   : > { %569 = vst [vmem:[%s3621_s27 + $0x620] sm:$0xff] %v568_v4  ;;  %571 = vst [vmem:[%s3621_s27 + $0x628] sm:$0xff] %v570_v5  ;;  %v572_v6 = vld [vmem:[%s3616_s26 + $0x18c0] sm:$0xff]  ;;  %v574_v7 = vld [vmem:[%s3616_s26 + $0x18c8] sm:$0xff] }
  0x73   : > { %v576_v8 = vld [vmem:[%s3616_s26 + $0x1900] sm:$0xff]  ;;  %573 = vst [vmem:[%s3621_s27 + $0x630] sm:$0xff] %v572_v6  ;;  %575 = vst [vmem:[%s3621_s27 + $0x638] sm:$0xff] %v574_v7  ;;  %v578_v9 = vld [vmem:[%s3616_s26 + $0x1908] sm:$0xff] }
  0x74   : > { %577 = vst [vmem:[%s3621_s27 + $0x640] sm:$0xff] %v576_v8  ;;  %v580_v10 = vld [vmem:[%s3616_s26 + $0x1940] sm:$0xff]  ;;  %v582_v11 = vld [vmem:[%s3616_s26 + $0x1948] sm:$0xff]  ;;  %579 = vst [vmem:[%s3621_s27 + $0x648] sm:$0xff] %v578_v9 }
  0x75   : > { %581 = vst [vmem:[%s3621_s27 + $0x650] sm:$0xff] %v580_v10  ;;  %583 = vst [vmem:[%s3621_s27 + $0x658] sm:$0xff] %v582_v11  ;;  %v584_v12 = vld [vmem:[%s3616_s26 + $0x1980] sm:$0xff]  ;;  %v586_v13 = vld [vmem:[%s3616_s26 + $0x1988] sm:$0xff] }
  0x76   : > { %v588_v14 = vld [vmem:[%s3616_s26 + $0x19c0] sm:$0xff]  ;;  %585 = vst [vmem:[%s3621_s27 + $0x660] sm:$0xff] %v584_v12  ;;  %587 = vst [vmem:[%s3621_s27 + $0x668] sm:$0xff] %v586_v13  ;;  %v590_v15 = vld [vmem:[%s3616_s26 + $0x19c8] sm:$0xff] }
  0x77   : > { %589 = vst [vmem:[%s3621_s27 + $0x670] sm:$0xff] %v588_v14  ;;  %v592_v16 = vld [vmem:[%s3616_s26 + $0x1a00] sm:$0xff]  ;;  %v594_v17 = vld [vmem:[%s3616_s26 + $0x1a08] sm:$0xff]  ;;  %591 = vst [vmem:[%s3621_s27 + $0x678] sm:$0xff] %v590_v15 }
  0x78   : > { %593 = vst [vmem:[%s3621_s27 + $0x680] sm:$0xff] %v592_v16  ;;  %595 = vst [vmem:[%s3621_s27 + $0x688] sm:$0xff] %v594_v17  ;;  %v596_v18 = vld [vmem:[%s3616_s26 + $0x1a40] sm:$0xff]  ;;  %v598_v19 = vld [vmem:[%s3616_s26 + $0x1a48] sm:$0xff] }
  0x79   : > { %v600_v20 = vld [vmem:[%s3616_s26 + $0x1a80] sm:$0xff]  ;;  %597 = vst [vmem:[%s3621_s27 + $0x690] sm:$0xff] %v596_v18  ;;  %599 = vst [vmem:[%s3621_s27 + $0x698] sm:$0xff] %v598_v19  ;;  %v602_v21 = vld [vmem:[%s3616_s26 + $0x1a88] sm:$0xff] }
  0x7a   : > { %601 = vst [vmem:[%s3621_s27 + $0x6a0] sm:$0xff] %v600_v20  ;;  %v604_v22 = vld [vmem:[%s3616_s26 + $0x1ac0] sm:$0xff]  ;;  %v606_v23 = vld [vmem:[%s3616_s26 + $0x1ac8] sm:$0xff]  ;;  %603 = vst [vmem:[%s3621_s27 + $0x6a8] sm:$0xff] %v602_v21 }
  0x7b   : > { %605 = vst [vmem:[%s3621_s27 + $0x6b0] sm:$0xff] %v604_v22  ;;  %607 = vst [vmem:[%s3621_s27 + $0x6b8] sm:$0xff] %v606_v23  ;;  %v608_v24 = vld [vmem:[%s3616_s26 + $0x1b00] sm:$0xff]  ;;  %v610_v25 = vld [vmem:[%s3616_s26 + $0x1b08] sm:$0xff] }
  0x7c   : > { %v612_v26 = vld [vmem:[%s3616_s26 + $0x1b40] sm:$0xff]  ;;  %609 = vst [vmem:[%s3621_s27 + $0x6c0] sm:$0xff] %v608_v24  ;;  %611 = vst [vmem:[%s3621_s27 + $0x6c8] sm:$0xff] %v610_v25  ;;  %v614_v27 = vld [vmem:[%s3616_s26 + $0x1b48] sm:$0xff] }
  0x7d   : > { %613 = vst [vmem:[%s3621_s27 + $0x6d0] sm:$0xff] %v612_v26  ;;  %v616_v28 = vld [vmem:[%s3616_s26 + $0x1b80] sm:$0xff]  ;;  %v618_v29 = vld [vmem:[%s3616_s26 + $0x1b88] sm:$0xff]  ;;  %615 = vst [vmem:[%s3621_s27 + $0x6d8] sm:$0xff] %v614_v27 }
  0x7e   : > { %617 = vst [vmem:[%s3621_s27 + $0x6e0] sm:$0xff] %v616_v28  ;;  %619 = vst [vmem:[%s3621_s27 + $0x6e8] sm:$0xff] %v618_v29  ;;  %v620_v30 = vld [vmem:[%s3616_s26 + $0x1bc0] sm:$0xff]  ;;  %v622_v31 = vld [vmem:[%s3616_s26 + $0x1bc8] sm:$0xff] }
  0x7f   : > { %v624_v32 = vld [vmem:[%s3616_s26 + $0x1c00] sm:$0xff]  ;;  %621 = vst [vmem:[%s3621_s27 + $0x6f0] sm:$0xff] %v620_v30  ;;  %623 = vst [vmem:[%s3621_s27 + $0x6f8] sm:$0xff] %v622_v31  ;;  %v626_v33 = vld [vmem:[%s3616_s26 + $0x1c08] sm:$0xff] }
  0x80   : > { %625 = vst [vmem:[%s3621_s27 + $0x700] sm:$0xff] %v624_v32  ;;  %v628_v34 = vld [vmem:[%s3616_s26 + $0x1c40] sm:$0xff]  ;;  %v630_v35 = vld [vmem:[%s3616_s26 + $0x1c48] sm:$0xff]  ;;  %627 = vst [vmem:[%s3621_s27 + $0x708] sm:$0xff] %v626_v33 }
  0x81   : > { %629 = vst [vmem:[%s3621_s27 + $0x710] sm:$0xff] %v628_v34  ;;  %631 = vst [vmem:[%s3621_s27 + $0x718] sm:$0xff] %v630_v35  ;;  %v632_v36 = vld [vmem:[%s3616_s26 + $0x1c80] sm:$0xff]  ;;  %v634_v37 = vld [vmem:[%s3616_s26 + $0x1c88] sm:$0xff] }
  0x82   : > { %v636_v38 = vld [vmem:[%s3616_s26 + $0x1cc0] sm:$0xff]  ;;  %633 = vst [vmem:[%s3621_s27 + $0x720] sm:$0xff] %v632_v36  ;;  %635 = vst [vmem:[%s3621_s27 + $0x728] sm:$0xff] %v634_v37  ;;  %v638_v39 = vld [vmem:[%s3616_s26 + $0x1cc8] sm:$0xff] }
  0x83   : > { %637 = vst [vmem:[%s3621_s27 + $0x730] sm:$0xff] %v636_v38  ;;  %v640_v40 = vld [vmem:[%s3616_s26 + $0x1d00] sm:$0xff]  ;;  %v642_v41 = vld [vmem:[%s3616_s26 + $0x1d08] sm:$0xff]  ;;  %639 = vst [vmem:[%s3621_s27 + $0x738] sm:$0xff] %v638_v39 }
  0x84   : > { %641 = vst [vmem:[%s3621_s27 + $0x740] sm:$0xff] %v640_v40  ;;  %643 = vst [vmem:[%s3621_s27 + $0x748] sm:$0xff] %v642_v41  ;;  %v644_v42 = vld [vmem:[%s3616_s26 + $0x1d40] sm:$0xff]  ;;  %v646_v43 = vld [vmem:[%s3616_s26 + $0x1d48] sm:$0xff] }
  0x85   : > { %v648_v44 = vld [vmem:[%s3616_s26 + $0x1d80] sm:$0xff]  ;;  %645 = vst [vmem:[%s3621_s27 + $0x750] sm:$0xff] %v644_v42  ;;  %647 = vst [vmem:[%s3621_s27 + $0x758] sm:$0xff] %v646_v43  ;;  %v650_v45 = vld [vmem:[%s3616_s26 + $0x1d88] sm:$0xff] }
  0x86   : > { %649 = vst [vmem:[%s3621_s27 + $0x760] sm:$0xff] %v648_v44  ;;  %v652_v46 = vld [vmem:[%s3616_s26 + $0x1dc0] sm:$0xff]  ;;  %v654_v47 = vld [vmem:[%s3616_s26 + $0x1dc8] sm:$0xff]  ;;  %651 = vst [vmem:[%s3621_s27 + $0x768] sm:$0xff] %v650_v45 }
  0x87   : > { %653 = vst [vmem:[%s3621_s27 + $0x770] sm:$0xff] %v652_v46  ;;  %655 = vst [vmem:[%s3621_s27 + $0x778] sm:$0xff] %v654_v47  ;;  %v656_v48 = vld [vmem:[%s3616_s26 + $0x1e00] sm:$0xff]  ;;  %v658_v49 = vld [vmem:[%s3616_s26 + $0x1e08] sm:$0xff] }
  0x88   : > { %v660_v50 = vld [vmem:[%s3616_s26 + $0x1e40] sm:$0xff]  ;;  %657 = vst [vmem:[%s3621_s27 + $0x780] sm:$0xff] %v656_v48  ;;  %659 = vst [vmem:[%s3621_s27 + $0x788] sm:$0xff] %v658_v49  ;;  %v662_v51 = vld [vmem:[%s3616_s26 + $0x1e48] sm:$0xff] }
  0x89   : > { %661 = vst [vmem:[%s3621_s27 + $0x790] sm:$0xff] %v660_v50  ;;  %v664_v52 = vld [vmem:[%s3616_s26 + $0x1e80] sm:$0xff]  ;;  %v666_v53 = vld [vmem:[%s3616_s26 + $0x1e88] sm:$0xff]  ;;  %663 = vst [vmem:[%s3621_s27 + $0x798] sm:$0xff] %v662_v51 }
  0x8a   : > { %665 = vst [vmem:[%s3621_s27 + $0x7a0] sm:$0xff] %v664_v52  ;;  %667 = vst [vmem:[%s3621_s27 + $0x7a8] sm:$0xff] %v666_v53  ;;  %v668_v54 = vld [vmem:[%s3616_s26 + $0x1ec0] sm:$0xff]  ;;  %v670_v55 = vld [vmem:[%s3616_s26 + $0x1ec8] sm:$0xff] }
  0x8b   : > { %v672_v56 = vld [vmem:[%s3616_s26 + $0x1f00] sm:$0xff]  ;;  %669 = vst [vmem:[%s3621_s27 + $0x7b0] sm:$0xff] %v668_v54  ;;  %671 = vst [vmem:[%s3621_s27 + $0x7b8] sm:$0xff] %v670_v55  ;;  %v674_v57 = vld [vmem:[%s3616_s26 + $0x1f08] sm:$0xff] }
  0x8c   : > { %673 = vst [vmem:[%s3621_s27 + $0x7c0] sm:$0xff] %v672_v56  ;;  %v676_v58 = vld [vmem:[%s3616_s26 + $0x1f40] sm:$0xff]  ;;  %v678_v59 = vld [vmem:[%s3616_s26 + $0x1f48] sm:$0xff]  ;;  %675 = vst [vmem:[%s3621_s27 + $0x7c8] sm:$0xff] %v674_v57 }
  0x8d   : > { %677 = vst [vmem:[%s3621_s27 + $0x7d0] sm:$0xff] %v676_v58  ;;  %679 = vst [vmem:[%s3621_s27 + $0x7d8] sm:$0xff] %v678_v59  ;;  %v680_v60 = vld [vmem:[%s3616_s26 + $0x1f80] sm:$0xff]  ;;  %v682_v61 = vld [vmem:[%s3616_s26 + $0x1f88] sm:$0xff] }
  0x8e   : > { %v684_v62 = vld [vmem:[%s3616_s26 + $0x1fc0] sm:$0xff]  ;;  %681 = vst [vmem:[%s3621_s27 + $0x7e0] sm:$0xff] %v680_v60  ;;  %683 = vst [vmem:[%s3621_s27 + $0x7e8] sm:$0xff] %v682_v61  ;;  %v686_v63 = vld [vmem:[%s3616_s26 + $0x1fc8] sm:$0xff] }
  0x8f   : > { %685 = vst [vmem:[%s3621_s27 + $0x7f0] sm:$0xff] %v684_v62  ;;  %687 = vst [vmem:[%s3621_s27 + $0x7f8] sm:$0xff] %v686_v63 }
  0x90 PF: > { %p2809_p6 = scmp.ge.s32.totalorder %s3551_s16, 1  ;;  %p700_p7 = scmp.lt.s32.totalorder %s3551_s16, 5 }
  0x92   : > { %p701_p8 = pnand %p2809_p6, %p700_p7 }
  0x93   : > { %s707_s28 = sand.u32 (!%p701_p8), 1, %s3535_s12   ;;  %s2811_s12 = sshll.u32 (!%p701_p8), %s3543_s14, 2 }
  0x94   : > { %704 = sbr.rel (%p701_p8) target bundleno = 614 (0x266), region = 51  ;;  %s2810_s6 = sshll.u32 (!%p701_p8), %s707_s28, 11 }
  0x95   : > { %s4153_s7 = scalar_lea.vmem (!%p701_p8), [#allocation2], %s2810_s6  ;;  %p750_p9 = scmp.lt.s32.totalorder (!%p701_p8), %s2811_s12, 15 }
  0x99   : > { %v4138_v0 = vld [vmem:[%s4489_s0] sm:$0xff]  ;;  %v4143_v1 = vld [vmem:[%s4489_s0 + $0x8] sm:$0xff]  ;;  %s4500_s12 = smov (!%p750_p9, %s2811_s12), 15 }
  0x9a   : > { %v4147_v2 = vcombine.high %v4138_v0, %v4138_v0  ;;  %v4151_v3 = vcombine.high %v4143_v1, %v4143_v1  ;;  %v3121_v4 = vld [vmem:[%s4153_s7 + $0xe4] ss:$16 sps:$4 sm:$0xff]   ;;  %v3125_v6 = vld [vmem:[%s4153_s7 + $0xe0] ss:$16 sps:$4 sm:$0xff]   ;;  %s752_s21 = scalar_lea.vmem %s4491_s2, %s4500_s12  ;;  %s2813_s14 = sshll.u32 %s4500_s12, 3 }
  0x9b   : > { %v3123_v5 = vld [vmem:[%s4153_s7 + $0x2e4] ss:$16 sps:$4 sm:$0xff]   ;;  %2354 = vmatprep.subr.bf16.mxu0 %v3121_v4  ;;  %v3126_v7 = vld [vmem:[%s4153_s7 + $0x2e0] ss:$16 sps:$4 sm:$0xff]   ;;  %s4468_s24 = scalar_lea.vmem %s4492_s3, %s2813_s14 }
  0x9c   : > { %2386 = vmatprep.mubr.bf16.mxu0 %v4147_v2  ;;  %2427 = vmatprep.mubr.bf16.mxu1 %v4151_v3  ;;  %v3127_v8 = vld [vmem:[%s4153_s7 + $0xc4] ss:$16 sps:$4 sm:$0xff]   ;;  %v3131_v10 = vld [vmem:[%s4153_s7 + $0xc0] ss:$16 sps:$4 sm:$0xff]  }
  0x9d   : > { %2395 = vmatprep.subr.bf16.mxu1 %v3123_v5  ;;  %2355 = vmatpush1.bf16.msra.mxu0 %v3125_v6  ;;  %v3129_v9 = vld [vmem:[%s4153_s7 + $0x2c4] ss:$16 sps:$4 sm:$0xff]   ;;  %v3132_v11 = vld [vmem:[%s4153_s7 + $0x2c0] ss:$16 sps:$4 sm:$0xff]  }
  0x9e   : > { %2396 = vmatpush1.bf16.msra.mxu1 %v3126_v7  ;;  %2356 = vmatprep.subr.bf16.mxu0 %v3127_v8  ;;  %v3133_v12 = vld [vmem:[%s4153_s7 + $0xa4] ss:$16 sps:$4 sm:$0xff]   ;;  %v3137_v14 = vld [vmem:[%s4153_s7 + $0xa0] ss:$16 sps:$4 sm:$0xff]  }
  0x9f   : > { %2397 = vmatprep.subr.bf16.mxu1 %v3129_v9  ;;  %v3135_v13 = vld [vmem:[%s4153_s7 + $0x2a4] ss:$16 sps:$4 sm:$0xff]   ;;  %v3138_v15 = vld [vmem:[%s4153_s7 + $0x2a0] ss:$16 sps:$4 sm:$0xff]  }
  0xa0   : > { %v3139_v16 = vld [vmem:[%s4153_s7 + $0x84] ss:$16 sps:$4 sm:$0xff]   ;;  %v3143_v18 = vld [vmem:[%s4153_s7 + $0x80] ss:$16 sps:$4 sm:$0xff]  }
  0xa1   : > { %2357 = vmatpush1.bf16.msra.mxu0 %v3131_v10  ;;  %v3141_v17 = vld [vmem:[%s4153_s7 + $0x284] ss:$16 sps:$4 sm:$0xff]   ;;  %v3144_v19 = vld [vmem:[%s4153_s7 + $0x280] ss:$16 sps:$4 sm:$0xff]  }
  0xa2   : > { %2398 = vmatpush1.bf16.msra.mxu1 %v3132_v11  ;;  %2358 = vmatprep.subr.bf16.mxu0 %v3133_v12  ;;  %v3145_v20 = vld [vmem:[%s4153_s7 + $0x64] ss:$16 sps:$4 sm:$0xff]   ;;  %v3149_v22 = vld [vmem:[%s4153_s7 + $0x60] ss:$16 sps:$4 sm:$0xff]   ;;  %v4231_v11 = vld [vmem:[%s4489_s0 + $0x18] sm:$0xff]  ;;  %v4235_v12 = vcombine.low %v4138_v0, %v4138_v0 }
  0xa3   : > { %2399 = vmatprep.subr.bf16.mxu1 %v3135_v13  ;;  %v3147_v21 = vld [vmem:[%s4153_s7 + $0x264] ss:$16 sps:$4 sm:$0xff]   ;;  %v3150_v23 = vld [vmem:[%s4153_s7 + $0x260] ss:$16 sps:$4 sm:$0xff]   ;;  %v4239_v13 = vcombine.low %v4143_v1, %v4143_v1  ;;  %v4251_v1 = vcombine.high %v4231_v11, %v4231_v11 }
  0xa4   : > { %v3151_v24 = vld [vmem:[%s4153_s7 + $0x44] ss:$16 sps:$4 sm:$0xff]   ;;  %v3155_v26 = vld [vmem:[%s4153_s7 + $0x40] ss:$16 sps:$4 sm:$0xff]  }
  0xa5   : > { %2359 = vmatpush1.bf16.msra.mxu0 %v3137_v14  ;;  %v3153_v25 = vld [vmem:[%s4153_s7 + $0x244] ss:$16 sps:$4 sm:$0xff]   ;;  %v3156_v27 = vld [vmem:[%s4153_s7 + $0x240] ss:$16 sps:$4 sm:$0xff]  }
  0xa6   : > { %2400 = vmatpush1.bf16.msra.mxu1 %v3138_v15  ;;  %2360 = vmatprep.subr.bf16.mxu0 %v3139_v16  ;;  %v3157_v28 = vld [vmem:[%s4153_s7 + $0x24] ss:$16 sps:$4 sm:$0xff]   ;;  %v3161_v30 = vld [vmem:[%s4153_s7 + $0x20] ss:$16 sps:$4 sm:$0xff]  }
  0xa7   : > { %2401 = vmatprep.subr.bf16.mxu1 %v3141_v17  ;;  %v3159_v29 = vld [vmem:[%s4153_s7 + $0x224] ss:$16 sps:$4 sm:$0xff]   ;;  %v3162_v31 = vld [vmem:[%s4153_s7 + $0x220] ss:$16 sps:$4 sm:$0xff]  }
  0xa8   : > { %v3163_v32 = vld [vmem:[%s4153_s7 + $0x4] ss:$16 sps:$4 sm:$0xff]   ;;  %v3167_v34 = vld [vmem:[%s4153_s7] ss:$16 sps:$4 sm:$0xff]  }
  0xa9   : > { %2361 = vmatpush1.bf16.msra.mxu0 %v3143_v18  ;;  %v3165_v33 = vld [vmem:[%s4153_s7 + $0x204] ss:$16 sps:$4 sm:$0xff]   ;;  %v3168_v35 = vld [vmem:[%s4153_s7 + $0x200] ss:$16 sps:$4 sm:$0xff]  }
  0xaa   : > { %2402 = vmatpush1.bf16.msra.mxu1 %v3144_v19  ;;  %2362 = vmatprep.subr.bf16.mxu0 %v3145_v20  ;;  %v3169_v36 = vld [vmem:[%s4153_s7 + $0x1e4] ss:$16 sps:$4 sm:$0xff]   ;;  %v3173_v38 = vld [vmem:[%s4153_s7 + $0x1e0] ss:$16 sps:$4 sm:$0xff]  }
  0xab   : > { %2403 = vmatprep.subr.bf16.mxu1 %v3147_v21  ;;  %v3171_v37 = vld [vmem:[%s4153_s7 + $0x3e4] ss:$16 sps:$4 sm:$0xff]   ;;  %v3174_v39 = vld [vmem:[%s4153_s7 + $0x3e0] ss:$16 sps:$4 sm:$0xff]  }
  0xac   : > { %v3175_v40 = vld [vmem:[%s4153_s7 + $0x1c4] ss:$16 sps:$4 sm:$0xff]   ;;  %v3179_v42 = vld [vmem:[%s4153_s7 + $0x1c0] ss:$16 sps:$4 sm:$0xff]  }
  0xad   : > { %2363 = vmatpush1.bf16.msra.mxu0 %v3149_v22  ;;  %v3177_v41 = vld [vmem:[%s4153_s7 + $0x3c4] ss:$16 sps:$4 sm:$0xff]   ;;  %v3180_v43 = vld [vmem:[%s4153_s7 + $0x3c0] ss:$16 sps:$4 sm:$0xff]  }
  0xae   : > { %2404 = vmatpush1.bf16.msra.mxu1 %v3150_v23  ;;  %2364 = vmatprep.subr.bf16.mxu0 %v3151_v24  ;;  %v3181_v44 = vld [vmem:[%s4153_s7 + $0x1a4] ss:$16 sps:$4 sm:$0xff]   ;;  %v3185_v46 = vld [vmem:[%s4153_s7 + $0x1a0] ss:$16 sps:$4 sm:$0xff]  }
  0xaf   : > { %2405 = vmatprep.subr.bf16.mxu1 %v3153_v25  ;;  %v3183_v45 = vld [vmem:[%s4153_s7 + $0x3a4] ss:$16 sps:$4 sm:$0xff]   ;;  %v3186_v47 = vld [vmem:[%s4153_s7 + $0x3a0] ss:$16 sps:$4 sm:$0xff]  }
  0xb0   : > { %v3187_v48 = vld [vmem:[%s4153_s7 + $0x184] ss:$16 sps:$4 sm:$0xff]   ;;  %v3191_v50 = vld [vmem:[%s4153_s7 + $0x180] ss:$16 sps:$4 sm:$0xff]  }
  0xb1   : > { %2365 = vmatpush1.bf16.msra.mxu0 %v3155_v26  ;;  %v3189_v49 = vld [vmem:[%s4153_s7 + $0x384] ss:$16 sps:$4 sm:$0xff]   ;;  %v3192_v51 = vld [vmem:[%s4153_s7 + $0x380] ss:$16 sps:$4 sm:$0xff]  }
  0xb2   : > { %2406 = vmatpush1.bf16.msra.mxu1 %v3156_v27  ;;  %2366 = vmatprep.subr.bf16.mxu0 %v3157_v28  ;;  %v3193_v52 = vld [vmem:[%s4153_s7 + $0x164] ss:$16 sps:$4 sm:$0xff]   ;;  %v3197_v54 = vld [vmem:[%s4153_s7 + $0x160] ss:$16 sps:$4 sm:$0xff]  }
  0xb3   : > { %2407 = vmatprep.subr.bf16.mxu1 %v3159_v29  ;;  %v3195_v53 = vld [vmem:[%s4153_s7 + $0x364] ss:$16 sps:$4 sm:$0xff]   ;;  %v3198_v55 = vld [vmem:[%s4153_s7 + $0x360] ss:$16 sps:$4 sm:$0xff]  }
  0xb4   : > { %v3199_v56 = vld [vmem:[%s4153_s7 + $0x144] ss:$16 sps:$4 sm:$0xff]   ;;  %v3203_v58 = vld [vmem:[%s4153_s7 + $0x140] ss:$16 sps:$4 sm:$0xff]  }
  0xb5   : > { %2367 = vmatpush1.bf16.msra.mxu0 %v3161_v30  ;;  %v3201_v57 = vld [vmem:[%s4153_s7 + $0x344] ss:$16 sps:$4 sm:$0xff]   ;;  %v3204_v59 = vld [vmem:[%s4153_s7 + $0x340] ss:$16 sps:$4 sm:$0xff]  }
  0xb6   : > { %2408 = vmatpush1.bf16.msra.mxu1 %v3162_v31  ;;  %2368 = vmatprep.subr.bf16.mxu0 %v3163_v32  ;;  %v3205_v60 = vld [vmem:[%s4153_s7 + $0x124] ss:$16 sps:$4 sm:$0xff]   ;;  %v3209_v62 = vld [vmem:[%s4153_s7 + $0x120] ss:$16 sps:$4 sm:$0xff]  }
  0xb7   : > { %2409 = vmatprep.subr.bf16.mxu1 %v3165_v33  ;;  %v3207_v61 = vld [vmem:[%s4153_s7 + $0x324] ss:$16 sps:$4 sm:$0xff]   ;;  %v3210_v63 = vld [vmem:[%s4153_s7 + $0x320] ss:$16 sps:$4 sm:$0xff]  }
  0xb8   : > { %v3211_v4 = vld [vmem:[%s4153_s7 + $0x104] ss:$16 sps:$4 sm:$0xff]   ;;  %v3215_v6 = vld [vmem:[%s4153_s7 + $0x100] ss:$16 sps:$4 sm:$0xff]  }
  0xb9   : > { %2369 = vmatpush1.bf16.msra.mxu0 %v3167_v34  ;;  %v3213_v5 = vld [vmem:[%s4153_s7 + $0x304] ss:$16 sps:$4 sm:$0xff]   ;;  %v3216_v7 = vld [vmem:[%s4153_s7 + $0x300] ss:$16 sps:$4 sm:$0xff]  }
  0xba   : > { %2410 = vmatpush1.bf16.msra.mxu1 %v3168_v35  ;;  %2370 = vmatprep.subr.bf16.mxu0 %v3169_v36  ;;  %v3223_v8 = vld [vmem:[%s4153_s7 + $0x4e4] ss:$16 sps:$4 sm:$0xff]   ;;  %v3221_v14 = vld [vmem:[%s4153_s7 + $0x4e0] ss:$16 sps:$4 sm:$0xff]  }
  0xbb   : > { %2411 = vmatprep.subr.bf16.mxu1 %v3171_v37  ;;  %v3226_v9 = vld [vmem:[%s4153_s7 + $0x6e4] ss:$16 sps:$4 sm:$0xff]   ;;  %v3224_v15 = vld [vmem:[%s4153_s7 + $0x6e0] ss:$16 sps:$4 sm:$0xff]  }
  0xbc   : > { %v4226_v10 = vld [vmem:[%s4489_s0 + $0x10] sm:$0xff] }
  0xbd   : > { %2371 = vmatpush2.bf16.msra.mxu0 %v3173_v38  ;;  %v3229_v16 = vld [vmem:[%s4153_s7 + $0x4c4] ss:$16 sps:$4 sm:$0xff]   ;;  %v4247_v0 = vcombine.high %v4226_v10, %v4226_v10  ;;  %v3227_v18 = vld [vmem:[%s4153_s7 + $0x4c0] ss:$16 sps:$4 sm:$0xff]  }
  0xbe   : > { %2412 = vmatpush2.bf16.msra.mxu1 %v3174_v39  ;;  %2372 = vmatprep.subr.bf16.mxu0 %v3175_v40  ;;  %v3232_v17 = vld [vmem:[%s4153_s7 + $0x6c4] ss:$16 sps:$4 sm:$0xff]   ;;  %v3230_v19 = vld [vmem:[%s4153_s7 + $0x6c0] ss:$16 sps:$4 sm:$0xff]  }
  0xbf   : > { %2413 = vmatprep.subr.bf16.mxu1 %v3177_v41  ;;  %v3235_v20 = vld [vmem:[%s4153_s7 + $0x4a4] ss:$16 sps:$4 sm:$0xff]   ;;  %v3233_v22 = vld [vmem:[%s4153_s7 + $0x4a0] ss:$16 sps:$4 sm:$0xff]  }
  0xc0   : > { %v3238_v21 = vld [vmem:[%s4153_s7 + $0x6a4] ss:$16 sps:$4 sm:$0xff]   ;;  %v3236_v23 = vld [vmem:[%s4153_s7 + $0x6a0] ss:$16 sps:$4 sm:$0xff]  }
  0xc1   : > { %2373 = vmatpush2.bf16.msra.mxu0 %v3179_v42  ;;  %v3241_v24 = vld [vmem:[%s4153_s7 + $0x484] ss:$16 sps:$4 sm:$0xff]   ;;  %v3239_v26 = vld [vmem:[%s4153_s7 + $0x480] ss:$16 sps:$4 sm:$0xff]  }
  0xc2   : > { %2414 = vmatpush2.bf16.msra.mxu1 %v3180_v43  ;;  %2374 = vmatprep.subr.bf16.mxu0 %v3181_v44  ;;  %v3244_v25 = vld [vmem:[%s4153_s7 + $0x684] ss:$16 sps:$4 sm:$0xff]   ;;  %v3242_v27 = vld [vmem:[%s4153_s7 + $0x680] ss:$16 sps:$4 sm:$0xff]  }
  0xc3   : > { %2415 = vmatprep.subr.bf16.mxu1 %v3183_v45  ;;  %v3247_v28 = vld [vmem:[%s4153_s7 + $0x464] ss:$16 sps:$4 sm:$0xff]   ;;  %v3245_v30 = vld [vmem:[%s4153_s7 + $0x460] ss:$16 sps:$4 sm:$0xff]  }
  0xc4   : > { %v3250_v29 = vld [vmem:[%s4153_s7 + $0x664] ss:$16 sps:$4 sm:$0xff]   ;;  %v3248_v31 = vld [vmem:[%s4153_s7 + $0x660] ss:$16 sps:$4 sm:$0xff]  }
  0xc5   : > { %2375 = vmatpush2.bf16.msra.mxu0 %v3185_v46  ;;  %v3253_v32 = vld [vmem:[%s4153_s7 + $0x444] ss:$16 sps:$4 sm:$0xff]   ;;  %v3251_v34 = vld [vmem:[%s4153_s7 + $0x440] ss:$16 sps:$4 sm:$0xff]  }
  0xc6   : > { %2416 = vmatpush2.bf16.msra.mxu1 %v3186_v47  ;;  %2376 = vmatprep.subr.bf16.mxu0 %v3187_v48  ;;  %v3256_v33 = vld [vmem:[%s4153_s7 + $0x644] ss:$16 sps:$4 sm:$0xff]   ;;  %v3254_v35 = vld [vmem:[%s4153_s7 + $0x640] ss:$16 sps:$4 sm:$0xff]  }
  0xc7   : > { %2417 = vmatprep.subr.bf16.mxu1 %v3189_v49  ;;  %v3259_v36 = vld [vmem:[%s4153_s7 + $0x424] ss:$16 sps:$4 sm:$0xff]   ;;  %v3257_v38 = vld [vmem:[%s4153_s7 + $0x420] ss:$16 sps:$4 sm:$0xff]  }
  0xc8   : > { %v3262_v37 = vld [vmem:[%s4153_s7 + $0x624] ss:$16 sps:$4 sm:$0xff]   ;;  %v3260_v39 = vld [vmem:[%s4153_s7 + $0x620] ss:$16 sps:$4 sm:$0xff]  }
  0xc9   : > { %2377 = vmatpush2.bf16.msra.mxu0 %v3191_v50  ;;  %v3265_v40 = vld [vmem:[%s4153_s7 + $0x404] ss:$16 sps:$4 sm:$0xff]   ;;  %v3263_v42 = vld [vmem:[%s4153_s7 + $0x400] ss:$16 sps:$4 sm:$0xff]  }
  0xca   : > { %2418 = vmatpush2.bf16.msra.mxu1 %v3192_v51  ;;  %2378 = vmatprep.subr.bf16.mxu0 %v3193_v52  ;;  %v3268_v41 = vld [vmem:[%s4153_s7 + $0x604] ss:$16 sps:$4 sm:$0xff]   ;;  %v3266_v43 = vld [vmem:[%s4153_s7 + $0x600] ss:$16 sps:$4 sm:$0xff]  }
  0xcb   : > { %2419 = vmatprep.subr.bf16.mxu1 %v3195_v53  ;;  %v3271_v44 = vld [vmem:[%s4153_s7 + $0x5e4] ss:$16 sps:$4 sm:$0xff]   ;;  %v3269_v46 = vld [vmem:[%s4153_s7 + $0x5e0] ss:$16 sps:$4 sm:$0xff]  }
  0xcc   : > { %v3274_v45 = vld [vmem:[%s4153_s7 + $0x7e4] ss:$16 sps:$4 sm:$0xff]   ;;  %v3272_v47 = vld [vmem:[%s4153_s7 + $0x7e0] ss:$16 sps:$4 sm:$0xff]  }
  0xcd   : > { %2379 = vmatpush2.bf16.msra.mxu0 %v3197_v54  ;;  %v3277_v48 = vld [vmem:[%s4153_s7 + $0x5c4] ss:$16 sps:$4 sm:$0xff]   ;;  %v3275_v50 = vld [vmem:[%s4153_s7 + $0x5c0] ss:$16 sps:$4 sm:$0xff]  }
  0xce   : > { %2420 = vmatpush2.bf16.msra.mxu1 %v3198_v55  ;;  %2380 = vmatprep.subr.bf16.mxu0 %v3199_v56  ;;  %v3280_v49 = vld [vmem:[%s4153_s7 + $0x7c4] ss:$16 sps:$4 sm:$0xff]   ;;  %v3278_v51 = vld [vmem:[%s4153_s7 + $0x7c0] ss:$16 sps:$4 sm:$0xff]  }
  0xcf   : > { %2421 = vmatprep.subr.bf16.mxu1 %v3201_v57  ;;  %v3283_v52 = vld [vmem:[%s4153_s7 + $0x5a4] ss:$16 sps:$4 sm:$0xff]   ;;  %v3281_v54 = vld [vmem:[%s4153_s7 + $0x5a0] ss:$16 sps:$4 sm:$0xff]  }
  0xd0   : > { %v3286_v53 = vld [vmem:[%s4153_s7 + $0x7a4] ss:$16 sps:$4 sm:$0xff]   ;;  %v3284_v55 = vld [vmem:[%s4153_s7 + $0x7a0] ss:$16 sps:$4 sm:$0xff]  }
  0xd1   : > { %2381 = vmatpush2.bf16.msra.mxu0 %v3203_v58  ;;  %v3289_v56 = vld [vmem:[%s4153_s7 + $0x584] ss:$16 sps:$4 sm:$0xff]   ;;  %v3287_v58 = vld [vmem:[%s4153_s7 + $0x580] ss:$16 sps:$4 sm:$0xff]  }
  0xd2   : > { %2422 = vmatpush2.bf16.msra.mxu1 %v3204_v59  ;;  %2382 = vmatprep.subr.bf16.mxu0 %v3205_v60  ;;  %v3292_v57 = vld [vmem:[%s4153_s7 + $0x784] ss:$16 sps:$4 sm:$0xff]   ;;  %v3290_v59 = vld [vmem:[%s4153_s7 + $0x780] ss:$16 sps:$4 sm:$0xff]  }
  0xd3   : > { %2423 = vmatprep.subr.bf16.mxu1 %v3207_v61  ;;  %v3295_v60 = vld [vmem:[%s4153_s7 + $0x564] ss:$16 sps:$4 sm:$0xff]  }
  0xd4   : > { %v3298_v61 = vld [vmem:[%s4153_s7 + $0x764] ss:$16 sps:$4 sm:$0xff]  }
  0xd5   : > { %2383 = vmatpush2.bf16.msra.mxu0 %v3209_v62  ;;  %v3293_v62 = vld [vmem:[%s4153_s7 + $0x560] ss:$16 sps:$4 sm:$0xff]  }
  0xd6   : > { %2424 = vmatpush2.bf16.msra.mxu1 %v3210_v63  ;;  %2384 = vmatprep.subr.bf16.mxu0 %v3211_v4  ;;  %v3296_v63 = vld [vmem:[%s4153_s7 + $0x760] ss:$16 sps:$4 sm:$0xff]   ;;  %v3301_v4 = vld [vmem:[%s4153_s7 + $0x544] ss:$16 sps:$4 sm:$0xff]  }
  0xd7   : > { %2425 = vmatprep.subr.bf16.mxu1 %v3213_v5  ;;  %v3304_v5 = vld [vmem:[%s4153_s7 + $0x744] ss:$16 sps:$4 sm:$0xff]  }
  0xd9   : > { %2385 = vmatpush2.bf16.msra.mxu0 %v3215_v6  ;;  %v3299_v6 = vld [vmem:[%s4153_s7 + $0x540] ss:$16 sps:$4 sm:$0xff]  }
  0xda   : > { %2426 = vmatpush2.bf16.msra.mxu1 %v3216_v7  ;;  %2436 = vmatprep.subr.bf16.mxu0 %v3223_v8  ;;  %v3302_v7 = vld [vmem:[%s4153_s7 + $0x740] ss:$16 sps:$4 sm:$0xff]   ;;  %v3307_v8 = vld [vmem:[%s4153_s7 + $0x524] ss:$16 sps:$4 sm:$0xff]  }
  0xdb   : > { %2477 = vmatprep.subr.bf16.mxu1 %v3226_v9  ;;  %v3310_v9 = vld [vmem:[%s4153_s7 + $0x724] ss:$16 sps:$4 sm:$0xff]  }
  0xdc   : > { %2387 = vmatmul.mubr.bf16.vlgmr.msra.gmra.mxu0 %v4235_v12 }
  0xdd   : > { %2428 = vmatmul.mubr.bf16.vlgmr.msra.gmra.mxu1 %v4239_v13  ;;  %2437 = vmatpush1.bf16.msra.mxu0 %v3221_v14  ;;  %v3305_v14 = vld [vmem:[%s4153_s7 + $0x520] ss:$16 sps:$4 sm:$0xff]  }
  0xde   : > { %2478 = vmatpush1.bf16.msra.mxu1 %v3224_v15  ;;  %2438 = vmatprep.subr.bf16.mxu0 %v3229_v16  ;;  %v3308_v15 = vld [vmem:[%s4153_s7 + $0x720] ss:$16 sps:$4 sm:$0xff]   ;;  %v3313_v16 = vld [vmem:[%s4153_s7 + $0x504] ss:$16 sps:$4 sm:$0xff]  }
  0xdf   : > { %2479 = vmatprep.subr.bf16.mxu1 %v3232_v17  ;;  %2468 = vmatprep.mubr.bf16.mxu0 %v4247_v0  ;;  %v3316_v17 = vld [vmem:[%s4153_s7 + $0x704] ss:$16 sps:$4 sm:$0xff]  }
  0xe0   : > { %2509 = vmatprep.mubr.bf16.mxu1 %v4251_v1 }
  0xe1   : > { %2439 = vmatpush1.bf16.msra.mxu0 %v3227_v18  ;;  %v3311_v18 = vld [vmem:[%s4153_s7 + $0x500] ss:$16 sps:$4 sm:$0xff]  }
  0xe2   : > { %2480 = vmatpush1.bf16.msra.mxu1 %v3230_v19  ;;  %2440 = vmatprep.subr.bf16.mxu0 %v3235_v20  ;;  %v3314_v19 = vld [vmem:[%s4153_s7 + $0x700] ss:$16 sps:$4 sm:$0xff]   ;;  %v3323_v20 = vld [vmem:[%s4153_s7 + $0xec] ss:$16 sps:$4 sm:$0xff]  }
  0xe3   : > { %2481 = vmatprep.subr.bf16.mxu1 %v3238_v21  ;;  %v3326_v21 = vld [vmem:[%s4153_s7 + $0x2ec] ss:$16 sps:$4 sm:$0xff]  }
  0xe5   : > { %2441 = vmatpush1.bf16.msra.mxu0 %v3233_v22  ;;  %v4319_v22 = vcombine.low %v4226_v10, %v4226_v10  ;;  %v3327_v10 = vld [vmem:[%s4153_s7 + $0xc8] ss:$16 sps:$4 sm:$0xff]  }
  0xe6   : > { %2482 = vmatpush1.bf16.msra.mxu1 %v3236_v23  ;;  %2442 = vmatprep.subr.bf16.mxu0 %v3241_v24  ;;  %v4323_v23 = vcombine.low %v4231_v11, %v4231_v11  ;;  %v3321_v24 = vld [vmem:[%s4153_s7 + $0xe8] ss:$16 sps:$4 sm:$0xff]   ;;  %v3335_v11 = vld [vmem:[%s4153_s7 + $0xac] ss:$16 sps:$4 sm:$0xff]  }
  0xe7   : > { %2483 = vmatprep.subr.bf16.mxu1 %v3244_v25  ;;  %v3324_v25 = vld [vmem:[%s4153_s7 + $0x2e8] ss:$16 sps:$4 sm:$0xff]  }
  0xe9   : > { %2443 = vmatpush1.bf16.msra.mxu0 %v3239_v26  ;;  %v3329_v26 = vld [vmem:[%s4153_s7 + $0xcc] ss:$16 sps:$4 sm:$0xff]  }
  0xea   : > { %2484 = vmatpush1.bf16.msra.mxu1 %v3242_v27  ;;  %2444 = vmatprep.subr.bf16.mxu0 %v3247_v28  ;;  %v3332_v27 = vld [vmem:[%s4153_s7 + $0x2cc] ss:$16 sps:$4 sm:$0xff]   ;;  %v3330_v28 = vld [vmem:[%s4153_s7 + $0x2c8] ss:$16 sps:$4 sm:$0xff]  }
  0xeb   : > { %2485 = vmatprep.subr.bf16.mxu1 %v3250_v29  ;;  %v3338_v29 = vld [vmem:[%s4153_s7 + $0x2ac] ss:$16 sps:$4 sm:$0xff]  }
  0xed   : > { %2445 = vmatpush1.bf16.msra.mxu0 %v3245_v30  ;;  %v3333_v30 = vld [vmem:[%s4153_s7 + $0xa8] ss:$16 sps:$4 sm:$0xff]  }
  0xee   : > { %2486 = vmatpush1.bf16.msra.mxu1 %v3248_v31  ;;  %2446 = vmatprep.subr.bf16.mxu0 %v3253_v32  ;;  %v3336_v31 = vld [vmem:[%s4153_s7 + $0x2a8] ss:$16 sps:$4 sm:$0xff]   ;;  %v3341_v32 = vld [vmem:[%s4153_s7 + $0x8c] ss:$16 sps:$4 sm:$0xff]  }
  0xef   : > { %2487 = vmatprep.subr.bf16.mxu1 %v3256_v33  ;;  %v3344_v33 = vld [vmem:[%s4153_s7 + $0x28c] ss:$16 sps:$4 sm:$0xff]  }
  0xf1   : > { %2447 = vmatpush1.bf16.msra.mxu0 %v3251_v34  ;;  %v3339_v34 = vld [vmem:[%s4153_s7 + $0x88] ss:$16 sps:$4 sm:$0xff]  }
  0xf2   : > { %2488 = vmatpush1.bf16.msra.mxu1 %v3254_v35  ;;  %2448 = vmatprep.subr.bf16.mxu0 %v3259_v36  ;;  %v3342_v35 = vld [vmem:[%s4153_s7 + $0x288] ss:$16 sps:$4 sm:$0xff]  }
  0xf3   : > { %2489 = vmatprep.subr.bf16.mxu1 %v3262_v37  ;;  %v3345_v36 = vld [vmem:[%s4153_s7 + $0x68] ss:$16 sps:$4 sm:$0xff]  }
  0xf4   : > { %v3348_v37 = vld [vmem:[%s4153_s7 + $0x268] ss:$16 sps:$4 sm:$0xff]  }
  0xf5   : > { %2449 = vmatpush1.bf16.msra.mxu0 %v3257_v38  ;;  %v3353_v38 = vld [vmem:[%s4153_s7 + $0x4c] ss:$16 sps:$4 sm:$0xff]  }
  0xf6   : > { %2490 = vmatpush1.bf16.msra.mxu1 %v3260_v39  ;;  %2450 = vmatprep.subr.bf16.mxu0 %v3265_v40  ;;  %v3356_v39 = vld [vmem:[%s4153_s7 + $0x24c] ss:$16 sps:$4 sm:$0xff]   ;;  %v3351_v40 = vld [vmem:[%s4153_s7 + $0x48] ss:$16 sps:$4 sm:$0xff]  }
  0xf7   : > { %2491 = vmatprep.subr.bf16.mxu1 %v3268_v41  ;;  %v3354_v41 = vld [vmem:[%s4153_s7 + $0x248] ss:$16 sps:$4 sm:$0xff]  }
  0xf9   : > { %2451 = vmatpush1.bf16.msra.mxu0 %v3263_v42  ;;  %v3359_v42 = vld [vmem:[%s4153_s7 + $0x2c] ss:$16 sps:$4 sm:$0xff]  }
  0xfa   : > { %2492 = vmatpush1.bf16.msra.mxu1 %v3266_v43  ;;  %2452 = vmatprep.subr.bf16.mxu0 %v3271_v44  ;;  %v3362_v43 = vld [vmem:[%s4153_s7 + $0x22c] ss:$16 sps:$4 sm:$0xff]   ;;  %v3357_v44 = vld [vmem:[%s4153_s7 + $0x28] ss:$16 sps:$4 sm:$0xff]  }
  0xfb   : > { %2493 = vmatprep.subr.bf16.mxu1 %v3274_v45  ;;  %v3360_v45 = vld [vmem:[%s4153_s7 + $0x228] ss:$16 sps:$4 sm:$0xff]  }
  0xfd   : > { %2453 = vmatpush2.bf16.msra.mxu0 %v3269_v46  ;;  %v3365_v46 = vld [vmem:[%s4153_s7 + $0xc] ss:$16 sps:$4 sm:$0xff]  }
  0xfe   : > { %2494 = vmatpush2.bf16.msra.mxu1 %v3272_v47  ;;  %2454 = vmatprep.subr.bf16.mxu0 %v3277_v48  ;;  %v3368_v47 = vld [vmem:[%s4153_s7 + $0x20c] ss:$16 sps:$4 sm:$0xff]   ;;  %v3363_v48 = vld [vmem:[%s4153_s7 + $0x8] ss:$16 sps:$4 sm:$0xff]  }
  0xff   : > { %2495 = vmatprep.subr.bf16.mxu1 %v3280_v49  ;;  %v3366_v49 = vld [vmem:[%s4153_s7 + $0x208] ss:$16 sps:$4 sm:$0xff]  }
 0x101   : > { %2455 = vmatpush2.bf16.msra.mxu0 %v3275_v50  ;;  %v3371_v50 = vld [vmem:[%s4153_s7 + $0x1ec] ss:$16 sps:$4 sm:$0xff]  }
 0x102   : > { %2496 = vmatpush2.bf16.msra.mxu1 %v3278_v51  ;;  %2456 = vmatprep.subr.bf16.mxu0 %v3283_v52  ;;  %v3374_v51 = vld [vmem:[%s4153_s7 + $0x3ec] ss:$16 sps:$4 sm:$0xff]   ;;  %v3369_v52 = vld [vmem:[%s4153_s7 + $0x1e8] ss:$16 sps:$4 sm:$0xff]  }
 0x103   : > { %2497 = vmatprep.subr.bf16.mxu1 %v3286_v53  ;;  %v3372_v53 = vld [vmem:[%s4153_s7 + $0x3e8] ss:$16 sps:$4 sm:$0xff]  }
 0x105   : > { %2457 = vmatpush2.bf16.msra.mxu0 %v3281_v54  ;;  %v3377_v54 = vld [vmem:[%s4153_s7 + $0x1cc] ss:$16 sps:$4 sm:$0xff]  }
 0x106   : > { %2498 = vmatpush2.bf16.msra.mxu1 %v3284_v55  ;;  %2458 = vmatprep.subr.bf16.mxu0 %v3289_v56  ;;  %v3380_v55 = vld [vmem:[%s4153_s7 + $0x3cc] ss:$16 sps:$4 sm:$0xff]   ;;  %v3375_v56 = vld [vmem:[%s4153_s7 + $0x1c8] ss:$16 sps:$4 sm:$0xff]  }
 0x107   : > { %2499 = vmatprep.subr.bf16.mxu1 %v3292_v57  ;;  %v3378_v57 = vld [vmem:[%s4153_s7 + $0x3c8] ss:$16 sps:$4 sm:$0xff]  }
 0x109   : > { %2459 = vmatpush2.bf16.msra.mxu0 %v3287_v58  ;;  %v3383_v58 = vld [vmem:[%s4153_s7 + $0x1ac] ss:$16 sps:$4 sm:$0xff]  }
 0x10a   : > { %2500 = vmatpush2.bf16.msra.mxu1 %v3290_v59  ;;  %2460 = vmatprep.subr.bf16.mxu0 %v3295_v60  ;;  %v3386_v59 = vld [vmem:[%s4153_s7 + $0x3ac] ss:$16 sps:$4 sm:$0xff]   ;;  %v3381_v60 = vld [vmem:[%s4153_s7 + $0x1a8] ss:$16 sps:$4 sm:$0xff]  }
 0x10b   : > { %2501 = vmatprep.subr.bf16.mxu1 %v3298_v61  ;;  %v3384_v61 = vld [vmem:[%s4153_s7 + $0x3a8] ss:$16 sps:$4 sm:$0xff]  }
 0x10d   : > { %2461 = vmatpush2.bf16.msra.mxu0 %v3293_v62  ;;  %v3389_v62 = vld [vmem:[%s4153_s7 + $0x18c] ss:$16 sps:$4 sm:$0xff]  }
 0x10e   : > { %2502 = vmatpush2.bf16.msra.mxu1 %v3296_v63  ;;  %2462 = vmatprep.subr.bf16.mxu0 %v3301_v4  ;;  %v3392_v63 = vld [vmem:[%s4153_s7 + $0x38c] ss:$16 sps:$4 sm:$0xff]   ;;  %v3387_v4 = vld [vmem:[%s4153_s7 + $0x188] ss:$16 sps:$4 sm:$0xff]  }
 0x10f   : > { %2503 = vmatprep.subr.bf16.mxu1 %v3304_v5  ;;  %v3390_v5 = vld [vmem:[%s4153_s7 + $0x388] ss:$16 sps:$4 sm:$0xff]  }
 0x111   : > { %2463 = vmatpush2.bf16.msra.mxu0 %v3299_v6  ;;  %v3395_v6 = vld [vmem:[%s4153_s7 + $0x16c] ss:$16 sps:$4 sm:$0xff]  }
 0x112   : > { %2504 = vmatpush2.bf16.msra.mxu1 %v3302_v7  ;;  %2464 = vmatprep.subr.bf16.mxu0 %v3307_v8  ;;  %v3398_v7 = vld [vmem:[%s4153_s7 + $0x36c] ss:$16 sps:$4 sm:$0xff]   ;;  %v3393_v8 = vld [vmem:[%s4153_s7 + $0x168] ss:$16 sps:$4 sm:$0xff]  }
 0x113   : > { %2505 = vmatprep.subr.bf16.mxu1 %v3310_v9  ;;  %v3396_v9 = vld [vmem:[%s4153_s7 + $0x368] ss:$16 sps:$4 sm:$0xff]  }
 0x115   : > { %2465 = vmatpush2.bf16.msra.mxu0 %v3305_v14  ;;  %v3401_v14 = vld [vmem:[%s4153_s7 + $0x14c] ss:$16 sps:$4 sm:$0xff]  }
 0x116   : > { %2506 = vmatpush2.bf16.msra.mxu1 %v3308_v15  ;;  %2466 = vmatprep.subr.bf16.mxu0 %v3313_v16  ;;  %v3404_v15 = vld [vmem:[%s4153_s7 + $0x34c] ss:$16 sps:$4 sm:$0xff]   ;;  %v3399_v16 = vld [vmem:[%s4153_s7 + $0x148] ss:$16 sps:$4 sm:$0xff]  }
 0x117   : > { %2507 = vmatprep.subr.bf16.mxu1 %v3316_v17  ;;  %v3402_v17 = vld [vmem:[%s4153_s7 + $0x348] ss:$16 sps:$4 sm:$0xff]  }
 0x119   : > { %2467 = vmatpush2.bf16.msra.mxu0 %v3311_v18  ;;  %v3407_v18 = vld [vmem:[%s4153_s7 + $0x12c] ss:$16 sps:$4 sm:$0xff]  }
 0x11a   : > { %2508 = vmatpush2.bf16.msra.mxu1 %v3314_v19  ;;  %2518 = vmatprep.subr.bf16.mxu0 %v3323_v20  ;;  %v3410_v19 = vld [vmem:[%s4153_s7 + $0x32c] ss:$16 sps:$4 sm:$0xff]   ;;  %v3405_v20 = vld [vmem:[%s4153_s7 + $0x128] ss:$16 sps:$4 sm:$0xff]  }
 0x11b   : > { %2559 = vmatprep.subr.bf16.mxu1 %v3326_v21  ;;  %v3408_v21 = vld [vmem:[%s4153_s7 + $0x328] ss:$16 sps:$4 sm:$0xff]  }
 0x11c   : > { %2469 = vmatmul.mubr.bf16.vlgmr.msra.gmra.mxu0 %v4319_v22 }
 0x11d   : > { %2510 = vmatmul.mubr.bf16.vlgmr.msra.gmra.mxu1 %v4323_v23  ;;  %2519 = vmatpush1.bf16.msra.mxu0 %v3321_v24  ;;  %v3413_v24 = vld [vmem:[%s4153_s7 + $0x10c] ss:$16 sps:$4 sm:$0xff]  }
 0x11e   : > { %2560 = vmatpush1.bf16.msra.mxu1 %v3324_v25  ;;  %2520 = vmatprep.subr.bf16.mxu0 %v3329_v26  ;;  %v3416_v25 = vld [vmem:[%s4153_s7 + $0x30c] ss:$16 sps:$4 sm:$0xff]   ;;  %v3411_v26 = vld [vmem:[%s4153_s7 + $0x108] ss:$16 sps:$4 sm:$0xff]  }
 0x11f   : > { %2561 = vmatprep.subr.bf16.mxu1 %v3332_v27  ;;  %2550 = vmatprep.mubr.bf16.mxu0 %v4147_v2  ;;  %v3347_v2 = vld [vmem:[%s4153_s7 + $0x6c] ss:$16 sps:$4 sm:$0xff]   ;;  %v3414_v27 = vld [vmem:[%s4153_s7 + $0x308] ss:$16 sps:$4 sm:$0xff]  }
 0x120   : > { %2591 = vmatprep.mubr.bf16.mxu1 %v4151_v3  ;;  %v3350_v3 = vld [vmem:[%s4153_s7 + $0x26c] ss:$16 sps:$4 sm:$0xff]  }
 0x121   : > { %2521 = vmatpush1.bf16.msra.mxu0 %v3327_v10  ;;  %v3419_v10 = vld [vmem:[%s4153_s7 + $0x4ec] ss:$16 sps:$4 sm:$0xff]  }
 0x122   : > { %2562 = vmatpush1.bf16.msra.mxu1 %v3330_v28  ;;  %2522 = vmatprep.subr.bf16.mxu0 %v3335_v11  ;;  %v3422_v28 = vld [vmem:[%s4153_s7 + $0x6ec] ss:$16 sps:$4 sm:$0xff]   ;;  %v3417_v11 = vld [vmem:[%s4153_s7 + $0x4e8] ss:$16 sps:$4 sm:$0xff]  }
 0x123   : > { %2563 = vmatprep.subr.bf16.mxu1 %v3338_v29  ;;  %v3420_v29 = vld [vmem:[%s4153_s7 + $0x6e8] ss:$16 sps:$4 sm:$0xff]  }
 0x125   : > { %2523 = vmatpush1.bf16.msra.mxu0 %v3333_v30  ;;  %v3425_v30 = vld [vmem:[%s4153_s7 + $0x4cc] ss:$16 sps:$4 sm:$0xff]  }
 0x126   : > { %2564 = vmatpush1.bf16.msra.mxu1 %v3336_v31  ;;  %2524 = vmatprep.subr.bf16.mxu0 %v3341_v32  ;;  %v3428_v31 = vld [vmem:[%s4153_s7 + $0x6cc] ss:$16 sps:$4 sm:$0xff]   ;;  %v3423_v32 = vld [vmem:[%s4153_s7 + $0x4c8] ss:$16 sps:$4 sm:$0xff]  }
 0x127   : > { %2565 = vmatprep.subr.bf16.mxu1 %v3344_v33  ;;  %v3426_v33 = vld [vmem:[%s4153_s7 + $0x6c8] ss:$16 sps:$4 sm:$0xff]  }
 0x129   : > { %2525 = vmatpush1.bf16.msra.mxu0 %v3339_v34  ;;  %v3431_v34 = vld [vmem:[%s4153_s7 + $0x4ac] ss:$16 sps:$4 sm:$0xff]  }
 0x12a   : > { %2566 = vmatpush1.bf16.msra.mxu1 %v3342_v35  ;;  %2526 = vmatprep.subr.bf16.mxu0 %v3347_v2  ;;  %v3434_v35 = vld [vmem:[%s4153_s7 + $0x6ac] ss:$16 sps:$4 sm:$0xff]  }
 0x12b   : > { %2567 = vmatprep.subr.bf16.mxu1 %v3350_v3  ;;  %v3437_v2 = vld [vmem:[%s4153_s7 + $0x48c] ss:$16 sps:$4 sm:$0xff]  }
 0x12c   : > { %v3440_v3 = vld [vmem:[%s4153_s7 + $0x68c] ss:$16 sps:$4 sm:$0xff]  }
 0x12d   : > { %2527 = vmatpush1.bf16.msra.mxu0 %v3345_v36  ;;  %v3435_v36 = vld [vmem:[%s4153_s7 + $0x488] ss:$16 sps:$4 sm:$0xff]  }
 0x12e   : > { %2568 = vmatpush1.bf16.msra.mxu1 %v3348_v37  ;;  %2528 = vmatprep.subr.bf16.mxu0 %v3353_v38  ;;  %v3446_v37 = vld [vmem:[%s4153_s7 + $0x66c] ss:$16 sps:$4 sm:$0xff]   ;;  %v3441_v38 = vld [vmem:[%s4153_s7 + $0x468] ss:$16 sps:$4 sm:$0xff]  }
 0x12f   : > { %2569 = vmatprep.subr.bf16.mxu1 %v3356_v39  ;;  %v3444_v39 = vld [vmem:[%s4153_s7 + $0x668] ss:$16 sps:$4 sm:$0xff]  }
 0x131   : > { %2529 = vmatpush1.bf16.msra.mxu0 %v3351_v40  ;;  %v3449_v40 = vld [vmem:[%s4153_s7 + $0x44c] ss:$16 sps:$4 sm:$0xff]  }
 0x132   : > { %2570 = vmatpush1.bf16.msra.mxu1 %v3354_v41  ;;  %2530 = vmatprep.subr.bf16.mxu0 %v3359_v42  ;;  %v3452_v41 = vld [vmem:[%s4153_s7 + $0x64c] ss:$16 sps:$4 sm:$0xff]   ;;  %v3447_v42 = vld [vmem:[%s4153_s7 + $0x448] ss:$16 sps:$4 sm:$0xff]  }
 0x133   : > { %2571 = vmatprep.subr.bf16.mxu1 %v3362_v43  ;;  %v3450_v43 = vld [vmem:[%s4153_s7 + $0x648] ss:$16 sps:$4 sm:$0xff]  }
 0x135   : > { %2531 = vmatpush1.bf16.msra.mxu0 %v3357_v44  ;;  %v3455_v44 = vld [vmem:[%s4153_s7 + $0x42c] ss:$16 sps:$4 sm:$0xff]  }
 0x136   : > { %2572 = vmatpush1.bf16.msra.mxu1 %v3360_v45  ;;  %2532 = vmatprep.subr.bf16.mxu0 %v3365_v46  ;;  %v3458_v45 = vld [vmem:[%s4153_s7 + $0x62c] ss:$16 sps:$4 sm:$0xff]   ;;  %v3453_v46 = vld [vmem:[%s4153_s7 + $0x428] ss:$16 sps:$4 sm:$0xff]  }
 0x137   : > { %2573 = vmatprep.subr.bf16.mxu1 %v3368_v47  ;;  %v3456_v47 = vld [vmem:[%s4153_s7 + $0x628] ss:$16 sps:$4 sm:$0xff]  }
 0x139   : > { %2533 = vmatpush1.bf16.msra.mxu0 %v3363_v48  ;;  %v3461_v48 = vld [vmem:[%s4153_s7 + $0x40c] ss:$16 sps:$4 sm:$0xff]  }
 0x13a   : > { %2574 = vmatpush1.bf16.msra.mxu1 %v3366_v49  ;;  %2534 = vmatprep.subr.bf16.mxu0 %v3371_v50  ;;  %v3464_v49 = vld [vmem:[%s4153_s7 + $0x60c] ss:$16 sps:$4 sm:$0xff]   ;;  %v3459_v50 = vld [vmem:[%s4153_s7 + $0x408] ss:$16 sps:$4 sm:$0xff]  }
 0x13b   : > { %2575 = vmatprep.subr.bf16.mxu1 %v3374_v51  ;;  %v3462_v51 = vld [vmem:[%s4153_s7 + $0x608] ss:$16 sps:$4 sm:$0xff]  }
 0x13d   : > { %2535 = vmatpush2.bf16.msra.mxu0 %v3369_v52  ;;  %v3467_v52 = vld [vmem:[%s4153_s7 + $0x5ec] ss:$16 sps:$4 sm:$0xff]  }
 0x13e   : > { %2576 = vmatpush2.bf16.msra.mxu1 %v3372_v53  ;;  %2536 = vmatprep.subr.bf16.mxu0 %v3377_v54  ;;  %v3470_v53 = vld [vmem:[%s4153_s7 + $0x7ec] ss:$16 sps:$4 sm:$0xff]   ;;  %v3465_v54 = vld [vmem:[%s4153_s7 + $0x5e8] ss:$16 sps:$4 sm:$0xff]  }
 0x13f   : > { %2577 = vmatprep.subr.bf16.mxu1 %v3380_v55  ;;  %v3468_v55 = vld [vmem:[%s4153_s7 + $0x7e8] ss:$16 sps:$4 sm:$0xff]  }
 0x141   : > { %2537 = vmatpush2.bf16.msra.mxu0 %v3375_v56  ;;  %v3473_v56 = vld [vmem:[%s4153_s7 + $0x5cc] ss:$16 sps:$4 sm:$0xff]  }
 0x142   : > { %2578 = vmatpush2.bf16.msra.mxu1 %v3378_v57  ;;  %2538 = vmatprep.subr.bf16.mxu0 %v3383_v58  ;;  %v3476_v57 = vld [vmem:[%s4153_s7 + $0x7cc] ss:$16 sps:$4 sm:$0xff]   ;;  %v3471_v58 = vld [vmem:[%s4153_s7 + $0x5c8] ss:$16 sps:$4 sm:$0xff]  }
 0x143   : > { %2579 = vmatprep.subr.bf16.mxu1 %v3386_v59  ;;  %v3474_v59 = vld [vmem:[%s4153_s7 + $0x7c8] ss:$16 sps:$4 sm:$0xff]  }
 0x145   : > { %2539 = vmatpush2.bf16.msra.mxu0 %v3381_v60  ;;  %v3479_v60 = vld [vmem:[%s4153_s7 + $0x5ac] ss:$16 sps:$4 sm:$0xff]  }
 0x146   : > { %2580 = vmatpush2.bf16.msra.mxu1 %v3384_v61  ;;  %2540 = vmatprep.subr.bf16.mxu0 %v3389_v62  ;;  %v3482_v61 = vld [vmem:[%s4153_s7 + $0x7ac] ss:$16 sps:$4 sm:$0xff]   ;;  %v3477_v62 = vld [vmem:[%s4153_s7 + $0x5a8] ss:$16 sps:$4 sm:$0xff]  }
 0x147   : > { %2581 = vmatprep.subr.bf16.mxu1 %v3392_v63  ;;  %v3480_v63 = vld [vmem:[%s4153_s7 + $0x7a8] ss:$16 sps:$4 sm:$0xff]  }
 0x149   : > { %2541 = vmatpush2.bf16.msra.mxu0 %v3387_v4  ;;  %v3485_v4 = vld [vmem:[%s4153_s7 + $0x58c] ss:$16 sps:$4 sm:$0xff]  }
 0x14a   : > { %2582 = vmatpush2.bf16.msra.mxu1 %v3390_v5  ;;  %2542 = vmatprep.subr.bf16.mxu0 %v3395_v6  ;;  %v3488_v5 = vld [vmem:[%s4153_s7 + $0x78c] ss:$16 sps:$4 sm:$0xff]   ;;  %v3483_v6 = vld [vmem:[%s4153_s7 + $0x588] ss:$16 sps:$4 sm:$0xff]  }
 0x14b   : > { %2583 = vmatprep.subr.bf16.mxu1 %v3398_v7  ;;  %v3486_v7 = vld [vmem:[%s4153_s7 + $0x788] ss:$16 sps:$4 sm:$0xff]  }
 0x14d   : > { %2543 = vmatpush2.bf16.msra.mxu0 %v3393_v8  ;;  %v3491_v8 = vld [vmem:[%s4153_s7 + $0x56c] ss:$16 sps:$4 sm:$0xff]  }
 0x14e   : > { %2584 = vmatpush2.bf16.msra.mxu1 %v3396_v9  ;;  %2544 = vmatprep.subr.bf16.mxu0 %v3401_v14  ;;  %v3494_v9 = vld [vmem:[%s4153_s7 + $0x76c] ss:$16 sps:$4 sm:$0xff]   ;;  %v3489_v14 = vld [vmem:[%s4153_s7 + $0x568] ss:$16 sps:$4 sm:$0xff]  }
 0x14f   : > { %2585 = vmatprep.subr.bf16.mxu1 %v3404_v15  ;;  %v3492_v15 = vld [vmem:[%s4153_s7 + $0x768] ss:$16 sps:$4 sm:$0xff]  }
 0x151   : > { %2545 = vmatpush2.bf16.msra.mxu0 %v3399_v16  ;;  %v3497_v16 = vld [vmem:[%s4153_s7 + $0x54c] ss:$16 sps:$4 sm:$0xff]  }
 0x152   : > { %2586 = vmatpush2.bf16.msra.mxu1 %v3402_v17  ;;  %2546 = vmatprep.subr.bf16.mxu0 %v3407_v18  ;;  %v3500_v17 = vld [vmem:[%s4153_s7 + $0x74c] ss:$16 sps:$4 sm:$0xff]   ;;  %v3495_v18 = vld [vmem:[%s4153_s7 + $0x548] ss:$16 sps:$4 sm:$0xff]  }
 0x153   : > { %2587 = vmatprep.subr.bf16.mxu1 %v3410_v19  ;;  %v3498_v19 = vld [vmem:[%s4153_s7 + $0x748] ss:$16 sps:$4 sm:$0xff]  }
 0x155   : > { %2547 = vmatpush2.bf16.msra.mxu0 %v3405_v20  ;;  %v3503_v20 = vld [vmem:[%s4153_s7 + $0x52c] ss:$16 sps:$4 sm:$0xff]  }
 0x156   : > { %2588 = vmatpush2.bf16.msra.mxu1 %v3408_v21  ;;  %2548 = vmatprep.subr.bf16.mxu0 %v3413_v24  ;;  %v3506_v21 = vld [vmem:[%s4153_s7 + $0x72c] ss:$16 sps:$4 sm:$0xff]   ;;  %v3501_v24 = vld [vmem:[%s4153_s7 + $0x528] ss:$16 sps:$4 sm:$0xff]  }
 0x157   : > { %2589 = vmatprep.subr.bf16.mxu1 %v3416_v25  ;;  %v3504_v25 = vld [vmem:[%s4153_s7 + $0x728] ss:$16 sps:$4 sm:$0xff]  }
 0x159   : > { %2549 = vmatpush2.bf16.msra.mxu0 %v3411_v26  ;;  %v3509_v26 = vld [vmem:[%s4153_s7 + $0x50c] ss:$16 sps:$4 sm:$0xff]  }
 0x15a   : > { %2590 = vmatpush2.bf16.msra.mxu1 %v3414_v27  ;;  %2600 = vmatprep.subr.bf16.mxu0 %v3419_v10  ;;  %v3512_v27 = vld [vmem:[%s4153_s7 + $0x70c] ss:$16 sps:$4 sm:$0xff]   ;;  %v3507_v10 = vld [vmem:[%s4153_s7 + $0x508] ss:$16 sps:$4 sm:$0xff]  }
 0x15b   : > { %2641 = vmatprep.subr.bf16.mxu1 %v3422_v28  ;;  %v3510_v28 = vld [vmem:[%s4153_s7 + $0x708] ss:$16 sps:$4 sm:$0xff]  }
 0x15c   : > { %2551 = vmatmul.mubr.bf16.vlgmr.msra.gmra.mxu0 %v4235_v12  ;;  %v3429_v12 = vld [vmem:[%s4153_s7 + $0x4a8] ss:$16 sps:$4 sm:$0xff]  }
 0x15d   : > { %2592 = vmatmul.mubr.bf16.vlgmr.msra.gmra.mxu1 %v4239_v13  ;;  %2601 = vmatpush1.bf16.msra.mxu0 %v3417_v11  ;;  %v3432_v13 = vld [vmem:[%s4153_s7 + $0x6a8] ss:$16 sps:$4 sm:$0xff]  }
 0x15e   : > { %2642 = vmatpush1.bf16.msra.mxu1 %v3420_v29  ;;  %2602 = vmatprep.subr.bf16.mxu0 %v3425_v30 }
 0x15f   : > { %2643 = vmatprep.subr.bf16.mxu1 %v3428_v31  ;;  %2632 = vmatprep.mubr.bf16.mxu0 %v4247_v0  ;;  %v3438_v0 = vld [vmem:[%s4153_s7 + $0x688] ss:$16 sps:$4 sm:$0xff]  }
 0x160   : > { %2673 = vmatprep.mubr.bf16.mxu1 %v4251_v1  ;;  %v3443_v1 = vld [vmem:[%s4153_s7 + $0x46c] ss:$16 sps:$4 sm:$0xff]  }
 0x161   : > { %2603 = vmatpush1.bf16.msra.mxu0 %v3423_v32 }
 0x162   : > { %2644 = vmatpush1.bf16.msra.mxu1 %v3426_v33  ;;  %2604 = vmatprep.subr.bf16.mxu0 %v3431_v34 }
 0x163   : > { %2645 = vmatprep.subr.bf16.mxu1 %v3434_v35 }
 0x165   : > { %2605 = vmatpush1.bf16.msra.mxu0 %v3429_v12  ;;  %v1026_v12 = vlaneseq }
 0x166   : > { %2646 = vmatpush1.bf16.msra.mxu1 %v3432_v13  ;;  %2606 = vmatprep.subr.bf16.mxu0 %v3437_v2 }
 0x167   : > { %2647 = vmatprep.subr.bf16.mxu1 %v3440_v3  ;;  %v1027_v13 = vshrl.u32 %v1026_v12, 7  ;;  %v1024_v3 = vld [vmem:[%s752_s21] sm:$0xf] }
 0x169   : > { %2607 = vmatpush1.bf16.msra.mxu0 %v3435_v36  ;;  %v1028_v2 = vsub.s32 0, %v1027_v13 }
 0x16a   : > { %2648 = vmatpush1.bf16.msra.mxu1 %v3438_v0  ;;  %2608 = vmatprep.subr.bf16.mxu0 %v3443_v1 }
 0x16b   : > { %2649 = vmatprep.subr.bf16.mxu1 %v3446_v37  ;;  %v1029_v36 = vrot.slane %v1024_v3, %v1028_v2 }
 0x16d   : > { %2609 = vmatpush1.bf16.msra.mxu0 %v3441_v38 }
 0x16e   : > { %2650 = vmatpush1.bf16.msra.mxu1 %v3444_v39  ;;  %2610 = vmatprep.subr.bf16.mxu0 %v3449_v40 }
 0x16f   : > { %2651 = vmatprep.subr.bf16.mxu1 %v3452_v41 }
 0x171   : > { %2611 = vmatpush1.bf16.msra.mxu0 %v3447_v42 }
 0x172   : > { %2652 = vmatpush1.bf16.msra.mxu1 %v3450_v43  ;;  %2612 = vmatprep.subr.bf16.mxu0 %v3455_v44 }
 0x173   : > { %2653 = vmatprep.subr.bf16.mxu1 %v3458_v45 }
 0x175   : > { %2613 = vmatpush1.bf16.msra.mxu0 %v3453_v46 }
 0x176   : > { %2654 = vmatpush1.bf16.msra.mxu1 %v3456_v47  ;;  %2614 = vmatprep.subr.bf16.mxu0 %v3461_v48 }
 0x177   : > { %2655 = vmatprep.subr.bf16.mxu1 %v3464_v49 }
 0x179   : > { %2615 = vmatpush1.bf16.msra.mxu0 %v3459_v50 }
 0x17a   : > { %2656 = vmatpush1.bf16.msra.mxu1 %v3462_v51  ;;  %2616 = vmatprep.subr.bf16.mxu0 %v3467_v52 }
 0x17b   : > { %2657 = vmatprep.subr.bf16.mxu1 %v3470_v53 }
 0x17d   : > { %2617 = vmatpush2.bf16.msra.mxu0 %v3465_v54 }
 0x17e   : > { %2658 = vmatpush2.bf16.msra.mxu1 %v3468_v55  ;;  %2618 = vmatprep.subr.bf16.mxu0 %v3473_v56 }
 0x17f   : > { %2659 = vmatprep.subr.bf16.mxu1 %v3476_v57 }
 0x181   : > { %2619 = vmatpush2.bf16.msra.mxu0 %v3471_v58 }
 0x182   : > { %2660 = vmatpush2.bf16.msra.mxu1 %v3474_v59  ;;  %2620 = vmatprep.subr.bf16.mxu0 %v3479_v60 }
 0x183   : > { %2661 = vmatprep.subr.bf16.mxu1 %v3482_v61  ;;  %v1036_v61 = vsub.s32 2, %v1027_v13 }
 0x185   : > { %2621 = vmatpush2.bf16.msra.mxu0 %v3477_v62  ;;  %v1040_v62 = vsub.s32 3, %v1027_v13 }
 0x186   : > { %2662 = vmatpush2.bf16.msra.mxu1 %v3480_v63  ;;  %2622 = vmatprep.subr.bf16.mxu0 %v3485_v4  ;;  %v1037_v63 = vrot.slane %v1024_v3, %v1036_v61 }
 0x187   : > { %2663 = vmatprep.subr.bf16.mxu1 %v3488_v5  ;;  %v1041_v4 = vrot.slane %v1024_v3, %v1040_v62 }
 0x189   : > { %2623 = vmatpush2.bf16.msra.mxu0 %v3483_v6 }
 0x18a   : > { %2664 = vmatpush2.bf16.msra.mxu1 %v3486_v7  ;;  %2624 = vmatprep.subr.bf16.mxu0 %v3491_v8 }
 0x18b   : > { %2665 = vmatprep.subr.bf16.mxu1 %v3494_v9 }
 0x18d   : > { %2625 = vmatpush2.bf16.msra.mxu0 %v3489_v14 }
 0x18e   : > { %2666 = vmatpush2.bf16.msra.mxu1 %v3492_v15  ;;  %2626 = vmatprep.subr.bf16.mxu0 %v3497_v16 }
 0x18f   : > { %2667 = vmatprep.subr.bf16.mxu1 %v3500_v17 }
 0x191   : > { %2627 = vmatpush2.bf16.msra.mxu0 %v3495_v18 }
 0x192   : > { %2668 = vmatpush2.bf16.msra.mxu1 %v3498_v19  ;;  %2628 = vmatprep.subr.bf16.mxu0 %v3503_v20 }
 0x193   : > { %2669 = vmatprep.subr.bf16.mxu1 %v3506_v21 }
 0x195   : > { %2629 = vmatpush2.bf16.msra.mxu0 %v3501_v24 }
 0x196   : > { %2670 = vmatpush2.bf16.msra.mxu1 %v3504_v25  ;;  %2630 = vmatprep.subr.bf16.mxu0 %v3509_v26 }
 0x197   : > { %2671 = vmatprep.subr.bf16.mxu1 %v3512_v27 }
 0x199   : > { %2631 = vmatpush2.bf16.msra.mxu0 %v3507_v10 }
 0x19a   : > { %2672 = vmatpush2.bf16.msra.mxu1 %v3510_v28 }
 0x19c   : > { %v2388_v11 = vpop.f32.mrf.mxu0  ;;  %2633 = vmatmul.mubr.bf16.vlgmr.msra.gmra.mxu0 %v4319_v22  ;;  %v1032_v22 = vsub.s32 1, %v1027_v13 }
 0x19d   : > { %v2429_v29 = vpop.f32.mrf.mxu1  ;;  %2674 = vmatmul.mubr.bf16.vlgmr.msra.gmra.mxu1 %v4323_v23  ;;  %v2389_v0 = vadd.f32 %v2388_v11, %v1029_v36 }
 0x19e   : > { %v2390_v30 = vpop.f32.mrf.mxu0  ;;  %v1033_v23 = vrot.slane %v1024_v3, %v1032_v22 }
 0x19f   : > { %v2431_v31 = vpop.f32.mrf.mxu1  ;;  %v2430_v37 = vadd.f32 %v2429_v29, %v2389_v0 }
 0x1a0   : > { %v2392_v32 = vpop.f32.mrf.mxu0  ;;  %v2391_v1 = vadd.f32 %v2390_v30, %v1033_v23 }
 0x1a1   : > { %v2433_v33 = vpop.f32.mrf.mxu1 }
 0x1a2   : > { %v2393_v34 = vpop.f32.mrf.mxu0  ;;  %v2432_v40 = vadd.f32 %v2431_v31, %v2391_v1 }
 0x1a3   : > { %v2434_v35 = vpop.f32.mrf.mxu1 }
 0x1dc   : > { %v2470_v38 = vpop.f32.mrf.mxu0 }
 0x1dd   : > { %v2511_v39 = vpop.f32.mrf.mxu1  ;;  %v2471_v41 = vadd.f32 %v2470_v38, %v2430_v37 }
 0x1de   : > { %v2472_v42 = vpop.f32.mrf.mxu0 }
 0x1df   : > { %v2513_v43 = vpop.f32.mrf.mxu1  ;;  %v2512_v44 = vadd.f32 %v2511_v39, %v2471_v41  ;;  %v2473_v45 = vadd.f32 %v2472_v42, %v2432_v40 }
 0x1e0   : > { %v2474_v46 = vpop.f32.mrf.mxu0 }
 0x1e1   : > { %v2515_v47 = vpop.f32.mrf.mxu1  ;;  %v2682_v48 = vmax.f32 %v2512_v44, 0.0  ;;  %v2514_v49 = vadd.f32 %v2513_v43, %v2473_v45 }
 0x1e2   : > { %v2475_v50 = vpop.f32.mrf.mxu0 }
 0x1e3   : > { %v2516_v51 = vpop.f32.mrf.mxu1  ;;  %2686 = vst [vmem:[%s4468_s24] sm:$0xff] %v2682_v48  ;;  %v2683_v52 = vmax.f32 %v2514_v49, 0.0 }
 0x1e5   : > { %2687 = vst [vmem:[%s4468_s24 + $0x8] sm:$0xff] %v2683_v52 }
 0x21c   : > { %v2552_v53 = vpop.f32.mrf.mxu0 }
 0x21d   : > { %v2593_v54 = vpop.f32.mrf.mxu1  ;;  %v2553_v5 = vadd.f32 %v2552_v53, %v1037_v63 }
 0x21e   : > { %v2554_v55 = vpop.f32.mrf.mxu0 }
 0x21f   : > { %v2595_v56 = vpop.f32.mrf.mxu1  ;;  %v2555_v6 = vadd.f32 %v2554_v55, %v1041_v4  ;;  %v2594_v7 = vadd.f32 %v2593_v54, %v2553_v5 }
 0x220   : > { %v2556_v57 = vpop.f32.mrf.mxu0 }
 0x221   : > { %v2597_v58 = vpop.f32.mrf.mxu1  ;;  %v2596_v14 = vadd.f32 %v2595_v56, %v2555_v6 }
 0x222   : > { %v2557_v59 = vpop.f32.mrf.mxu0 }
 0x223   : > { %v2598_v60 = vpop.f32.mrf.mxu1 }
 0x25c   : > { %v2634_v8 = vpop.f32.mrf.mxu0 }
 0x25d   : > { %v2675_v9 = vpop.f32.mrf.mxu1  ;;  %v2635_v15 = vadd.f32 %v2634_v8, %v2594_v7 }
 0x25e   : > { %v2636_v16 = vpop.f32.mrf.mxu0 }
 0x25f   : > { %v2677_v17 = vpop.f32.mrf.mxu1  ;;  %v2676_v18 = vadd.f32 %v2675_v9, %v2635_v15  ;;  %v2637_v19 = vadd.f32 %v2636_v16, %v2596_v14 }
 0x260   : > { %v2638_v20 = vpop.f32.mrf.mxu0 }
 0x261   : > { %v2679_v21 = vpop.f32.mrf.mxu1  ;;  %v2684_v24 = vmax.f32 %v2676_v18, 0.0  ;;  %v2678_v25 = vadd.f32 %v2677_v17, %v2637_v19 }
 0x262   : > { %v2639_v26 = vpop.f32.mrf.mxu0 }
 0x263   : > { %v2680_v27 = vpop.f32.mrf.mxu1  ;;  %2688 = vst [vmem:[%s4468_s24 + $0x10] sm:$0xff] %v2684_v24  ;;  %v2685_v10 = vmax.f32 %v2678_v25, 0.0 }
 0x265   : > { %2689 = vst [vmem:[%s4468_s24 + $0x18] sm:$0xff] %v2685_v10 }
 0x266 PF: > { %s13_s16 = sadd.s32 1, %s3551_s16   ;;  %s4493_s12 = smov %s3539_s13 }
 0x267   : > { %p10_p10 = scmp.ge.s32.totalorder %s13_s16, 6   ;;  %s4494_s13 = smov %s3608_s20 }
 0x268   : > { %s4495_s14 = smov %s3547_s15  ;;  %s4496_s15 = smov %s4498_s17 }
 0x269   :  { %12 = sbr.rel (!%p10_p10) target bundleno = 3 (0x3), region = 96 }

// kernel: alexnet_forward.16
= control target key start
LH: loop header
LB: loop body
LE: loop exit
PB: predicated region body
PF: predicated region fallthrough
CT: control target
= control target key end

     0   :  { %s6638_s12 = smov 0   ;;  %s6640_s13 = smov 0   ;;  %s8428_s0 = inlined_call_operand.vmem [shape: bf16[8,2048], index: 0, kind: input, shape index: {}]   ;;  %s8429_s1 = inlined_call_operand.vmem [shape: bf16[2048,2048], index: 1, kind: input, shape index: {}]   ;;  %s8430_s2 = inlined_call_operand.vmem [shape: f32[1,2048], index: 2, kind: input, shape index: {}]   ;;  %s8431_s3 = inlined_call_operand.vmem [shape: f32[8,2048], index: 3, kind: output, shape index: {}]  }
   0x1   :  { %s6642_s14 = smov 0   ;;  %s6644_s15 = smov 0  }
   0x2   :  { %s6646_s16 = smov 0  }
   0x3 LB: > { %s22_s17 = sadd.s32 1, %s6612_s15  ;;  %p65_p1 = scmp.ne.s32.totalorder %s6604_s13, %s6600_s12  ;;  %s6616_s16 = sphi %s6646_s16, %s13_s16   ;;  %s6612_s15 = sphi %s6644_s15, %s8435_s15   ;;  %s6608_s14 = sphi %s6642_s14, %s8434_s14   ;;  %s6604_s13 = sphi %s6640_s13, %s8433_s13   ;;  %s6600_s12 = sphi %s6638_s12, %s8432_s12  }
   0x4   : > { %p23_p0 = scmp.ge.s32.totalorder %s22_s17, 4  ;;  %p66_p2 = scmp.eq.s32.totalorder %s6616_s16, 0 }
   0x5   : > { %s58_s19 = sadd.s32 1, %s6604_s13  ;;  %p5213_p5 = scmp.ge.s32.totalorder %s6616_s16, 4 }
   0x6   : > { %s8437_s17 = smov (%p23_p0, %s22_s17), 0  ;;  %p67_p3 = por %p66_p2, %p65_p1 }
   0x7   : > { %s55_s18 = ssub.s32 %s6612_s15, %s8437_s17  ;;  %153 = sbr.rel (%p5213_p5) target bundleno = 272 (0x110), region = 20 }
   0x8   : > { %p56_p4 = scmp.eq.s32.totalorder %s55_s18, 0 }
   0xa   : > { %s6673_s20 = scalar_select %p56_p4, %s6604_s13, %s58_s19  }
   0xc   : > { %156 = sbr.rel (!%p67_p3) target bundleno = 272 (0x110), region = 24  ;;  %s158_s21 = sand.u32 (%p67_p3), 1, %s6604_s13  }
   0xd   : > { %s5752_s22 = sshll.u32 (%p67_p3), %s6612_s15, 4  ;;  %s5214_s23 = sshll.u32 (%p67_p3), %s158_s21, 12 }
   0xe   : > { %s6681_s26 = scalar_lea.vmem (%p67_p3), %s8429_s1, %s5752_s22  ;;  %s6686_s27 = scalar_lea.vmem (%p67_p3), [#allocation2], %s5214_s23 }
   0xf   : > { %v176_v0 = vld [vmem:[%s6681_s26] sm:$0xff] (%p67_p3)  ;;  %v178_v1 = vld [vmem:[%s6681_s26 + $0x8] sm:$0xff] (%p67_p3) }
  0x10   : > { %v180_v2 = vld [vmem:[%s6681_s26 + $0x40] sm:$0xff] (%p67_p3)  ;;  %177 = vst [vmem:[%s6686_s27] sm:$0xff] (%p67_p3), %v176_v0  ;;  %179 = vst [vmem:[%s6686_s27 + $0x8] sm:$0xff] (%p67_p3), %v178_v1  ;;  %v182_v3 = vld [vmem:[%s6681_s26 + $0x48] sm:$0xff] (%p67_p3) }
  0x11   : > { %181 = vst [vmem:[%s6686_s27 + $0x10] sm:$0xff] %v180_v2  ;;  %v184_v4 = vld [vmem:[%s6681_s26 + $0x80] sm:$0xff]  ;;  %v186_v5 = vld [vmem:[%s6681_s26 + $0x88] sm:$0xff]  ;;  %183 = vst [vmem:[%s6686_s27 + $0x18] sm:$0xff] %v182_v3 }
  0x12   : > { %185 = vst [vmem:[%s6686_s27 + $0x20] sm:$0xff] %v184_v4  ;;  %187 = vst [vmem:[%s6686_s27 + $0x28] sm:$0xff] %v186_v5  ;;  %v188_v6 = vld [vmem:[%s6681_s26 + $0xc0] sm:$0xff]  ;;  %v190_v7 = vld [vmem:[%s6681_s26 + $0xc8] sm:$0xff] }
  0x13   : > { %v192_v8 = vld [vmem:[%s6681_s26 + $0x100] sm:$0xff]  ;;  %189 = vst [vmem:[%s6686_s27 + $0x30] sm:$0xff] %v188_v6  ;;  %191 = vst [vmem:[%s6686_s27 + $0x38] sm:$0xff] %v190_v7  ;;  %v194_v9 = vld [vmem:[%s6681_s26 + $0x108] sm:$0xff] }
  0x14   : > { %193 = vst [vmem:[%s6686_s27 + $0x40] sm:$0xff] %v192_v8  ;;  %v196_v10 = vld [vmem:[%s6681_s26 + $0x140] sm:$0xff]  ;;  %v198_v11 = vld [vmem:[%s6681_s26 + $0x148] sm:$0xff]  ;;  %195 = vst [vmem:[%s6686_s27 + $0x48] sm:$0xff] %v194_v9 }
  0x15   : > { %197 = vst [vmem:[%s6686_s27 + $0x50] sm:$0xff] %v196_v10  ;;  %199 = vst [vmem:[%s6686_s27 + $0x58] sm:$0xff] %v198_v11  ;;  %v200_v12 = vld [vmem:[%s6681_s26 + $0x180] sm:$0xff]  ;;  %v202_v13 = vld [vmem:[%s6681_s26 + $0x188] sm:$0xff] }
  0x16   : > { %v204_v14 = vld [vmem:[%s6681_s26 + $0x1c0] sm:$0xff]  ;;  %201 = vst [vmem:[%s6686_s27 + $0x60] sm:$0xff] %v200_v12  ;;  %203 = vst [vmem:[%s6686_s27 + $0x68] sm:$0xff] %v202_v13  ;;  %v206_v15 = vld [vmem:[%s6681_s26 + $0x1c8] sm:$0xff] }
  0x17   : > { %205 = vst [vmem:[%s6686_s27 + $0x70] sm:$0xff] %v204_v14  ;;  %v208_v16 = vld [vmem:[%s6681_s26 + $0x200] sm:$0xff]  ;;  %v210_v17 = vld [vmem:[%s6681_s26 + $0x208] sm:$0xff]  ;;  %207 = vst [vmem:[%s6686_s27 + $0x78] sm:$0xff] %v206_v15 }
  0x18   : > { %209 = vst [vmem:[%s6686_s27 + $0x80] sm:$0xff] %v208_v16  ;;  %211 = vst [vmem:[%s6686_s27 + $0x88] sm:$0xff] %v210_v17  ;;  %v212_v18 = vld [vmem:[%s6681_s26 + $0x240] sm:$0xff]  ;;  %v214_v19 = vld [vmem:[%s6681_s26 + $0x248] sm:$0xff] }
  0x19   : > { %v216_v20 = vld [vmem:[%s6681_s26 + $0x280] sm:$0xff]  ;;  %213 = vst [vmem:[%s6686_s27 + $0x90] sm:$0xff] %v212_v18  ;;  %215 = vst [vmem:[%s6686_s27 + $0x98] sm:$0xff] %v214_v19  ;;  %v218_v21 = vld [vmem:[%s6681_s26 + $0x288] sm:$0xff] }
  0x1a   : > { %217 = vst [vmem:[%s6686_s27 + $0xa0] sm:$0xff] %v216_v20  ;;  %v220_v22 = vld [vmem:[%s6681_s26 + $0x2c0] sm:$0xff]  ;;  %v222_v23 = vld [vmem:[%s6681_s26 + $0x2c8] sm:$0xff]  ;;  %219 = vst [vmem:[%s6686_s27 + $0xa8] sm:$0xff] %v218_v21 }
  0x1b   : > { %221 = vst [vmem:[%s6686_s27 + $0xb0] sm:$0xff] %v220_v22  ;;  %223 = vst [vmem:[%s6686_s27 + $0xb8] sm:$0xff] %v222_v23  ;;  %v224_v24 = vld [vmem:[%s6681_s26 + $0x300] sm:$0xff]  ;;  %v226_v25 = vld [vmem:[%s6681_s26 + $0x308] sm:$0xff] }
  0x1c   : > { %v228_v26 = vld [vmem:[%s6681_s26 + $0x340] sm:$0xff]  ;;  %225 = vst [vmem:[%s6686_s27 + $0xc0] sm:$0xff] %v224_v24  ;;  %227 = vst [vmem:[%s6686_s27 + $0xc8] sm:$0xff] %v226_v25  ;;  %v230_v27 = vld [vmem:[%s6681_s26 + $0x348] sm:$0xff] }
  0x1d   : > { %229 = vst [vmem:[%s6686_s27 + $0xd0] sm:$0xff] %v228_v26  ;;  %v232_v28 = vld [vmem:[%s6681_s26 + $0x380] sm:$0xff]  ;;  %v234_v29 = vld [vmem:[%s6681_s26 + $0x388] sm:$0xff]  ;;  %231 = vst [vmem:[%s6686_s27 + $0xd8] sm:$0xff] %v230_v27 }
  0x1e   : > { %233 = vst [vmem:[%s6686_s27 + $0xe0] sm:$0xff] %v232_v28  ;;  %235 = vst [vmem:[%s6686_s27 + $0xe8] sm:$0xff] %v234_v29  ;;  %v236_v30 = vld [vmem:[%s6681_s26 + $0x3c0] sm:$0xff]  ;;  %v238_v31 = vld [vmem:[%s6681_s26 + $0x3c8] sm:$0xff] }
  0x1f   : > { %v240_v32 = vld [vmem:[%s6681_s26 + $0x400] sm:$0xff]  ;;  %237 = vst [vmem:[%s6686_s27 + $0xf0] sm:$0xff] %v236_v30  ;;  %239 = vst [vmem:[%s6686_s27 + $0xf8] sm:$0xff] %v238_v31  ;;  %v242_v33 = vld [vmem:[%s6681_s26 + $0x408] sm:$0xff] }
  0x20   : > { %241 = vst [vmem:[%s6686_s27 + $0x100] sm:$0xff] %v240_v32  ;;  %v244_v34 = vld [vmem:[%s6681_s26 + $0x440] sm:$0xff]  ;;  %v246_v35 = vld [vmem:[%s6681_s26 + $0x448] sm:$0xff]  ;;  %243 = vst [vmem:[%s6686_s27 + $0x108] sm:$0xff] %v242_v33 }
  0x21   : > { %245 = vst [vmem:[%s6686_s27 + $0x110] sm:$0xff] %v244_v34  ;;  %247 = vst [vmem:[%s6686_s27 + $0x118] sm:$0xff] %v246_v35  ;;  %v248_v36 = vld [vmem:[%s6681_s26 + $0x480] sm:$0xff]  ;;  %v250_v37 = vld [vmem:[%s6681_s26 + $0x488] sm:$0xff] }
  0x22   : > { %v252_v38 = vld [vmem:[%s6681_s26 + $0x4c0] sm:$0xff]  ;;  %249 = vst [vmem:[%s6686_s27 + $0x120] sm:$0xff] %v248_v36  ;;  %251 = vst [vmem:[%s6686_s27 + $0x128] sm:$0xff] %v250_v37  ;;  %v254_v39 = vld [vmem:[%s6681_s26 + $0x4c8] sm:$0xff] }
  0x23   : > { %253 = vst [vmem:[%s6686_s27 + $0x130] sm:$0xff] %v252_v38  ;;  %v256_v40 = vld [vmem:[%s6681_s26 + $0x500] sm:$0xff]  ;;  %v258_v41 = vld [vmem:[%s6681_s26 + $0x508] sm:$0xff]  ;;  %255 = vst [vmem:[%s6686_s27 + $0x138] sm:$0xff] %v254_v39 }
  0x24   : > { %257 = vst [vmem:[%s6686_s27 + $0x140] sm:$0xff] %v256_v40  ;;  %259 = vst [vmem:[%s6686_s27 + $0x148] sm:$0xff] %v258_v41  ;;  %v260_v42 = vld [vmem:[%s6681_s26 + $0x540] sm:$0xff]  ;;  %v262_v43 = vld [vmem:[%s6681_s26 + $0x548] sm:$0xff] }
  0x25   : > { %v264_v44 = vld [vmem:[%s6681_s26 + $0x580] sm:$0xff]  ;;  %261 = vst [vmem:[%s6686_s27 + $0x150] sm:$0xff] %v260_v42  ;;  %263 = vst [vmem:[%s6686_s27 + $0x158] sm:$0xff] %v262_v43  ;;  %v266_v45 = vld [vmem:[%s6681_s26 + $0x588] sm:$0xff] }
  0x26   : > { %265 = vst [vmem:[%s6686_s27 + $0x160] sm:$0xff] %v264_v44  ;;  %v268_v46 = vld [vmem:[%s6681_s26 + $0x5c0] sm:$0xff]  ;;  %v270_v47 = vld [vmem:[%s6681_s26 + $0x5c8] sm:$0xff]  ;;  %267 = vst [vmem:[%s6686_s27 + $0x168] sm:$0xff] %v266_v45 }
  0x27   : > { %269 = vst [vmem:[%s6686_s27 + $0x170] sm:$0xff] %v268_v46  ;;  %271 = vst [vmem:[%s6686_s27 + $0x178] sm:$0xff] %v270_v47  ;;  %v272_v48 = vld [vmem:[%s6681_s26 + $0x600] sm:$0xff]  ;;  %v274_v49 = vld [vmem:[%s6681_s26 + $0x608] sm:$0xff] }
  0x28   : > { %v276_v50 = vld [vmem:[%s6681_s26 + $0x640] sm:$0xff]  ;;  %273 = vst [vmem:[%s6686_s27 + $0x180] sm:$0xff] %v272_v48  ;;  %275 = vst [vmem:[%s6686_s27 + $0x188] sm:$0xff] %v274_v49  ;;  %v278_v51 = vld [vmem:[%s6681_s26 + $0x648] sm:$0xff] }
  0x29   : > { %277 = vst [vmem:[%s6686_s27 + $0x190] sm:$0xff] %v276_v50  ;;  %v280_v52 = vld [vmem:[%s6681_s26 + $0x680] sm:$0xff]  ;;  %v282_v53 = vld [vmem:[%s6681_s26 + $0x688] sm:$0xff]  ;;  %279 = vst [vmem:[%s6686_s27 + $0x198] sm:$0xff] %v278_v51 }
  0x2a   : > { %281 = vst [vmem:[%s6686_s27 + $0x1a0] sm:$0xff] %v280_v52  ;;  %283 = vst [vmem:[%s6686_s27 + $0x1a8] sm:$0xff] %v282_v53  ;;  %v284_v54 = vld [vmem:[%s6681_s26 + $0x6c0] sm:$0xff]  ;;  %v286_v55 = vld [vmem:[%s6681_s26 + $0x6c8] sm:$0xff] }
  0x2b   : > { %v288_v56 = vld [vmem:[%s6681_s26 + $0x700] sm:$0xff]  ;;  %285 = vst [vmem:[%s6686_s27 + $0x1b0] sm:$0xff] %v284_v54  ;;  %287 = vst [vmem:[%s6686_s27 + $0x1b8] sm:$0xff] %v286_v55  ;;  %v290_v57 = vld [vmem:[%s6681_s26 + $0x708] sm:$0xff] }
  0x2c   : > { %289 = vst [vmem:[%s6686_s27 + $0x1c0] sm:$0xff] %v288_v56  ;;  %v292_v58 = vld [vmem:[%s6681_s26 + $0x740] sm:$0xff]  ;;  %v294_v59 = vld [vmem:[%s6681_s26 + $0x748] sm:$0xff]  ;;  %291 = vst [vmem:[%s6686_s27 + $0x1c8] sm:$0xff] %v290_v57 }
  0x2d   : > { %293 = vst [vmem:[%s6686_s27 + $0x1d0] sm:$0xff] %v292_v58  ;;  %295 = vst [vmem:[%s6686_s27 + $0x1d8] sm:$0xff] %v294_v59  ;;  %v296_v60 = vld [vmem:[%s6681_s26 + $0x780] sm:$0xff]  ;;  %v298_v61 = vld [vmem:[%s6681_s26 + $0x788] sm:$0xff] }
  0x2e   : > { %v300_v62 = vld [vmem:[%s6681_s26 + $0x7c0] sm:$0xff]  ;;  %297 = vst [vmem:[%s6686_s27 + $0x1e0] sm:$0xff] %v296_v60  ;;  %299 = vst [vmem:[%s6686_s27 + $0x1e8] sm:$0xff] %v298_v61  ;;  %v302_v63 = vld [vmem:[%s6681_s26 + $0x7c8] sm:$0xff] }
  0x2f   : > { %301 = vst [vmem:[%s6686_s27 + $0x1f0] sm:$0xff] %v300_v62  ;;  %v304_v0 = vld [vmem:[%s6681_s26 + $0x800] sm:$0xff]  ;;  %v306_v1 = vld [vmem:[%s6681_s26 + $0x808] sm:$0xff]  ;;  %303 = vst [vmem:[%s6686_s27 + $0x1f8] sm:$0xff] %v302_v63 }
  0x30   : > { %305 = vst [vmem:[%s6686_s27 + $0x200] sm:$0xff] %v304_v0  ;;  %307 = vst [vmem:[%s6686_s27 + $0x208] sm:$0xff] %v306_v1  ;;  %v308_v2 = vld [vmem:[%s6681_s26 + $0x840] sm:$0xff]  ;;  %v310_v3 = vld [vmem:[%s6681_s26 + $0x848] sm:$0xff] }
  0x31   : > { %v312_v4 = vld [vmem:[%s6681_s26 + $0x880] sm:$0xff]  ;;  %309 = vst [vmem:[%s6686_s27 + $0x210] sm:$0xff] %v308_v2  ;;  %311 = vst [vmem:[%s6686_s27 + $0x218] sm:$0xff] %v310_v3  ;;  %v314_v5 = vld [vmem:[%s6681_s26 + $0x888] sm:$0xff] }
  0x32   : > { %313 = vst [vmem:[%s6686_s27 + $0x220] sm:$0xff] %v312_v4  ;;  %v316_v6 = vld [vmem:[%s6681_s26 + $0x8c0] sm:$0xff]  ;;  %v318_v7 = vld [vmem:[%s6681_s26 + $0x8c8] sm:$0xff]  ;;  %315 = vst [vmem:[%s6686_s27 + $0x228] sm:$0xff] %v314_v5 }
  0x33   : > { %317 = vst [vmem:[%s6686_s27 + $0x230] sm:$0xff] %v316_v6  ;;  %319 = vst [vmem:[%s6686_s27 + $0x238] sm:$0xff] %v318_v7  ;;  %v320_v8 = vld [vmem:[%s6681_s26 + $0x900] sm:$0xff]  ;;  %v322_v9 = vld [vmem:[%s6681_s26 + $0x908] sm:$0xff] }
  0x34   : > { %v324_v10 = vld [vmem:[%s6681_s26 + $0x940] sm:$0xff]  ;;  %321 = vst [vmem:[%s6686_s27 + $0x240] sm:$0xff] %v320_v8  ;;  %323 = vst [vmem:[%s6686_s27 + $0x248] sm:$0xff] %v322_v9  ;;  %v326_v11 = vld [vmem:[%s6681_s26 + $0x948] sm:$0xff] }
  0x35   : > { %325 = vst [vmem:[%s6686_s27 + $0x250] sm:$0xff] %v324_v10  ;;  %v328_v12 = vld [vmem:[%s6681_s26 + $0x980] sm:$0xff]  ;;  %v330_v13 = vld [vmem:[%s6681_s26 + $0x988] sm:$0xff]  ;;  %327 = vst [vmem:[%s6686_s27 + $0x258] sm:$0xff] %v326_v11 }
  0x36   : > { %329 = vst [vmem:[%s6686_s27 + $0x260] sm:$0xff] %v328_v12  ;;  %331 = vst [vmem:[%s6686_s27 + $0x268] sm:$0xff] %v330_v13  ;;  %v332_v14 = vld [vmem:[%s6681_s26 + $0x9c0] sm:$0xff]  ;;  %v334_v15 = vld [vmem:[%s6681_s26 + $0x9c8] sm:$0xff] }
  0x37   : > { %v336_v16 = vld [vmem:[%s6681_s26 + $0xa00] sm:$0xff]  ;;  %333 = vst [vmem:[%s6686_s27 + $0x270] sm:$0xff] %v332_v14  ;;  %335 = vst [vmem:[%s6686_s27 + $0x278] sm:$0xff] %v334_v15  ;;  %v338_v17 = vld [vmem:[%s6681_s26 + $0xa08] sm:$0xff] }
  0x38   : > { %337 = vst [vmem:[%s6686_s27 + $0x280] sm:$0xff] %v336_v16  ;;  %v340_v18 = vld [vmem:[%s6681_s26 + $0xa40] sm:$0xff]  ;;  %v342_v19 = vld [vmem:[%s6681_s26 + $0xa48] sm:$0xff]  ;;  %339 = vst [vmem:[%s6686_s27 + $0x288] sm:$0xff] %v338_v17 }
  0x39   : > { %341 = vst [vmem:[%s6686_s27 + $0x290] sm:$0xff] %v340_v18  ;;  %343 = vst [vmem:[%s6686_s27 + $0x298] sm:$0xff] %v342_v19  ;;  %v344_v20 = vld [vmem:[%s6681_s26 + $0xa80] sm:$0xff]  ;;  %v346_v21 = vld [vmem:[%s6681_s26 + $0xa88] sm:$0xff] }
  0x3a   : > { %v348_v22 = vld [vmem:[%s6681_s26 + $0xac0] sm:$0xff]  ;;  %345 = vst [vmem:[%s6686_s27 + $0x2a0] sm:$0xff] %v344_v20  ;;  %347 = vst [vmem:[%s6686_s27 + $0x2a8] sm:$0xff] %v346_v21  ;;  %v350_v23 = vld [vmem:[%s6681_s26 + $0xac8] sm:$0xff] }
  0x3b   : > { %349 = vst [vmem:[%s6686_s27 + $0x2b0] sm:$0xff] %v348_v22  ;;  %v352_v24 = vld [vmem:[%s6681_s26 + $0xb00] sm:$0xff]  ;;  %v354_v25 = vld [vmem:[%s6681_s26 + $0xb08] sm:$0xff]  ;;  %351 = vst [vmem:[%s6686_s27 + $0x2b8] sm:$0xff] %v350_v23 }
  0x3c   : > { %353 = vst [vmem:[%s6686_s27 + $0x2c0] sm:$0xff] %v352_v24  ;;  %355 = vst [vmem:[%s6686_s27 + $0x2c8] sm:$0xff] %v354_v25  ;;  %v356_v26 = vld [vmem:[%s6681_s26 + $0xb40] sm:$0xff]  ;;  %v358_v27 = vld [vmem:[%s6681_s26 + $0xb48] sm:$0xff] }
  0x3d   : > { %v360_v28 = vld [vmem:[%s6681_s26 + $0xb80] sm:$0xff]  ;;  %357 = vst [vmem:[%s6686_s27 + $0x2d0] sm:$0xff] %v356_v26  ;;  %359 = vst [vmem:[%s6686_s27 + $0x2d8] sm:$0xff] %v358_v27  ;;  %v362_v29 = vld [vmem:[%s6681_s26 + $0xb88] sm:$0xff] }
  0x3e   : > { %361 = vst [vmem:[%s6686_s27 + $0x2e0] sm:$0xff] %v360_v28  ;;  %v364_v30 = vld [vmem:[%s6681_s26 + $0xbc0] sm:$0xff]  ;;  %v366_v31 = vld [vmem:[%s6681_s26 + $0xbc8] sm:$0xff]  ;;  %363 = vst [vmem:[%s6686_s27 + $0x2e8] sm:$0xff] %v362_v29 }
  0x3f   : > { %365 = vst [vmem:[%s6686_s27 + $0x2f0] sm:$0xff] %v364_v30  ;;  %367 = vst [vmem:[%s6686_s27 + $0x2f8] sm:$0xff] %v366_v31  ;;  %v368_v32 = vld [vmem:[%s6681_s26 + $0xc00] sm:$0xff]  ;;  %v370_v33 = vld [vmem:[%s6681_s26 + $0xc08] sm:$0xff] }
  0x40   : > { %v372_v34 = vld [vmem:[%s6681_s26 + $0xc40] sm:$0xff]  ;;  %369 = vst [vmem:[%s6686_s27 + $0x300] sm:$0xff] %v368_v32  ;;  %371 = vst [vmem:[%s6686_s27 + $0x308] sm:$0xff] %v370_v33  ;;  %v374_v35 = vld [vmem:[%s6681_s26 + $0xc48] sm:$0xff] }
  0x41   : > { %373 = vst [vmem:[%s6686_s27 + $0x310] sm:$0xff] %v372_v34  ;;  %v376_v36 = vld [vmem:[%s6681_s26 + $0xc80] sm:$0xff]  ;;  %v378_v37 = vld [vmem:[%s6681_s26 + $0xc88] sm:$0xff]  ;;  %375 = vst [vmem:[%s6686_s27 + $0x318] sm:$0xff] %v374_v35 }
  0x42   : > { %377 = vst [vmem:[%s6686_s27 + $0x320] sm:$0xff] %v376_v36  ;;  %379 = vst [vmem:[%s6686_s27 + $0x328] sm:$0xff] %v378_v37  ;;  %v380_v38 = vld [vmem:[%s6681_s26 + $0xcc0] sm:$0xff]  ;;  %v382_v39 = vld [vmem:[%s6681_s26 + $0xcc8] sm:$0xff] }
  0x43   : > { %v384_v40 = vld [vmem:[%s6681_s26 + $0xd00] sm:$0xff]  ;;  %381 = vst [vmem:[%s6686_s27 + $0x330] sm:$0xff] %v380_v38  ;;  %383 = vst [vmem:[%s6686_s27 + $0x338] sm:$0xff] %v382_v39  ;;  %v386_v41 = vld [vmem:[%s6681_s26 + $0xd08] sm:$0xff] }
  0x44   : > { %385 = vst [vmem:[%s6686_s27 + $0x340] sm:$0xff] %v384_v40  ;;  %v388_v42 = vld [vmem:[%s6681_s26 + $0xd40] sm:$0xff]  ;;  %v390_v43 = vld [vmem:[%s6681_s26 + $0xd48] sm:$0xff]  ;;  %387 = vst [vmem:[%s6686_s27 + $0x348] sm:$0xff] %v386_v41 }
  0x45   : > { %389 = vst [vmem:[%s6686_s27 + $0x350] sm:$0xff] %v388_v42  ;;  %391 = vst [vmem:[%s6686_s27 + $0x358] sm:$0xff] %v390_v43  ;;  %v392_v44 = vld [vmem:[%s6681_s26 + $0xd80] sm:$0xff]  ;;  %v394_v45 = vld [vmem:[%s6681_s26 + $0xd88] sm:$0xff] }
  0x46   : > { %v396_v46 = vld [vmem:[%s6681_s26 + $0xdc0] sm:$0xff]  ;;  %393 = vst [vmem:[%s6686_s27 + $0x360] sm:$0xff] %v392_v44  ;;  %395 = vst [vmem:[%s6686_s27 + $0x368] sm:$0xff] %v394_v45  ;;  %v398_v47 = vld [vmem:[%s6681_s26 + $0xdc8] sm:$0xff] }
  0x47   : > { %397 = vst [vmem:[%s6686_s27 + $0x370] sm:$0xff] %v396_v46  ;;  %v400_v48 = vld [vmem:[%s6681_s26 + $0xe00] sm:$0xff]  ;;  %v402_v49 = vld [vmem:[%s6681_s26 + $0xe08] sm:$0xff]  ;;  %399 = vst [vmem:[%s6686_s27 + $0x378] sm:$0xff] %v398_v47 }
  0x48   : > { %401 = vst [vmem:[%s6686_s27 + $0x380] sm:$0xff] %v400_v48  ;;  %403 = vst [vmem:[%s6686_s27 + $0x388] sm:$0xff] %v402_v49  ;;  %v404_v50 = vld [vmem:[%s6681_s26 + $0xe40] sm:$0xff]  ;;  %v406_v51 = vld [vmem:[%s6681_s26 + $0xe48] sm:$0xff] }
  0x49   : > { %v408_v52 = vld [vmem:[%s6681_s26 + $0xe80] sm:$0xff]  ;;  %405 = vst [vmem:[%s6686_s27 + $0x390] sm:$0xff] %v404_v50  ;;  %407 = vst [vmem:[%s6686_s27 + $0x398] sm:$0xff] %v406_v51  ;;  %v410_v53 = vld [vmem:[%s6681_s26 + $0xe88] sm:$0xff] }
  0x4a   : > { %409 = vst [vmem:[%s6686_s27 + $0x3a0] sm:$0xff] %v408_v52  ;;  %v412_v54 = vld [vmem:[%s6681_s26 + $0xec0] sm:$0xff]  ;;  %v414_v55 = vld [vmem:[%s6681_s26 + $0xec8] sm:$0xff]  ;;  %411 = vst [vmem:[%s6686_s27 + $0x3a8] sm:$0xff] %v410_v53 }
  0x4b   : > { %413 = vst [vmem:[%s6686_s27 + $0x3b0] sm:$0xff] %v412_v54  ;;  %415 = vst [vmem:[%s6686_s27 + $0x3b8] sm:$0xff] %v414_v55  ;;  %v416_v56 = vld [vmem:[%s6681_s26 + $0xf00] sm:$0xff]  ;;  %v418_v57 = vld [vmem:[%s6681_s26 + $0xf08] sm:$0xff] }
  0x4c   : > { %v420_v58 = vld [vmem:[%s6681_s26 + $0xf40] sm:$0xff]  ;;  %417 = vst [vmem:[%s6686_s27 + $0x3c0] sm:$0xff] %v416_v56  ;;  %419 = vst [vmem:[%s6686_s27 + $0x3c8] sm:$0xff] %v418_v57  ;;  %v422_v59 = vld [vmem:[%s6681_s26 + $0xf48] sm:$0xff] }
  0x4d   : > { %421 = vst [vmem:[%s6686_s27 + $0x3d0] sm:$0xff] %v420_v58  ;;  %v424_v60 = vld [vmem:[%s6681_s26 + $0xf80] sm:$0xff]  ;;  %v426_v61 = vld [vmem:[%s6681_s26 + $0xf88] sm:$0xff]  ;;  %423 = vst [vmem:[%s6686_s27 + $0x3d8] sm:$0xff] %v422_v59 }
  0x4e   : > { %425 = vst [vmem:[%s6686_s27 + $0x3e0] sm:$0xff] %v424_v60  ;;  %427 = vst [vmem:[%s6686_s27 + $0x3e8] sm:$0xff] %v426_v61  ;;  %v428_v62 = vld [vmem:[%s6681_s26 + $0xfc0] sm:$0xff]  ;;  %v430_v63 = vld [vmem:[%s6681_s26 + $0xfc8] sm:$0xff] }
  0x4f   : > { %v432_v0 = vld [vmem:[%s6681_s26 + $0x1000] sm:$0xff]  ;;  %429 = vst [vmem:[%s6686_s27 + $0x3f0] sm:$0xff] %v428_v62  ;;  %431 = vst [vmem:[%s6686_s27 + $0x3f8] sm:$0xff] %v430_v63  ;;  %v434_v1 = vld [vmem:[%s6681_s26 + $0x1008] sm:$0xff] }
  0x50   : > { %433 = vst [vmem:[%s6686_s27 + $0x400] sm:$0xff] %v432_v0  ;;  %v436_v2 = vld [vmem:[%s6681_s26 + $0x1040] sm:$0xff]  ;;  %v438_v3 = vld [vmem:[%s6681_s26 + $0x1048] sm:$0xff]  ;;  %435 = vst [vmem:[%s6686_s27 + $0x408] sm:$0xff] %v434_v1 }
  0x51   : > { %437 = vst [vmem:[%s6686_s27 + $0x410] sm:$0xff] %v436_v2  ;;  %439 = vst [vmem:[%s6686_s27 + $0x418] sm:$0xff] %v438_v3  ;;  %v440_v4 = vld [vmem:[%s6681_s26 + $0x1080] sm:$0xff]  ;;  %v442_v5 = vld [vmem:[%s6681_s26 + $0x1088] sm:$0xff] }
  0x52   : > { %v444_v6 = vld [vmem:[%s6681_s26 + $0x10c0] sm:$0xff]  ;;  %441 = vst [vmem:[%s6686_s27 + $0x420] sm:$0xff] %v440_v4  ;;  %443 = vst [vmem:[%s6686_s27 + $0x428] sm:$0xff] %v442_v5  ;;  %v446_v7 = vld [vmem:[%s6681_s26 + $0x10c8] sm:$0xff] }
  0x53   : > { %445 = vst [vmem:[%s6686_s27 + $0x430] sm:$0xff] %v444_v6  ;;  %v448_v8 = vld [vmem:[%s6681_s26 + $0x1100] sm:$0xff]  ;;  %v450_v9 = vld [vmem:[%s6681_s26 + $0x1108] sm:$0xff]  ;;  %447 = vst [vmem:[%s6686_s27 + $0x438] sm:$0xff] %v446_v7 }
  0x54   : > { %449 = vst [vmem:[%s6686_s27 + $0x440] sm:$0xff] %v448_v8  ;;  %451 = vst [vmem:[%s6686_s27 + $0x448] sm:$0xff] %v450_v9  ;;  %v452_v10 = vld [vmem:[%s6681_s26 + $0x1140] sm:$0xff]  ;;  %v454_v11 = vld [vmem:[%s6681_s26 + $0x1148] sm:$0xff] }
  0x55   : > { %v456_v12 = vld [vmem:[%s6681_s26 + $0x1180] sm:$0xff]  ;;  %453 = vst [vmem:[%s6686_s27 + $0x450] sm:$0xff] %v452_v10  ;;  %455 = vst [vmem:[%s6686_s27 + $0x458] sm:$0xff] %v454_v11  ;;  %v458_v13 = vld [vmem:[%s6681_s26 + $0x1188] sm:$0xff] }
  0x56   : > { %457 = vst [vmem:[%s6686_s27 + $0x460] sm:$0xff] %v456_v12  ;;  %v460_v14 = vld [vmem:[%s6681_s26 + $0x11c0] sm:$0xff]  ;;  %v462_v15 = vld [vmem:[%s6681_s26 + $0x11c8] sm:$0xff]  ;;  %459 = vst [vmem:[%s6686_s27 + $0x468] sm:$0xff] %v458_v13 }
  0x57   : > { %461 = vst [vmem:[%s6686_s27 + $0x470] sm:$0xff] %v460_v14  ;;  %463 = vst [vmem:[%s6686_s27 + $0x478] sm:$0xff] %v462_v15  ;;  %v464_v16 = vld [vmem:[%s6681_s26 + $0x1200] sm:$0xff]  ;;  %v466_v17 = vld [vmem:[%s6681_s26 + $0x1208] sm:$0xff] }
  0x58   : > { %v468_v18 = vld [vmem:[%s6681_s26 + $0x1240] sm:$0xff]  ;;  %465 = vst [vmem:[%s6686_s27 + $0x480] sm:$0xff] %v464_v16  ;;  %467 = vst [vmem:[%s6686_s27 + $0x488] sm:$0xff] %v466_v17  ;;  %v470_v19 = vld [vmem:[%s6681_s26 + $0x1248] sm:$0xff] }
  0x59   : > { %469 = vst [vmem:[%s6686_s27 + $0x490] sm:$0xff] %v468_v18  ;;  %v472_v20 = vld [vmem:[%s6681_s26 + $0x1280] sm:$0xff]  ;;  %v474_v21 = vld [vmem:[%s6681_s26 + $0x1288] sm:$0xff]  ;;  %471 = vst [vmem:[%s6686_s27 + $0x498] sm:$0xff] %v470_v19 }
  0x5a   : > { %473 = vst [vmem:[%s6686_s27 + $0x4a0] sm:$0xff] %v472_v20  ;;  %475 = vst [vmem:[%s6686_s27 + $0x4a8] sm:$0xff] %v474_v21  ;;  %v476_v22 = vld [vmem:[%s6681_s26 + $0x12c0] sm:$0xff]  ;;  %v478_v23 = vld [vmem:[%s6681_s26 + $0x12c8] sm:$0xff] }
  0x5b   : > { %v480_v24 = vld [vmem:[%s6681_s26 + $0x1300] sm:$0xff]  ;;  %477 = vst [vmem:[%s6686_s27 + $0x4b0] sm:$0xff] %v476_v22  ;;  %479 = vst [vmem:[%s6686_s27 + $0x4b8] sm:$0xff] %v478_v23  ;;  %v482_v25 = vld [vmem:[%s6681_s26 + $0x1308] sm:$0xff] }
  0x5c   : > { %481 = vst [vmem:[%s6686_s27 + $0x4c0] sm:$0xff] %v480_v24  ;;  %v484_v26 = vld [vmem:[%s6681_s26 + $0x1340] sm:$0xff]  ;;  %v486_v27 = vld [vmem:[%s6681_s26 + $0x1348] sm:$0xff]  ;;  %483 = vst [vmem:[%s6686_s27 + $0x4c8] sm:$0xff] %v482_v25 }
  0x5d   : > { %485 = vst [vmem:[%s6686_s27 + $0x4d0] sm:$0xff] %v484_v26  ;;  %487 = vst [vmem:[%s6686_s27 + $0x4d8] sm:$0xff] %v486_v27  ;;  %v488_v28 = vld [vmem:[%s6681_s26 + $0x1380] sm:$0xff]  ;;  %v490_v29 = vld [vmem:[%s6681_s26 + $0x1388] sm:$0xff] }
  0x5e   : > { %v492_v30 = vld [vmem:[%s6681_s26 + $0x13c0] sm:$0xff]  ;;  %489 = vst [vmem:[%s6686_s27 + $0x4e0] sm:$0xff] %v488_v28  ;;  %491 = vst [vmem:[%s6686_s27 + $0x4e8] sm:$0xff] %v490_v29  ;;  %v494_v31 = vld [vmem:[%s6681_s26 + $0x13c8] sm:$0xff] }
  0x5f   : > { %493 = vst [vmem:[%s6686_s27 + $0x4f0] sm:$0xff] %v492_v30  ;;  %v496_v32 = vld [vmem:[%s6681_s26 + $0x1400] sm:$0xff]  ;;  %v498_v33 = vld [vmem:[%s6681_s26 + $0x1408] sm:$0xff]  ;;  %495 = vst [vmem:[%s6686_s27 + $0x4f8] sm:$0xff] %v494_v31 }
  0x60   : > { %497 = vst [vmem:[%s6686_s27 + $0x500] sm:$0xff] %v496_v32  ;;  %499 = vst [vmem:[%s6686_s27 + $0x508] sm:$0xff] %v498_v33  ;;  %v500_v34 = vld [vmem:[%s6681_s26 + $0x1440] sm:$0xff]  ;;  %v502_v35 = vld [vmem:[%s6681_s26 + $0x1448] sm:$0xff] }
  0x61   : > { %v504_v36 = vld [vmem:[%s6681_s26 + $0x1480] sm:$0xff]  ;;  %501 = vst [vmem:[%s6686_s27 + $0x510] sm:$0xff] %v500_v34  ;;  %503 = vst [vmem:[%s6686_s27 + $0x518] sm:$0xff] %v502_v35  ;;  %v506_v37 = vld [vmem:[%s6681_s26 + $0x1488] sm:$0xff] }
  0x62   : > { %505 = vst [vmem:[%s6686_s27 + $0x520] sm:$0xff] %v504_v36  ;;  %v508_v38 = vld [vmem:[%s6681_s26 + $0x14c0] sm:$0xff]  ;;  %v510_v39 = vld [vmem:[%s6681_s26 + $0x14c8] sm:$0xff]  ;;  %507 = vst [vmem:[%s6686_s27 + $0x528] sm:$0xff] %v506_v37 }
  0x63   : > { %509 = vst [vmem:[%s6686_s27 + $0x530] sm:$0xff] %v508_v38  ;;  %511 = vst [vmem:[%s6686_s27 + $0x538] sm:$0xff] %v510_v39  ;;  %v512_v40 = vld [vmem:[%s6681_s26 + $0x1500] sm:$0xff]  ;;  %v514_v41 = vld [vmem:[%s6681_s26 + $0x1508] sm:$0xff] }
  0x64   : > { %v516_v42 = vld [vmem:[%s6681_s26 + $0x1540] sm:$0xff]  ;;  %513 = vst [vmem:[%s6686_s27 + $0x540] sm:$0xff] %v512_v40  ;;  %515 = vst [vmem:[%s6686_s27 + $0x548] sm:$0xff] %v514_v41  ;;  %v518_v43 = vld [vmem:[%s6681_s26 + $0x1548] sm:$0xff] }
  0x65   : > { %517 = vst [vmem:[%s6686_s27 + $0x550] sm:$0xff] %v516_v42  ;;  %v520_v44 = vld [vmem:[%s6681_s26 + $0x1580] sm:$0xff]  ;;  %v522_v45 = vld [vmem:[%s6681_s26 + $0x1588] sm:$0xff]  ;;  %519 = vst [vmem:[%s6686_s27 + $0x558] sm:$0xff] %v518_v43 }
  0x66   : > { %521 = vst [vmem:[%s6686_s27 + $0x560] sm:$0xff] %v520_v44  ;;  %523 = vst [vmem:[%s6686_s27 + $0x568] sm:$0xff] %v522_v45  ;;  %v524_v46 = vld [vmem:[%s6681_s26 + $0x15c0] sm:$0xff]  ;;  %v526_v47 = vld [vmem:[%s6681_s26 + $0x15c8] sm:$0xff] }
  0x67   : > { %v528_v48 = vld [vmem:[%s6681_s26 + $0x1600] sm:$0xff]  ;;  %525 = vst [vmem:[%s6686_s27 + $0x570] sm:$0xff] %v524_v46  ;;  %527 = vst [vmem:[%s6686_s27 + $0x578] sm:$0xff] %v526_v47  ;;  %v530_v49 = vld [vmem:[%s6681_s26 + $0x1608] sm:$0xff] }
  0x68   : > { %529 = vst [vmem:[%s6686_s27 + $0x580] sm:$0xff] %v528_v48  ;;  %v532_v50 = vld [vmem:[%s6681_s26 + $0x1640] sm:$0xff]  ;;  %v534_v51 = vld [vmem:[%s6681_s26 + $0x1648] sm:$0xff]  ;;  %531 = vst [vmem:[%s6686_s27 + $0x588] sm:$0xff] %v530_v49 }
  0x69   : > { %533 = vst [vmem:[%s6686_s27 + $0x590] sm:$0xff] %v532_v50  ;;  %535 = vst [vmem:[%s6686_s27 + $0x598] sm:$0xff] %v534_v51  ;;  %v536_v52 = vld [vmem:[%s6681_s26 + $0x1680] sm:$0xff]  ;;  %v538_v53 = vld [vmem:[%s6681_s26 + $0x1688] sm:$0xff] }
  0x6a   : > { %v540_v54 = vld [vmem:[%s6681_s26 + $0x16c0] sm:$0xff]  ;;  %537 = vst [vmem:[%s6686_s27 + $0x5a0] sm:$0xff] %v536_v52  ;;  %539 = vst [vmem:[%s6686_s27 + $0x5a8] sm:$0xff] %v538_v53  ;;  %v542_v55 = vld [vmem:[%s6681_s26 + $0x16c8] sm:$0xff] }
  0x6b   : > { %541 = vst [vmem:[%s6686_s27 + $0x5b0] sm:$0xff] %v540_v54  ;;  %v544_v56 = vld [vmem:[%s6681_s26 + $0x1700] sm:$0xff]  ;;  %v546_v57 = vld [vmem:[%s6681_s26 + $0x1708] sm:$0xff]  ;;  %543 = vst [vmem:[%s6686_s27 + $0x5b8] sm:$0xff] %v542_v55 }
  0x6c   : > { %545 = vst [vmem:[%s6686_s27 + $0x5c0] sm:$0xff] %v544_v56  ;;  %547 = vst [vmem:[%s6686_s27 + $0x5c8] sm:$0xff] %v546_v57  ;;  %v548_v58 = vld [vmem:[%s6681_s26 + $0x1740] sm:$0xff]  ;;  %v550_v59 = vld [vmem:[%s6681_s26 + $0x1748] sm:$0xff] }
  0x6d   : > { %v552_v60 = vld [vmem:[%s6681_s26 + $0x1780] sm:$0xff]  ;;  %549 = vst [vmem:[%s6686_s27 + $0x5d0] sm:$0xff] %v548_v58  ;;  %551 = vst [vmem:[%s6686_s27 + $0x5d8] sm:$0xff] %v550_v59  ;;  %v554_v61 = vld [vmem:[%s6681_s26 + $0x1788] sm:$0xff] }
  0x6e   : > { %553 = vst [vmem:[%s6686_s27 + $0x5e0] sm:$0xff] %v552_v60  ;;  %v556_v62 = vld [vmem:[%s6681_s26 + $0x17c0] sm:$0xff]  ;;  %v558_v63 = vld [vmem:[%s6681_s26 + $0x17c8] sm:$0xff]  ;;  %555 = vst [vmem:[%s6686_s27 + $0x5e8] sm:$0xff] %v554_v61 }
  0x6f   : > { %557 = vst [vmem:[%s6686_s27 + $0x5f0] sm:$0xff] %v556_v62  ;;  %559 = vst [vmem:[%s6686_s27 + $0x5f8] sm:$0xff] %v558_v63  ;;  %v560_v0 = vld [vmem:[%s6681_s26 + $0x1800] sm:$0xff]  ;;  %v562_v1 = vld [vmem:[%s6681_s26 + $0x1808] sm:$0xff] }
  0x70   : > { %v564_v2 = vld [vmem:[%s6681_s26 + $0x1840] sm:$0xff]  ;;  %561 = vst [vmem:[%s6686_s27 + $0x600] sm:$0xff] %v560_v0  ;;  %563 = vst [vmem:[%s6686_s27 + $0x608] sm:$0xff] %v562_v1  ;;  %v566_v3 = vld [vmem:[%s6681_s26 + $0x1848] sm:$0xff] }
  0x71   : > { %565 = vst [vmem:[%s6686_s27 + $0x610] sm:$0xff] %v564_v2  ;;  %v568_v4 = vld [vmem:[%s6681_s26 + $0x1880] sm:$0xff]  ;;  %v570_v5 = vld [vmem:[%s6681_s26 + $0x1888] sm:$0xff]  ;;  %567 = vst [vmem:[%s6686_s27 + $0x618] sm:$0xff] %v566_v3 }
  0x72   : > { %569 = vst [vmem:[%s6686_s27 + $0x620] sm:$0xff] %v568_v4  ;;  %571 = vst [vmem:[%s6686_s27 + $0x628] sm:$0xff] %v570_v5  ;;  %v572_v6 = vld [vmem:[%s6681_s26 + $0x18c0] sm:$0xff]  ;;  %v574_v7 = vld [vmem:[%s6681_s26 + $0x18c8] sm:$0xff] }
  0x73   : > { %v576_v8 = vld [vmem:[%s6681_s26 + $0x1900] sm:$0xff]  ;;  %573 = vst [vmem:[%s6686_s27 + $0x630] sm:$0xff] %v572_v6  ;;  %575 = vst [vmem:[%s6686_s27 + $0x638] sm:$0xff] %v574_v7  ;;  %v578_v9 = vld [vmem:[%s6681_s26 + $0x1908] sm:$0xff] }
  0x74   : > { %577 = vst [vmem:[%s6686_s27 + $0x640] sm:$0xff] %v576_v8  ;;  %v580_v10 = vld [vmem:[%s6681_s26 + $0x1940] sm:$0xff]  ;;  %v582_v11 = vld [vmem:[%s6681_s26 + $0x1948] sm:$0xff]  ;;  %579 = vst [vmem:[%s6686_s27 + $0x648] sm:$0xff] %v578_v9 }
  0x75   : > { %581 = vst [vmem:[%s6686_s27 + $0x650] sm:$0xff] %v580_v10  ;;  %583 = vst [vmem:[%s6686_s27 + $0x658] sm:$0xff] %v582_v11  ;;  %v584_v12 = vld [vmem:[%s6681_s26 + $0x1980] sm:$0xff]  ;;  %v586_v13 = vld [vmem:[%s6681_s26 + $0x1988] sm:$0xff] }
  0x76   : > { %v588_v14 = vld [vmem:[%s6681_s26 + $0x19c0] sm:$0xff]  ;;  %585 = vst [vmem:[%s6686_s27 + $0x660] sm:$0xff] %v584_v12  ;;  %587 = vst [vmem:[%s6686_s27 + $0x668] sm:$0xff] %v586_v13  ;;  %v590_v15 = vld [vmem:[%s6681_s26 + $0x19c8] sm:$0xff] }
  0x77   : > { %589 = vst [vmem:[%s6686_s27 + $0x670] sm:$0xff] %v588_v14  ;;  %v592_v16 = vld [vmem:[%s6681_s26 + $0x1a00] sm:$0xff]  ;;  %v594_v17 = vld [vmem:[%s6681_s26 + $0x1a08] sm:$0xff]  ;;  %591 = vst [vmem:[%s6686_s27 + $0x678] sm:$0xff] %v590_v15 }
  0x78   : > { %593 = vst [vmem:[%s6686_s27 + $0x680] sm:$0xff] %v592_v16  ;;  %595 = vst [vmem:[%s6686_s27 + $0x688] sm:$0xff] %v594_v17  ;;  %v596_v18 = vld [vmem:[%s6681_s26 + $0x1a40] sm:$0xff]  ;;  %v598_v19 = vld [vmem:[%s6681_s26 + $0x1a48] sm:$0xff] }
  0x79   : > { %v600_v20 = vld [vmem:[%s6681_s26 + $0x1a80] sm:$0xff]  ;;  %597 = vst [vmem:[%s6686_s27 + $0x690] sm:$0xff] %v596_v18  ;;  %599 = vst [vmem:[%s6686_s27 + $0x698] sm:$0xff] %v598_v19  ;;  %v602_v21 = vld [vmem:[%s6681_s26 + $0x1a88] sm:$0xff] }
  0x7a   : > { %601 = vst [vmem:[%s6686_s27 + $0x6a0] sm:$0xff] %v600_v20  ;;  %v604_v22 = vld [vmem:[%s6681_s26 + $0x1ac0] sm:$0xff]  ;;  %v606_v23 = vld [vmem:[%s6681_s26 + $0x1ac8] sm:$0xff]  ;;  %603 = vst [vmem:[%s6686_s27 + $0x6a8] sm:$0xff] %v602_v21 }
  0x7b   : > { %605 = vst [vmem:[%s6686_s27 + $0x6b0] sm:$0xff] %v604_v22  ;;  %607 = vst [vmem:[%s6686_s27 + $0x6b8] sm:$0xff] %v606_v23  ;;  %v608_v24 = vld [vmem:[%s6681_s26 + $0x1b00] sm:$0xff]  ;;  %v610_v25 = vld [vmem:[%s6681_s26 + $0x1b08] sm:$0xff] }
  0x7c   : > { %v612_v26 = vld [vmem:[%s6681_s26 + $0x1b40] sm:$0xff]  ;;  %609 = vst [vmem:[%s6686_s27 + $0x6c0] sm:$0xff] %v608_v24  ;;  %611 = vst [vmem:[%s6686_s27 + $0x6c8] sm:$0xff] %v610_v25  ;;  %v614_v27 = vld [vmem:[%s6681_s26 + $0x1b48] sm:$0xff] }
  0x7d   : > { %613 = vst [vmem:[%s6686_s27 + $0x6d0] sm:$0xff] %v612_v26  ;;  %v616_v28 = vld [vmem:[%s6681_s26 + $0x1b80] sm:$0xff]  ;;  %v618_v29 = vld [vmem:[%s6681_s26 + $0x1b88] sm:$0xff]  ;;  %615 = vst [vmem:[%s6686_s27 + $0x6d8] sm:$0xff] %v614_v27 }
  0x7e   : > { %617 = vst [vmem:[%s6686_s27 + $0x6e0] sm:$0xff] %v616_v28  ;;  %619 = vst [vmem:[%s6686_s27 + $0x6e8] sm:$0xff] %v618_v29  ;;  %v620_v30 = vld [vmem:[%s6681_s26 + $0x1bc0] sm:$0xff]  ;;  %v622_v31 = vld [vmem:[%s6681_s26 + $0x1bc8] sm:$0xff] }
  0x7f   : > { %v624_v32 = vld [vmem:[%s6681_s26 + $0x1c00] sm:$0xff]  ;;  %621 = vst [vmem:[%s6686_s27 + $0x6f0] sm:$0xff] %v620_v30  ;;  %623 = vst [vmem:[%s6686_s27 + $0x6f8] sm:$0xff] %v622_v31  ;;  %v626_v33 = vld [vmem:[%s6681_s26 + $0x1c08] sm:$0xff] }
  0x80   : > { %625 = vst [vmem:[%s6686_s27 + $0x700] sm:$0xff] %v624_v32  ;;  %v628_v34 = vld [vmem:[%s6681_s26 + $0x1c40] sm:$0xff]  ;;  %v630_v35 = vld [vmem:[%s6681_s26 + $0x1c48] sm:$0xff]  ;;  %627 = vst [vmem:[%s6686_s27 + $0x708] sm:$0xff] %v626_v33 }
  0x81   : > { %629 = vst [vmem:[%s6686_s27 + $0x710] sm:$0xff] %v628_v34  ;;  %631 = vst [vmem:[%s6686_s27 + $0x718] sm:$0xff] %v630_v35  ;;  %v632_v36 = vld [vmem:[%s6681_s26 + $0x1c80] sm:$0xff]  ;;  %v634_v37 = vld [vmem:[%s6681_s26 + $0x1c88] sm:$0xff] }
  0x82   : > { %v636_v38 = vld [vmem:[%s6681_s26 + $0x1cc0] sm:$0xff]  ;;  %633 = vst [vmem:[%s6686_s27 + $0x720] sm:$0xff] %v632_v36  ;;  %635 = vst [vmem:[%s6686_s27 + $0x728] sm:$0xff] %v634_v37  ;;  %v638_v39 = vld [vmem:[%s6681_s26 + $0x1cc8] sm:$0xff] }
  0x83   : > { %637 = vst [vmem:[%s6686_s27 + $0x730] sm:$0xff] %v636_v38  ;;  %v640_v40 = vld [vmem:[%s6681_s26 + $0x1d00] sm:$0xff]  ;;  %v642_v41 = vld [vmem:[%s6681_s26 + $0x1d08] sm:$0xff]  ;;  %639 = vst [vmem:[%s6686_s27 + $0x738] sm:$0xff] %v638_v39 }
  0x84   : > { %641 = vst [vmem:[%s6686_s27 + $0x740] sm:$0xff] %v640_v40  ;;  %643 = vst [vmem:[%s6686_s27 + $0x748] sm:$0xff] %v642_v41  ;;  %v644_v42 = vld [vmem:[%s6681_s26 + $0x1d40] sm:$0xff]  ;;  %v646_v43 = vld [vmem:[%s6681_s26 + $0x1d48] sm:$0xff] }
  0x85   : > { %v648_v44 = vld [vmem:[%s6681_s26 + $0x1d80] sm:$0xff]  ;;  %645 = vst [vmem:[%s6686_s27 + $0x750] sm:$0xff] %v644_v42  ;;  %647 = vst [vmem:[%s6686_s27 + $0x758] sm:$0xff] %v646_v43  ;;  %v650_v45 = vld [vmem:[%s6681_s26 + $0x1d88] sm:$0xff] }
  0x86   : > { %649 = vst [vmem:[%s6686_s27 + $0x760] sm:$0xff] %v648_v44  ;;  %v652_v46 = vld [vmem:[%s6681_s26 + $0x1dc0] sm:$0xff]  ;;  %v654_v47 = vld [vmem:[%s6681_s26 + $0x1dc8] sm:$0xff]  ;;  %651 = vst [vmem:[%s6686_s27 + $0x768] sm:$0xff] %v650_v45 }
  0x87   : > { %653 = vst [vmem:[%s6686_s27 + $0x770] sm:$0xff] %v652_v46  ;;  %655 = vst [vmem:[%s6686_s27 + $0x778] sm:$0xff] %v654_v47  ;;  %v656_v48 = vld [vmem:[%s6681_s26 + $0x1e00] sm:$0xff]  ;;  %v658_v49 = vld [vmem:[%s6681_s26 + $0x1e08] sm:$0xff] }
  0x88   : > { %v660_v50 = vld [vmem:[%s6681_s26 + $0x1e40] sm:$0xff]  ;;  %657 = vst [vmem:[%s6686_s27 + $0x780] sm:$0xff] %v656_v48  ;;  %659 = vst [vmem:[%s6686_s27 + $0x788] sm:$0xff] %v658_v49  ;;  %v662_v51 = vld [vmem:[%s6681_s26 + $0x1e48] sm:$0xff] }
  0x89   : > { %661 = vst [vmem:[%s6686_s27 + $0x790] sm:$0xff] %v660_v50  ;;  %v664_v52 = vld [vmem:[%s6681_s26 + $0x1e80] sm:$0xff]  ;;  %v666_v53 = vld [vmem:[%s6681_s26 + $0x1e88] sm:$0xff]  ;;  %663 = vst [vmem:[%s6686_s27 + $0x798] sm:$0xff] %v662_v51 }
  0x8a   : > { %665 = vst [vmem:[%s6686_s27 + $0x7a0] sm:$0xff] %v664_v52  ;;  %667 = vst [vmem:[%s6686_s27 + $0x7a8] sm:$0xff] %v666_v53  ;;  %v668_v54 = vld [vmem:[%s6681_s26 + $0x1ec0] sm:$0xff]  ;;  %v670_v55 = vld [vmem:[%s6681_s26 + $0x1ec8] sm:$0xff] }
  0x8b   : > { %v672_v56 = vld [vmem:[%s6681_s26 + $0x1f00] sm:$0xff]  ;;  %669 = vst [vmem:[%s6686_s27 + $0x7b0] sm:$0xff] %v668_v54  ;;  %671 = vst [vmem:[%s6686_s27 + $0x7b8] sm:$0xff] %v670_v55  ;;  %v674_v57 = vld [vmem:[%s6681_s26 + $0x1f08] sm:$0xff] }
  0x8c   : > { %673 = vst [vmem:[%s6686_s27 + $0x7c0] sm:$0xff] %v672_v56  ;;  %v676_v58 = vld [vmem:[%s6681_s26 + $0x1f40] sm:$0xff]  ;;  %v678_v59 = vld [vmem:[%s6681_s26 + $0x1f48] sm:$0xff]  ;;  %675 = vst [vmem:[%s6686_s27 + $0x7c8] sm:$0xff] %v674_v57 }
  0x8d   : > { %677 = vst [vmem:[%s6686_s27 + $0x7d0] sm:$0xff] %v676_v58  ;;  %679 = vst [vmem:[%s6686_s27 + $0x7d8] sm:$0xff] %v678_v59  ;;  %v680_v60 = vld [vmem:[%s6681_s26 + $0x1f80] sm:$0xff]  ;;  %v682_v61 = vld [vmem:[%s6681_s26 + $0x1f88] sm:$0xff] }
  0x8e   : > { %v684_v62 = vld [vmem:[%s6681_s26 + $0x1fc0] sm:$0xff]  ;;  %681 = vst [vmem:[%s6686_s27 + $0x7e0] sm:$0xff] %v680_v60  ;;  %683 = vst [vmem:[%s6686_s27 + $0x7e8] sm:$0xff] %v682_v61  ;;  %v686_v63 = vld [vmem:[%s6681_s26 + $0x1fc8] sm:$0xff] }
  0x8f   : > { %685 = vst [vmem:[%s6686_s27 + $0x7f0] sm:$0xff] %v684_v62  ;;  %v688_v0 = vld [vmem:[%s6681_s26 + $0x2000] sm:$0xff]  ;;  %v690_v1 = vld [vmem:[%s6681_s26 + $0x2008] sm:$0xff]  ;;  %687 = vst [vmem:[%s6686_s27 + $0x7f8] sm:$0xff] %v686_v63 }
  0x90   : > { %689 = vst [vmem:[%s6686_s27 + $0x800] sm:$0xff] %v688_v0  ;;  %691 = vst [vmem:[%s6686_s27 + $0x808] sm:$0xff] %v690_v1  ;;  %v692_v2 = vld [vmem:[%s6681_s26 + $0x2040] sm:$0xff]  ;;  %v694_v3 = vld [vmem:[%s6681_s26 + $0x2048] sm:$0xff] }
  0x91   : > { %v696_v4 = vld [vmem:[%s6681_s26 + $0x2080] sm:$0xff]  ;;  %693 = vst [vmem:[%s6686_s27 + $0x810] sm:$0xff] %v692_v2  ;;  %695 = vst [vmem:[%s6686_s27 + $0x818] sm:$0xff] %v694_v3  ;;  %v698_v5 = vld [vmem:[%s6681_s26 + $0x2088] sm:$0xff] }
  0x92   : > { %697 = vst [vmem:[%s6686_s27 + $0x820] sm:$0xff] %v696_v4  ;;  %v700_v6 = vld [vmem:[%s6681_s26 + $0x20c0] sm:$0xff]  ;;  %v702_v7 = vld [vmem:[%s6681_s26 + $0x20c8] sm:$0xff]  ;;  %699 = vst [vmem:[%s6686_s27 + $0x828] sm:$0xff] %v698_v5 }
  0x93   : > { %701 = vst [vmem:[%s6686_s27 + $0x830] sm:$0xff] %v700_v6  ;;  %703 = vst [vmem:[%s6686_s27 + $0x838] sm:$0xff] %v702_v7  ;;  %v704_v8 = vld [vmem:[%s6681_s26 + $0x2100] sm:$0xff]  ;;  %v706_v9 = vld [vmem:[%s6681_s26 + $0x2108] sm:$0xff] }
  0x94   : > { %v708_v10 = vld [vmem:[%s6681_s26 + $0x2140] sm:$0xff]  ;;  %705 = vst [vmem:[%s6686_s27 + $0x840] sm:$0xff] %v704_v8  ;;  %707 = vst [vmem:[%s6686_s27 + $0x848] sm:$0xff] %v706_v9  ;;  %v710_v11 = vld [vmem:[%s6681_s26 + $0x2148] sm:$0xff] }
  0x95   : > { %709 = vst [vmem:[%s6686_s27 + $0x850] sm:$0xff] %v708_v10  ;;  %v712_v12 = vld [vmem:[%s6681_s26 + $0x2180] sm:$0xff]  ;;  %v714_v13 = vld [vmem:[%s6681_s26 + $0x2188] sm:$0xff]  ;;  %711 = vst [vmem:[%s6686_s27 + $0x858] sm:$0xff] %v710_v11 }
  0x96   : > { %713 = vst [vmem:[%s6686_s27 + $0x860] sm:$0xff] %v712_v12  ;;  %715 = vst [vmem:[%s6686_s27 + $0x868] sm:$0xff] %v714_v13  ;;  %v716_v14 = vld [vmem:[%s6681_s26 + $0x21c0] sm:$0xff]  ;;  %v718_v15 = vld [vmem:[%s6681_s26 + $0x21c8] sm:$0xff] }
  0x97   : > { %v720_v16 = vld [vmem:[%s6681_s26 + $0x2200] sm:$0xff]  ;;  %717 = vst [vmem:[%s6686_s27 + $0x870] sm:$0xff] %v716_v14  ;;  %719 = vst [vmem:[%s6686_s27 + $0x878] sm:$0xff] %v718_v15  ;;  %v722_v17 = vld [vmem:[%s6681_s26 + $0x2208] sm:$0xff] }
  0x98   : > { %721 = vst [vmem:[%s6686_s27 + $0x880] sm:$0xff] %v720_v16  ;;  %v724_v18 = vld [vmem:[%s6681_s26 + $0x2240] sm:$0xff]  ;;  %v726_v19 = vld [vmem:[%s6681_s26 + $0x2248] sm:$0xff]  ;;  %723 = vst [vmem:[%s6686_s27 + $0x888] sm:$0xff] %v722_v17 }
  0x99   : > { %725 = vst [vmem:[%s6686_s27 + $0x890] sm:$0xff] %v724_v18  ;;  %727 = vst [vmem:[%s6686_s27 + $0x898] sm:$0xff] %v726_v19  ;;  %v728_v20 = vld [vmem:[%s6681_s26 + $0x2280] sm:$0xff]  ;;  %v730_v21 = vld [vmem:[%s6681_s26 + $0x2288] sm:$0xff] }
  0x9a   : > { %v732_v22 = vld [vmem:[%s6681_s26 + $0x22c0] sm:$0xff]  ;;  %729 = vst [vmem:[%s6686_s27 + $0x8a0] sm:$0xff] %v728_v20  ;;  %731 = vst [vmem:[%s6686_s27 + $0x8a8] sm:$0xff] %v730_v21  ;;  %v734_v23 = vld [vmem:[%s6681_s26 + $0x22c8] sm:$0xff] }
  0x9b   : > { %733 = vst [vmem:[%s6686_s27 + $0x8b0] sm:$0xff] %v732_v22  ;;  %v736_v24 = vld [vmem:[%s6681_s26 + $0x2300] sm:$0xff]  ;;  %v738_v25 = vld [vmem:[%s6681_s26 + $0x2308] sm:$0xff]  ;;  %735 = vst [vmem:[%s6686_s27 + $0x8b8] sm:$0xff] %v734_v23 }
  0x9c   : > { %737 = vst [vmem:[%s6686_s27 + $0x8c0] sm:$0xff] %v736_v24  ;;  %739 = vst [vmem:[%s6686_s27 + $0x8c8] sm:$0xff] %v738_v25  ;;  %v740_v26 = vld [vmem:[%s6681_s26 + $0x2340] sm:$0xff]  ;;  %v742_v27 = vld [vmem:[%s6681_s26 + $0x2348] sm:$0xff] }
  0x9d   : > { %v744_v28 = vld [vmem:[%s6681_s26 + $0x2380] sm:$0xff]  ;;  %741 = vst [vmem:[%s6686_s27 + $0x8d0] sm:$0xff] %v740_v26  ;;  %743 = vst [vmem:[%s6686_s27 + $0x8d8] sm:$0xff] %v742_v27  ;;  %v746_v29 = vld [vmem:[%s6681_s26 + $0x2388] sm:$0xff] }
  0x9e   : > { %745 = vst [vmem:[%s6686_s27 + $0x8e0] sm:$0xff] %v744_v28  ;;  %v748_v30 = vld [vmem:[%s6681_s26 + $0x23c0] sm:$0xff]  ;;  %v750_v31 = vld [vmem:[%s6681_s26 + $0x23c8] sm:$0xff]  ;;  %747 = vst [vmem:[%s6686_s27 + $0x8e8] sm:$0xff] %v746_v29 }
  0x9f   : > { %749 = vst [vmem:[%s6686_s27 + $0x8f0] sm:$0xff] %v748_v30  ;;  %751 = vst [vmem:[%s6686_s27 + $0x8f8] sm:$0xff] %v750_v31  ;;  %v752_v32 = vld [vmem:[%s6681_s26 + $0x2400] sm:$0xff]  ;;  %v754_v33 = vld [vmem:[%s6681_s26 + $0x2408] sm:$0xff] }
  0xa0   : > { %v756_v34 = vld [vmem:[%s6681_s26 + $0x2440] sm:$0xff]  ;;  %753 = vst [vmem:[%s6686_s27 + $0x900] sm:$0xff] %v752_v32  ;;  %755 = vst [vmem:[%s6686_s27 + $0x908] sm:$0xff] %v754_v33  ;;  %v758_v35 = vld [vmem:[%s6681_s26 + $0x2448] sm:$0xff] }
  0xa1   : > { %757 = vst [vmem:[%s6686_s27 + $0x910] sm:$0xff] %v756_v34  ;;  %v760_v36 = vld [vmem:[%s6681_s26 + $0x2480] sm:$0xff]  ;;  %v762_v37 = vld [vmem:[%s6681_s26 + $0x2488] sm:$0xff]  ;;  %759 = vst [vmem:[%s6686_s27 + $0x918] sm:$0xff] %v758_v35 }
  0xa2   : > { %761 = vst [vmem:[%s6686_s27 + $0x920] sm:$0xff] %v760_v36  ;;  %763 = vst [vmem:[%s6686_s27 + $0x928] sm:$0xff] %v762_v37  ;;  %v764_v38 = vld [vmem:[%s6681_s26 + $0x24c0] sm:$0xff]  ;;  %v766_v39 = vld [vmem:[%s6681_s26 + $0x24c8] sm:$0xff] }
  0xa3   : > { %v768_v40 = vld [vmem:[%s6681_s26 + $0x2500] sm:$0xff]  ;;  %765 = vst [vmem:[%s6686_s27 + $0x930] sm:$0xff] %v764_v38  ;;  %767 = vst [vmem:[%s6686_s27 + $0x938] sm:$0xff] %v766_v39  ;;  %v770_v41 = vld [vmem:[%s6681_s26 + $0x2508] sm:$0xff] }
  0xa4   : > { %769 = vst [vmem:[%s6686_s27 + $0x940] sm:$0xff] %v768_v40  ;;  %v772_v42 = vld [vmem:[%s6681_s26 + $0x2540] sm:$0xff]  ;;  %v774_v43 = vld [vmem:[%s6681_s26 + $0x2548] sm:$0xff]  ;;  %771 = vst [vmem:[%s6686_s27 + $0x948] sm:$0xff] %v770_v41 }
  0xa5   : > { %773 = vst [vmem:[%s6686_s27 + $0x950] sm:$0xff] %v772_v42  ;;  %775 = vst [vmem:[%s6686_s27 + $0x958] sm:$0xff] %v774_v43  ;;  %v776_v44 = vld [vmem:[%s6681_s26 + $0x2580] sm:$0xff]  ;;  %v778_v45 = vld [vmem:[%s6681_s26 + $0x2588] sm:$0xff] }
  0xa6   : > { %v780_v46 = vld [vmem:[%s6681_s26 + $0x25c0] sm:$0xff]  ;;  %777 = vst [vmem:[%s6686_s27 + $0x960] sm:$0xff] %v776_v44  ;;  %779 = vst [vmem:[%s6686_s27 + $0x968] sm:$0xff] %v778_v45  ;;  %v782_v47 = vld [vmem:[%s6681_s26 + $0x25c8] sm:$0xff] }
  0xa7   : > { %781 = vst [vmem:[%s6686_s27 + $0x970] sm:$0xff] %v780_v46  ;;  %v784_v48 = vld [vmem:[%s6681_s26 + $0x2600] sm:$0xff]  ;;  %v786_v49 = vld [vmem:[%s6681_s26 + $0x2608] sm:$0xff]  ;;  %783 = vst [vmem:[%s6686_s27 + $0x978] sm:$0xff] %v782_v47 }
  0xa8   : > { %785 = vst [vmem:[%s6686_s27 + $0x980] sm:$0xff] %v784_v48  ;;  %787 = vst [vmem:[%s6686_s27 + $0x988] sm:$0xff] %v786_v49  ;;  %v788_v50 = vld [vmem:[%s6681_s26 + $0x2640] sm:$0xff]  ;;  %v790_v51 = vld [vmem:[%s6681_s26 + $0x2648] sm:$0xff] }
  0xa9   : > { %v792_v52 = vld [vmem:[%s6681_s26 + $0x2680] sm:$0xff]  ;;  %789 = vst [vmem:[%s6686_s27 + $0x990] sm:$0xff] %v788_v50  ;;  %791 = vst [vmem:[%s6686_s27 + $0x998] sm:$0xff] %v790_v51  ;;  %v794_v53 = vld [vmem:[%s6681_s26 + $0x2688] sm:$0xff] }
  0xaa   : > { %793 = vst [vmem:[%s6686_s27 + $0x9a0] sm:$0xff] %v792_v52  ;;  %v796_v54 = vld [vmem:[%s6681_s26 + $0x26c0] sm:$0xff]  ;;  %v798_v55 = vld [vmem:[%s6681_s26 + $0x26c8] sm:$0xff]  ;;  %795 = vst [vmem:[%s6686_s27 + $0x9a8] sm:$0xff] %v794_v53 }
  0xab   : > { %797 = vst [vmem:[%s6686_s27 + $0x9b0] sm:$0xff] %v796_v54  ;;  %799 = vst [vmem:[%s6686_s27 + $0x9b8] sm:$0xff] %v798_v55  ;;  %v800_v56 = vld [vmem:[%s6681_s26 + $0x2700] sm:$0xff]  ;;  %v802_v57 = vld [vmem:[%s6681_s26 + $0x2708] sm:$0xff] }
  0xac   : > { %v804_v58 = vld [vmem:[%s6681_s26 + $0x2740] sm:$0xff]  ;;  %801 = vst [vmem:[%s6686_s27 + $0x9c0] sm:$0xff] %v800_v56  ;;  %803 = vst [vmem:[%s6686_s27 + $0x9c8] sm:$0xff] %v802_v57  ;;  %v806_v59 = vld [vmem:[%s6681_s26 + $0x2748] sm:$0xff] }
  0xad   : > { %805 = vst [vmem:[%s6686_s27 + $0x9d0] sm:$0xff] %v804_v58  ;;  %v808_v60 = vld [vmem:[%s6681_s26 + $0x2780] sm:$0xff]  ;;  %v810_v61 = vld [vmem:[%s6681_s26 + $0x2788] sm:$0xff]  ;;  %807 = vst [vmem:[%s6686_s27 + $0x9d8] sm:$0xff] %v806_v59 }
  0xae   : > { %809 = vst [vmem:[%s6686_s27 + $0x9e0] sm:$0xff] %v808_v60  ;;  %811 = vst [vmem:[%s6686_s27 + $0x9e8] sm:$0xff] %v810_v61  ;;  %v812_v62 = vld [vmem:[%s6681_s26 + $0x27c0] sm:$0xff]  ;;  %v814_v63 = vld [vmem:[%s6681_s26 + $0x27c8] sm:$0xff] }
  0xaf   : > { %v816_v0 = vld [vmem:[%s6681_s26 + $0x2800] sm:$0xff]  ;;  %813 = vst [vmem:[%s6686_s27 + $0x9f0] sm:$0xff] %v812_v62  ;;  %815 = vst [vmem:[%s6686_s27 + $0x9f8] sm:$0xff] %v814_v63  ;;  %v818_v1 = vld [vmem:[%s6681_s26 + $0x2808] sm:$0xff] }
  0xb0   : > { %817 = vst [vmem:[%s6686_s27 + $0xa00] sm:$0xff] %v816_v0  ;;  %v820_v2 = vld [vmem:[%s6681_s26 + $0x2840] sm:$0xff]  ;;  %v822_v3 = vld [vmem:[%s6681_s26 + $0x2848] sm:$0xff]  ;;  %819 = vst [vmem:[%s6686_s27 + $0xa08] sm:$0xff] %v818_v1 }
  0xb1   : > { %821 = vst [vmem:[%s6686_s27 + $0xa10] sm:$0xff] %v820_v2  ;;  %823 = vst [vmem:[%s6686_s27 + $0xa18] sm:$0xff] %v822_v3  ;;  %v824_v4 = vld [vmem:[%s6681_s26 + $0x2880] sm:$0xff]  ;;  %v826_v5 = vld [vmem:[%s6681_s26 + $0x2888] sm:$0xff] }
  0xb2   : > { %v828_v6 = vld [vmem:[%s6681_s26 + $0x28c0] sm:$0xff]  ;;  %825 = vst [vmem:[%s6686_s27 + $0xa20] sm:$0xff] %v824_v4  ;;  %827 = vst [vmem:[%s6686_s27 + $0xa28] sm:$0xff] %v826_v5  ;;  %v830_v7 = vld [vmem:[%s6681_s26 + $0x28c8] sm:$0xff] }
  0xb3   : > { %829 = vst [vmem:[%s6686_s27 + $0xa30] sm:$0xff] %v828_v6  ;;  %v832_v8 = vld [vmem:[%s6681_s26 + $0x2900] sm:$0xff]  ;;  %v834_v9 = vld [vmem:[%s6681_s26 + $0x2908] sm:$0xff]  ;;  %831 = vst [vmem:[%s6686_s27 + $0xa38] sm:$0xff] %v830_v7 }
  0xb4   : > { %833 = vst [vmem:[%s6686_s27 + $0xa40] sm:$0xff] %v832_v8  ;;  %835 = vst [vmem:[%s6686_s27 + $0xa48] sm:$0xff] %v834_v9  ;;  %v836_v10 = vld [vmem:[%s6681_s26 + $0x2940] sm:$0xff]  ;;  %v838_v11 = vld [vmem:[%s6681_s26 + $0x2948] sm:$0xff] }
  0xb5   : > { %v840_v12 = vld [vmem:[%s6681_s26 + $0x2980] sm:$0xff]  ;;  %837 = vst [vmem:[%s6686_s27 + $0xa50] sm:$0xff] %v836_v10  ;;  %839 = vst [vmem:[%s6686_s27 + $0xa58] sm:$0xff] %v838_v11  ;;  %v842_v13 = vld [vmem:[%s6681_s26 + $0x2988] sm:$0xff] }
  0xb6   : > { %841 = vst [vmem:[%s6686_s27 + $0xa60] sm:$0xff] %v840_v12  ;;  %v844_v14 = vld [vmem:[%s6681_s26 + $0x29c0] sm:$0xff]  ;;  %v846_v15 = vld [vmem:[%s6681_s26 + $0x29c8] sm:$0xff]  ;;  %843 = vst [vmem:[%s6686_s27 + $0xa68] sm:$0xff] %v842_v13 }
  0xb7   : > { %845 = vst [vmem:[%s6686_s27 + $0xa70] sm:$0xff] %v844_v14  ;;  %847 = vst [vmem:[%s6686_s27 + $0xa78] sm:$0xff] %v846_v15  ;;  %v848_v16 = vld [vmem:[%s6681_s26 + $0x2a00] sm:$0xff]  ;;  %v850_v17 = vld [vmem:[%s6681_s26 + $0x2a08] sm:$0xff] }
  0xb8   : > { %v852_v18 = vld [vmem:[%s6681_s26 + $0x2a40] sm:$0xff]  ;;  %849 = vst [vmem:[%s6686_s27 + $0xa80] sm:$0xff] %v848_v16  ;;  %851 = vst [vmem:[%s6686_s27 + $0xa88] sm:$0xff] %v850_v17  ;;  %v854_v19 = vld [vmem:[%s6681_s26 + $0x2a48] sm:$0xff] }
  0xb9   : > { %853 = vst [vmem:[%s6686_s27 + $0xa90] sm:$0xff] %v852_v18  ;;  %v856_v20 = vld [vmem:[%s6681_s26 + $0x2a80] sm:$0xff]  ;;  %v858_v21 = vld [vmem:[%s6681_s26 + $0x2a88] sm:$0xff]  ;;  %855 = vst [vmem:[%s6686_s27 + $0xa98] sm:$0xff] %v854_v19 }
  0xba   : > { %857 = vst [vmem:[%s6686_s27 + $0xaa0] sm:$0xff] %v856_v20  ;;  %859 = vst [vmem:[%s6686_s27 + $0xaa8] sm:$0xff] %v858_v21  ;;  %v860_v22 = vld [vmem:[%s6681_s26 + $0x2ac0] sm:$0xff]  ;;  %v862_v23 = vld [vmem:[%s6681_s26 + $0x2ac8] sm:$0xff] }
  0xbb   : > { %v864_v24 = vld [vmem:[%s6681_s26 + $0x2b00] sm:$0xff]  ;;  %861 = vst [vmem:[%s6686_s27 + $0xab0] sm:$0xff] %v860_v22  ;;  %863 = vst [vmem:[%s6686_s27 + $0xab8] sm:$0xff] %v862_v23  ;;  %v866_v25 = vld [vmem:[%s6681_s26 + $0x2b08] sm:$0xff] }
  0xbc   : > { %865 = vst [vmem:[%s6686_s27 + $0xac0] sm:$0xff] %v864_v24  ;;  %v868_v26 = vld [vmem:[%s6681_s26 + $0x2b40] sm:$0xff]  ;;  %v870_v27 = vld [vmem:[%s6681_s26 + $0x2b48] sm:$0xff]  ;;  %867 = vst [vmem:[%s6686_s27 + $0xac8] sm:$0xff] %v866_v25 }
  0xbd   : > { %869 = vst [vmem:[%s6686_s27 + $0xad0] sm:$0xff] %v868_v26  ;;  %871 = vst [vmem:[%s6686_s27 + $0xad8] sm:$0xff] %v870_v27  ;;  %v872_v28 = vld [vmem:[%s6681_s26 + $0x2b80] sm:$0xff]  ;;  %v874_v29 = vld [vmem:[%s6681_s26 + $0x2b88] sm:$0xff] }
  0xbe   : > { %v876_v30 = vld [vmem:[%s6681_s26 + $0x2bc0] sm:$0xff]  ;;  %873 = vst [vmem:[%s6686_s27 + $0xae0] sm:$0xff] %v872_v28  ;;  %875 = vst [vmem:[%s6686_s27 + $0xae8] sm:$0xff] %v874_v29  ;;  %v878_v31 = vld [vmem:[%s6681_s26 + $0x2bc8] sm:$0xff] }
  0xbf   : > { %877 = vst [vmem:[%s6686_s27 + $0xaf0] sm:$0xff] %v876_v30  ;;  %v880_v32 = vld [vmem:[%s6681_s26 + $0x2c00] sm:$0xff]  ;;  %v882_v33 = vld [vmem:[%s6681_s26 + $0x2c08] sm:$0xff]  ;;  %879 = vst [vmem:[%s6686_s27 + $0xaf8] sm:$0xff] %v878_v31 }
  0xc0   : > { %881 = vst [vmem:[%s6686_s27 + $0xb00] sm:$0xff] %v880_v32  ;;  %883 = vst [vmem:[%s6686_s27 + $0xb08] sm:$0xff] %v882_v33  ;;  %v884_v34 = vld [vmem:[%s6681_s26 + $0x2c40] sm:$0xff]  ;;  %v886_v35 = vld [vmem:[%s6681_s26 + $0x2c48] sm:$0xff] }
  0xc1   : > { %v888_v36 = vld [vmem:[%s6681_s26 + $0x2c80] sm:$0xff]  ;;  %885 = vst [vmem:[%s6686_s27 + $0xb10] sm:$0xff] %v884_v34  ;;  %887 = vst [vmem:[%s6686_s27 + $0xb18] sm:$0xff] %v886_v35  ;;  %v890_v37 = vld [vmem:[%s6681_s26 + $0x2c88] sm:$0xff] }
  0xc2   : > { %889 = vst [vmem:[%s6686_s27 + $0xb20] sm:$0xff] %v888_v36  ;;  %v892_v38 = vld [vmem:[%s6681_s26 + $0x2cc0] sm:$0xff]  ;;  %v894_v39 = vld [vmem:[%s6681_s26 + $0x2cc8] sm:$0xff]  ;;  %891 = vst [vmem:[%s6686_s27 + $0xb28] sm:$0xff] %v890_v37 }
  0xc3   : > { %893 = vst [vmem:[%s6686_s27 + $0xb30] sm:$0xff] %v892_v38  ;;  %895 = vst [vmem:[%s6686_s27 + $0xb38] sm:$0xff] %v894_v39  ;;  %v896_v40 = vld [vmem:[%s6681_s26 + $0x2d00] sm:$0xff]  ;;  %v898_v41 = vld [vmem:[%s6681_s26 + $0x2d08] sm:$0xff] }
  0xc4   : > { %v900_v42 = vld [vmem:[%s6681_s26 + $0x2d40] sm:$0xff]  ;;  %897 = vst [vmem:[%s6686_s27 + $0xb40] sm:$0xff] %v896_v40  ;;  %899 = vst [vmem:[%s6686_s27 + $0xb48] sm:$0xff] %v898_v41  ;;  %v902_v43 = vld [vmem:[%s6681_s26 + $0x2d48] sm:$0xff] }
  0xc5   : > { %901 = vst [vmem:[%s6686_s27 + $0xb50] sm:$0xff] %v900_v42  ;;  %v904_v44 = vld [vmem:[%s6681_s26 + $0x2d80] sm:$0xff]  ;;  %v906_v45 = vld [vmem:[%s6681_s26 + $0x2d88] sm:$0xff]  ;;  %903 = vst [vmem:[%s6686_s27 + $0xb58] sm:$0xff] %v902_v43 }
  0xc6   : > { %905 = vst [vmem:[%s6686_s27 + $0xb60] sm:$0xff] %v904_v44  ;;  %907 = vst [vmem:[%s6686_s27 + $0xb68] sm:$0xff] %v906_v45  ;;  %v908_v46 = vld [vmem:[%s6681_s26 + $0x2dc0] sm:$0xff]  ;;  %v910_v47 = vld [vmem:[%s6681_s26 + $0x2dc8] sm:$0xff] }
  0xc7   : > { %v912_v48 = vld [vmem:[%s6681_s26 + $0x2e00] sm:$0xff]  ;;  %909 = vst [vmem:[%s6686_s27 + $0xb70] sm:$0xff] %v908_v46  ;;  %911 = vst [vmem:[%s6686_s27 + $0xb78] sm:$0xff] %v910_v47  ;;  %v914_v49 = vld [vmem:[%s6681_s26 + $0x2e08] sm:$0xff] }
  0xc8   : > { %913 = vst [vmem:[%s6686_s27 + $0xb80] sm:$0xff] %v912_v48  ;;  %v916_v50 = vld [vmem:[%s6681_s26 + $0x2e40] sm:$0xff]  ;;  %v918_v51 = vld [vmem:[%s6681_s26 + $0x2e48] sm:$0xff]  ;;  %915 = vst [vmem:[%s6686_s27 + $0xb88] sm:$0xff] %v914_v49 }
  0xc9   : > { %917 = vst [vmem:[%s6686_s27 + $0xb90] sm:$0xff] %v916_v50  ;;  %919 = vst [vmem:[%s6686_s27 + $0xb98] sm:$0xff] %v918_v51  ;;  %v920_v52 = vld [vmem:[%s6681_s26 + $0x2e80] sm:$0xff]  ;;  %v922_v53 = vld [vmem:[%s6681_s26 + $0x2e88] sm:$0xff] }
  0xca   : > { %v924_v54 = vld [vmem:[%s6681_s26 + $0x2ec0] sm:$0xff]  ;;  %921 = vst [vmem:[%s6686_s27 + $0xba0] sm:$0xff] %v920_v52  ;;  %923 = vst [vmem:[%s6686_s27 + $0xba8] sm:$0xff] %v922_v53  ;;  %v926_v55 = vld [vmem:[%s6681_s26 + $0x2ec8] sm:$0xff] }
  0xcb   : > { %925 = vst [vmem:[%s6686_s27 + $0xbb0] sm:$0xff] %v924_v54  ;;  %v928_v56 = vld [vmem:[%s6681_s26 + $0x2f00] sm:$0xff]  ;;  %v930_v57 = vld [vmem:[%s6681_s26 + $0x2f08] sm:$0xff]  ;;  %927 = vst [vmem:[%s6686_s27 + $0xbb8] sm:$0xff] %v926_v55 }
  0xcc   : > { %929 = vst [vmem:[%s6686_s27 + $0xbc0] sm:$0xff] %v928_v56  ;;  %931 = vst [vmem:[%s6686_s27 + $0xbc8] sm:$0xff] %v930_v57  ;;  %v932_v58 = vld [vmem:[%s6681_s26 + $0x2f40] sm:$0xff]  ;;  %v934_v59 = vld [vmem:[%s6681_s26 + $0x2f48] sm:$0xff] }
  0xcd   : > { %v936_v60 = vld [vmem:[%s6681_s26 + $0x2f80] sm:$0xff]  ;;  %933 = vst [vmem:[%s6686_s27 + $0xbd0] sm:$0xff] %v932_v58  ;;  %935 = vst [vmem:[%s6686_s27 + $0xbd8] sm:$0xff] %v934_v59  ;;  %v938_v61 = vld [vmem:[%s6681_s26 + $0x2f88] sm:$0xff] }
  0xce   : > { %937 = vst [vmem:[%s6686_s27 + $0xbe0] sm:$0xff] %v936_v60  ;;  %v940_v62 = vld [vmem:[%s6681_s26 + $0x2fc0] sm:$0xff]  ;;  %v942_v63 = vld [vmem:[%s6681_s26 + $0x2fc8] sm:$0xff]  ;;  %939 = vst [vmem:[%s6686_s27 + $0xbe8] sm:$0xff] %v938_v61 }
  0xcf   : > { %941 = vst [vmem:[%s6686_s27 + $0xbf0] sm:$0xff] %v940_v62  ;;  %943 = vst [vmem:[%s6686_s27 + $0xbf8] sm:$0xff] %v942_v63  ;;  %v944_v0 = vld [vmem:[%s6681_s26 + $0x3000] sm:$0xff]  ;;  %v946_v1 = vld [vmem:[%s6681_s26 + $0x3008] sm:$0xff] }
  0xd0   : > { %v948_v2 = vld [vmem:[%s6681_s26 + $0x3040] sm:$0xff]  ;;  %945 = vst [vmem:[%s6686_s27 + $0xc00] sm:$0xff] %v944_v0  ;;  %947 = vst [vmem:[%s6686_s27 + $0xc08] sm:$0xff] %v946_v1  ;;  %v950_v3 = vld [vmem:[%s6681_s26 + $0x3048] sm:$0xff] }
  0xd1   : > { %949 = vst [vmem:[%s6686_s27 + $0xc10] sm:$0xff] %v948_v2  ;;  %v952_v4 = vld [vmem:[%s6681_s26 + $0x3080] sm:$0xff]  ;;  %v954_v5 = vld [vmem:[%s6681_s26 + $0x3088] sm:$0xff]  ;;  %951 = vst [vmem:[%s6686_s27 + $0xc18] sm:$0xff] %v950_v3 }
  0xd2   : > { %953 = vst [vmem:[%s6686_s27 + $0xc20] sm:$0xff] %v952_v4  ;;  %955 = vst [vmem:[%s6686_s27 + $0xc28] sm:$0xff] %v954_v5  ;;  %v956_v6 = vld [vmem:[%s6681_s26 + $0x30c0] sm:$0xff]  ;;  %v958_v7 = vld [vmem:[%s6681_s26 + $0x30c8] sm:$0xff] }
  0xd3   : > { %v960_v8 = vld [vmem:[%s6681_s26 + $0x3100] sm:$0xff]  ;;  %957 = vst [vmem:[%s6686_s27 + $0xc30] sm:$0xff] %v956_v6  ;;  %959 = vst [vmem:[%s6686_s27 + $0xc38] sm:$0xff] %v958_v7  ;;  %v962_v9 = vld [vmem:[%s6681_s26 + $0x3108] sm:$0xff] }
  0xd4   : > { %961 = vst [vmem:[%s6686_s27 + $0xc40] sm:$0xff] %v960_v8  ;;  %v964_v10 = vld [vmem:[%s6681_s26 + $0x3140] sm:$0xff]  ;;  %v966_v11 = vld [vmem:[%s6681_s26 + $0x3148] sm:$0xff]  ;;  %963 = vst [vmem:[%s6686_s27 + $0xc48] sm:$0xff] %v962_v9 }
  0xd5   : > { %965 = vst [vmem:[%s6686_s27 + $0xc50] sm:$0xff] %v964_v10  ;;  %967 = vst [vmem:[%s6686_s27 + $0xc58] sm:$0xff] %v966_v11  ;;  %v968_v12 = vld [vmem:[%s6681_s26 + $0x3180] sm:$0xff]  ;;  %v970_v13 = vld [vmem:[%s6681_s26 + $0x3188] sm:$0xff] }
  0xd6   : > { %v972_v14 = vld [vmem:[%s6681_s26 + $0x31c0] sm:$0xff]  ;;  %969 = vst [vmem:[%s6686_s27 + $0xc60] sm:$0xff] %v968_v12  ;;  %971 = vst [vmem:[%s6686_s27 + $0xc68] sm:$0xff] %v970_v13  ;;  %v974_v15 = vld [vmem:[%s6681_s26 + $0x31c8] sm:$0xff] }
  0xd7   : > { %973 = vst [vmem:[%s6686_s27 + $0xc70] sm:$0xff] %v972_v14  ;;  %v976_v16 = vld [vmem:[%s6681_s26 + $0x3200] sm:$0xff]  ;;  %v978_v17 = vld [vmem:[%s6681_s26 + $0x3208] sm:$0xff]  ;;  %975 = vst [vmem:[%s6686_s27 + $0xc78] sm:$0xff] %v974_v15 }
  0xd8   : > { %977 = vst [vmem:[%s6686_s27 + $0xc80] sm:$0xff] %v976_v16  ;;  %979 = vst [vmem:[%s6686_s27 + $0xc88] sm:$0xff] %v978_v17  ;;  %v980_v18 = vld [vmem:[%s6681_s26 + $0x3240] sm:$0xff]  ;;  %v982_v19 = vld [vmem:[%s6681_s26 + $0x3248] sm:$0xff] }
  0xd9   : > { %v984_v20 = vld [vmem:[%s6681_s26 + $0x3280] sm:$0xff]  ;;  %981 = vst [vmem:[%s6686_s27 + $0xc90] sm:$0xff] %v980_v18  ;;  %983 = vst [vmem:[%s6686_s27 + $0xc98] sm:$0xff] %v982_v19  ;;  %v986_v21 = vld [vmem:[%s6681_s26 + $0x3288] sm:$0xff] }
  0xda   : > { %985 = vst [vmem:[%s6686_s27 + $0xca0] sm:$0xff] %v984_v20  ;;  %v988_v22 = vld [vmem:[%s6681_s26 + $0x32c0] sm:$0xff]  ;;  %v990_v23 = vld [vmem:[%s6681_s26 + $0x32c8] sm:$0xff]  ;;  %987 = vst [vmem:[%s6686_s27 + $0xca8] sm:$0xff] %v986_v21 }
  0xdb   : > { %989 = vst [vmem:[%s6686_s27 + $0xcb0] sm:$0xff] %v988_v22  ;;  %991 = vst [vmem:[%s6686_s27 + $0xcb8] sm:$0xff] %v990_v23  ;;  %v992_v24 = vld [vmem:[%s6681_s26 + $0x3300] sm:$0xff]  ;;  %v994_v25 = vld [vmem:[%s6681_s26 + $0x3308] sm:$0xff] }
  0xdc   : > { %v996_v26 = vld [vmem:[%s6681_s26 + $0x3340] sm:$0xff]  ;;  %993 = vst [vmem:[%s6686_s27 + $0xcc0] sm:$0xff] %v992_v24  ;;  %995 = vst [vmem:[%s6686_s27 + $0xcc8] sm:$0xff] %v994_v25  ;;  %v998_v27 = vld [vmem:[%s6681_s26 + $0x3348] sm:$0xff] }
  0xdd   : > { %997 = vst [vmem:[%s6686_s27 + $0xcd0] sm:$0xff] %v996_v26  ;;  %v1000_v28 = vld [vmem:[%s6681_s26 + $0x3380] sm:$0xff]  ;;  %v1002_v29 = vld [vmem:[%s6681_s26 + $0x3388] sm:$0xff]  ;;  %999 = vst [vmem:[%s6686_s27 + $0xcd8] sm:$0xff] %v998_v27 }
  0xde   : > { %1001 = vst [vmem:[%s6686_s27 + $0xce0] sm:$0xff] %v1000_v28  ;;  %1003 = vst [vmem:[%s6686_s27 + $0xce8] sm:$0xff] %v1002_v29  ;;  %v1004_v30 = vld [vmem:[%s6681_s26 + $0x33c0] sm:$0xff]  ;;  %v1006_v31 = vld [vmem:[%s6681_s26 + $0x33c8] sm:$0xff] }
  0xdf   : > { %v1008_v32 = vld [vmem:[%s6681_s26 + $0x3400] sm:$0xff]  ;;  %1005 = vst [vmem:[%s6686_s27 + $0xcf0] sm:$0xff] %v1004_v30  ;;  %1007 = vst [vmem:[%s6686_s27 + $0xcf8] sm:$0xff] %v1006_v31  ;;  %v1010_v33 = vld [vmem:[%s6681_s26 + $0x3408] sm:$0xff] }
  0xe0   : > { %1009 = vst [vmem:[%s6686_s27 + $0xd00] sm:$0xff] %v1008_v32  ;;  %v1012_v34 = vld [vmem:[%s6681_s26 + $0x3440] sm:$0xff]  ;;  %v1014_v35 = vld [vmem:[%s6681_s26 + $0x3448] sm:$0xff]  ;;  %1011 = vst [vmem:[%s6686_s27 + $0xd08] sm:$0xff] %v1010_v33 }
  0xe1   : > { %1013 = vst [vmem:[%s6686_s27 + $0xd10] sm:$0xff] %v1012_v34  ;;  %1015 = vst [vmem:[%s6686_s27 + $0xd18] sm:$0xff] %v1014_v35  ;;  %v1016_v36 = vld [vmem:[%s6681_s26 + $0x3480] sm:$0xff]  ;;  %v1018_v37 = vld [vmem:[%s6681_s26 + $0x3488] sm:$0xff] }
  0xe2   : > { %v1020_v38 = vld [vmem:[%s6681_s26 + $0x34c0] sm:$0xff]  ;;  %1017 = vst [vmem:[%s6686_s27 + $0xd20] sm:$0xff] %v1016_v36  ;;  %1019 = vst [vmem:[%s6686_s27 + $0xd28] sm:$0xff] %v1018_v37  ;;  %v1022_v39 = vld [vmem:[%s6681_s26 + $0x34c8] sm:$0xff] }
  0xe3   : > { %1021 = vst [vmem:[%s6686_s27 + $0xd30] sm:$0xff] %v1020_v38  ;;  %v1024_v40 = vld [vmem:[%s6681_s26 + $0x3500] sm:$0xff]  ;;  %v1026_v41 = vld [vmem:[%s6681_s26 + $0x3508] sm:$0xff]  ;;  %1023 = vst [vmem:[%s6686_s27 + $0xd38] sm:$0xff] %v1022_v39 }
  0xe4   : > { %1025 = vst [vmem:[%s6686_s27 + $0xd40] sm:$0xff] %v1024_v40  ;;  %1027 = vst [vmem:[%s6686_s27 + $0xd48] sm:$0xff] %v1026_v41  ;;  %v1028_v42 = vld [vmem:[%s6681_s26 + $0x3540] sm:$0xff]  ;;  %v1030_v43 = vld [vmem:[%s6681_s26 + $0x3548] sm:$0xff] }
  0xe5   : > { %v1032_v44 = vld [vmem:[%s6681_s26 + $0x3580] sm:$0xff]  ;;  %1029 = vst [vmem:[%s6686_s27 + $0xd50] sm:$0xff] %v1028_v42  ;;  %1031 = vst [vmem:[%s6686_s27 + $0xd58] sm:$0xff] %v1030_v43  ;;  %v1034_v45 = vld [vmem:[%s6681_s26 + $0x3588] sm:$0xff] }
  0xe6   : > { %1033 = vst [vmem:[%s6686_s27 + $0xd60] sm:$0xff] %v1032_v44  ;;  %v1036_v46 = vld [vmem:[%s6681_s26 + $0x35c0] sm:$0xff]  ;;  %v1038_v47 = vld [vmem:[%s6681_s26 + $0x35c8] sm:$0xff]  ;;  %1035 = vst [vmem:[%s6686_s27 + $0xd68] sm:$0xff] %v1034_v45 }
  0xe7   : > { %1037 = vst [vmem:[%s6686_s27 + $0xd70] sm:$0xff] %v1036_v46  ;;  %1039 = vst [vmem:[%s6686_s27 + $0xd78] sm:$0xff] %v1038_v47  ;;  %v1040_v48 = vld [vmem:[%s6681_s26 + $0x3600] sm:$0xff]  ;;  %v1042_v49 = vld [vmem:[%s6681_s26 + $0x3608] sm:$0xff] }
  0xe8   : > { %v1044_v50 = vld [vmem:[%s6681_s26 + $0x3640] sm:$0xff]  ;;  %1041 = vst [vmem:[%s6686_s27 + $0xd80] sm:$0xff] %v1040_v48  ;;  %1043 = vst [vmem:[%s6686_s27 + $0xd88] sm:$0xff] %v1042_v49  ;;  %v1046_v51 = vld [vmem:[%s6681_s26 + $0x3648] sm:$0xff] }
  0xe9   : > { %1045 = vst [vmem:[%s6686_s27 + $0xd90] sm:$0xff] %v1044_v50  ;;  %v1048_v52 = vld [vmem:[%s6681_s26 + $0x3680] sm:$0xff]  ;;  %v1050_v53 = vld [vmem:[%s6681_s26 + $0x3688] sm:$0xff]  ;;  %1047 = vst [vmem:[%s6686_s27 + $0xd98] sm:$0xff] %v1046_v51 }
  0xea   : > { %1049 = vst [vmem:[%s6686_s27 + $0xda0] sm:$0xff] %v1048_v52  ;;  %1051 = vst [vmem:[%s6686_s27 + $0xda8] sm:$0xff] %v1050_v53  ;;  %v1052_v54 = vld [vmem:[%s6681_s26 + $0x36c0] sm:$0xff]  ;;  %v1054_v55 = vld [vmem:[%s6681_s26 + $0x36c8] sm:$0xff] }
  0xeb   : > { %v1056_v56 = vld [vmem:[%s6681_s26 + $0x3700] sm:$0xff]  ;;  %1053 = vst [vmem:[%s6686_s27 + $0xdb0] sm:$0xff] %v1052_v54  ;;  %1055 = vst [vmem:[%s6686_s27 + $0xdb8] sm:$0xff] %v1054_v55  ;;  %v1058_v57 = vld [vmem:[%s6681_s26 + $0x3708] sm:$0xff] }
  0xec   : > { %1057 = vst [vmem:[%s6686_s27 + $0xdc0] sm:$0xff] %v1056_v56  ;;  %v1060_v58 = vld [vmem:[%s6681_s26 + $0x3740] sm:$0xff]  ;;  %v1062_v59 = vld [vmem:[%s6681_s26 + $0x3748] sm:$0xff]  ;;  %1059 = vst [vmem:[%s6686_s27 + $0xdc8] sm:$0xff] %v1058_v57 }
  0xed   : > { %1061 = vst [vmem:[%s6686_s27 + $0xdd0] sm:$0xff] %v1060_v58  ;;  %1063 = vst [vmem:[%s6686_s27 + $0xdd8] sm:$0xff] %v1062_v59  ;;  %v1064_v60 = vld [vmem:[%s6681_s26 + $0x3780] sm:$0xff]  ;;  %v1066_v61 = vld [vmem:[%s6681_s26 + $0x3788] sm:$0xff] }
  0xee   : > { %v1068_v62 = vld [vmem:[%s6681_s26 + $0x37c0] sm:$0xff]  ;;  %1065 = vst [vmem:[%s6686_s27 + $0xde0] sm:$0xff] %v1064_v60  ;;  %1067 = vst [vmem:[%s6686_s27 + $0xde8] sm:$0xff] %v1066_v61  ;;  %v1070_v63 = vld [vmem:[%s6681_s26 + $0x37c8] sm:$0xff] }
  0xef   : > { %1069 = vst [vmem:[%s6686_s27 + $0xdf0] sm:$0xff] %v1068_v62  ;;  %v1072_v0 = vld [vmem:[%s6681_s26 + $0x3800] sm:$0xff]  ;;  %v1074_v1 = vld [vmem:[%s6681_s26 + $0x3808] sm:$0xff]  ;;  %1071 = vst [vmem:[%s6686_s27 + $0xdf8] sm:$0xff] %v1070_v63 }
  0xf0   : > { %1073 = vst [vmem:[%s6686_s27 + $0xe00] sm:$0xff] %v1072_v0  ;;  %1075 = vst [vmem:[%s6686_s27 + $0xe08] sm:$0xff] %v1074_v1  ;;  %v1076_v2 = vld [vmem:[%s6681_s26 + $0x3840] sm:$0xff]  ;;  %v1078_v3 = vld [vmem:[%s6681_s26 + $0x3848] sm:$0xff] }
  0xf1   : > { %v1080_v4 = vld [vmem:[%s6681_s26 + $0x3880] sm:$0xff]  ;;  %1077 = vst [vmem:[%s6686_s27 + $0xe10] sm:$0xff] %v1076_v2  ;;  %1079 = vst [vmem:[%s6686_s27 + $0xe18] sm:$0xff] %v1078_v3  ;;  %v1082_v5 = vld [vmem:[%s6681_s26 + $0x3888] sm:$0xff] }
  0xf2   : > { %1081 = vst [vmem:[%s6686_s27 + $0xe20] sm:$0xff] %v1080_v4  ;;  %v1084_v6 = vld [vmem:[%s6681_s26 + $0x38c0] sm:$0xff]  ;;  %v1086_v7 = vld [vmem:[%s6681_s26 + $0x38c8] sm:$0xff]  ;;  %1083 = vst [vmem:[%s6686_s27 + $0xe28] sm:$0xff] %v1082_v5 }
  0xf3   : > { %1085 = vst [vmem:[%s6686_s27 + $0xe30] sm:$0xff] %v1084_v6  ;;  %1087 = vst [vmem:[%s6686_s27 + $0xe38] sm:$0xff] %v1086_v7  ;;  %v1088_v8 = vld [vmem:[%s6681_s26 + $0x3900] sm:$0xff]  ;;  %v1090_v9 = vld [vmem:[%s6681_s26 + $0x3908] sm:$0xff] }
  0xf4   : > { %v1092_v10 = vld [vmem:[%s6681_s26 + $0x3940] sm:$0xff]  ;;  %1089 = vst [vmem:[%s6686_s27 + $0xe40] sm:$0xff] %v1088_v8  ;;  %1091 = vst [vmem:[%s6686_s27 + $0xe48] sm:$0xff] %v1090_v9  ;;  %v1094_v11 = vld [vmem:[%s6681_s26 + $0x3948] sm:$0xff] }
  0xf5   : > { %1093 = vst [vmem:[%s6686_s27 + $0xe50] sm:$0xff] %v1092_v10  ;;  %v1096_v12 = vld [vmem:[%s6681_s26 + $0x3980] sm:$0xff]  ;;  %v1098_v13 = vld [vmem:[%s6681_s26 + $0x3988] sm:$0xff]  ;;  %1095 = vst [vmem:[%s6686_s27 + $0xe58] sm:$0xff] %v1094_v11 }
  0xf6   : > { %1097 = vst [vmem:[%s6686_s27 + $0xe60] sm:$0xff] %v1096_v12  ;;  %1099 = vst [vmem:[%s6686_s27 + $0xe68] sm:$0xff] %v1098_v13  ;;  %v1100_v14 = vld [vmem:[%s6681_s26 + $0x39c0] sm:$0xff]  ;;  %v1102_v15 = vld [vmem:[%s6681_s26 + $0x39c8] sm:$0xff] }
  0xf7   : > { %v1104_v16 = vld [vmem:[%s6681_s26 + $0x3a00] sm:$0xff]  ;;  %1101 = vst [vmem:[%s6686_s27 + $0xe70] sm:$0xff] %v1100_v14  ;;  %1103 = vst [vmem:[%s6686_s27 + $0xe78] sm:$0xff] %v1102_v15  ;;  %v1106_v17 = vld [vmem:[%s6681_s26 + $0x3a08] sm:$0xff] }
  0xf8   : > { %1105 = vst [vmem:[%s6686_s27 + $0xe80] sm:$0xff] %v1104_v16  ;;  %v1108_v18 = vld [vmem:[%s6681_s26 + $0x3a40] sm:$0xff]  ;;  %v1110_v19 = vld [vmem:[%s6681_s26 + $0x3a48] sm:$0xff]  ;;  %1107 = vst [vmem:[%s6686_s27 + $0xe88] sm:$0xff] %v1106_v17 }
  0xf9   : > { %1109 = vst [vmem:[%s6686_s27 + $0xe90] sm:$0xff] %v1108_v18  ;;  %1111 = vst [vmem:[%s6686_s27 + $0xe98] sm:$0xff] %v1110_v19  ;;  %v1112_v20 = vld [vmem:[%s6681_s26 + $0x3a80] sm:$0xff]  ;;  %v1114_v21 = vld [vmem:[%s6681_s26 + $0x3a88] sm:$0xff] }
  0xfa   : > { %v1116_v22 = vld [vmem:[%s6681_s26 + $0x3ac0] sm:$0xff]  ;;  %1113 = vst [vmem:[%s6686_s27 + $0xea0] sm:$0xff] %v1112_v20  ;;  %1115 = vst [vmem:[%s6686_s27 + $0xea8] sm:$0xff] %v1114_v21  ;;  %v1118_v23 = vld [vmem:[%s6681_s26 + $0x3ac8] sm:$0xff] }
  0xfb   : > { %1117 = vst [vmem:[%s6686_s27 + $0xeb0] sm:$0xff] %v1116_v22  ;;  %v1120_v24 = vld [vmem:[%s6681_s26 + $0x3b00] sm:$0xff]  ;;  %v1122_v25 = vld [vmem:[%s6681_s26 + $0x3b08] sm:$0xff]  ;;  %1119 = vst [vmem:[%s6686_s27 + $0xeb8] sm:$0xff] %v1118_v23 }
  0xfc   : > { %1121 = vst [vmem:[%s6686_s27 + $0xec0] sm:$0xff] %v1120_v24  ;;  %1123 = vst [vmem:[%s6686_s27 + $0xec8] sm:$0xff] %v1122_v25  ;;  %v1124_v26 = vld [vmem:[%s6681_s26 + $0x3b40] sm:$0xff]  ;;  %v1126_v27 = vld [vmem:[%s6681_s26 + $0x3b48] sm:$0xff] }
  0xfd   : > { %v1128_v28 = vld [vmem:[%s6681_s26 + $0x3b80] sm:$0xff]  ;;  %1125 = vst [vmem:[%s6686_s27 + $0xed0] sm:$0xff] %v1124_v26  ;;  %1127 = vst [vmem:[%s6686_s27 + $0xed8] sm:$0xff] %v1126_v27  ;;  %v1130_v29 = vld [vmem:[%s6681_s26 + $0x3b88] sm:$0xff] }
  0xfe   : > { %1129 = vst [vmem:[%s6686_s27 + $0xee0] sm:$0xff] %v1128_v28  ;;  %v1132_v30 = vld [vmem:[%s6681_s26 + $0x3bc0] sm:$0xff]  ;;  %v1134_v31 = vld [vmem:[%s6681_s26 + $0x3bc8] sm:$0xff]  ;;  %1131 = vst [vmem:[%s6686_s27 + $0xee8] sm:$0xff] %v1130_v29 }
  0xff   : > { %1133 = vst [vmem:[%s6686_s27 + $0xef0] sm:$0xff] %v1132_v30  ;;  %1135 = vst [vmem:[%s6686_s27 + $0xef8] sm:$0xff] %v1134_v31  ;;  %v1136_v32 = vld [vmem:[%s6681_s26 + $0x3c00] sm:$0xff]  ;;  %v1138_v33 = vld [vmem:[%s6681_s26 + $0x3c08] sm:$0xff] }
 0x100   : > { %v1140_v34 = vld [vmem:[%s6681_s26 + $0x3c40] sm:$0xff]  ;;  %1137 = vst [vmem:[%s6686_s27 + $0xf00] sm:$0xff] %v1136_v32  ;;  %1139 = vst [vmem:[%s6686_s27 + $0xf08] sm:$0xff] %v1138_v33  ;;  %v1142_v35 = vld [vmem:[%s6681_s26 + $0x3c48] sm:$0xff] }
 0x101   : > { %1141 = vst [vmem:[%s6686_s27 + $0xf10] sm:$0xff] %v1140_v34  ;;  %v1144_v36 = vld [vmem:[%s6681_s26 + $0x3c80] sm:$0xff]  ;;  %v1146_v37 = vld [vmem:[%s6681_s26 + $0x3c88] sm:$0xff]  ;;  %1143 = vst [vmem:[%s6686_s27 + $0xf18] sm:$0xff] %v1142_v35 }
 0x102   : > { %1145 = vst [vmem:[%s6686_s27 + $0xf20] sm:$0xff] %v1144_v36  ;;  %1147 = vst [vmem:[%s6686_s27 + $0xf28] sm:$0xff] %v1146_v37  ;;  %v1148_v38 = vld [vmem:[%s6681_s26 + $0x3cc0] sm:$0xff]  ;;  %v1150_v39 = vld [vmem:[%s6681_s26 + $0x3cc8] sm:$0xff] }
 0x103   : > { %v1152_v40 = vld [vmem:[%s6681_s26 + $0x3d00] sm:$0xff]  ;;  %1149 = vst [vmem:[%s6686_s27 + $0xf30] sm:$0xff] %v1148_v38  ;;  %1151 = vst [vmem:[%s6686_s27 + $0xf38] sm:$0xff] %v1150_v39  ;;  %v1154_v41 = vld [vmem:[%s6681_s26 + $0x3d08] sm:$0xff] }
 0x104   : > { %1153 = vst [vmem:[%s6686_s27 + $0xf40] sm:$0xff] %v1152_v40  ;;  %v1156_v42 = vld [vmem:[%s6681_s26 + $0x3d40] sm:$0xff]  ;;  %v1158_v43 = vld [vmem:[%s6681_s26 + $0x3d48] sm:$0xff]  ;;  %1155 = vst [vmem:[%s6686_s27 + $0xf48] sm:$0xff] %v1154_v41 }
 0x105   : > { %1157 = vst [vmem:[%s6686_s27 + $0xf50] sm:$0xff] %v1156_v42  ;;  %1159 = vst [vmem:[%s6686_s27 + $0xf58] sm:$0xff] %v1158_v43  ;;  %v1160_v44 = vld [vmem:[%s6681_s26 + $0x3d80] sm:$0xff]  ;;  %v1162_v45 = vld [vmem:[%s6681_s26 + $0x3d88] sm:$0xff] }
 0x106   : > { %v1164_v46 = vld [vmem:[%s6681_s26 + $0x3dc0] sm:$0xff]  ;;  %1161 = vst [vmem:[%s6686_s27 + $0xf60] sm:$0xff] %v1160_v44  ;;  %1163 = vst [vmem:[%s6686_s27 + $0xf68] sm:$0xff] %v1162_v45  ;;  %v1166_v47 = vld [vmem:[%s6681_s26 + $0x3dc8] sm:$0xff] }
 0x107   : > { %1165 = vst [vmem:[%s6686_s27 + $0xf70] sm:$0xff] %v1164_v46  ;;  %v1168_v48 = vld [vmem:[%s6681_s26 + $0x3e00] sm:$0xff]  ;;  %v1170_v49 = vld [vmem:[%s6681_s26 + $0x3e08] sm:$0xff]  ;;  %1167 = vst [vmem:[%s6686_s27 + $0xf78] sm:$0xff] %v1166_v47 }
 0x108   : > { %1169 = vst [vmem:[%s6686_s27 + $0xf80] sm:$0xff] %v1168_v48  ;;  %1171 = vst [vmem:[%s6686_s27 + $0xf88] sm:$0xff] %v1170_v49  ;;  %v1172_v50 = vld [vmem:[%s6681_s26 + $0x3e40] sm:$0xff]  ;;  %v1174_v51 = vld [vmem:[%s6681_s26 + $0x3e48] sm:$0xff] }
 0x109   : > { %v1176_v52 = vld [vmem:[%s6681_s26 + $0x3e80] sm:$0xff]  ;;  %1173 = vst [vmem:[%s6686_s27 + $0xf90] sm:$0xff] %v1172_v50  ;;  %1175 = vst [vmem:[%s6686_s27 + $0xf98] sm:$0xff] %v1174_v51  ;;  %v1178_v53 = vld [vmem:[%s6681_s26 + $0x3e88] sm:$0xff] }
 0x10a   : > { %1177 = vst [vmem:[%s6686_s27 + $0xfa0] sm:$0xff] %v1176_v52  ;;  %v1180_v54 = vld [vmem:[%s6681_s26 + $0x3ec0] sm:$0xff]  ;;  %v1182_v55 = vld [vmem:[%s6681_s26 + $0x3ec8] sm:$0xff]  ;;  %1179 = vst [vmem:[%s6686_s27 + $0xfa8] sm:$0xff] %v1178_v53 }
 0x10b   : > { %1181 = vst [vmem:[%s6686_s27 + $0xfb0] sm:$0xff] %v1180_v54  ;;  %1183 = vst [vmem:[%s6686_s27 + $0xfb8] sm:$0xff] %v1182_v55  ;;  %v1184_v56 = vld [vmem:[%s6681_s26 + $0x3f00] sm:$0xff]  ;;  %v1186_v57 = vld [vmem:[%s6681_s26 + $0x3f08] sm:$0xff] }
 0x10c   : > { %v1188_v58 = vld [vmem:[%s6681_s26 + $0x3f40] sm:$0xff]  ;;  %1185 = vst [vmem:[%s6686_s27 + $0xfc0] sm:$0xff] %v1184_v56  ;;  %1187 = vst [vmem:[%s6686_s27 + $0xfc8] sm:$0xff] %v1186_v57  ;;  %v1190_v59 = vld [vmem:[%s6681_s26 + $0x3f48] sm:$0xff] }
 0x10d   : > { %1189 = vst [vmem:[%s6686_s27 + $0xfd0] sm:$0xff] %v1188_v58  ;;  %v1192_v60 = vld [vmem:[%s6681_s26 + $0x3f80] sm:$0xff]  ;;  %v1194_v61 = vld [vmem:[%s6681_s26 + $0x3f88] sm:$0xff]  ;;  %1191 = vst [vmem:[%s6686_s27 + $0xfd8] sm:$0xff] %v1190_v59 }
 0x10e   : > { %1193 = vst [vmem:[%s6686_s27 + $0xfe0] sm:$0xff] %v1192_v60  ;;  %1195 = vst [vmem:[%s6686_s27 + $0xfe8] sm:$0xff] %v1194_v61  ;;  %v1196_v62 = vld [vmem:[%s6681_s26 + $0x3fc0] sm:$0xff]  ;;  %v1198_v63 = vld [vmem:[%s6681_s26 + $0x3fc8] sm:$0xff] }
 0x10f   : > { %1197 = vst [vmem:[%s6686_s27 + $0xff0] sm:$0xff] %v1196_v62  ;;  %1199 = vst [vmem:[%s6686_s27 + $0xff8] sm:$0xff] %v1198_v63 }
 0x110 PF: > { %p5217_p6 = scmp.ge.s32.totalorder %s6616_s16, 1  ;;  %p1212_p7 = scmp.lt.s32.totalorder %s6616_s16, 5 }
 0x112   : > { %p1213_p8 = pnand %p5217_p6, %p1212_p7 }
 0x113   : > { %s1219_s28 = sand.u32 (!%p1213_p8), 1, %s6600_s12   ;;  %s5219_s26 = sshll.u32 (!%p1213_p8), %s6608_s14, 2 }
 0x114   : > { %1216 = sbr.rel (%p1213_p8) target bundleno = 998 (0x3e6), region = 51  ;;  %s5218_s6 = sshll.u32 (!%p1213_p8), %s1219_s28, 12 }
 0x115   : > { %s7730_s7 = scalar_lea.vmem (!%p1213_p8), [#allocation2], %s5218_s6  ;;  %p1262_p9 = scmp.lt.s32.totalorder (!%p1213_p8), %s5219_s26, 15 }
 0x119   : > { %v7715_v0 = vld [vmem:[%s8428_s0] sm:$0xff]  ;;  %v7720_v1 = vld [vmem:[%s8428_s0 + $0x8] sm:$0xff]  ;;  %s8439_s26 = smov (!%p1262_p9, %s5219_s26), 15 }
 0x11a   : > { %v7724_v2 = vcombine.high %v7715_v0, %v7715_v0  ;;  %v7728_v3 = vcombine.high %v7720_v1, %v7720_v1  ;;  %v5793_v4 = vld [vmem:[%s7730_s7 + $0xe4] ss:$16 sps:$4 sm:$0xff]   ;;  %v5797_v6 = vld [vmem:[%s7730_s7 + $0xe0] ss:$16 sps:$4 sm:$0xff]   ;;  %s8087_s28 = scalar_lea.vmem %s8430_s2, %s8439_s26  ;;  %s5221_s29 = sshll.u32 %s8439_s26, 3 }
 0x11b   : > { %v5795_v5 = vld [vmem:[%s7730_s7 + $0x2e4] ss:$16 sps:$4 sm:$0xff]   ;;  %4434 = vmatprep.subr.bf16.mxu0 %v5793_v4  ;;  %v5798_v7 = vld [vmem:[%s7730_s7 + $0x2e0] ss:$16 sps:$4 sm:$0xff]   ;;  %s8348_s5 = scalar_lea.vmem %s8431_s3, %s5221_s29 }
 0x11c   : > { %4466 = vmatprep.mubr.bf16.mxu0 %v7724_v2  ;;  %4507 = vmatprep.mubr.bf16.mxu1 %v7728_v3  ;;  %v5799_v8 = vld [vmem:[%s7730_s7 + $0xc4] ss:$16 sps:$4 sm:$0xff]   ;;  %v5803_v10 = vld [vmem:[%s7730_s7 + $0xc0] ss:$16 sps:$4 sm:$0xff]  }
 0x11d   : > { %4475 = vmatprep.subr.bf16.mxu1 %v5795_v5  ;;  %4435 = vmatpush1.bf16.msra.mxu0 %v5797_v6  ;;  %v5801_v9 = vld [vmem:[%s7730_s7 + $0x2c4] ss:$16 sps:$4 sm:$0xff]   ;;  %v5804_v11 = vld [vmem:[%s7730_s7 + $0x2c0] ss:$16 sps:$4 sm:$0xff]  }
 0x11e   : > { %4476 = vmatpush1.bf16.msra.mxu1 %v5798_v7  ;;  %4436 = vmatprep.subr.bf16.mxu0 %v5799_v8  ;;  %v5805_v12 = vld [vmem:[%s7730_s7 + $0xa4] ss:$16 sps:$4 sm:$0xff]   ;;  %v5809_v14 = vld [vmem:[%s7730_s7 + $0xa0] ss:$16 sps:$4 sm:$0xff]  }
 0x11f   : > { %4477 = vmatprep.subr.bf16.mxu1 %v5801_v9  ;;  %v5807_v13 = vld [vmem:[%s7730_s7 + $0x2a4] ss:$16 sps:$4 sm:$0xff]   ;;  %v5810_v15 = vld [vmem:[%s7730_s7 + $0x2a0] ss:$16 sps:$4 sm:$0xff]  }
 0x120   : > { %v5811_v16 = vld [vmem:[%s7730_s7 + $0x84] ss:$16 sps:$4 sm:$0xff]   ;;  %v5815_v18 = vld [vmem:[%s7730_s7 + $0x80] ss:$16 sps:$4 sm:$0xff]  }
 0x121   : > { %4437 = vmatpush1.bf16.msra.mxu0 %v5803_v10  ;;  %v5813_v17 = vld [vmem:[%s7730_s7 + $0x284] ss:$16 sps:$4 sm:$0xff]   ;;  %v5816_v19 = vld [vmem:[%s7730_s7 + $0x280] ss:$16 sps:$4 sm:$0xff]  }
 0x122   : > { %4478 = vmatpush1.bf16.msra.mxu1 %v5804_v11  ;;  %4438 = vmatprep.subr.bf16.mxu0 %v5805_v12  ;;  %v5817_v20 = vld [vmem:[%s7730_s7 + $0x64] ss:$16 sps:$4 sm:$0xff]   ;;  %v5821_v22 = vld [vmem:[%s7730_s7 + $0x60] ss:$16 sps:$4 sm:$0xff]   ;;  %v7808_v11 = vld [vmem:[%s8428_s0 + $0x18] sm:$0xff]  ;;  %v7812_v12 = vcombine.low %v7715_v0, %v7715_v0 }
 0x123   : > { %4479 = vmatprep.subr.bf16.mxu1 %v5807_v13  ;;  %v5819_v21 = vld [vmem:[%s7730_s7 + $0x264] ss:$16 sps:$4 sm:$0xff]   ;;  %v5822_v23 = vld [vmem:[%s7730_s7 + $0x260] ss:$16 sps:$4 sm:$0xff]   ;;  %v7816_v13 = vcombine.low %v7720_v1, %v7720_v1  ;;  %v7828_v1 = vcombine.high %v7808_v11, %v7808_v11 }
 0x124   : > { %v5823_v24 = vld [vmem:[%s7730_s7 + $0x44] ss:$16 sps:$4 sm:$0xff]   ;;  %v5827_v26 = vld [vmem:[%s7730_s7 + $0x40] ss:$16 sps:$4 sm:$0xff]  }
 0x125   : > { %4439 = vmatpush1.bf16.msra.mxu0 %v5809_v14  ;;  %v5825_v25 = vld [vmem:[%s7730_s7 + $0x244] ss:$16 sps:$4 sm:$0xff]   ;;  %v5828_v27 = vld [vmem:[%s7730_s7 + $0x240] ss:$16 sps:$4 sm:$0xff]  }
 0x126   : > { %4480 = vmatpush1.bf16.msra.mxu1 %v5810_v15  ;;  %4440 = vmatprep.subr.bf16.mxu0 %v5811_v16  ;;  %v5829_v28 = vld [vmem:[%s7730_s7 + $0x24] ss:$16 sps:$4 sm:$0xff]   ;;  %v5833_v30 = vld [vmem:[%s7730_s7 + $0x20] ss:$16 sps:$4 sm:$0xff]  }
 0x127   : > { %4481 = vmatprep.subr.bf16.mxu1 %v5813_v17  ;;  %v5831_v29 = vld [vmem:[%s7730_s7 + $0x224] ss:$16 sps:$4 sm:$0xff]   ;;  %v5834_v31 = vld [vmem:[%s7730_s7 + $0x220] ss:$16 sps:$4 sm:$0xff]  }
 0x128   : > { %v5835_v32 = vld [vmem:[%s7730_s7 + $0x4] ss:$16 sps:$4 sm:$0xff]   ;;  %v5839_v34 = vld [vmem:[%s7730_s7] ss:$16 sps:$4 sm:$0xff]  }
 0x129   : > { %4441 = vmatpush1.bf16.msra.mxu0 %v5815_v18  ;;  %v5837_v33 = vld [vmem:[%s7730_s7 + $0x204] ss:$16 sps:$4 sm:$0xff]   ;;  %v5840_v35 = vld [vmem:[%s7730_s7 + $0x200] ss:$16 sps:$4 sm:$0xff]  }
 0x12a   : > { %4482 = vmatpush1.bf16.msra.mxu1 %v5816_v19  ;;  %4442 = vmatprep.subr.bf16.mxu0 %v5817_v20  ;;  %v5841_v36 = vld [vmem:[%s7730_s7 + $0x1e4] ss:$16 sps:$4 sm:$0xff]   ;;  %v5845_v38 = vld [vmem:[%s7730_s7 + $0x1e0] ss:$16 sps:$4 sm:$0xff]  }
 0x12b   : > { %4483 = vmatprep.subr.bf16.mxu1 %v5819_v21  ;;  %v5843_v37 = vld [vmem:[%s7730_s7 + $0x3e4] ss:$16 sps:$4 sm:$0xff]   ;;  %v5846_v39 = vld [vmem:[%s7730_s7 + $0x3e0] ss:$16 sps:$4 sm:$0xff]  }
 0x12c   : > { %v5847_v40 = vld [vmem:[%s7730_s7 + $0x1c4] ss:$16 sps:$4 sm:$0xff]   ;;  %v5851_v42 = vld [vmem:[%s7730_s7 + $0x1c0] ss:$16 sps:$4 sm:$0xff]  }
 0x12d   : > { %4443 = vmatpush1.bf16.msra.mxu0 %v5821_v22  ;;  %v5849_v41 = vld [vmem:[%s7730_s7 + $0x3c4] ss:$16 sps:$4 sm:$0xff]   ;;  %v5852_v43 = vld [vmem:[%s7730_s7 + $0x3c0] ss:$16 sps:$4 sm:$0xff]  }
 0x12e   : > { %4484 = vmatpush1.bf16.msra.mxu1 %v5822_v23  ;;  %4444 = vmatprep.subr.bf16.mxu0 %v5823_v24  ;;  %v5853_v44 = vld [vmem:[%s7730_s7 + $0x1a4] ss:$16 sps:$4 sm:$0xff]   ;;  %v5857_v46 = vld [vmem:[%s7730_s7 + $0x1a0] ss:$16 sps:$4 sm:$0xff]  }
 0x12f   : > { %4485 = vmatprep.subr.bf16.mxu1 %v5825_v25  ;;  %v5855_v45 = vld [vmem:[%s7730_s7 + $0x3a4] ss:$16 sps:$4 sm:$0xff]   ;;  %v5858_v47 = vld [vmem:[%s7730_s7 + $0x3a0] ss:$16 sps:$4 sm:$0xff]  }
 0x130   : > { %v5859_v48 = vld [vmem:[%s7730_s7 + $0x184] ss:$16 sps:$4 sm:$0xff]   ;;  %v5863_v50 = vld [vmem:[%s7730_s7 + $0x180] ss:$16 sps:$4 sm:$0xff]  }
 0x131   : > { %4445 = vmatpush1.bf16.msra.mxu0 %v5827_v26  ;;  %v5861_v49 = vld [vmem:[%s7730_s7 + $0x384] ss:$16 sps:$4 sm:$0xff]   ;;  %v5864_v51 = vld [vmem:[%s7730_s7 + $0x380] ss:$16 sps:$4 sm:$0xff]  }
 0x132   : > { %4486 = vmatpush1.bf16.msra.mxu1 %v5828_v27  ;;  %4446 = vmatprep.subr.bf16.mxu0 %v5829_v28  ;;  %v5865_v52 = vld [vmem:[%s7730_s7 + $0x164] ss:$16 sps:$4 sm:$0xff]   ;;  %v5869_v54 = vld [vmem:[%s7730_s7 + $0x160] ss:$16 sps:$4 sm:$0xff]  }
 0x133   : > { %4487 = vmatprep.subr.bf16.mxu1 %v5831_v29  ;;  %v5867_v53 = vld [vmem:[%s7730_s7 + $0x364] ss:$16 sps:$4 sm:$0xff]   ;;  %v5870_v55 = vld [vmem:[%s7730_s7 + $0x360] ss:$16 sps:$4 sm:$0xff]  }
 0x134   : > { %v5871_v56 = vld [vmem:[%s7730_s7 + $0x144] ss:$16 sps:$4 sm:$0xff]   ;;  %v5875_v58 = vld [vmem:[%s7730_s7 + $0x140] ss:$16 sps:$4 sm:$0xff]  }
 0x135   : > { %4447 = vmatpush1.bf16.msra.mxu0 %v5833_v30  ;;  %v5873_v57 = vld [vmem:[%s7730_s7 + $0x344] ss:$16 sps:$4 sm:$0xff]   ;;  %v5876_v59 = vld [vmem:[%s7730_s7 + $0x340] ss:$16 sps:$4 sm:$0xff]  }
 0x136   : > { %4488 = vmatpush1.bf16.msra.mxu1 %v5834_v31  ;;  %4448 = vmatprep.subr.bf16.mxu0 %v5835_v32  ;;  %v5877_v60 = vld [vmem:[%s7730_s7 + $0x124] ss:$16 sps:$4 sm:$0xff]   ;;  %v5881_v62 = vld [vmem:[%s7730_s7 + $0x120] ss:$16 sps:$4 sm:$0xff]  }
 0x137   : > { %4489 = vmatprep.subr.bf16.mxu1 %v5837_v33  ;;  %v5879_v61 = vld [vmem:[%s7730_s7 + $0x324] ss:$16 sps:$4 sm:$0xff]   ;;  %v5882_v63 = vld [vmem:[%s7730_s7 + $0x320] ss:$16 sps:$4 sm:$0xff]  }
 0x138   : > { %v5883_v4 = vld [vmem:[%s7730_s7 + $0x104] ss:$16 sps:$4 sm:$0xff]   ;;  %v5887_v6 = vld [vmem:[%s7730_s7 + $0x100] ss:$16 sps:$4 sm:$0xff]  }
 0x139   : > { %4449 = vmatpush1.bf16.msra.mxu0 %v5839_v34  ;;  %v5885_v5 = vld [vmem:[%s7730_s7 + $0x304] ss:$16 sps:$4 sm:$0xff]   ;;  %v5888_v7 = vld [vmem:[%s7730_s7 + $0x300] ss:$16 sps:$4 sm:$0xff]  }
 0x13a   : > { %4490 = vmatpush1.bf16.msra.mxu1 %v5840_v35  ;;  %4450 = vmatprep.subr.bf16.mxu0 %v5841_v36  ;;  %v5895_v8 = vld [vmem:[%s7730_s7 + $0x4e4] ss:$16 sps:$4 sm:$0xff]   ;;  %v5893_v14 = vld [vmem:[%s7730_s7 + $0x4e0] ss:$16 sps:$4 sm:$0xff]  }
 0x13b   : > { %4491 = vmatprep.subr.bf16.mxu1 %v5843_v37  ;;  %v5898_v9 = vld [vmem:[%s7730_s7 + $0x6e4] ss:$16 sps:$4 sm:$0xff]   ;;  %v5896_v15 = vld [vmem:[%s7730_s7 + $0x6e0] ss:$16 sps:$4 sm:$0xff]  }
 0x13c   : > { %v7803_v10 = vld [vmem:[%s8428_s0 + $0x10] sm:$0xff] }
 0x13d   : > { %4451 = vmatpush2.bf16.msra.mxu0 %v5845_v38  ;;  %v5901_v16 = vld [vmem:[%s7730_s7 + $0x4c4] ss:$16 sps:$4 sm:$0xff]   ;;  %v7824_v0 = vcombine.high %v7803_v10, %v7803_v10  ;;  %v5899_v18 = vld [vmem:[%s7730_s7 + $0x4c0] ss:$16 sps:$4 sm:$0xff]  }
 0x13e   : > { %4492 = vmatpush2.bf16.msra.mxu1 %v5846_v39  ;;  %4452 = vmatprep.subr.bf16.mxu0 %v5847_v40  ;;  %v5904_v17 = vld [vmem:[%s7730_s7 + $0x6c4] ss:$16 sps:$4 sm:$0xff]   ;;  %v5902_v19 = vld [vmem:[%s7730_s7 + $0x6c0] ss:$16 sps:$4 sm:$0xff]  }
 0x13f   : > { %4493 = vmatprep.subr.bf16.mxu1 %v5849_v41  ;;  %v5907_v20 = vld [vmem:[%s7730_s7 + $0x4a4] ss:$16 sps:$4 sm:$0xff]   ;;  %v5905_v22 = vld [vmem:[%s7730_s7 + $0x4a0] ss:$16 sps:$4 sm:$0xff]  }
 0x140   : > { %v5910_v21 = vld [vmem:[%s7730_s7 + $0x6a4] ss:$16 sps:$4 sm:$0xff]   ;;  %v5908_v23 = vld [vmem:[%s7730_s7 + $0x6a0] ss:$16 sps:$4 sm:$0xff]  }
 0x141   : > { %4453 = vmatpush2.bf16.msra.mxu0 %v5851_v42  ;;  %v5913_v24 = vld [vmem:[%s7730_s7 + $0x484] ss:$16 sps:$4 sm:$0xff]   ;;  %v5911_v26 = vld [vmem:[%s7730_s7 + $0x480] ss:$16 sps:$4 sm:$0xff]  }
 0x142   : > { %4494 = vmatpush2.bf16.msra.mxu1 %v5852_v43  ;;  %4454 = vmatprep.subr.bf16.mxu0 %v5853_v44  ;;  %v5916_v25 = vld [vmem:[%s7730_s7 + $0x684] ss:$16 sps:$4 sm:$0xff]   ;;  %v5914_v27 = vld [vmem:[%s7730_s7 + $0x680] ss:$16 sps:$4 sm:$0xff]  }
 0x143   : > { %4495 = vmatprep.subr.bf16.mxu1 %v5855_v45  ;;  %v5919_v28 = vld [vmem:[%s7730_s7 + $0x464] ss:$16 sps:$4 sm:$0xff]   ;;  %v5917_v30 = vld [vmem:[%s7730_s7 + $0x460] ss:$16 sps:$4 sm:$0xff]  }
 0x144   : > { %v5922_v29 = vld [vmem:[%s7730_s7 + $0x664] ss:$16 sps:$4 sm:$0xff]   ;;  %v5920_v31 = vld [vmem:[%s7730_s7 + $0x660] ss:$16 sps:$4 sm:$0xff]  }
 0x145   : > { %4455 = vmatpush2.bf16.msra.mxu0 %v5857_v46  ;;  %v5925_v32 = vld [vmem:[%s7730_s7 + $0x444] ss:$16 sps:$4 sm:$0xff]   ;;  %v5923_v34 = vld [vmem:[%s7730_s7 + $0x440] ss:$16 sps:$4 sm:$0xff]  }
 0x146   : > { %4496 = vmatpush2.bf16.msra.mxu1 %v5858_v47  ;;  %4456 = vmatprep.subr.bf16.mxu0 %v5859_v48  ;;  %v5928_v33 = vld [vmem:[%s7730_s7 + $0x644] ss:$16 sps:$4 sm:$0xff]   ;;  %v5926_v35 = vld [vmem:[%s7730_s7 + $0x640] ss:$16 sps:$4 sm:$0xff]  }
 0x147   : > { %4497 = vmatprep.subr.bf16.mxu1 %v5861_v49  ;;  %v5931_v36 = vld [vmem:[%s7730_s7 + $0x424] ss:$16 sps:$4 sm:$0xff]   ;;  %v5929_v38 = vld [vmem:[%s7730_s7 + $0x420] ss:$16 sps:$4 sm:$0xff]  }
 0x148   : > { %v5934_v37 = vld [vmem:[%s7730_s7 + $0x624] ss:$16 sps:$4 sm:$0xff]   ;;  %v5932_v39 = vld [vmem:[%s7730_s7 + $0x620] ss:$16 sps:$4 sm:$0xff]  }
 0x149   : > { %4457 = vmatpush2.bf16.msra.mxu0 %v5863_v50  ;;  %v5937_v40 = vld [vmem:[%s7730_s7 + $0x404] ss:$16 sps:$4 sm:$0xff]   ;;  %v5935_v42 = vld [vmem:[%s7730_s7 + $0x400] ss:$16 sps:$4 sm:$0xff]  }
 0x14a   : > { %4498 = vmatpush2.bf16.msra.mxu1 %v5864_v51  ;;  %4458 = vmatprep.subr.bf16.mxu0 %v5865_v52  ;;  %v5940_v41 = vld [vmem:[%s7730_s7 + $0x604] ss:$16 sps:$4 sm:$0xff]   ;;  %v5938_v43 = vld [vmem:[%s7730_s7 + $0x600] ss:$16 sps:$4 sm:$0xff]  }
 0x14b   : > { %4499 = vmatprep.subr.bf16.mxu1 %v5867_v53  ;;  %v5943_v44 = vld [vmem:[%s7730_s7 + $0x5e4] ss:$16 sps:$4 sm:$0xff]   ;;  %v5941_v46 = vld [vmem:[%s7730_s7 + $0x5e0] ss:$16 sps:$4 sm:$0xff]  }
 0x14c   : > { %v5946_v45 = vld [vmem:[%s7730_s7 + $0x7e4] ss:$16 sps:$4 sm:$0xff]   ;;  %v5944_v47 = vld [vmem:[%s7730_s7 + $0x7e0] ss:$16 sps:$4 sm:$0xff]  }
 0x14d   : > { %4459 = vmatpush2.bf16.msra.mxu0 %v5869_v54  ;;  %v5949_v48 = vld [vmem:[%s7730_s7 + $0x5c4] ss:$16 sps:$4 sm:$0xff]   ;;  %v5947_v50 = vld [vmem:[%s7730_s7 + $0x5c0] ss:$16 sps:$4 sm:$0xff]  }
 0x14e   : > { %4500 = vmatpush2.bf16.msra.mxu1 %v5870_v55  ;;  %4460 = vmatprep.subr.bf16.mxu0 %v5871_v56  ;;  %v5952_v49 = vld [vmem:[%s7730_s7 + $0x7c4] ss:$16 sps:$4 sm:$0xff]   ;;  %v5950_v51 = vld [vmem:[%s7730_s7 + $0x7c0] ss:$16 sps:$4 sm:$0xff]  }
 0x14f   : > { %4501 = vmatprep.subr.bf16.mxu1 %v5873_v57  ;;  %v5955_v52 = vld [vmem:[%s7730_s7 + $0x5a4] ss:$16 sps:$4 sm:$0xff]   ;;  %v5953_v54 = vld [vmem:[%s7730_s7 + $0x5a0] ss:$16 sps:$4 sm:$0xff]  }
 0x150   : > { %v5958_v53 = vld [vmem:[%s7730_s7 + $0x7a4] ss:$16 sps:$4 sm:$0xff]   ;;  %v5956_v55 = vld [vmem:[%s7730_s7 + $0x7a0] ss:$16 sps:$4 sm:$0xff]  }
 0x151   : > { %4461 = vmatpush2.bf16.msra.mxu0 %v5875_v58  ;;  %v5961_v56 = vld [vmem:[%s7730_s7 + $0x584] ss:$16 sps:$4 sm:$0xff]   ;;  %v5959_v58 = vld [vmem:[%s7730_s7 + $0x580] ss:$16 sps:$4 sm:$0xff]  }
 0x152   : > { %4502 = vmatpush2.bf16.msra.mxu1 %v5876_v59  ;;  %4462 = vmatprep.subr.bf16.mxu0 %v5877_v60  ;;  %v5964_v57 = vld [vmem:[%s7730_s7 + $0x784] ss:$16 sps:$4 sm:$0xff]   ;;  %v5962_v59 = vld [vmem:[%s7730_s7 + $0x780] ss:$16 sps:$4 sm:$0xff]  }
 0x153   : > { %4503 = vmatprep.subr.bf16.mxu1 %v5879_v61  ;;  %v5967_v60 = vld [vmem:[%s7730_s7 + $0x564] ss:$16 sps:$4 sm:$0xff]  }
 0x154   : > { %v5970_v61 = vld [vmem:[%s7730_s7 + $0x764] ss:$16 sps:$4 sm:$0xff]  }
 0x155   : > { %4463 = vmatpush2.bf16.msra.mxu0 %v5881_v62  ;;  %v5965_v62 = vld [vmem:[%s7730_s7 + $0x560] ss:$16 sps:$4 sm:$0xff]  }
 0x156   : > { %4504 = vmatpush2.bf16.msra.mxu1 %v5882_v63  ;;  %4464 = vmatprep.subr.bf16.mxu0 %v5883_v4  ;;  %v5968_v63 = vld [vmem:[%s7730_s7 + $0x760] ss:$16 sps:$4 sm:$0xff]   ;;  %v5973_v4 = vld [vmem:[%s7730_s7 + $0x544] ss:$16 sps:$4 sm:$0xff]  }
 0x157   : > { %4505 = vmatprep.subr.bf16.mxu1 %v5885_v5  ;;  %v5976_v5 = vld [vmem:[%s7730_s7 + $0x744] ss:$16 sps:$4 sm:$0xff]  }
 0x159   : > { %4465 = vmatpush2.bf16.msra.mxu0 %v5887_v6  ;;  %v5971_v6 = vld [vmem:[%s7730_s7 + $0x540] ss:$16 sps:$4 sm:$0xff]  }
 0x15a   : > { %4506 = vmatpush2.bf16.msra.mxu1 %v5888_v7  ;;  %4516 = vmatprep.subr.bf16.mxu0 %v5895_v8  ;;  %v5974_v7 = vld [vmem:[%s7730_s7 + $0x740] ss:$16 sps:$4 sm:$0xff]   ;;  %v5979_v8 = vld [vmem:[%s7730_s7 + $0x524] ss:$16 sps:$4 sm:$0xff]  }
 0x15b   : > { %4557 = vmatprep.subr.bf16.mxu1 %v5898_v9  ;;  %v5982_v9 = vld [vmem:[%s7730_s7 + $0x724] ss:$16 sps:$4 sm:$0xff]  }
 0x15c   : > { %4467 = vmatmul.mubr.bf16.vlgmr.msra.gmra.mxu0 %v7812_v12 }
 0x15d   : > { %4508 = vmatmul.mubr.bf16.vlgmr.msra.gmra.mxu1 %v7816_v13  ;;  %4517 = vmatpush1.bf16.msra.mxu0 %v5893_v14  ;;  %v5977_v14 = vld [vmem:[%s7730_s7 + $0x520] ss:$16 sps:$4 sm:$0xff]  }
 0x15e   : > { %4558 = vmatpush1.bf16.msra.mxu1 %v5896_v15  ;;  %4518 = vmatprep.subr.bf16.mxu0 %v5901_v16  ;;  %v5980_v15 = vld [vmem:[%s7730_s7 + $0x720] ss:$16 sps:$4 sm:$0xff]   ;;  %v5985_v16 = vld [vmem:[%s7730_s7 + $0x504] ss:$16 sps:$4 sm:$0xff]  }
 0x15f   : > { %4559 = vmatprep.subr.bf16.mxu1 %v5904_v17  ;;  %4548 = vmatprep.mubr.bf16.mxu0 %v7824_v0  ;;  %v5988_v17 = vld [vmem:[%s7730_s7 + $0x704] ss:$16 sps:$4 sm:$0xff]  }
 0x160   : > { %4589 = vmatprep.mubr.bf16.mxu1 %v7828_v1 }
 0x161   : > { %4519 = vmatpush1.bf16.msra.mxu0 %v5899_v18  ;;  %v5983_v18 = vld [vmem:[%s7730_s7 + $0x500] ss:$16 sps:$4 sm:$0xff]  }
 0x162   : > { %4560 = vmatpush1.bf16.msra.mxu1 %v5902_v19  ;;  %4520 = vmatprep.subr.bf16.mxu0 %v5907_v20  ;;  %v5986_v19 = vld [vmem:[%s7730_s7 + $0x700] ss:$16 sps:$4 sm:$0xff]   ;;  %v5995_v20 = vld [vmem:[%s7730_s7 + $0x8e4] ss:$16 sps:$4 sm:$0xff]  }
 0x163   : > { %4561 = vmatprep.subr.bf16.mxu1 %v5910_v21  ;;  %v5998_v21 = vld [vmem:[%s7730_s7 + $0xae4] ss:$16 sps:$4 sm:$0xff]  }
 0x165   : > { %4521 = vmatpush1.bf16.msra.mxu0 %v5905_v22  ;;  %v7896_v22 = vcombine.low %v7803_v10, %v7803_v10  ;;  %v7912_v10 = vld [vmem:[%s8428_s0 + $0x28] sm:$0xff] }
 0x166   : > { %4562 = vmatpush1.bf16.msra.mxu1 %v5908_v23  ;;  %4522 = vmatprep.subr.bf16.mxu0 %v5913_v24  ;;  %v7900_v23 = vcombine.low %v7808_v11, %v7808_v11  ;;  %v5993_v24 = vld [vmem:[%s7730_s7 + $0x8e0] ss:$16 sps:$4 sm:$0xff]   ;;  %v6001_v11 = vld [vmem:[%s7730_s7 + $0x8c4] ss:$16 sps:$4 sm:$0xff]  }
 0x167   : > { %4563 = vmatprep.subr.bf16.mxu1 %v5916_v25  ;;  %v5996_v25 = vld [vmem:[%s7730_s7 + $0xae0] ss:$16 sps:$4 sm:$0xff]  }
 0x169   : > { %4523 = vmatpush1.bf16.msra.mxu0 %v5911_v26  ;;  %v7907_v26 = vld [vmem:[%s8428_s0 + $0x20] sm:$0xff] }
 0x16a   : > { %4564 = vmatpush1.bf16.msra.mxu1 %v5914_v27  ;;  %4524 = vmatprep.subr.bf16.mxu0 %v5919_v28  ;;  %v6004_v27 = vld [vmem:[%s7730_s7 + $0xac4] ss:$16 sps:$4 sm:$0xff]   ;;  %v7918_v28 = vcombine.high %v7907_v26, %v7907_v26 }
 0x16b   : > { %4565 = vmatprep.subr.bf16.mxu1 %v5922_v29  ;;  %v7922_v29 = vcombine.high %v7912_v10, %v7912_v10 }
 0x16d   : > { %4525 = vmatpush1.bf16.msra.mxu0 %v5917_v30  ;;  %v5999_v30 = vld [vmem:[%s7730_s7 + $0x8c0] ss:$16 sps:$4 sm:$0xff]  }
 0x16e   : > { %4566 = vmatpush1.bf16.msra.mxu1 %v5920_v31  ;;  %4526 = vmatprep.subr.bf16.mxu0 %v5925_v32  ;;  %v6002_v31 = vld [vmem:[%s7730_s7 + $0xac0] ss:$16 sps:$4 sm:$0xff]   ;;  %v6007_v32 = vld [vmem:[%s7730_s7 + $0x8a4] ss:$16 sps:$4 sm:$0xff]  }
 0x16f   : > { %4567 = vmatprep.subr.bf16.mxu1 %v5928_v33  ;;  %v6010_v33 = vld [vmem:[%s7730_s7 + $0xaa4] ss:$16 sps:$4 sm:$0xff]  }
 0x171   : > { %4527 = vmatpush1.bf16.msra.mxu0 %v5923_v34  ;;  %v6005_v34 = vld [vmem:[%s7730_s7 + $0x8a0] ss:$16 sps:$4 sm:$0xff]  }
 0x172   : > { %4568 = vmatpush1.bf16.msra.mxu1 %v5926_v35  ;;  %4528 = vmatprep.subr.bf16.mxu0 %v5931_v36  ;;  %v6008_v35 = vld [vmem:[%s7730_s7 + $0xaa0] ss:$16 sps:$4 sm:$0xff]   ;;  %v6013_v36 = vld [vmem:[%s7730_s7 + $0x884] ss:$16 sps:$4 sm:$0xff]  }
 0x173   : > { %4569 = vmatprep.subr.bf16.mxu1 %v5934_v37  ;;  %v6016_v37 = vld [vmem:[%s7730_s7 + $0xa84] ss:$16 sps:$4 sm:$0xff]  }
 0x175   : > { %4529 = vmatpush1.bf16.msra.mxu0 %v5929_v38  ;;  %v6011_v38 = vld [vmem:[%s7730_s7 + $0x880] ss:$16 sps:$4 sm:$0xff]  }
 0x176   : > { %4570 = vmatpush1.bf16.msra.mxu1 %v5932_v39  ;;  %4530 = vmatprep.subr.bf16.mxu0 %v5937_v40  ;;  %v6014_v39 = vld [vmem:[%s7730_s7 + $0xa80] ss:$16 sps:$4 sm:$0xff]   ;;  %v6019_v40 = vld [vmem:[%s7730_s7 + $0x864] ss:$16 sps:$4 sm:$0xff]  }
 0x177   : > { %4571 = vmatprep.subr.bf16.mxu1 %v5940_v41  ;;  %v6022_v41 = vld [vmem:[%s7730_s7 + $0xa64] ss:$16 sps:$4 sm:$0xff]  }
 0x179   : > { %4531 = vmatpush1.bf16.msra.mxu0 %v5935_v42  ;;  %v6017_v42 = vld [vmem:[%s7730_s7 + $0x860] ss:$16 sps:$4 sm:$0xff]  }
 0x17a   : > { %4572 = vmatpush1.bf16.msra.mxu1 %v5938_v43  ;;  %4532 = vmatprep.subr.bf16.mxu0 %v5943_v44  ;;  %v6020_v43 = vld [vmem:[%s7730_s7 + $0xa60] ss:$16 sps:$4 sm:$0xff]   ;;  %v6025_v44 = vld [vmem:[%s7730_s7 + $0x844] ss:$16 sps:$4 sm:$0xff]  }
 0x17b   : > { %4573 = vmatprep.subr.bf16.mxu1 %v5946_v45  ;;  %v6028_v45 = vld [vmem:[%s7730_s7 + $0xa44] ss:$16 sps:$4 sm:$0xff]  }
 0x17d   : > { %4533 = vmatpush2.bf16.msra.mxu0 %v5941_v46  ;;  %v6023_v46 = vld [vmem:[%s7730_s7 + $0x840] ss:$16 sps:$4 sm:$0xff]  }
 0x17e   : > { %4574 = vmatpush2.bf16.msra.mxu1 %v5944_v47  ;;  %4534 = vmatprep.subr.bf16.mxu0 %v5949_v48  ;;  %v6026_v47 = vld [vmem:[%s7730_s7 + $0xa40] ss:$16 sps:$4 sm:$0xff]   ;;  %v6031_v48 = vld [vmem:[%s7730_s7 + $0x824] ss:$16 sps:$4 sm:$0xff]  }
 0x17f   : > { %4575 = vmatprep.subr.bf16.mxu1 %v5952_v49  ;;  %v6034_v49 = vld [vmem:[%s7730_s7 + $0xa24] ss:$16 sps:$4 sm:$0xff]  }
 0x181   : > { %4535 = vmatpush2.bf16.msra.mxu0 %v5947_v50  ;;  %v6029_v50 = vld [vmem:[%s7730_s7 + $0x820] ss:$16 sps:$4 sm:$0xff]  }
 0x182   : > { %4576 = vmatpush2.bf16.msra.mxu1 %v5950_v51  ;;  %4536 = vmatprep.subr.bf16.mxu0 %v5955_v52  ;;  %v6032_v51 = vld [vmem:[%s7730_s7 + $0xa20] ss:$16 sps:$4 sm:$0xff]   ;;  %v6037_v52 = vld [vmem:[%s7730_s7 + $0x804] ss:$16 sps:$4 sm:$0xff]  }
 0x183   : > { %4577 = vmatprep.subr.bf16.mxu1 %v5958_v53  ;;  %v6040_v53 = vld [vmem:[%s7730_s7 + $0xa04] ss:$16 sps:$4 sm:$0xff]  }
 0x185   : > { %4537 = vmatpush2.bf16.msra.mxu0 %v5953_v54  ;;  %v6035_v54 = vld [vmem:[%s7730_s7 + $0x800] ss:$16 sps:$4 sm:$0xff]  }
 0x186   : > { %4578 = vmatpush2.bf16.msra.mxu1 %v5956_v55  ;;  %4538 = vmatprep.subr.bf16.mxu0 %v5961_v56  ;;  %v6038_v55 = vld [vmem:[%s7730_s7 + $0xa00] ss:$16 sps:$4 sm:$0xff]   ;;  %v6043_v56 = vld [vmem:[%s7730_s7 + $0x9e4] ss:$16 sps:$4 sm:$0xff]  }
 0x187   : > { %4579 = vmatprep.subr.bf16.mxu1 %v5964_v57  ;;  %v6046_v57 = vld [vmem:[%s7730_s7 + $0xbe4] ss:$16 sps:$4 sm:$0xff]  }
 0x189   : > { %4539 = vmatpush2.bf16.msra.mxu0 %v5959_v58  ;;  %v6041_v58 = vld [vmem:[%s7730_s7 + $0x9e0] ss:$16 sps:$4 sm:$0xff]  }
 0x18a   : > { %4580 = vmatpush2.bf16.msra.mxu1 %v5962_v59  ;;  %4540 = vmatprep.subr.bf16.mxu0 %v5967_v60  ;;  %v6044_v59 = vld [vmem:[%s7730_s7 + $0xbe0] ss:$16 sps:$4 sm:$0xff]   ;;  %v6049_v60 = vld [vmem:[%s7730_s7 + $0x9c4] ss:$16 sps:$4 sm:$0xff]  }
 0x18b   : > { %4581 = vmatprep.subr.bf16.mxu1 %v5970_v61  ;;  %v6052_v61 = vld [vmem:[%s7730_s7 + $0xbc4] ss:$16 sps:$4 sm:$0xff]  }
 0x18d   : > { %4541 = vmatpush2.bf16.msra.mxu0 %v5965_v62  ;;  %v6047_v62 = vld [vmem:[%s7730_s7 + $0x9c0] ss:$16 sps:$4 sm:$0xff]  }
 0x18e   : > { %4582 = vmatpush2.bf16.msra.mxu1 %v5968_v63  ;;  %4542 = vmatprep.subr.bf16.mxu0 %v5973_v4  ;;  %v6050_v63 = vld [vmem:[%s7730_s7 + $0xbc0] ss:$16 sps:$4 sm:$0xff]   ;;  %v6055_v4 = vld [vmem:[%s7730_s7 + $0x9a4] ss:$16 sps:$4 sm:$0xff]  }
 0x18f   : > { %4583 = vmatprep.subr.bf16.mxu1 %v5976_v5  ;;  %v6058_v5 = vld [vmem:[%s7730_s7 + $0xba4] ss:$16 sps:$4 sm:$0xff]  }
 0x191   : > { %4543 = vmatpush2.bf16.msra.mxu0 %v5971_v6  ;;  %v6053_v6 = vld [vmem:[%s7730_s7 + $0x9a0] ss:$16 sps:$4 sm:$0xff]  }
 0x192   : > { %4584 = vmatpush2.bf16.msra.mxu1 %v5974_v7  ;;  %4544 = vmatprep.subr.bf16.mxu0 %v5979_v8  ;;  %v6056_v7 = vld [vmem:[%s7730_s7 + $0xba0] ss:$16 sps:$4 sm:$0xff]   ;;  %v6061_v8 = vld [vmem:[%s7730_s7 + $0x984] ss:$16 sps:$4 sm:$0xff]  }
 0x193   : > { %4585 = vmatprep.subr.bf16.mxu1 %v5982_v9  ;;  %v6064_v9 = vld [vmem:[%s7730_s7 + $0xb84] ss:$16 sps:$4 sm:$0xff]  }
 0x195   : > { %4545 = vmatpush2.bf16.msra.mxu0 %v5977_v14  ;;  %v6059_v14 = vld [vmem:[%s7730_s7 + $0x980] ss:$16 sps:$4 sm:$0xff]  }
 0x196   : > { %4586 = vmatpush2.bf16.msra.mxu1 %v5980_v15  ;;  %4546 = vmatprep.subr.bf16.mxu0 %v5985_v16  ;;  %v6062_v15 = vld [vmem:[%s7730_s7 + $0xb80] ss:$16 sps:$4 sm:$0xff]   ;;  %v6067_v16 = vld [vmem:[%s7730_s7 + $0x964] ss:$16 sps:$4 sm:$0xff]  }
 0x197   : > { %4587 = vmatprep.subr.bf16.mxu1 %v5988_v17  ;;  %v6070_v17 = vld [vmem:[%s7730_s7 + $0xb64] ss:$16 sps:$4 sm:$0xff]  }
 0x199   : > { %4547 = vmatpush2.bf16.msra.mxu0 %v5983_v18  ;;  %v6065_v18 = vld [vmem:[%s7730_s7 + $0x960] ss:$16 sps:$4 sm:$0xff]  }
 0x19a   : > { %4588 = vmatpush2.bf16.msra.mxu1 %v5986_v19  ;;  %4598 = vmatprep.subr.bf16.mxu0 %v5995_v20  ;;  %v6068_v19 = vld [vmem:[%s7730_s7 + $0xb60] ss:$16 sps:$4 sm:$0xff]   ;;  %v6073_v20 = vld [vmem:[%s7730_s7 + $0x944] ss:$16 sps:$4 sm:$0xff]  }
 0x19b   : > { %4639 = vmatprep.subr.bf16.mxu1 %v5998_v21  ;;  %v6076_v21 = vld [vmem:[%s7730_s7 + $0xb44] ss:$16 sps:$4 sm:$0xff]  }
 0x19c   : > { %4549 = vmatmul.mubr.bf16.vlgmr.msra.gmra.mxu0 %v7896_v22 }
 0x19d   : > { %4590 = vmatmul.mubr.bf16.vlgmr.msra.gmra.mxu1 %v7900_v23  ;;  %4599 = vmatpush1.bf16.msra.mxu0 %v5993_v24  ;;  %v6071_v24 = vld [vmem:[%s7730_s7 + $0x940] ss:$16 sps:$4 sm:$0xff]  }
 0x19e   : > { %4640 = vmatpush1.bf16.msra.mxu1 %v5996_v25  ;;  %4600 = vmatprep.subr.bf16.mxu0 %v6001_v11  ;;  %v6074_v25 = vld [vmem:[%s7730_s7 + $0xb40] ss:$16 sps:$4 sm:$0xff]   ;;  %v6079_v11 = vld [vmem:[%s7730_s7 + $0x924] ss:$16 sps:$4 sm:$0xff]  }
 0x19f   : > { %4641 = vmatprep.subr.bf16.mxu1 %v6004_v27  ;;  %4630 = vmatprep.mubr.bf16.mxu0 %v7918_v28  ;;  %v6082_v27 = vld [vmem:[%s7730_s7 + $0xb24] ss:$16 sps:$4 sm:$0xff]  }
 0x1a0   : > { %4671 = vmatprep.mubr.bf16.mxu1 %v7922_v29 }
 0x1a1   : > { %4601 = vmatpush1.bf16.msra.mxu0 %v5999_v30  ;;  %v6077_v30 = vld [vmem:[%s7730_s7 + $0x920] ss:$16 sps:$4 sm:$0xff]  }
 0x1a2   : > { %4642 = vmatpush1.bf16.msra.mxu1 %v6002_v31  ;;  %4602 = vmatprep.subr.bf16.mxu0 %v6007_v32  ;;  %v6080_v31 = vld [vmem:[%s7730_s7 + $0xb20] ss:$16 sps:$4 sm:$0xff]   ;;  %v6085_v32 = vld [vmem:[%s7730_s7 + $0x904] ss:$16 sps:$4 sm:$0xff]  }
 0x1a3   : > { %4643 = vmatprep.subr.bf16.mxu1 %v6010_v33  ;;  %v6088_v33 = vld [vmem:[%s7730_s7 + $0xb04] ss:$16 sps:$4 sm:$0xff]  }
 0x1a5   : > { %4603 = vmatpush1.bf16.msra.mxu0 %v6005_v34  ;;  %v6083_v34 = vld [vmem:[%s7730_s7 + $0x900] ss:$16 sps:$4 sm:$0xff]  }
 0x1a6   : > { %4644 = vmatpush1.bf16.msra.mxu1 %v6008_v35  ;;  %4604 = vmatprep.subr.bf16.mxu0 %v6013_v36  ;;  %v6086_v35 = vld [vmem:[%s7730_s7 + $0xb00] ss:$16 sps:$4 sm:$0xff]   ;;  %v6095_v36 = vld [vmem:[%s7730_s7 + $0xce4] ss:$16 sps:$4 sm:$0xff]  }
 0x1a7   : > { %4645 = vmatprep.subr.bf16.mxu1 %v6016_v37  ;;  %v6098_v37 = vld [vmem:[%s7730_s7 + $0xee4] ss:$16 sps:$4 sm:$0xff]  }
 0x1a9   : > { %4605 = vmatpush1.bf16.msra.mxu0 %v6011_v38  ;;  %v6093_v38 = vld [vmem:[%s7730_s7 + $0xce0] ss:$16 sps:$4 sm:$0xff]  }
 0x1aa   : > { %4646 = vmatpush1.bf16.msra.mxu1 %v6014_v39  ;;  %4606 = vmatprep.subr.bf16.mxu0 %v6019_v40  ;;  %v7992_v39 = vld [vmem:[%s8428_s0 + $0x30] sm:$0xff]  ;;  %v7996_v40 = vcombine.low %v7907_v26, %v7907_v26 }
 0x1ab   : > { %4647 = vmatprep.subr.bf16.mxu1 %v6022_v41  ;;  %v8000_v41 = vcombine.low %v7912_v10, %v7912_v10  ;;  %v6104_v26 = vld [vmem:[%s7730_s7 + $0xec4] ss:$16 sps:$4 sm:$0xff]   ;;  %v8012_v10 = vcombine.high %v7992_v39, %v7992_v39 }
 0x1ad   : > { %4607 = vmatpush1.bf16.msra.mxu0 %v6017_v42  ;;  %v8005_v42 = vld [vmem:[%s8428_s0 + $0x38] sm:$0xff] }
 0x1ae   : > { %4648 = vmatpush1.bf16.msra.mxu1 %v6020_v43  ;;  %4608 = vmatprep.subr.bf16.mxu0 %v6025_v44  ;;  %v6096_v43 = vld [vmem:[%s7730_s7 + $0xee0] ss:$16 sps:$4 sm:$0xff]   ;;  %v6101_v44 = vld [vmem:[%s7730_s7 + $0xcc4] ss:$16 sps:$4 sm:$0xff]  }
 0x1af   : > { %4649 = vmatprep.subr.bf16.mxu1 %v6028_v45  ;;  %v8016_v45 = vcombine.high %v8005_v42, %v8005_v42 }
 0x1b1   : > { %4609 = vmatpush1.bf16.msra.mxu0 %v6023_v46  ;;  %v6099_v46 = vld [vmem:[%s7730_s7 + $0xcc0] ss:$16 sps:$4 sm:$0xff]  }
 0x1b2   : > { %4650 = vmatpush1.bf16.msra.mxu1 %v6026_v47  ;;  %4610 = vmatprep.subr.bf16.mxu0 %v6031_v48  ;;  %v6102_v47 = vld [vmem:[%s7730_s7 + $0xec0] ss:$16 sps:$4 sm:$0xff]   ;;  %v6107_v48 = vld [vmem:[%s7730_s7 + $0xca4] ss:$16 sps:$4 sm:$0xff]  }
 0x1b3   : > { %4651 = vmatprep.subr.bf16.mxu1 %v6034_v49  ;;  %v6110_v49 = vld [vmem:[%s7730_s7 + $0xea4] ss:$16 sps:$4 sm:$0xff]  }
 0x1b5   : > { %4611 = vmatpush1.bf16.msra.mxu0 %v6029_v50  ;;  %v6105_v50 = vld [vmem:[%s7730_s7 + $0xca0] ss:$16 sps:$4 sm:$0xff]  }
 0x1b6   : > { %4652 = vmatpush1.bf16.msra.mxu1 %v6032_v51  ;;  %4612 = vmatprep.subr.bf16.mxu0 %v6037_v52  ;;  %v6108_v51 = vld [vmem:[%s7730_s7 + $0xea0] ss:$16 sps:$4 sm:$0xff]   ;;  %v6113_v52 = vld [vmem:[%s7730_s7 + $0xc84] ss:$16 sps:$4 sm:$0xff]  }
 0x1b7   : > { %4653 = vmatprep.subr.bf16.mxu1 %v6040_v53  ;;  %v6116_v53 = vld [vmem:[%s7730_s7 + $0xe84] ss:$16 sps:$4 sm:$0xff]  }
 0x1b9   : > { %4613 = vmatpush1.bf16.msra.mxu0 %v6035_v54  ;;  %v6111_v54 = vld [vmem:[%s7730_s7 + $0xc80] ss:$16 sps:$4 sm:$0xff]  }
 0x1ba   : > { %4654 = vmatpush1.bf16.msra.mxu1 %v6038_v55  ;;  %4614 = vmatprep.subr.bf16.mxu0 %v6043_v56  ;;  %v6114_v55 = vld [vmem:[%s7730_s7 + $0xe80] ss:$16 sps:$4 sm:$0xff]   ;;  %v6119_v56 = vld [vmem:[%s7730_s7 + $0xc64] ss:$16 sps:$4 sm:$0xff]  }
 0x1bb   : > { %4655 = vmatprep.subr.bf16.mxu1 %v6046_v57  ;;  %v6122_v57 = vld [vmem:[%s7730_s7 + $0xe64] ss:$16 sps:$4 sm:$0xff]  }
 0x1bd   : > { %4615 = vmatpush2.bf16.msra.mxu0 %v6041_v58  ;;  %v6117_v58 = vld [vmem:[%s7730_s7 + $0xc60] ss:$16 sps:$4 sm:$0xff]  }
 0x1be   : > { %4656 = vmatpush2.bf16.msra.mxu1 %v6044_v59  ;;  %4616 = vmatprep.subr.bf16.mxu0 %v6049_v60  ;;  %v6120_v59 = vld [vmem:[%s7730_s7 + $0xe60] ss:$16 sps:$4 sm:$0xff]   ;;  %v6125_v60 = vld [vmem:[%s7730_s7 + $0xc44] ss:$16 sps:$4 sm:$0xff]  }
 0x1bf   : > { %4657 = vmatprep.subr.bf16.mxu1 %v6052_v61  ;;  %v6128_v61 = vld [vmem:[%s7730_s7 + $0xe44] ss:$16 sps:$4 sm:$0xff]  }
 0x1c1   : > { %4617 = vmatpush2.bf16.msra.mxu0 %v6047_v62  ;;  %v6123_v62 = vld [vmem:[%s7730_s7 + $0xc40] ss:$16 sps:$4 sm:$0xff]  }
 0x1c2   : > { %4658 = vmatpush2.bf16.msra.mxu1 %v6050_v63  ;;  %4618 = vmatprep.subr.bf16.mxu0 %v6055_v4  ;;  %v6126_v63 = vld [vmem:[%s7730_s7 + $0xe40] ss:$16 sps:$4 sm:$0xff]   ;;  %v6131_v4 = vld [vmem:[%s7730_s7 + $0xc24] ss:$16 sps:$4 sm:$0xff]  }
 0x1c3   : > { %4659 = vmatprep.subr.bf16.mxu1 %v6058_v5  ;;  %v6134_v5 = vld [vmem:[%s7730_s7 + $0xe24] ss:$16 sps:$4 sm:$0xff]  }
 0x1c5   : > { %4619 = vmatpush2.bf16.msra.mxu0 %v6053_v6  ;;  %v6129_v6 = vld [vmem:[%s7730_s7 + $0xc20] ss:$16 sps:$4 sm:$0xff]  }
 0x1c6   : > { %4660 = vmatpush2.bf16.msra.mxu1 %v6056_v7  ;;  %4620 = vmatprep.subr.bf16.mxu0 %v6061_v8  ;;  %v6132_v7 = vld [vmem:[%s7730_s7 + $0xe20] ss:$16 sps:$4 sm:$0xff]   ;;  %v6137_v8 = vld [vmem:[%s7730_s7 + $0xc04] ss:$16 sps:$4 sm:$0xff]  }
 0x1c7   : > { %4661 = vmatprep.subr.bf16.mxu1 %v6064_v9  ;;  %v6140_v9 = vld [vmem:[%s7730_s7 + $0xe04] ss:$16 sps:$4 sm:$0xff]  }
 0x1c9   : > { %4621 = vmatpush2.bf16.msra.mxu0 %v6059_v14  ;;  %v6135_v14 = vld [vmem:[%s7730_s7 + $0xc00] ss:$16 sps:$4 sm:$0xff]  }
 0x1ca   : > { %4662 = vmatpush2.bf16.msra.mxu1 %v6062_v15  ;;  %4622 = vmatprep.subr.bf16.mxu0 %v6067_v16  ;;  %v6138_v15 = vld [vmem:[%s7730_s7 + $0xe00] ss:$16 sps:$4 sm:$0xff]   ;;  %v6143_v16 = vld [vmem:[%s7730_s7 + $0xde4] ss:$16 sps:$4 sm:$0xff]  }
 0x1cb   : > { %4663 = vmatprep.subr.bf16.mxu1 %v6070_v17  ;;  %v6146_v17 = vld [vmem:[%s7730_s7 + $0xfe4] ss:$16 sps:$4 sm:$0xff]  }
 0x1cd   : > { %4623 = vmatpush2.bf16.msra.mxu0 %v6065_v18  ;;  %v6141_v18 = vld [vmem:[%s7730_s7 + $0xde0] ss:$16 sps:$4 sm:$0xff]  }
 0x1ce   : > { %4664 = vmatpush2.bf16.msra.mxu1 %v6068_v19  ;;  %4624 = vmatprep.subr.bf16.mxu0 %v6073_v20  ;;  %v6144_v19 = vld [vmem:[%s7730_s7 + $0xfe0] ss:$16 sps:$4 sm:$0xff]   ;;  %v6149_v20 = vld [vmem:[%s7730_s7 + $0xdc4] ss:$16 sps:$4 sm:$0xff]  }
 0x1cf   : > { %4665 = vmatprep.subr.bf16.mxu1 %v6076_v21  ;;  %v6152_v21 = vld [vmem:[%s7730_s7 + $0xfc4] ss:$16 sps:$4 sm:$0xff]  }
 0x1d1   : > { %4625 = vmatpush2.bf16.msra.mxu0 %v6071_v24  ;;  %v6147_v24 = vld [vmem:[%s7730_s7 + $0xdc0] ss:$16 sps:$4 sm:$0xff]  }
 0x1d2   : > { %4666 = vmatpush2.bf16.msra.mxu1 %v6074_v25  ;;  %4626 = vmatprep.subr.bf16.mxu0 %v6079_v11  ;;  %v6150_v25 = vld [vmem:[%s7730_s7 + $0xfc0] ss:$16 sps:$4 sm:$0xff]   ;;  %v6155_v11 = vld [vmem:[%s7730_s7 + $0xda4] ss:$16 sps:$4 sm:$0xff]  }
 0x1d3   : > { %4667 = vmatprep.subr.bf16.mxu1 %v6082_v27  ;;  %v6158_v27 = vld [vmem:[%s7730_s7 + $0xfa4] ss:$16 sps:$4 sm:$0xff]  }
 0x1d5   : > { %4627 = vmatpush2.bf16.msra.mxu0 %v6077_v30  ;;  %v6153_v30 = vld [vmem:[%s7730_s7 + $0xda0] ss:$16 sps:$4 sm:$0xff]  }
 0x1d6   : > { %4668 = vmatpush2.bf16.msra.mxu1 %v6080_v31  ;;  %4628 = vmatprep.subr.bf16.mxu0 %v6085_v32  ;;  %v6156_v31 = vld [vmem:[%s7730_s7 + $0xfa0] ss:$16 sps:$4 sm:$0xff]   ;;  %v6161_v32 = vld [vmem:[%s7730_s7 + $0xd84] ss:$16 sps:$4 sm:$0xff]  }
 0x1d7   : > { %4669 = vmatprep.subr.bf16.mxu1 %v6088_v33  ;;  %v6164_v33 = vld [vmem:[%s7730_s7 + $0xf84] ss:$16 sps:$4 sm:$0xff]  }
 0x1d9   : > { %4629 = vmatpush2.bf16.msra.mxu0 %v6083_v34  ;;  %v6159_v34 = vld [vmem:[%s7730_s7 + $0xd80] ss:$16 sps:$4 sm:$0xff]  }
 0x1da   : > { %4670 = vmatpush2.bf16.msra.mxu1 %v6086_v35  ;;  %4680 = vmatprep.subr.bf16.mxu0 %v6095_v36  ;;  %v6162_v35 = vld [vmem:[%s7730_s7 + $0xf80] ss:$16 sps:$4 sm:$0xff]   ;;  %v6167_v36 = vld [vmem:[%s7730_s7 + $0xd64] ss:$16 sps:$4 sm:$0xff]  }
 0x1db   : > { %4721 = vmatprep.subr.bf16.mxu1 %v6098_v37  ;;  %v6170_v37 = vld [vmem:[%s7730_s7 + $0xf64] ss:$16 sps:$4 sm:$0xff]  }
 0x1dc   : > { %4631 = vmatmul.mubr.bf16.vlgmr.msra.gmra.mxu0 %v7996_v40 }
 0x1dd   : > { %4672 = vmatmul.mubr.bf16.vlgmr.msra.gmra.mxu1 %v8000_v41  ;;  %4681 = vmatpush1.bf16.msra.mxu0 %v6093_v38  ;;  %v6165_v38 = vld [vmem:[%s7730_s7 + $0xd60] ss:$16 sps:$4 sm:$0xff]  }
 0x1de   : > { %4722 = vmatpush1.bf16.msra.mxu1 %v6096_v43  ;;  %4682 = vmatprep.subr.bf16.mxu0 %v6101_v44  ;;  %v6168_v43 = vld [vmem:[%s7730_s7 + $0xf60] ss:$16 sps:$4 sm:$0xff]   ;;  %v6173_v44 = vld [vmem:[%s7730_s7 + $0xd44] ss:$16 sps:$4 sm:$0xff]  }
 0x1df   : > { %4723 = vmatprep.subr.bf16.mxu1 %v6104_v26  ;;  %4712 = vmatprep.mubr.bf16.mxu0 %v8012_v10  ;;  %v6176_v26 = vld [vmem:[%s7730_s7 + $0xf44] ss:$16 sps:$4 sm:$0xff]  }
 0x1e0   : > { %4753 = vmatprep.mubr.bf16.mxu1 %v8016_v45 }
 0x1e1   : > { %4683 = vmatpush1.bf16.msra.mxu0 %v6099_v46  ;;  %v6171_v46 = vld [vmem:[%s7730_s7 + $0xd40] ss:$16 sps:$4 sm:$0xff]  }
 0x1e2   : > { %4724 = vmatpush1.bf16.msra.mxu1 %v6102_v47  ;;  %4684 = vmatprep.subr.bf16.mxu0 %v6107_v48  ;;  %v6174_v47 = vld [vmem:[%s7730_s7 + $0xf40] ss:$16 sps:$4 sm:$0xff]   ;;  %v1798_v48 = vlaneseq }
 0x1e3   : > { %4725 = vmatprep.subr.bf16.mxu1 %v6110_v49  ;;  %v6179_v49 = vld [vmem:[%s7730_s7 + $0xd24] ss:$16 sps:$4 sm:$0xff]  }
 0x1e5   : > { %4685 = vmatpush1.bf16.msra.mxu0 %v6105_v50  ;;  %v6182_v50 = vld [vmem:[%s7730_s7 + $0xf24] ss:$16 sps:$4 sm:$0xff]  }
 0x1e6   : > { %4726 = vmatpush1.bf16.msra.mxu1 %v6108_v51  ;;  %4686 = vmatprep.subr.bf16.mxu0 %v6113_v52  ;;  %v6177_v51 = vld [vmem:[%s7730_s7 + $0xd20] ss:$16 sps:$4 sm:$0xff]  }
 0x1e7   : > { %4727 = vmatprep.subr.bf16.mxu1 %v6116_v53  ;;  %v6180_v52 = vld [vmem:[%s7730_s7 + $0xf20] ss:$16 sps:$4 sm:$0xff]   ;;  %v8079_v53 = vshrl.u32 %v1798_v48, 7  ;;  %v6226_v48 = vld [vmem:[%s7730_s7 + $0x248] ss:$16 sps:$4 sm:$0xff]  }
 0x1e9   : > { %4687 = vmatpush1.bf16.msra.mxu0 %v6111_v54  ;;  %v6185_v54 = vld [vmem:[%s7730_s7 + $0xd04] ss:$16 sps:$4 sm:$0xff]  }
 0x1ea   : > { %4728 = vmatpush1.bf16.msra.mxu1 %v6114_v55  ;;  %4688 = vmatprep.subr.bf16.mxu0 %v6119_v56  ;;  %v6188_v55 = vld [vmem:[%s7730_s7 + $0xf04] ss:$16 sps:$4 sm:$0xff]   ;;  %v6183_v56 = vld [vmem:[%s7730_s7 + $0xd00] ss:$16 sps:$4 sm:$0xff]  }
 0x1eb   : > { %4729 = vmatprep.subr.bf16.mxu1 %v6122_v57  ;;  %v6186_v57 = vld [vmem:[%s7730_s7 + $0xf00] ss:$16 sps:$4 sm:$0xff]  }
 0x1ed   : > { %4689 = vmatpush1.bf16.msra.mxu0 %v6117_v58  ;;  %v1796_v58 = vld [vmem:[%s8087_s28] sm:$0xf] }
 0x1ee   : > { %4730 = vmatpush1.bf16.msra.mxu1 %v6120_v59  ;;  %4690 = vmatprep.subr.bf16.mxu0 %v6125_v60  ;;  %v1800_v59 = vsub.s32 0, %v8079_v53  ;;  %v6195_v60 = vld [vmem:[%s7730_s7 + $0xec] ss:$16 sps:$4 sm:$0xff]  }
 0x1ef   : > { %4731 = vmatprep.subr.bf16.mxu1 %v6128_v61  ;;  %v6198_v61 = vld [vmem:[%s7730_s7 + $0x2ec] ss:$16 sps:$4 sm:$0xff]  }
 0x1f1   : > { %4691 = vmatpush1.bf16.msra.mxu0 %v6123_v62  ;;  %v1804_v62 = vsub.s32 1, %v8079_v53 }
 0x1f2   : > { %4732 = vmatpush1.bf16.msra.mxu1 %v6126_v63  ;;  %4692 = vmatprep.subr.bf16.mxu0 %v6131_v4  ;;  %v8098_v63 = vcombine.low %v7992_v39, %v7992_v39  ;;  %v8102_v4 = vcombine.low %v8005_v42, %v8005_v42  ;;  %v6202_v42 = vld [vmem:[%s7730_s7 + $0x2c8] ss:$16 sps:$4 sm:$0xff]  }
 0x1f3   : > { %4733 = vmatprep.subr.bf16.mxu1 %v6134_v5  ;;  %v6193_v5 = vld [vmem:[%s7730_s7 + $0xe8] ss:$16 sps:$4 sm:$0xff]  }
 0x1f5   : > { %4693 = vmatpush1.bf16.msra.mxu0 %v6129_v6  ;;  %v1801_v6 = vrot.slane %v1796_v58, %v1800_v59  ;;  %v6246_v59 = vld [vmem:[%s7730_s7 + $0x3ec] ss:$16 sps:$4 sm:$0xff]  }
 0x1f6   : > { %4734 = vmatpush1.bf16.msra.mxu1 %v6132_v7  ;;  %4694 = vmatprep.subr.bf16.mxu0 %v6137_v8  ;;  %v6196_v7 = vld [vmem:[%s7730_s7 + $0x2e8] ss:$16 sps:$4 sm:$0xff]   ;;  %v6201_v8 = vld [vmem:[%s7730_s7 + $0xcc] ss:$16 sps:$4 sm:$0xff]  }
 0x1f7   : > { %4735 = vmatprep.subr.bf16.mxu1 %v6140_v9  ;;  %v6204_v9 = vld [vmem:[%s7730_s7 + $0x2cc] ss:$16 sps:$4 sm:$0xff]  }
 0x1f9   : > { %4695 = vmatpush1.bf16.msra.mxu0 %v6135_v14  ;;  %v1805_v14 = vrot.slane %v1796_v58, %v1804_v62  ;;  %v6243_v58 = vld [vmem:[%s7730_s7 + $0x1ec] ss:$16 sps:$4 sm:$0xff]  }
 0x1fa   : > { %4736 = vmatpush1.bf16.msra.mxu1 %v6138_v15  ;;  %4696 = vmatprep.subr.bf16.mxu0 %v6143_v16  ;;  %v6199_v15 = vld [vmem:[%s7730_s7 + $0xc8] ss:$16 sps:$4 sm:$0xff]   ;;  %v6249_v62 = vld [vmem:[%s7730_s7 + $0x1cc] ss:$16 sps:$4 sm:$0xff]  }
 0x1fb   : > { %4737 = vmatprep.subr.bf16.mxu1 %v6146_v17 }
 0x1fd   : > { %4697 = vmatpush2.bf16.msra.mxu0 %v6141_v18  ;;  %v6207_v18 = vld [vmem:[%s7730_s7 + $0xac] ss:$16 sps:$4 sm:$0xff]  }
 0x1fe   : > { %4738 = vmatpush2.bf16.msra.mxu1 %v6144_v19  ;;  %4698 = vmatprep.subr.bf16.mxu0 %v6149_v20 }
 0x1ff   : > { %4739 = vmatprep.subr.bf16.mxu1 %v6152_v21  ;;  %v6210_v21 = vld [vmem:[%s7730_s7 + $0x2ac] ss:$16 sps:$4 sm:$0xff]  }
 0x201   : > { %4699 = vmatpush2.bf16.msra.mxu0 %v6147_v24 }
 0x202   : > { %4740 = vmatpush2.bf16.msra.mxu1 %v6150_v25  ;;  %4700 = vmatprep.subr.bf16.mxu0 %v6155_v11  ;;  %v6205_v11 = vld [vmem:[%s7730_s7 + $0xa8] ss:$16 sps:$4 sm:$0xff]  }
 0x203   : > { %4741 = vmatprep.subr.bf16.mxu1 %v6158_v27  ;;  %v6208_v27 = vld [vmem:[%s7730_s7 + $0x2a8] ss:$16 sps:$4 sm:$0xff]  }
 0x205   : > { %4701 = vmatpush2.bf16.msra.mxu0 %v6153_v30 }
 0x206   : > { %4742 = vmatpush2.bf16.msra.mxu1 %v6156_v31  ;;  %4702 = vmatprep.subr.bf16.mxu0 %v6161_v32 }
 0x207   : > { %4743 = vmatprep.subr.bf16.mxu1 %v6164_v33 }
 0x209   : > { %4703 = vmatpush2.bf16.msra.mxu0 %v6159_v34 }
 0x20a   : > { %4744 = vmatpush2.bf16.msra.mxu1 %v6162_v35  ;;  %4704 = vmatprep.subr.bf16.mxu0 %v6167_v36  ;;  %v6213_v35 = vld [vmem:[%s7730_s7 + $0x8c] ss:$16 sps:$4 sm:$0xff]   ;;  %v6214_v36 = vld [vmem:[%s7730_s7 + $0x288] ss:$16 sps:$4 sm:$0xff]  }
 0x20b   : > { %4745 = vmatprep.subr.bf16.mxu1 %v6170_v37  ;;  %v6219_v37 = vld [vmem:[%s7730_s7 + $0x6c] ss:$16 sps:$4 sm:$0xff]  }
 0x20d   : > { %4705 = vmatpush2.bf16.msra.mxu0 %v6165_v38  ;;  %v6222_v38 = vld [vmem:[%s7730_s7 + $0x26c] ss:$16 sps:$4 sm:$0xff]  }
 0x20e   : > { %4746 = vmatpush2.bf16.msra.mxu1 %v6168_v43  ;;  %4706 = vmatprep.subr.bf16.mxu0 %v6173_v44  ;;  %v6217_v43 = vld [vmem:[%s7730_s7 + $0x68] ss:$16 sps:$4 sm:$0xff]  }
 0x20f   : > { %4747 = vmatprep.subr.bf16.mxu1 %v6176_v26  ;;  %v6220_v44 = vld [vmem:[%s7730_s7 + $0x268] ss:$16 sps:$4 sm:$0xff]   ;;  %v6225_v26 = vld [vmem:[%s7730_s7 + $0x4c] ss:$16 sps:$4 sm:$0xff]  }
 0x211   : > { %4707 = vmatpush2.bf16.msra.mxu0 %v6171_v46  ;;  %v6228_v46 = vld [vmem:[%s7730_s7 + $0x24c] ss:$16 sps:$4 sm:$0xff]  }
 0x212   : > { %4748 = vmatpush2.bf16.msra.mxu1 %v6174_v47  ;;  %4708 = vmatprep.subr.bf16.mxu0 %v6179_v49  ;;  %v6223_v47 = vld [vmem:[%s7730_s7 + $0x48] ss:$16 sps:$4 sm:$0xff]   ;;  %v6231_v49 = vld [vmem:[%s7730_s7 + $0x2c] ss:$16 sps:$4 sm:$0xff]  }
 0x213   : > { %4749 = vmatprep.subr.bf16.mxu1 %v6182_v50  ;;  %v6234_v50 = vld [vmem:[%s7730_s7 + $0x22c] ss:$16 sps:$4 sm:$0xff]  }
 0x215   : > { %4709 = vmatpush2.bf16.msra.mxu0 %v6177_v51  ;;  %v6229_v51 = vld [vmem:[%s7730_s7 + $0x28] ss:$16 sps:$4 sm:$0xff]  }
 0x216   : > { %4750 = vmatpush2.bf16.msra.mxu1 %v6180_v52  ;;  %4710 = vmatprep.subr.bf16.mxu0 %v6185_v54  ;;  %v6232_v52 = vld [vmem:[%s7730_s7 + $0x228] ss:$16 sps:$4 sm:$0xff]   ;;  %v6237_v54 = vld [vmem:[%s7730_s7 + $0xc] ss:$16 sps:$4 sm:$0xff]  }
 0x217   : > { %4751 = vmatprep.subr.bf16.mxu1 %v6188_v55  ;;  %v6240_v55 = vld [vmem:[%s7730_s7 + $0x20c] ss:$16 sps:$4 sm:$0xff]  }
 0x219   : > { %4711 = vmatpush2.bf16.msra.mxu0 %v6183_v56  ;;  %v6235_v56 = vld [vmem:[%s7730_s7 + $0x8] ss:$16 sps:$4 sm:$0xff]  }
 0x21a   : > { %4752 = vmatpush2.bf16.msra.mxu1 %v6186_v57  ;;  %4762 = vmatprep.subr.bf16.mxu0 %v6195_v60  ;;  %v6238_v57 = vld [vmem:[%s7730_s7 + $0x208] ss:$16 sps:$4 sm:$0xff]  }
 0x21b   : > { %4803 = vmatprep.subr.bf16.mxu1 %v6198_v61  ;;  %v6241_v60 = vld [vmem:[%s7730_s7 + $0x1e8] ss:$16 sps:$4 sm:$0xff]  }
 0x21c   : > { %v4468_v39 = vpop.f32.mrf.mxu0  ;;  %4713 = vmatmul.mubr.bf16.vlgmr.msra.gmra.mxu0 %v8098_v63  ;;  %v6244_v61 = vld [vmem:[%s7730_s7 + $0x3e8] ss:$16 sps:$4 sm:$0xff]  }
 0x21d   : > { %v4509_v16 = vpop.f32.mrf.mxu1  ;;  %4754 = vmatmul.mubr.bf16.vlgmr.msra.gmra.mxu1 %v8102_v4  ;;  %v4469_v17 = vadd.f32 %v4468_v39, %v1801_v6  ;;  %4763 = vmatpush1.bf16.msra.mxu0 %v6193_v5  ;;  %v6252_v5 = vld [vmem:[%s7730_s7 + $0x3cc] ss:$16 sps:$4 sm:$0xff]   ;;  %v6247_v6 = vld [vmem:[%s7730_s7 + $0x1c8] ss:$16 sps:$4 sm:$0xff]  }
 0x21e   : > { %4804 = vmatpush1.bf16.msra.mxu1 %v6196_v7  ;;  %v4470_v19 = vpop.f32.mrf.mxu0  ;;  %4764 = vmatprep.subr.bf16.mxu0 %v6201_v8  ;;  %v6250_v7 = vld [vmem:[%s7730_s7 + $0x3c8] ss:$16 sps:$4 sm:$0xff]   ;;  %v6255_v8 = vld [vmem:[%s7730_s7 + $0x1ac] ss:$16 sps:$4 sm:$0xff]  }
 0x21f   : > { %v4511_v20 = vpop.f32.mrf.mxu1  ;;  %4805 = vmatprep.subr.bf16.mxu1 %v6204_v9  ;;  %v8114_v24 = vadd.f32 %v4509_v16, %v4469_v17  ;;  %v4471_v25 = vadd.f32 %v4470_v19, %v1805_v14  ;;  %4794 = vmatprep.mubr.bf16.mxu0 %v7724_v2  ;;  %v6216_v2 = vld [vmem:[%s7730_s7 + $0x28c] ss:$16 sps:$4 sm:$0xff]   ;;  %v6253_v14 = vld [vmem:[%s7730_s7 + $0x1a8] ss:$16 sps:$4 sm:$0xff]  }
 0x220   : > { %4835 = vmatprep.mubr.bf16.mxu1 %v7728_v3  ;;  %v4472_v30 = vpop.f32.mrf.mxu0  ;;  %v6211_v3 = vld [vmem:[%s7730_s7 + $0x88] ss:$16 sps:$4 sm:$0xff]   ;;  %v6258_v9 = vld [vmem:[%s7730_s7 + $0x3ac] ss:$16 sps:$4 sm:$0xff]  }
 0x221   : > { %v4513_v31 = vpop.f32.mrf.mxu1  ;;  %v8120_v32 = vadd.f32 %v4511_v20, %v4471_v25  ;;  %4765 = vmatpush1.bf16.msra.mxu0 %v6199_v15  ;;  %v6256_v15 = vld [vmem:[%s7730_s7 + $0x3a8] ss:$16 sps:$4 sm:$0xff]   ;;  %v6261_v39 = vld [vmem:[%s7730_s7 + $0x18c] ss:$16 sps:$4 sm:$0xff]  }
 0x222   : > { %4806 = vmatpush1.bf16.msra.mxu1 %v6202_v42  ;;  %v4473_v33 = vpop.f32.mrf.mxu0  ;;  %4766 = vmatprep.subr.bf16.mxu0 %v6207_v18  ;;  %v6264_v16 = vld [vmem:[%s7730_s7 + $0x38c] ss:$16 sps:$4 sm:$0xff]   ;;  %v6259_v42 = vld [vmem:[%s7730_s7 + $0x188] ss:$16 sps:$4 sm:$0xff]  }
 0x223   : > { %v4514_v34 = vpop.f32.mrf.mxu1  ;;  %4807 = vmatprep.subr.bf16.mxu1 %v6210_v21  ;;  %v6262_v17 = vld [vmem:[%s7730_s7 + $0x388] ss:$16 sps:$4 sm:$0xff]   ;;  %v6267_v18 = vld [vmem:[%s7730_s7 + $0x16c] ss:$16 sps:$4 sm:$0xff]  }
 0x224   : > { %v6270_v19 = vld [vmem:[%s7730_s7 + $0x36c] ss:$16 sps:$4 sm:$0xff]   ;;  %v6265_v20 = vld [vmem:[%s7730_s7 + $0x168] ss:$16 sps:$4 sm:$0xff]  }
 0x225   : > { %4767 = vmatpush1.bf16.msra.mxu0 %v6205_v11  ;;  %v6268_v21 = vld [vmem:[%s7730_s7 + $0x368] ss:$16 sps:$4 sm:$0xff]   ;;  %v6273_v25 = vld [vmem:[%s7730_s7 + $0x14c] ss:$16 sps:$4 sm:$0xff]  }
 0x226   : > { %4808 = vmatpush1.bf16.msra.mxu1 %v6208_v27  ;;  %4768 = vmatprep.subr.bf16.mxu0 %v6213_v35  ;;  %v6276_v11 = vld [vmem:[%s7730_s7 + $0x34c] ss:$16 sps:$4 sm:$0xff]   ;;  %v6271_v27 = vld [vmem:[%s7730_s7 + $0x148] ss:$16 sps:$4 sm:$0xff]  }
 0x227   : > { %4809 = vmatprep.subr.bf16.mxu1 %v6216_v2  ;;  %v6274_v30 = vld [vmem:[%s7730_s7 + $0x348] ss:$16 sps:$4 sm:$0xff]   ;;  %v6279_v31 = vld [vmem:[%s7730_s7 + $0x12c] ss:$16 sps:$4 sm:$0xff]  }
 0x228   : > { %v6282_v33 = vld [vmem:[%s7730_s7 + $0x32c] ss:$16 sps:$4 sm:$0xff]   ;;  %v6277_v34 = vld [vmem:[%s7730_s7 + $0x128] ss:$16 sps:$4 sm:$0xff]  }
 0x229   : > { %4769 = vmatpush1.bf16.msra.mxu0 %v6211_v3  ;;  %v6280_v35 = vld [vmem:[%s7730_s7 + $0x328] ss:$16 sps:$4 sm:$0xff]   ;;  %v6285_v2 = vld [vmem:[%s7730_s7 + $0x10c] ss:$16 sps:$4 sm:$0xff]  }
 0x22a   : > { %4810 = vmatpush1.bf16.msra.mxu1 %v6214_v36  ;;  %4770 = vmatprep.subr.bf16.mxu0 %v6219_v37  ;;  %v6288_v3 = vld [vmem:[%s7730_s7 + $0x30c] ss:$16 sps:$4 sm:$0xff]   ;;  %v6283_v36 = vld [vmem:[%s7730_s7 + $0x108] ss:$16 sps:$4 sm:$0xff]  }
 0x22b   : > { %4811 = vmatprep.subr.bf16.mxu1 %v6222_v38  ;;  %v6286_v37 = vld [vmem:[%s7730_s7 + $0x308] ss:$16 sps:$4 sm:$0xff]   ;;  %v6291_v38 = vld [vmem:[%s7730_s7 + $0x4ec] ss:$16 sps:$4 sm:$0xff]  }
 0x22d   : > { %4771 = vmatpush1.bf16.msra.mxu0 %v6217_v43  ;;  %v6294_v43 = vld [vmem:[%s7730_s7 + $0x6ec] ss:$16 sps:$4 sm:$0xff]  }
 0x22e   : > { %4812 = vmatpush1.bf16.msra.mxu1 %v6220_v44  ;;  %4772 = vmatprep.subr.bf16.mxu0 %v6225_v26  ;;  %v6289_v44 = vld [vmem:[%s7730_s7 + $0x4e8] ss:$16 sps:$4 sm:$0xff]  }
 0x22f   : > { %4813 = vmatprep.subr.bf16.mxu1 %v6228_v46  ;;  %v6292_v26 = vld [vmem:[%s7730_s7 + $0x6e8] ss:$16 sps:$4 sm:$0xff]   ;;  %v6297_v46 = vld [vmem:[%s7730_s7 + $0x4cc] ss:$16 sps:$4 sm:$0xff]  }
 0x231   : > { %4773 = vmatpush1.bf16.msra.mxu0 %v6223_v47  ;;  %v6300_v47 = vld [vmem:[%s7730_s7 + $0x6cc] ss:$16 sps:$4 sm:$0xff]  }
 0x232   : > { %4814 = vmatpush1.bf16.msra.mxu1 %v6226_v48  ;;  %4774 = vmatprep.subr.bf16.mxu0 %v6231_v49 }
 0x233   : > { %4815 = vmatprep.subr.bf16.mxu1 %v6234_v50 }
 0x235   : > { %4775 = vmatpush1.bf16.msra.mxu0 %v6229_v51  ;;  %v6295_v51 = vld [vmem:[%s7730_s7 + $0x4c8] ss:$16 sps:$4 sm:$0xff]  }
 0x236   : > { %4816 = vmatpush1.bf16.msra.mxu1 %v6232_v52  ;;  %4776 = vmatprep.subr.bf16.mxu0 %v6237_v54  ;;  %v6298_v52 = vld [vmem:[%s7730_s7 + $0x6c8] ss:$16 sps:$4 sm:$0xff]  }
 0x237   : > { %4817 = vmatprep.subr.bf16.mxu1 %v6240_v55 }
 0x239   : > { %4777 = vmatpush1.bf16.msra.mxu0 %v6235_v56  ;;  %v6303_v56 = vld [vmem:[%s7730_s7 + $0x4ac] ss:$16 sps:$4 sm:$0xff]  }
 0x23a   : > { %4818 = vmatpush1.bf16.msra.mxu1 %v6238_v57  ;;  %4778 = vmatprep.subr.bf16.mxu0 %v6243_v58  ;;  %v6306_v57 = vld [vmem:[%s7730_s7 + $0x6ac] ss:$16 sps:$4 sm:$0xff]  }
 0x23b   : > { %4819 = vmatprep.subr.bf16.mxu1 %v6246_v59 }
 0x23d   : > { %4779 = vmatpush2.bf16.msra.mxu0 %v6241_v60  ;;  %v6301_v60 = vld [vmem:[%s7730_s7 + $0x4a8] ss:$16 sps:$4 sm:$0xff]  }
 0x23e   : > { %4820 = vmatpush2.bf16.msra.mxu1 %v6244_v61  ;;  %4780 = vmatprep.subr.bf16.mxu0 %v6249_v62  ;;  %v6304_v61 = vld [vmem:[%s7730_s7 + $0x6a8] ss:$16 sps:$4 sm:$0xff]  }
 0x23f   : > { %4821 = vmatprep.subr.bf16.mxu1 %v6252_v5 }
 0x241   : > { %4781 = vmatpush2.bf16.msra.mxu0 %v6247_v6  ;;  %v6310_v6 = vld [vmem:[%s7730_s7 + $0x688] ss:$16 sps:$4 sm:$0xff]  }
 0x242   : > { %4822 = vmatpush2.bf16.msra.mxu1 %v6250_v7  ;;  %4782 = vmatprep.subr.bf16.mxu0 %v6255_v8  ;;  %v6315_v7 = vld [vmem:[%s7730_s7 + $0x46c] ss:$16 sps:$4 sm:$0xff]  }
 0x243   : > { %4823 = vmatprep.subr.bf16.mxu1 %v6258_v9  ;;  %v6318_v8 = vld [vmem:[%s7730_s7 + $0x66c] ss:$16 sps:$4 sm:$0xff]   ;;  %v6313_v9 = vld [vmem:[%s7730_s7 + $0x468] ss:$16 sps:$4 sm:$0xff]  }
 0x245   : > { %4783 = vmatpush2.bf16.msra.mxu0 %v6253_v14  ;;  %v6316_v14 = vld [vmem:[%s7730_s7 + $0x668] ss:$16 sps:$4 sm:$0xff]  }
 0x246   : > { %4824 = vmatpush2.bf16.msra.mxu1 %v6256_v15  ;;  %4784 = vmatprep.subr.bf16.mxu0 %v6261_v39  ;;  %v6321_v15 = vld [vmem:[%s7730_s7 + $0x44c] ss:$16 sps:$4 sm:$0xff]  }
 0x247   : > { %4825 = vmatprep.subr.bf16.mxu1 %v6264_v16  ;;  %v6324_v39 = vld [vmem:[%s7730_s7 + $0x64c] ss:$16 sps:$4 sm:$0xff]   ;;  %v6319_v16 = vld [vmem:[%s7730_s7 + $0x448] ss:$16 sps:$4 sm:$0xff]  }
 0x249   : > { %4785 = vmatpush2.bf16.msra.mxu0 %v6259_v42  ;;  %v6322_v42 = vld [vmem:[%s7730_s7 + $0x648] ss:$16 sps:$4 sm:$0xff]  }
 0x24a   : > { %4826 = vmatpush2.bf16.msra.mxu1 %v6262_v17  ;;  %4786 = vmatprep.subr.bf16.mxu0 %v6267_v18  ;;  %v6327_v17 = vld [vmem:[%s7730_s7 + $0x42c] ss:$16 sps:$4 sm:$0xff]  }
 0x24b   : > { %4827 = vmatprep.subr.bf16.mxu1 %v6270_v19  ;;  %v6330_v18 = vld [vmem:[%s7730_s7 + $0x62c] ss:$16 sps:$4 sm:$0xff]   ;;  %v6325_v19 = vld [vmem:[%s7730_s7 + $0x428] ss:$16 sps:$4 sm:$0xff]  }
 0x24d   : > { %4787 = vmatpush2.bf16.msra.mxu0 %v6265_v20  ;;  %v6328_v20 = vld [vmem:[%s7730_s7 + $0x628] ss:$16 sps:$4 sm:$0xff]  }
 0x24e   : > { %4828 = vmatpush2.bf16.msra.mxu1 %v6268_v21  ;;  %4788 = vmatprep.subr.bf16.mxu0 %v6273_v25  ;;  %v6333_v21 = vld [vmem:[%s7730_s7 + $0x40c] ss:$16 sps:$4 sm:$0xff]  }
 0x24f   : > { %4829 = vmatprep.subr.bf16.mxu1 %v6276_v11  ;;  %v6336_v25 = vld [vmem:[%s7730_s7 + $0x60c] ss:$16 sps:$4 sm:$0xff]   ;;  %v6331_v11 = vld [vmem:[%s7730_s7 + $0x408] ss:$16 sps:$4 sm:$0xff]  }
 0x251   : > { %4789 = vmatpush2.bf16.msra.mxu0 %v6271_v27  ;;  %v6334_v27 = vld [vmem:[%s7730_s7 + $0x608] ss:$16 sps:$4 sm:$0xff]  }
 0x252   : > { %4830 = vmatpush2.bf16.msra.mxu1 %v6274_v30  ;;  %4790 = vmatprep.subr.bf16.mxu0 %v6279_v31  ;;  %v6339_v30 = vld [vmem:[%s7730_s7 + $0x5ec] ss:$16 sps:$4 sm:$0xff]  }
 0x253   : > { %4831 = vmatprep.subr.bf16.mxu1 %v6282_v33  ;;  %v6342_v31 = vld [vmem:[%s7730_s7 + $0x7ec] ss:$16 sps:$4 sm:$0xff]   ;;  %v6337_v33 = vld [vmem:[%s7730_s7 + $0x5e8] ss:$16 sps:$4 sm:$0xff]  }
 0x255   : > { %4791 = vmatpush2.bf16.msra.mxu0 %v6277_v34  ;;  %v6340_v34 = vld [vmem:[%s7730_s7 + $0x7e8] ss:$16 sps:$4 sm:$0xff]  }
 0x256   : > { %4832 = vmatpush2.bf16.msra.mxu1 %v6280_v35  ;;  %4792 = vmatprep.subr.bf16.mxu0 %v6285_v2  ;;  %v6345_v35 = vld [vmem:[%s7730_s7 + $0x5cc] ss:$16 sps:$4 sm:$0xff]  }
 0x257   : > { %4833 = vmatprep.subr.bf16.mxu1 %v6288_v3  ;;  %v6348_v2 = vld [vmem:[%s7730_s7 + $0x7cc] ss:$16 sps:$4 sm:$0xff]   ;;  %v6343_v3 = vld [vmem:[%s7730_s7 + $0x5c8] ss:$16 sps:$4 sm:$0xff]  }
 0x259   : > { %4793 = vmatpush2.bf16.msra.mxu0 %v6283_v36  ;;  %v6346_v36 = vld [vmem:[%s7730_s7 + $0x7c8] ss:$16 sps:$4 sm:$0xff]  }
 0x25a   : > { %4834 = vmatpush2.bf16.msra.mxu1 %v6286_v37  ;;  %4844 = vmatprep.subr.bf16.mxu0 %v6291_v38  ;;  %v6351_v37 = vld [vmem:[%s7730_s7 + $0x5ac] ss:$16 sps:$4 sm:$0xff]  }
 0x25b   : > { %4885 = vmatprep.subr.bf16.mxu1 %v6294_v43  ;;  %v6354_v38 = vld [vmem:[%s7730_s7 + $0x7ac] ss:$16 sps:$4 sm:$0xff]   ;;  %v6349_v43 = vld [vmem:[%s7730_s7 + $0x5a8] ss:$16 sps:$4 sm:$0xff]  }
 0x25c   : > { %v4550_v48 = vpop.f32.mrf.mxu0  ;;  %4795 = vmatmul.mubr.bf16.vlgmr.msra.gmra.mxu0 %v7812_v12 }
 0x25d   : > { %v4591_v49 = vpop.f32.mrf.mxu1  ;;  %4836 = vmatmul.mubr.bf16.vlgmr.msra.gmra.mxu1 %v7816_v13  ;;  %v4551_v50 = vadd.f32 %v4550_v48, %v8114_v24  ;;  %4845 = vmatpush1.bf16.msra.mxu0 %v6289_v44  ;;  %v6352_v44 = vld [vmem:[%s7730_s7 + $0x7a8] ss:$16 sps:$4 sm:$0xff]  }
 0x25e   : > { %4886 = vmatpush1.bf16.msra.mxu1 %v6292_v26  ;;  %v4552_v54 = vpop.f32.mrf.mxu0  ;;  %4846 = vmatprep.subr.bf16.mxu0 %v6297_v46  ;;  %v6357_v26 = vld [vmem:[%s7730_s7 + $0x58c] ss:$16 sps:$4 sm:$0xff]   ;;  %v6358_v48 = vld [vmem:[%s7730_s7 + $0x788] ss:$16 sps:$4 sm:$0xff]  }
 0x25f   : > { %v4593_v55 = vpop.f32.mrf.mxu1  ;;  %4887 = vmatprep.subr.bf16.mxu1 %v6300_v47  ;;  %v8187_v58 = vadd.f32 %v4591_v49, %v4551_v50  ;;  %v4553_v12 = vadd.f32 %v4552_v54, %v8120_v32  ;;  %4876 = vmatprep.mubr.bf16.mxu0 %v7824_v0  ;;  %v6309_v0 = vld [vmem:[%s7730_s7 + $0x48c] ss:$16 sps:$4 sm:$0xff]   ;;  %v6307_v32 = vld [vmem:[%s7730_s7 + $0x488] ss:$16 sps:$4 sm:$0xff]  }
 0x260   : > { %4917 = vmatprep.mubr.bf16.mxu1 %v7828_v1  ;;  %v4554_v13 = vpop.f32.mrf.mxu0  ;;  %v6312_v1 = vld [vmem:[%s7730_s7 + $0x68c] ss:$16 sps:$4 sm:$0xff]   ;;  %v6355_v47 = vld [vmem:[%s7730_s7 + $0x588] ss:$16 sps:$4 sm:$0xff]  }
 0x261   : > { %v4595_v24 = vpop.f32.mrf.mxu1  ;;  %v8192_v59 = vadd.f32 %v4593_v55, %v4553_v12  ;;  %4847 = vmatpush1.bf16.msra.mxu0 %v6295_v51  ;;  %v6360_v46 = vld [vmem:[%s7730_s7 + $0x78c] ss:$16 sps:$4 sm:$0xff]   ;;  %v6361_v51 = vld [vmem:[%s7730_s7 + $0x568] ss:$16 sps:$4 sm:$0xff]  }
 0x262   : > { %4888 = vmatpush1.bf16.msra.mxu1 %v6298_v52  ;;  %v4555_v62 = vpop.f32.mrf.mxu0  ;;  %4848 = vmatprep.subr.bf16.mxu0 %v6303_v56  ;;  %v6363_v49 = vld [vmem:[%s7730_s7 + $0x56c] ss:$16 sps:$4 sm:$0xff]   ;;  %v6364_v52 = vld [vmem:[%s7730_s7 + $0x768] ss:$16 sps:$4 sm:$0xff]  }
 0x263   : > { %v4596_v5 = vpop.f32.mrf.mxu1  ;;  %4889 = vmatprep.subr.bf16.mxu1 %v6306_v57  ;;  %v6366_v50 = vld [vmem:[%s7730_s7 + $0x76c] ss:$16 sps:$4 sm:$0xff]   ;;  %v6367_v56 = vld [vmem:[%s7730_s7 + $0x548] ss:$16 sps:$4 sm:$0xff]  }
 0x264   : > { %v6369_v54 = vld [vmem:[%s7730_s7 + $0x54c] ss:$16 sps:$4 sm:$0xff]   ;;  %v6370_v57 = vld [vmem:[%s7730_s7 + $0x748] ss:$16 sps:$4 sm:$0xff]  }
 0x265   : > { %4849 = vmatpush1.bf16.msra.mxu0 %v6301_v60  ;;  %v6372_v55 = vld [vmem:[%s7730_s7 + $0x74c] ss:$16 sps:$4 sm:$0xff]   ;;  %v6373_v24 = vld [vmem:[%s7730_s7 + $0x528] ss:$16 sps:$4 sm:$0xff]  }
 0x266   : > { %4890 = vmatpush1.bf16.msra.mxu1 %v6304_v61  ;;  %4850 = vmatprep.subr.bf16.mxu0 %v6309_v0  ;;  %v6375_v12 = vld [vmem:[%s7730_s7 + $0x52c] ss:$16 sps:$4 sm:$0xff]   ;;  %v6376_v60 = vld [vmem:[%s7730_s7 + $0x728] ss:$16 sps:$4 sm:$0xff]  }
 0x267   : > { %4891 = vmatprep.subr.bf16.mxu1 %v6312_v1  ;;  %v6378_v13 = vld [vmem:[%s7730_s7 + $0x72c] ss:$16 sps:$4 sm:$0xff]   ;;  %v6379_v5 = vld [vmem:[%s7730_s7 + $0x508] ss:$16 sps:$4 sm:$0xff]  }
 0x268   : > { %v6381_v61 = vld [vmem:[%s7730_s7 + $0x50c] ss:$16 sps:$4 sm:$0xff]   ;;  %v6382_v0 = vld [vmem:[%s7730_s7 + $0x708] ss:$16 sps:$4 sm:$0xff]  }
 0x269   : > { %4851 = vmatpush1.bf16.msra.mxu0 %v6307_v32  ;;  %v6384_v62 = vld [vmem:[%s7730_s7 + $0x70c] ss:$16 sps:$4 sm:$0xff]  }
 0x26a   : > { %4892 = vmatpush1.bf16.msra.mxu1 %v6310_v6  ;;  %4852 = vmatprep.subr.bf16.mxu0 %v6315_v7  ;;  %v6387_v1 = vld [vmem:[%s7730_s7 + $0x8ec] ss:$16 sps:$4 sm:$0xff]   ;;  %v6385_v6 = vld [vmem:[%s7730_s7 + $0x8e8] ss:$16 sps:$4 sm:$0xff]  }
 0x26b   : > { %4893 = vmatprep.subr.bf16.mxu1 %v6318_v8  ;;  %v6390_v32 = vld [vmem:[%s7730_s7 + $0xaec] ss:$16 sps:$4 sm:$0xff]   ;;  %v6388_v7 = vld [vmem:[%s7730_s7 + $0xae8] ss:$16 sps:$4 sm:$0xff]  }
 0x26c   : > { %v6393_v8 = vld [vmem:[%s7730_s7 + $0x8cc] ss:$16 sps:$4 sm:$0xff]  }
 0x26d   : > { %4853 = vmatpush1.bf16.msra.mxu0 %v6313_v9  ;;  %v6396_v9 = vld [vmem:[%s7730_s7 + $0xacc] ss:$16 sps:$4 sm:$0xff]  }
 0x26e   : > { %4894 = vmatpush1.bf16.msra.mxu1 %v6316_v14  ;;  %4854 = vmatprep.subr.bf16.mxu0 %v6321_v15 }
 0x26f   : > { %4895 = vmatprep.subr.bf16.mxu1 %v6324_v39  ;;  %v6391_v39 = vld [vmem:[%s7730_s7 + $0x8c8] ss:$16 sps:$4 sm:$0xff]  }
 0x271   : > { %4855 = vmatpush1.bf16.msra.mxu0 %v6319_v16  ;;  %v6394_v16 = vld [vmem:[%s7730_s7 + $0xac8] ss:$16 sps:$4 sm:$0xff]  }
 0x272   : > { %4896 = vmatpush1.bf16.msra.mxu1 %v6322_v42  ;;  %4856 = vmatprep.subr.bf16.mxu0 %v6327_v17 }
 0x273   : > { %4897 = vmatprep.subr.bf16.mxu1 %v6330_v18  ;;  %v6399_v18 = vld [vmem:[%s7730_s7 + $0x8ac] ss:$16 sps:$4 sm:$0xff]  }
 0x275   : > { %4857 = vmatpush1.bf16.msra.mxu0 %v6325_v19  ;;  %v6402_v19 = vld [vmem:[%s7730_s7 + $0xaac] ss:$16 sps:$4 sm:$0xff]  }
 0x276   : > { %4898 = vmatpush1.bf16.msra.mxu1 %v6328_v20  ;;  %4858 = vmatprep.subr.bf16.mxu0 %v6333_v21  ;;  %v6397_v20 = vld [vmem:[%s7730_s7 + $0x8a8] ss:$16 sps:$4 sm:$0xff]  }
 0x277   : > { %4899 = vmatprep.subr.bf16.mxu1 %v6336_v25  ;;  %v6400_v21 = vld [vmem:[%s7730_s7 + $0xaa8] ss:$16 sps:$4 sm:$0xff]  }
 0x279   : > { %4859 = vmatpush1.bf16.msra.mxu0 %v6331_v11 }
 0x27a   : > { %4900 = vmatpush1.bf16.msra.mxu1 %v6334_v27  ;;  %4860 = vmatprep.subr.bf16.mxu0 %v6339_v30  ;;  %v6405_v27 = vld [vmem:[%s7730_s7 + $0x88c] ss:$16 sps:$4 sm:$0xff]   ;;  %v6406_v30 = vld [vmem:[%s7730_s7 + $0xa88] ss:$16 sps:$4 sm:$0xff]  }
 0x27b   : > { %4901 = vmatprep.subr.bf16.mxu1 %v6342_v31  ;;  %v6411_v31 = vld [vmem:[%s7730_s7 + $0x86c] ss:$16 sps:$4 sm:$0xff]  }
 0x27d   : > { %4861 = vmatpush2.bf16.msra.mxu0 %v6337_v33  ;;  %v6414_v33 = vld [vmem:[%s7730_s7 + $0xa6c] ss:$16 sps:$4 sm:$0xff]  }
 0x27e   : > { %4902 = vmatpush2.bf16.msra.mxu1 %v6340_v34  ;;  %4862 = vmatprep.subr.bf16.mxu0 %v6345_v35  ;;  %v6409_v34 = vld [vmem:[%s7730_s7 + $0x868] ss:$16 sps:$4 sm:$0xff]  }
 0x27f   : > { %4903 = vmatprep.subr.bf16.mxu1 %v6348_v2  ;;  %v6412_v35 = vld [vmem:[%s7730_s7 + $0xa68] ss:$16 sps:$4 sm:$0xff]   ;;  %v6417_v2 = vld [vmem:[%s7730_s7 + $0x84c] ss:$16 sps:$4 sm:$0xff]  }
 0x281   : > { %4863 = vmatpush2.bf16.msra.mxu0 %v6343_v3  ;;  %v6420_v3 = vld [vmem:[%s7730_s7 + $0xa4c] ss:$16 sps:$4 sm:$0xff]  }
 0x282   : > { %4904 = vmatpush2.bf16.msra.mxu1 %v6346_v36  ;;  %4864 = vmatprep.subr.bf16.mxu0 %v6351_v37  ;;  %v6415_v36 = vld [vmem:[%s7730_s7 + $0x848] ss:$16 sps:$4 sm:$0xff]  }
 0x283   : > { %4905 = vmatprep.subr.bf16.mxu1 %v6354_v38  ;;  %v6418_v37 = vld [vmem:[%s7730_s7 + $0xa48] ss:$16 sps:$4 sm:$0xff]   ;;  %v6423_v38 = vld [vmem:[%s7730_s7 + $0x82c] ss:$16 sps:$4 sm:$0xff]  }
 0x285   : > { %4865 = vmatpush2.bf16.msra.mxu0 %v6349_v43  ;;  %v6426_v43 = vld [vmem:[%s7730_s7 + $0xa2c] ss:$16 sps:$4 sm:$0xff]  }
 0x286   : > { %4906 = vmatpush2.bf16.msra.mxu1 %v6352_v44  ;;  %4866 = vmatprep.subr.bf16.mxu0 %v6357_v26  ;;  %v6421_v44 = vld [vmem:[%s7730_s7 + $0x828] ss:$16 sps:$4 sm:$0xff]  }
 0x287   : > { %4907 = vmatprep.subr.bf16.mxu1 %v6360_v46  ;;  %v6424_v26 = vld [vmem:[%s7730_s7 + $0xa28] ss:$16 sps:$4 sm:$0xff]   ;;  %v6429_v46 = vld [vmem:[%s7730_s7 + $0x80c] ss:$16 sps:$4 sm:$0xff]  }
 0x289   : > { %4867 = vmatpush2.bf16.msra.mxu0 %v6355_v47  ;;  %v6432_v47 = vld [vmem:[%s7730_s7 + $0xa0c] ss:$16 sps:$4 sm:$0xff]  }
 0x28a   : > { %4908 = vmatpush2.bf16.msra.mxu1 %v6358_v48  ;;  %4868 = vmatprep.subr.bf16.mxu0 %v6363_v49  ;;  %v6427_v48 = vld [vmem:[%s7730_s7 + $0x808] ss:$16 sps:$4 sm:$0xff]  }
 0x28b   : > { %4909 = vmatprep.subr.bf16.mxu1 %v6366_v50  ;;  %v6430_v49 = vld [vmem:[%s7730_s7 + $0xa08] ss:$16 sps:$4 sm:$0xff]   ;;  %v6435_v50 = vld [vmem:[%s7730_s7 + $0x9ec] ss:$16 sps:$4 sm:$0xff]  }
 0x28d   : > { %4869 = vmatpush2.bf16.msra.mxu0 %v6361_v51  ;;  %v6438_v51 = vld [vmem:[%s7730_s7 + $0xbec] ss:$16 sps:$4 sm:$0xff]  }
 0x28e   : > { %4910 = vmatpush2.bf16.msra.mxu1 %v6364_v52  ;;  %4870 = vmatprep.subr.bf16.mxu0 %v6369_v54  ;;  %v6433_v52 = vld [vmem:[%s7730_s7 + $0x9e8] ss:$16 sps:$4 sm:$0xff]  }
 0x28f   : > { %4911 = vmatprep.subr.bf16.mxu1 %v6372_v55  ;;  %v6436_v54 = vld [vmem:[%s7730_s7 + $0xbe8] ss:$16 sps:$4 sm:$0xff]   ;;  %v6441_v55 = vld [vmem:[%s7730_s7 + $0x9cc] ss:$16 sps:$4 sm:$0xff]  }
 0x291   : > { %4871 = vmatpush2.bf16.msra.mxu0 %v6367_v56  ;;  %v6444_v56 = vld [vmem:[%s7730_s7 + $0xbcc] ss:$16 sps:$4 sm:$0xff]  }
 0x292   : > { %4912 = vmatpush2.bf16.msra.mxu1 %v6370_v57  ;;  %4872 = vmatprep.subr.bf16.mxu0 %v6375_v12  ;;  %v6439_v57 = vld [vmem:[%s7730_s7 + $0x9c8] ss:$16 sps:$4 sm:$0xff]  }
 0x293   : > { %4913 = vmatprep.subr.bf16.mxu1 %v6378_v13  ;;  %v6442_v12 = vld [vmem:[%s7730_s7 + $0xbc8] ss:$16 sps:$4 sm:$0xff]   ;;  %v6447_v13 = vld [vmem:[%s7730_s7 + $0x9ac] ss:$16 sps:$4 sm:$0xff]  }
 0x295   : > { %4873 = vmatpush2.bf16.msra.mxu0 %v6373_v24  ;;  %v6450_v24 = vld [vmem:[%s7730_s7 + $0xbac] ss:$16 sps:$4 sm:$0xff]  }
 0x296   : > { %4914 = vmatpush2.bf16.msra.mxu1 %v6376_v60  ;;  %4874 = vmatprep.subr.bf16.mxu0 %v6381_v61  ;;  %v6445_v60 = vld [vmem:[%s7730_s7 + $0x9a8] ss:$16 sps:$4 sm:$0xff]  }
 0x297   : > { %4915 = vmatprep.subr.bf16.mxu1 %v6384_v62  ;;  %v6448_v61 = vld [vmem:[%s7730_s7 + $0xba8] ss:$16 sps:$4 sm:$0xff]   ;;  %v6453_v62 = vld [vmem:[%s7730_s7 + $0x98c] ss:$16 sps:$4 sm:$0xff]  }
 0x299   : > { %4875 = vmatpush2.bf16.msra.mxu0 %v6379_v5  ;;  %v6456_v5 = vld [vmem:[%s7730_s7 + $0xb8c] ss:$16 sps:$4 sm:$0xff]  }
 0x29a   : > { %4916 = vmatpush2.bf16.msra.mxu1 %v6382_v0  ;;  %4926 = vmatprep.subr.bf16.mxu0 %v6387_v1  ;;  %v6451_v0 = vld [vmem:[%s7730_s7 + $0x988] ss:$16 sps:$4 sm:$0xff]  }
 0x29b   : > { %4967 = vmatprep.subr.bf16.mxu1 %v6390_v32  ;;  %v6454_v1 = vld [vmem:[%s7730_s7 + $0xb88] ss:$16 sps:$4 sm:$0xff]   ;;  %v6459_v32 = vld [vmem:[%s7730_s7 + $0x96c] ss:$16 sps:$4 sm:$0xff]  }
 0x29c   : > { %v8254_v14 = vpop.f32.mrf.mxu0  ;;  %4877 = vmatmul.mubr.bf16.vlgmr.msra.gmra.mxu0 %v7896_v22 }
 0x29d   : > { %v8256_v15 = vpop.f32.mrf.mxu1  ;;  %4918 = vmatmul.mubr.bf16.vlgmr.msra.gmra.mxu1 %v7900_v23  ;;  %4927 = vmatpush1.bf16.msra.mxu0 %v6385_v6  ;;  %v6462_v6 = vld [vmem:[%s7730_s7 + $0xb6c] ss:$16 sps:$4 sm:$0xff]  }
 0x29e   : > { %4968 = vmatpush1.bf16.msra.mxu1 %v6388_v7  ;;  %v8262_v42 = vpop.f32.mrf.mxu0  ;;  %4928 = vmatprep.subr.bf16.mxu0 %v6393_v8  ;;  %v6457_v7 = vld [vmem:[%s7730_s7 + $0x968] ss:$16 sps:$4 sm:$0xff]  }
 0x29f   : > { %v8264_v17 = vpop.f32.mrf.mxu1  ;;  %4969 = vmatprep.subr.bf16.mxu1 %v6396_v9  ;;  %4958 = vmatprep.mubr.bf16.mxu0 %v7918_v28  ;;  %v6408_v28 = vld [vmem:[%s7730_s7 + $0xa8c] ss:$16 sps:$4 sm:$0xff]   ;;  %v6460_v8 = vld [vmem:[%s7730_s7 + $0xb68] ss:$16 sps:$4 sm:$0xff]  }
 0x2a0   : > { %4999 = vmatprep.mubr.bf16.mxu1 %v7922_v29  ;;  %v4636_v22 = vpop.f32.mrf.mxu0  ;;  %v6403_v29 = vld [vmem:[%s7730_s7 + $0x888] ss:$16 sps:$4 sm:$0xff]   ;;  %v6465_v9 = vld [vmem:[%s7730_s7 + $0x94c] ss:$16 sps:$4 sm:$0xff]  }
 0x2a1   : > { %v4677_v23 = vpop.f32.mrf.mxu1  ;;  %4929 = vmatpush1.bf16.msra.mxu0 %v6391_v39  ;;  %v6468_v39 = vld [vmem:[%s7730_s7 + $0xb4c] ss:$16 sps:$4 sm:$0xff]  }
 0x2a2   : > { %4970 = vmatpush1.bf16.msra.mxu1 %v6394_v16  ;;  %v4637_v25 = vpop.f32.mrf.mxu0  ;;  %4930 = vmatprep.subr.bf16.mxu0 %v6399_v18  ;;  %v6463_v16 = vld [vmem:[%s7730_s7 + $0x948] ss:$16 sps:$4 sm:$0xff]   ;;  %v6474_v22 = vld [vmem:[%s7730_s7 + $0xb2c] ss:$16 sps:$4 sm:$0xff]  }
 0x2a3   : > { %v4678_v11 = vpop.f32.mrf.mxu1  ;;  %4971 = vmatprep.subr.bf16.mxu1 %v6402_v19  ;;  %v6466_v18 = vld [vmem:[%s7730_s7 + $0xb48] ss:$16 sps:$4 sm:$0xff]   ;;  %v6471_v19 = vld [vmem:[%s7730_s7 + $0x92c] ss:$16 sps:$4 sm:$0xff]  }
 0x2a4   : > { %v6469_v23 = vld [vmem:[%s7730_s7 + $0x928] ss:$16 sps:$4 sm:$0xff]   ;;  %v6480_v25 = vld [vmem:[%s7730_s7 + $0xb0c] ss:$16 sps:$4 sm:$0xff]  }
 0x2a5   : > { %4931 = vmatpush1.bf16.msra.mxu0 %v6397_v20  ;;  %v6472_v20 = vld [vmem:[%s7730_s7 + $0xb28] ss:$16 sps:$4 sm:$0xff]  }
 0x2a6   : > { %4972 = vmatpush1.bf16.msra.mxu1 %v6400_v21  ;;  %4932 = vmatprep.subr.bf16.mxu0 %v6405_v27  ;;  %v6477_v21 = vld [vmem:[%s7730_s7 + $0x90c] ss:$16 sps:$4 sm:$0xff]   ;;  %v6475_v11 = vld [vmem:[%s7730_s7 + $0x908] ss:$16 sps:$4 sm:$0xff]  }
 0x2a7   : > { %4973 = vmatprep.subr.bf16.mxu1 %v6408_v28  ;;  %v6478_v27 = vld [vmem:[%s7730_s7 + $0xb08] ss:$16 sps:$4 sm:$0xff]   ;;  %v6483_v28 = vld [vmem:[%s7730_s7 + $0xcec] ss:$16 sps:$4 sm:$0xff]  }
 0x2a9   : > { %4933 = vmatpush1.bf16.msra.mxu0 %v6403_v29  ;;  %v6486_v29 = vld [vmem:[%s7730_s7 + $0xeec] ss:$16 sps:$4 sm:$0xff]  }
 0x2aa   : > { %4974 = vmatpush1.bf16.msra.mxu1 %v6406_v30  ;;  %4934 = vmatprep.subr.bf16.mxu0 %v6411_v31  ;;  %v4633_v30 = vadd.f32 %v8254_v14, %v8187_v58  ;;  %v4635_v31 = vadd.f32 %v8262_v42, %v8192_v59  ;;  %v6487_v42 = vld [vmem:[%s7730_s7 + $0xcc8] ss:$16 sps:$4 sm:$0xff]  }
 0x2ab   : > { %4975 = vmatprep.subr.bf16.mxu1 %v6414_v33  ;;  %v6481_v33 = vld [vmem:[%s7730_s7 + $0xce8] ss:$16 sps:$4 sm:$0xff]  }
 0x2ac   : > { %v4676_v59 = vadd.f32 %v8264_v17, %v4635_v31  ;;  %v6547_v31 = vld [vmem:[%s7730_s7 + $0xd88] ss:$16 sps:$4 sm:$0xff]  }
 0x2ad   : > { %4935 = vmatpush1.bf16.msra.mxu0 %v6409_v34  ;;  %v6484_v34 = vld [vmem:[%s7730_s7 + $0xee8] ss:$16 sps:$4 sm:$0xff]  }
 0x2ae   : > { %4976 = vmatpush1.bf16.msra.mxu1 %v6412_v35  ;;  %4936 = vmatprep.subr.bf16.mxu0 %v6417_v2  ;;  %v6489_v35 = vld [vmem:[%s7730_s7 + $0xccc] ss:$16 sps:$4 sm:$0xff]  }
 0x2af   : > { %4977 = vmatprep.subr.bf16.mxu1 %v6420_v3  ;;  %v6492_v2 = vld [vmem:[%s7730_s7 + $0xecc] ss:$16 sps:$4 sm:$0xff]   ;;  %v4674_v3 = vadd.f32 %v8256_v15, %v4633_v30 }
 0x2b0   : > { %v6495_v15 = vld [vmem:[%s7730_s7 + $0xcac] ss:$16 sps:$4 sm:$0xff]  }
 0x2b1   : > { %4937 = vmatpush1.bf16.msra.mxu0 %v6415_v36  ;;  %v6552_v30 = vld [vmem:[%s7730_s7 + $0xf8c] ss:$16 sps:$4 sm:$0xff]  }
 0x2b2   : > { %4978 = vmatpush1.bf16.msra.mxu1 %v6418_v37  ;;  %4938 = vmatprep.subr.bf16.mxu0 %v6423_v38  ;;  %v6490_v37 = vld [vmem:[%s7730_s7 + $0xec8] ss:$16 sps:$4 sm:$0xff]  }
 0x2b3   : > { %4979 = vmatprep.subr.bf16.mxu1 %v6426_v43 }
 0x2b5   : > { %4939 = vmatpush1.bf16.msra.mxu0 %v6421_v44  ;;  %v6498_v44 = vld [vmem:[%s7730_s7 + $0xeac] ss:$16 sps:$4 sm:$0xff]  }
 0x2b6   : > { %4980 = vmatpush1.bf16.msra.mxu1 %v6424_v26  ;;  %4940 = vmatprep.subr.bf16.mxu0 %v6429_v46 }
 0x2b7   : > { %4981 = vmatprep.subr.bf16.mxu1 %v6432_v47 }
 0x2b9   : > { %4941 = vmatpush1.bf16.msra.mxu0 %v6427_v48  ;;  %v6493_v48 = vld [vmem:[%s7730_s7 + $0xca8] ss:$16 sps:$4 sm:$0xff]  }
 0x2ba   : > { %4982 = vmatpush1.bf16.msra.mxu1 %v6430_v49  ;;  %4942 = vmatprep.subr.bf16.mxu0 %v6435_v50  ;;  %v6501_v50 = vld [vmem:[%s7730_s7 + $0xc8c] ss:$16 sps:$4 sm:$0xff]  }
 0x2bb   : > { %4983 = vmatprep.subr.bf16.mxu1 %v6438_v51  ;;  %v6504_v51 = vld [vmem:[%s7730_s7 + $0xe8c] ss:$16 sps:$4 sm:$0xff]  }
 0x2bd   : > { %4943 = vmatpush2.bf16.msra.mxu0 %v6433_v52 }
 0x2be   : > { %4984 = vmatpush2.bf16.msra.mxu1 %v6436_v54  ;;  %4944 = vmatprep.subr.bf16.mxu0 %v6441_v55  ;;  %v6499_v54 = vld [vmem:[%s7730_s7 + $0xc88] ss:$16 sps:$4 sm:$0xff]  }
 0x2bf   : > { %4985 = vmatprep.subr.bf16.mxu1 %v6444_v56  ;;  %v6502_v55 = vld [vmem:[%s7730_s7 + $0xe88] ss:$16 sps:$4 sm:$0xff]   ;;  %v6507_v56 = vld [vmem:[%s7730_s7 + $0xc6c] ss:$16 sps:$4 sm:$0xff]  }
 0x2c1   : > { %4945 = vmatpush2.bf16.msra.mxu0 %v6439_v57  ;;  %v6510_v57 = vld [vmem:[%s7730_s7 + $0xe6c] ss:$16 sps:$4 sm:$0xff]  }
 0x2c2   : > { %4986 = vmatpush2.bf16.msra.mxu1 %v6442_v12  ;;  %4946 = vmatprep.subr.bf16.mxu0 %v6447_v13  ;;  %v6505_v12 = vld [vmem:[%s7730_s7 + $0xc68] ss:$16 sps:$4 sm:$0xff]  }
 0x2c3   : > { %4987 = vmatprep.subr.bf16.mxu1 %v6450_v24  ;;  %v6508_v13 = vld [vmem:[%s7730_s7 + $0xe68] ss:$16 sps:$4 sm:$0xff]   ;;  %v6513_v24 = vld [vmem:[%s7730_s7 + $0xc4c] ss:$16 sps:$4 sm:$0xff]  }
 0x2c5   : > { %4947 = vmatpush2.bf16.msra.mxu0 %v6445_v60  ;;  %v6516_v60 = vld [vmem:[%s7730_s7 + $0xe4c] ss:$16 sps:$4 sm:$0xff]  }
 0x2c6   : > { %4988 = vmatpush2.bf16.msra.mxu1 %v6448_v61  ;;  %4948 = vmatprep.subr.bf16.mxu0 %v6453_v62  ;;  %v6511_v61 = vld [vmem:[%s7730_s7 + $0xc48] ss:$16 sps:$4 sm:$0xff]  }
 0x2c7   : > { %4989 = vmatprep.subr.bf16.mxu1 %v6456_v5  ;;  %v6514_v62 = vld [vmem:[%s7730_s7 + $0xe48] ss:$16 sps:$4 sm:$0xff]   ;;  %v6519_v5 = vld [vmem:[%s7730_s7 + $0xc2c] ss:$16 sps:$4 sm:$0xff]  }
 0x2c9   : > { %4949 = vmatpush2.bf16.msra.mxu0 %v6451_v0  ;;  %v6522_v0 = vld [vmem:[%s7730_s7 + $0xe2c] ss:$16 sps:$4 sm:$0xff]  }
 0x2ca   : > { %4990 = vmatpush2.bf16.msra.mxu1 %v6454_v1  ;;  %4950 = vmatprep.subr.bf16.mxu0 %v6459_v32  ;;  %v6517_v1 = vld [vmem:[%s7730_s7 + $0xc28] ss:$16 sps:$4 sm:$0xff]  }
 0x2cb   : > { %4991 = vmatprep.subr.bf16.mxu1 %v6462_v6  ;;  %v6520_v32 = vld [vmem:[%s7730_s7 + $0xe28] ss:$16 sps:$4 sm:$0xff]   ;;  %v6525_v6 = vld [vmem:[%s7730_s7 + $0xc0c] ss:$16 sps:$4 sm:$0xff]  }
 0x2cd   : > { %4951 = vmatpush2.bf16.msra.mxu0 %v6457_v7  ;;  %v6528_v7 = vld [vmem:[%s7730_s7 + $0xe0c] ss:$16 sps:$4 sm:$0xff]  }
 0x2ce   : > { %4992 = vmatpush2.bf16.msra.mxu1 %v6460_v8  ;;  %4952 = vmatprep.subr.bf16.mxu0 %v6465_v9  ;;  %v6523_v8 = vld [vmem:[%s7730_s7 + $0xc08] ss:$16 sps:$4 sm:$0xff]  }
 0x2cf   : > { %4993 = vmatprep.subr.bf16.mxu1 %v6468_v39  ;;  %v6526_v9 = vld [vmem:[%s7730_s7 + $0xe08] ss:$16 sps:$4 sm:$0xff]   ;;  %v6531_v39 = vld [vmem:[%s7730_s7 + $0xdec] ss:$16 sps:$4 sm:$0xff]  }
 0x2d1   : > { %4953 = vmatpush2.bf16.msra.mxu0 %v6463_v16  ;;  %v6534_v16 = vld [vmem:[%s7730_s7 + $0xfec] ss:$16 sps:$4 sm:$0xff]  }
 0x2d2   : > { %4994 = vmatpush2.bf16.msra.mxu1 %v6466_v18  ;;  %4954 = vmatprep.subr.bf16.mxu0 %v6471_v19  ;;  %v6529_v18 = vld [vmem:[%s7730_s7 + $0xde8] ss:$16 sps:$4 sm:$0xff]  }
 0x2d3   : > { %4995 = vmatprep.subr.bf16.mxu1 %v6474_v22  ;;  %v6532_v19 = vld [vmem:[%s7730_s7 + $0xfe8] ss:$16 sps:$4 sm:$0xff]   ;;  %v6537_v22 = vld [vmem:[%s7730_s7 + $0xdcc] ss:$16 sps:$4 sm:$0xff]  }
 0x2d5   : > { %4955 = vmatpush2.bf16.msra.mxu0 %v6469_v23  ;;  %v6540_v23 = vld [vmem:[%s7730_s7 + $0xfcc] ss:$16 sps:$4 sm:$0xff]  }
 0x2d6   : > { %4996 = vmatpush2.bf16.msra.mxu1 %v6472_v20  ;;  %4956 = vmatprep.subr.bf16.mxu0 %v6477_v21  ;;  %v6535_v20 = vld [vmem:[%s7730_s7 + $0xdc8] ss:$16 sps:$4 sm:$0xff]  }
 0x2d7   : > { %4997 = vmatprep.subr.bf16.mxu1 %v6480_v25  ;;  %v6538_v21 = vld [vmem:[%s7730_s7 + $0xfc8] ss:$16 sps:$4 sm:$0xff]   ;;  %v6543_v25 = vld [vmem:[%s7730_s7 + $0xdac] ss:$16 sps:$4 sm:$0xff]  }
 0x2d9   : > { %4957 = vmatpush2.bf16.msra.mxu0 %v6475_v11  ;;  %v6546_v11 = vld [vmem:[%s7730_s7 + $0xfac] ss:$16 sps:$4 sm:$0xff]  }
 0x2da   : > { %4998 = vmatpush2.bf16.msra.mxu1 %v6478_v27  ;;  %5008 = vmatprep.subr.bf16.mxu0 %v6483_v28  ;;  %v6541_v27 = vld [vmem:[%s7730_s7 + $0xda8] ss:$16 sps:$4 sm:$0xff]  }
 0x2db   : > { %5049 = vmatprep.subr.bf16.mxu1 %v6486_v29  ;;  %v6544_v28 = vld [vmem:[%s7730_s7 + $0xfa8] ss:$16 sps:$4 sm:$0xff]   ;;  %v6549_v29 = vld [vmem:[%s7730_s7 + $0xd8c] ss:$16 sps:$4 sm:$0xff]  }
 0x2dc   : > { %v4714_v36 = vpop.f32.mrf.mxu0  ;;  %4959 = vmatmul.mubr.bf16.vlgmr.msra.gmra.mxu0 %v7996_v40 }
 0x2dd   : > { %v4755_v58 = vpop.f32.mrf.mxu1  ;;  %5000 = vmatmul.mubr.bf16.vlgmr.msra.gmra.mxu1 %v8000_v41  ;;  %v4715_v14 = vadd.f32 %v4714_v36, %v4674_v3  ;;  %5009 = vmatpush1.bf16.msra.mxu0 %v6481_v33  ;;  %v6550_v33 = vld [vmem:[%s7730_s7 + $0xf88] ss:$16 sps:$4 sm:$0xff]   ;;  %v6561_v36 = vld [vmem:[%s7730_s7 + $0xd4c] ss:$16 sps:$4 sm:$0xff]  }
 0x2de   : > { %5050 = vmatpush1.bf16.msra.mxu1 %v6484_v34  ;;  %v4716_v38 = vpop.f32.mrf.mxu0  ;;  %5010 = vmatprep.subr.bf16.mxu0 %v6489_v35  ;;  %v6555_v34 = vld [vmem:[%s7730_s7 + $0xd6c] ss:$16 sps:$4 sm:$0xff]   ;;  %v6556_v3 = vld [vmem:[%s7730_s7 + $0xf68] ss:$16 sps:$4 sm:$0xff]  }
 0x2df   : > { %v4757_v43 = vpop.f32.mrf.mxu1  ;;  %5051 = vmatprep.subr.bf16.mxu1 %v6492_v2  ;;  %v4756_v26 = vadd.f32 %v4755_v58, %v4715_v14  ;;  %v4717_v40 = vadd.f32 %v4716_v38, %v4676_v59  ;;  %5040 = vmatprep.mubr.bf16.mxu0 %v8012_v10  ;;  %v6496_v10 = vld [vmem:[%s7730_s7 + $0xea8] ss:$16 sps:$4 sm:$0xff]   ;;  %v6558_v35 = vld [vmem:[%s7730_s7 + $0xf6c] ss:$16 sps:$4 sm:$0xff]  }
 0x2e0   : > { %5081 = vmatprep.mubr.bf16.mxu1 %v8016_v45  ;;  %v4718_v41 = vpop.f32.mrf.mxu0  ;;  %v6553_v2 = vld [vmem:[%s7730_s7 + $0xd68] ss:$16 sps:$4 sm:$0xff]   ;;  %v6564_v58 = vld [vmem:[%s7730_s7 + $0xf4c] ss:$16 sps:$4 sm:$0xff]  }
 0x2e1   : > { %v4759_v17 = vpop.f32.mrf.mxu1  ;;  %v5090_v46 = vmax.f32 %v4756_v26, 0.0  ;;  %v4758_v47 = vadd.f32 %v4757_v43, %v4717_v40  ;;  %5011 = vmatpush1.bf16.msra.mxu0 %v6487_v42  ;;  %v6559_v59 = vld [vmem:[%s7730_s7 + $0xd48] ss:$16 sps:$4 sm:$0xff]   ;;  %v6567_v42 = vld [vmem:[%s7730_s7 + $0xd2c] ss:$16 sps:$4 sm:$0xff]   ;;  %v1808_v41 = vsub.s32 2, %v8079_v53 }
 0x2e2   : > { %5052 = vmatpush1.bf16.msra.mxu1 %v6490_v37  ;;  %v4719_v49 = vpop.f32.mrf.mxu0  ;;  %5012 = vmatprep.subr.bf16.mxu0 %v6495_v15  ;;  %v6562_v14 = vld [vmem:[%s7730_s7 + $0xf48] ss:$16 sps:$4 sm:$0xff]   ;;  %v6570_v37 = vld [vmem:[%s7730_s7 + $0xf2c] ss:$16 sps:$4 sm:$0xff]   ;;  %v1812_v17 = vsub.s32 3, %v8079_v53 }
 0x2e3   : > { %v4760_v45 = vpop.f32.mrf.mxu1  ;;  %5053 = vmatprep.subr.bf16.mxu1 %v6498_v44  ;;  %5094 = vst [vmem:[%s8348_s5] sm:$0xff] %v5090_v46  ;;  %v5091_v52 = vmax.f32 %v4758_v47, 0.0  ;;  %v6565_v38 = vld [vmem:[%s7730_s7 + $0xd28] ss:$16 sps:$4 sm:$0xff]   ;;  %v6573_v15 = vld [vmem:[%s7730_s7 + $0xd0c] ss:$16 sps:$4 sm:$0xff]  }
 0x2e4   : > { %v6568_v43 = vld [vmem:[%s7730_s7 + $0xf28] ss:$16 sps:$4 sm:$0xff]   ;;  %v6576_v44 = vld [vmem:[%s7730_s7 + $0xf0c] ss:$16 sps:$4 sm:$0xff]   ;;  %v6577_v46 = vld [vmem:[%s8087_s28] sm:$0xf] }
 0x2e5   : > { %5095 = vst [vmem:[%s8348_s5 + $0x8] sm:$0xff] %v5091_v52  ;;  %5013 = vmatpush1.bf16.msra.mxu0 %v6493_v48  ;;  %v6571_v26 = vld [vmem:[%s7730_s7 + $0xd08] ss:$16 sps:$4 sm:$0xff]   ;;  %v1809_v47 = vrot.slane %v6577_v46, %v1808_v41  ;;  %v1813_v48 = vrot.slane %v6577_v46, %v1812_v17 }
 0x2e6   : > { %5054 = vmatpush1.bf16.msra.mxu1 %v6496_v10  ;;  %5014 = vmatprep.subr.bf16.mxu0 %v6501_v50  ;;  %v6574_v40 = vld [vmem:[%s7730_s7 + $0xf08] ss:$16 sps:$4 sm:$0xff]  }
 0x2e7   : > { %5055 = vmatprep.subr.bf16.mxu1 %v6504_v51 }
 0x2e9   : > { %5015 = vmatpush1.bf16.msra.mxu0 %v6499_v54 }
 0x2ea   : > { %5056 = vmatpush1.bf16.msra.mxu1 %v6502_v55  ;;  %5016 = vmatprep.subr.bf16.mxu0 %v6507_v56 }
 0x2eb   : > { %5057 = vmatprep.subr.bf16.mxu1 %v6510_v57 }
 0x2ed   : > { %5017 = vmatpush1.bf16.msra.mxu0 %v6505_v12 }
 0x2ee   : > { %5058 = vmatpush1.bf16.msra.mxu1 %v6508_v13  ;;  %5018 = vmatprep.subr.bf16.mxu0 %v6513_v24 }
 0x2ef   : > { %5059 = vmatprep.subr.bf16.mxu1 %v6516_v60 }
 0x2f1   : > { %5019 = vmatpush1.bf16.msra.mxu0 %v6511_v61 }
 0x2f2   : > { %5060 = vmatpush1.bf16.msra.mxu1 %v6514_v62  ;;  %5020 = vmatprep.subr.bf16.mxu0 %v6519_v5 }
 0x2f3   : > { %5061 = vmatprep.subr.bf16.mxu1 %v6522_v0 }
 0x2f5   : > { %5021 = vmatpush1.bf16.msra.mxu0 %v6517_v1 }
 0x2f6   : > { %5062 = vmatpush1.bf16.msra.mxu1 %v6520_v32  ;;  %5022 = vmatprep.subr.bf16.mxu0 %v6525_v6 }
 0x2f7   : > { %5063 = vmatprep.subr.bf16.mxu1 %v6528_v7 }
 0x2f9   : > { %5023 = vmatpush1.bf16.msra.mxu0 %v6523_v8 }
 0x2fa   : > { %5064 = vmatpush1.bf16.msra.mxu1 %v6526_v9  ;;  %5024 = vmatprep.subr.bf16.mxu0 %v6531_v39 }
 0x2fb   : > { %5065 = vmatprep.subr.bf16.mxu1 %v6534_v16 }
 0x2fd   : > { %5025 = vmatpush2.bf16.msra.mxu0 %v6529_v18 }
 0x2fe   : > { %5066 = vmatpush2.bf16.msra.mxu1 %v6532_v19  ;;  %5026 = vmatprep.subr.bf16.mxu0 %v6537_v22 }
 0x2ff   : > { %5067 = vmatprep.subr.bf16.mxu1 %v6540_v23 }
 0x301   : > { %5027 = vmatpush2.bf16.msra.mxu0 %v6535_v20 }
 0x302   : > { %5068 = vmatpush2.bf16.msra.mxu1 %v6538_v21  ;;  %5028 = vmatprep.subr.bf16.mxu0 %v6543_v25 }
 0x303   : > { %5069 = vmatprep.subr.bf16.mxu1 %v6546_v11 }
 0x305   : > { %5029 = vmatpush2.bf16.msra.mxu0 %v6541_v27 }
 0x306   : > { %5070 = vmatpush2.bf16.msra.mxu1 %v6544_v28  ;;  %5030 = vmatprep.subr.bf16.mxu0 %v6549_v29 }
 0x307   : > { %5071 = vmatprep.subr.bf16.mxu1 %v6552_v30 }
 0x309   : > { %5031 = vmatpush2.bf16.msra.mxu0 %v6547_v31 }
 0x30a   : > { %5072 = vmatpush2.bf16.msra.mxu1 %v6550_v33  ;;  %5032 = vmatprep.subr.bf16.mxu0 %v6555_v34 }
 0x30b   : > { %5073 = vmatprep.subr.bf16.mxu1 %v6558_v35 }
 0x30d   : > { %5033 = vmatpush2.bf16.msra.mxu0 %v6553_v2 }
 0x30e   : > { %5074 = vmatpush2.bf16.msra.mxu1 %v6556_v3  ;;  %5034 = vmatprep.subr.bf16.mxu0 %v6561_v36 }
 0x30f   : > { %5075 = vmatprep.subr.bf16.mxu1 %v6564_v58 }
 0x311   : > { %5035 = vmatpush2.bf16.msra.mxu0 %v6559_v59 }
 0x312   : > { %5076 = vmatpush2.bf16.msra.mxu1 %v6562_v14  ;;  %5036 = vmatprep.subr.bf16.mxu0 %v6567_v42 }
 0x313   : > { %5077 = vmatprep.subr.bf16.mxu1 %v6570_v37 }
 0x315   : > { %5037 = vmatpush2.bf16.msra.mxu0 %v6565_v38 }
 0x316   : > { %5078 = vmatpush2.bf16.msra.mxu1 %v6568_v43  ;;  %5038 = vmatprep.subr.bf16.mxu0 %v6573_v15 }
 0x317   : > { %5079 = vmatprep.subr.bf16.mxu1 %v6576_v44 }
 0x319   : > { %5039 = vmatpush2.bf16.msra.mxu0 %v6571_v26 }
 0x31a   : > { %5080 = vmatpush2.bf16.msra.mxu1 %v6574_v40 }
 0x31c   : > { %v4796_v10 = vpop.f32.mrf.mxu0  ;;  %5041 = vmatmul.mubr.bf16.vlgmr.msra.gmra.mxu0 %v8098_v63 }
 0x31d   : > { %v4837_v49 = vpop.f32.mrf.mxu1  ;;  %5082 = vmatmul.mubr.bf16.vlgmr.msra.gmra.mxu1 %v8102_v4  ;;  %v4797_v45 = vadd.f32 %v4796_v10, %v1809_v47 }
 0x31e   : > { %v4798_v50 = vpop.f32.mrf.mxu0 }
 0x31f   : > { %v4839_v51 = vpop.f32.mrf.mxu1  ;;  %v4838_v52 = vadd.f32 %v4837_v49, %v4797_v45  ;;  %v4799_v54 = vadd.f32 %v4798_v50, %v1813_v48 }
 0x320   : > { %v4800_v55 = vpop.f32.mrf.mxu0 }
 0x321   : > { %v4841_v56 = vpop.f32.mrf.mxu1  ;;  %v4840_v57 = vadd.f32 %v4839_v51, %v4799_v54 }
 0x322   : > { %v4801_v53 = vpop.f32.mrf.mxu0 }
 0x323   : > { %v4842_v12 = vpop.f32.mrf.mxu1 }
 0x35c   : > { %v4878_v13 = vpop.f32.mrf.mxu0 }
 0x35d   : > { %v4919_v24 = vpop.f32.mrf.mxu1  ;;  %v4879_v60 = vadd.f32 %v4878_v13, %v4838_v52 }
 0x35e   : > { %v4880_v61 = vpop.f32.mrf.mxu0 }
 0x35f   : > { %v4921_v62 = vpop.f32.mrf.mxu1  ;;  %v4920_v5 = vadd.f32 %v4919_v24, %v4879_v60  ;;  %v4881_v0 = vadd.f32 %v4880_v61, %v4840_v57 }
 0x360   : > { %v4882_v63 = vpop.f32.mrf.mxu0 }
 0x361   : > { %v4923_v1 = vpop.f32.mrf.mxu1  ;;  %v4922_v4 = vadd.f32 %v4921_v62, %v4881_v0 }
 0x362   : > { %v4883_v32 = vpop.f32.mrf.mxu0 }
 0x363   : > { %v4924_v6 = vpop.f32.mrf.mxu1 }
 0x39c   : > { %v4960_v7 = vpop.f32.mrf.mxu0 }
 0x39d   : > { %v5001_v8 = vpop.f32.mrf.mxu1  ;;  %v4961_v23 = vadd.f32 %v4960_v7, %v4920_v5 }
 0x39e   : > { %v4962_v9 = vpop.f32.mrf.mxu0 }
 0x39f   : > { %v5003_v39 = vpop.f32.mrf.mxu1  ;;  %v4963_v20 = vadd.f32 %v4962_v9, %v4922_v4  ;;  %v5002_v21 = vadd.f32 %v5001_v8, %v4961_v23 }
 0x3a0   : > { %v4964_v16 = vpop.f32.mrf.mxu0 }
 0x3a1   : > { %v5005_v18 = vpop.f32.mrf.mxu1  ;;  %v5004_v27 = vadd.f32 %v5003_v39, %v4963_v20 }
 0x3a2   : > { %v4965_v19 = vpop.f32.mrf.mxu0 }
 0x3a3   : > { %v5006_v22 = vpop.f32.mrf.mxu1 }
 0x3dc   : > { %v5042_v25 = vpop.f32.mrf.mxu0 }
 0x3dd   : > { %v5083_v11 = vpop.f32.mrf.mxu1  ;;  %v5043_v28 = vadd.f32 %v5042_v25, %v5002_v21 }
 0x3de   : > { %v5044_v29 = vpop.f32.mrf.mxu0 }
 0x3df   : > { %v5085_v30 = vpop.f32.mrf.mxu1  ;;  %v5084_v31 = vadd.f32 %v5083_v11, %v5043_v28  ;;  %v5045_v33 = vadd.f32 %v5044_v29, %v5004_v27 }
 0x3e0   : > { %v5046_v34 = vpop.f32.mrf.mxu0 }
 0x3e1   : > { %v5087_v35 = vpop.f32.mrf.mxu1  ;;  %v5092_v2 = vmax.f32 %v5084_v31, 0.0  ;;  %v5086_v3 = vadd.f32 %v5085_v30, %v5045_v33 }
 0x3e2   : > { %v5047_v36 = vpop.f32.mrf.mxu0 }
 0x3e3   : > { %v5088_v58 = vpop.f32.mrf.mxu1  ;;  %5096 = vst [vmem:[%s8348_s5 + $0x10] sm:$0xff] %v5092_v2  ;;  %v5093_v59 = vmax.f32 %v5086_v3, 0.0 }
 0x3e5   : > { %5097 = vst [vmem:[%s8348_s5 + $0x18] sm:$0xff] %v5093_v59 }
 0x3e6 PF: > { %s13_s16 = sadd.s32 1, %s6616_s16   ;;  %s8432_s12 = smov %s6604_s13 }
 0x3e7   : > { %p10_p10 = scmp.ge.s32.totalorder %s13_s16, 6   ;;  %s8433_s13 = smov %s6673_s20 }
 0x3e8   : > { %s8434_s14 = smov %s6612_s15  ;;  %s8435_s15 = smov %s8437_s17 }
 0x3e9   :  { %12 = sbr.rel (!%p10_p10) target bundleno = 3 (0x3), region = 96 }

// kernel: alexnet_forward.17
= control target key start
LH: loop header
LB: loop body
LE: loop exit
PB: predicated region body
PF: predicated region fallthrough
CT: control target
= control target key end

     0   :  { %s2334_s1 = inlined_call_operand.vmem [shape: bf16[2048,128], index: 1, kind: input, shape index: {}]   ;;  %s2335_s0 = inlined_call_operand.vmem [shape: bf16[8,2048], index: 0, kind: input, shape index: {}]   ;;  %s2336_s2 = inlined_call_operand.vmem [shape: f32[1,128], index: 2, kind: input, shape index: {}]   ;;  %s2337_s3 = inlined_call_operand.vmem [shape: f32[8,128], index: 3, kind: output, shape index: {}]  }
   0x1   :  { %v1756_v0 = vld [vmem:[%s2334_s1 + $0x78] sm:$0xff]   ;;  %v1760_v4 = vld [vmem:[%s2334_s1 + $0x70] sm:$0xff]   ;;  %v1764_v8 = vld [vmem:[%s2334_s1 + $0x68] sm:$0xff]  }
   0x2   :  { %v1757_v1 = vld [vmem:[%s2334_s1 + $0xf8] sm:$0xff]   ;;  %1580 = vmatprep.subr.bf16.mxu0 %v1756_v0  ;;  %v1761_v5 = vld [vmem:[%s2334_s1 + $0xf0] sm:$0xff]   ;;  %v1765_v9 = vld [vmem:[%s2334_s1 + $0xe8] sm:$0xff]  }
   0x3   :  { %v1758_v2 = vld [vmem:[%s2334_s1 + $0x38] sm:$0xff]   ;;  %1602 = vmatprep.subr.bf16.mxu1 %v1757_v1  ;;  %v1762_v6 = vld [vmem:[%s2334_s1 + $0x30] sm:$0xff]   ;;  %v1766_v10 = vld [vmem:[%s2334_s1 + $0x28] sm:$0xff]  }
   0x4   :  { %v1759_v3 = vld [vmem:[%s2334_s1 + $0xb8] sm:$0xff]   ;;  %1581 = vmatpush3.bf16.msra.mxu0 %v1758_v2  ;;  %v1763_v7 = vld [vmem:[%s2334_s1 + $0xb0] sm:$0xff]   ;;  %v1767_v11 = vld [vmem:[%s2334_s1 + $0xa8] sm:$0xff]  }
   0x5   :  { %1603 = vmatpush3.bf16.msra.mxu1 %v1759_v3  ;;  %1582 = vmatprep.subr.bf16.mxu0 %v1760_v4  ;;  %v1768_v12 = vld [vmem:[%s2334_s1 + $0x60] sm:$0xff]   ;;  %v1772_v16 = vld [vmem:[%s2334_s1 + $0x58] sm:$0xff]   ;;  %v1776_v20 = vld [vmem:[%s2334_s1 + $0x50] sm:$0xff]  }
   0x6   :  { %1604 = vmatprep.subr.bf16.mxu1 %v1761_v5  ;;  %v1769_v13 = vld [vmem:[%s2334_s1 + $0xe0] sm:$0xff]   ;;  %v1773_v17 = vld [vmem:[%s2334_s1 + $0xd8] sm:$0xff]   ;;  %v1777_v21 = vld [vmem:[%s2334_s1 + $0xd0] sm:$0xff]  }
   0x7   :  { %v1770_v14 = vld [vmem:[%s2334_s1 + $0x20] sm:$0xff]   ;;  %v1774_v18 = vld [vmem:[%s2334_s1 + $0x18] sm:$0xff]   ;;  %v1778_v22 = vld [vmem:[%s2334_s1 + $0x10] sm:$0xff]  }
   0x8   :  { %1583 = vmatpush3.bf16.msra.mxu0 %v1762_v6  ;;  %v1771_v15 = vld [vmem:[%s2334_s1 + $0xa0] sm:$0xff]   ;;  %v1775_v19 = vld [vmem:[%s2334_s1 + $0x98] sm:$0xff]   ;;  %v1779_v23 = vld [vmem:[%s2334_s1 + $0x90] sm:$0xff]  }
   0x9   :  { %1605 = vmatpush3.bf16.msra.mxu1 %v1763_v7  ;;  %1584 = vmatprep.subr.bf16.mxu0 %v1764_v8  ;;  %v1780_v24 = vld [vmem:[%s2334_s1 + $0x48] sm:$0xff]   ;;  %v1784_v28 = vld [vmem:[%s2334_s1 + $0x40] sm:$0xff]   ;;  %v1792_v38 = vld [vmem:[%s2334_s1 + $0x178] sm:$0xff]  }
   0xa   :  { %1606 = vmatprep.subr.bf16.mxu1 %v1765_v9  ;;  %v1781_v25 = vld [vmem:[%s2334_s1 + $0xc8] sm:$0xff]   ;;  %v1785_v29 = vld [vmem:[%s2334_s1 + $0xc0] sm:$0xff]   ;;  %v1793_v39 = vld [vmem:[%s2334_s1 + $0x1f8] sm:$0xff]  }
   0xb   :  { %v1782_v26 = vld [vmem:[%s2334_s1 + $0x8] sm:$0xff]   ;;  %v1786_v30 = vld [vmem:[%s2334_s1] sm:$0xff]   ;;  %v1794_v40 = vld [vmem:[%s2334_s1 + $0x138] sm:$0xff]  }
   0xc   :  { %1585 = vmatpush3.bf16.msra.mxu0 %v1766_v10  ;;  %v1783_v27 = vld [vmem:[%s2334_s1 + $0x88] sm:$0xff]   ;;  %v1787_v31 = vld [vmem:[%s2334_s1 + $0x80] sm:$0xff]   ;;  %v1795_v41 = vld [vmem:[%s2334_s1 + $0x1b8] sm:$0xff]  }
   0xd   :  { %1607 = vmatpush3.bf16.msra.mxu1 %v1767_v11  ;;  %1586 = vmatprep.subr.bf16.mxu0 %v1768_v12  ;;  %v15_v32 = vld [vmem:[%s2335_s0] sm:$0xff]  ;;  %v16_v33 = vld [vmem:[%s2335_s0 + $0x8] sm:$0xff]  ;;  %v1796_v42 = vld [vmem:[%s2334_s1 + $0x170] sm:$0xff]  }
   0xe   :  { %1608 = vmatprep.subr.bf16.mxu1 %v1769_v13  ;;  %v1436_v34 = vcombine.low %v15_v32, %v15_v32  ;;  %v1437_v35 = vcombine.high %v15_v32, %v15_v32  ;;  %v1438_v36 = vcombine.low %v16_v33, %v16_v33  ;;  %v1439_v37 = vcombine.high %v16_v33, %v16_v33  ;;  %v1797_v43 = vld [vmem:[%s2334_s1 + $0x1f0] sm:$0xff]   ;;  %v1800_v46 = vld [vmem:[%s2334_s1 + $0x168] sm:$0xff]   ;;  %v1804_v50 = vld [vmem:[%s2334_s1 + $0x160] sm:$0xff]  }
   0xf   :  { %v1798_v44 = vld [vmem:[%s2334_s1 + $0x130] sm:$0xff]   ;;  %v1801_v47 = vld [vmem:[%s2334_s1 + $0x1e8] sm:$0xff]   ;;  %v1805_v51 = vld [vmem:[%s2334_s1 + $0x1e0] sm:$0xff]  }
  0x10   :  { %1587 = vmatpush3.bf16.msra.mxu0 %v1770_v14  ;;  %1142 = vmatprep.mubr.bf16.mxu0 %v1437_v35  ;;  %v1799_v45 = vld [vmem:[%s2334_s1 + $0x1b0] sm:$0xff]   ;;  %v1802_v48 = vld [vmem:[%s2334_s1 + $0x128] sm:$0xff]   ;;  %v1806_v52 = vld [vmem:[%s2334_s1 + $0x120] sm:$0xff]  }
  0x11   :  { %1609 = vmatpush3.bf16.msra.mxu1 %v1771_v15  ;;  %1588 = vmatprep.subr.bf16.mxu0 %v1772_v16  ;;  %v1803_v49 = vld [vmem:[%s2334_s1 + $0x1a8] sm:$0xff]   ;;  %v1807_v53 = vld [vmem:[%s2334_s1 + $0x1a0] sm:$0xff]   ;;  %v1808_v54 = vld [vmem:[%s2334_s1 + $0x158] sm:$0xff]  }
  0x12   :  { %1610 = vmatprep.subr.bf16.mxu1 %v1773_v17  ;;  %1182 = vmatprep.mubr.bf16.mxu1 %v1439_v37  ;;  %v1809_v55 = vld [vmem:[%s2334_s1 + $0x1d8] sm:$0xff]   ;;  %v1812_v58 = vld [vmem:[%s2334_s1 + $0x150] sm:$0xff]   ;;  %v1816_v62 = vld [vmem:[%s2334_s1 + $0x148] sm:$0xff]  }
  0x13   :  { %v1810_v56 = vld [vmem:[%s2334_s1 + $0x118] sm:$0xff]   ;;  %v1813_v59 = vld [vmem:[%s2334_s1 + $0x1d0] sm:$0xff]   ;;  %v1817_v63 = vld [vmem:[%s2334_s1 + $0x1c8] sm:$0xff]  }
  0x14   :  { %1589 = vmatpush3.bf16.msra.mxu0 %v1774_v18  ;;  %v1811_v57 = vld [vmem:[%s2334_s1 + $0x198] sm:$0xff]   ;;  %v1814_v60 = vld [vmem:[%s2334_s1 + $0x110] sm:$0xff]   ;;  %v1818_v0 = vld [vmem:[%s2334_s1 + $0x108] sm:$0xff]  }
  0x15   :  { %1611 = vmatpush3.bf16.msra.mxu1 %v1775_v19  ;;  %1590 = vmatprep.subr.bf16.mxu0 %v1776_v20  ;;  %v1815_v61 = vld [vmem:[%s2334_s1 + $0x190] sm:$0xff]   ;;  %v1819_v1 = vld [vmem:[%s2334_s1 + $0x188] sm:$0xff]   ;;  %v1820_v2 = vld [vmem:[%s2334_s1 + $0x140] sm:$0xff]  }
  0x16   :  { %1612 = vmatprep.subr.bf16.mxu1 %v1777_v21  ;;  %v1821_v3 = vld [vmem:[%s2334_s1 + $0x1c0] sm:$0xff]   ;;  %v17_v6 = vld [vmem:[%s2335_s0 + $0x10] sm:$0xff]  ;;  %v18_v9 = vld [vmem:[%s2335_s0 + $0x18] sm:$0xff] }
  0x17   :  { %v1822_v4 = vld [vmem:[%s2334_s1 + $0x100] sm:$0xff]   ;;  %v1440_v7 = vcombine.low %v17_v6, %v17_v6  ;;  %v1441_v8 = vcombine.high %v17_v6, %v17_v6  ;;  %v1442_v10 = vcombine.low %v18_v9, %v18_v9  ;;  %v1443_v11 = vcombine.high %v18_v9, %v18_v9  ;;  %v1828_v12 = vld [vmem:[%s2334_s1 + $0x278] sm:$0xff]   ;;  %v1832_v16 = vld [vmem:[%s2334_s1 + $0x270] sm:$0xff]  }
  0x18   :  { %1591 = vmatpush3.bf16.msra.mxu0 %v1778_v22  ;;  %v1823_v5 = vld [vmem:[%s2334_s1 + $0x180] sm:$0xff]   ;;  %v1829_v13 = vld [vmem:[%s2334_s1 + $0x2f8] sm:$0xff]   ;;  %v1833_v17 = vld [vmem:[%s2334_s1 + $0x2f0] sm:$0xff]  }
  0x19   :  { %1613 = vmatpush3.bf16.msra.mxu1 %v1779_v23  ;;  %1592 = vmatprep.subr.bf16.mxu0 %v1780_v24  ;;  %v1830_v14 = vld [vmem:[%s2334_s1 + $0x238] sm:$0xff]   ;;  %v1834_v18 = vld [vmem:[%s2334_s1 + $0x230] sm:$0xff]   ;;  %v1836_v20 = vld [vmem:[%s2334_s1 + $0x268] sm:$0xff]  }
  0x1a   :  { %1614 = vmatprep.subr.bf16.mxu1 %v1781_v25  ;;  %v1831_v15 = vld [vmem:[%s2334_s1 + $0x2b8] sm:$0xff]   ;;  %v1835_v19 = vld [vmem:[%s2334_s1 + $0x2b0] sm:$0xff]   ;;  %v1837_v21 = vld [vmem:[%s2334_s1 + $0x2e8] sm:$0xff]  }
  0x1b   :  { %v1838_v22 = vld [vmem:[%s2334_s1 + $0x228] sm:$0xff]   ;;  %v1840_v24 = vld [vmem:[%s2334_s1 + $0x260] sm:$0xff]   ;;  %v1848_v32 = vld [vmem:[%s2334_s1 + $0x250] sm:$0xff]  }
  0x1c   :  { %1593 = vmatpush3.bf16.msra.mxu0 %v1782_v26  ;;  %v1839_v23 = vld [vmem:[%s2334_s1 + $0x2a8] sm:$0xff]   ;;  %v1841_v25 = vld [vmem:[%s2334_s1 + $0x2e0] sm:$0xff]   ;;  %v1849_v33 = vld [vmem:[%s2334_s1 + $0x2d0] sm:$0xff]  }
  0x1d   :  { %1615 = vmatpush3.bf16.msra.mxu1 %v1783_v27  ;;  %1594 = vmatprep.subr.bf16.mxu0 %v1784_v28  ;;  %v1842_v26 = vld [vmem:[%s2334_s1 + $0x220] sm:$0xff]   ;;  %v1844_v28 = vld [vmem:[%s2334_s1 + $0x258] sm:$0xff]   ;;  %v1851_v35 = vld [vmem:[%s2334_s1 + $0x290] sm:$0xff]  }
  0x1e   :  { %1616 = vmatprep.subr.bf16.mxu1 %v1785_v29  ;;  %v1843_v27 = vld [vmem:[%s2334_s1 + $0x2a0] sm:$0xff]   ;;  %v1845_v29 = vld [vmem:[%s2334_s1 + $0x2d8] sm:$0xff]   ;;  %v1853_v37 = vld [vmem:[%s2334_s1 + $0x2c8] sm:$0xff]  }
  0x1f   :  { %v1884_v6 = vld [vmem:[%s2334_s1 + $0x350] sm:$0xff]  }
  0x20   :  { %1595 = vmatpush3.bf16.msra.mxu0 %v1786_v30  ;;  %v1846_v30 = vld [vmem:[%s2334_s1 + $0x218] sm:$0xff]   ;;  %v1887_v9 = vld [vmem:[%s2334_s1 + $0x390] sm:$0xff]  }
  0x21   :  { %1617 = vmatpush3.bf16.msra.mxu1 %v1787_v31  ;;  %1624 = vmatprep.subr.bf16.mxu0 %v1792_v38  ;;  %v1847_v31 = vld [vmem:[%s2334_s1 + $0x298] sm:$0xff]   ;;  %v1854_v38 = vld [vmem:[%s2334_s1 + $0x208] sm:$0xff]  }
  0x22   :  { %1646 = vmatprep.subr.bf16.mxu1 %v1793_v39  ;;  %v1855_v39 = vld [vmem:[%s2334_s1 + $0x288] sm:$0xff]  }
  0x23   :  { %1143 = vmatmul.mubr.bf16.vlgmr.msra.gmra.mxu0 %v1436_v34  ;;  %v1850_v34 = vld [vmem:[%s2334_s1 + $0x210] sm:$0xff]  }
  0x24   :  { %1183 = vmatmul.mubr.bf16.vlgmr.msra.gmra.mxu1 %v1438_v36  ;;  %1625 = vmatpush3.bf16.msra.mxu0 %v1794_v40  ;;  %v1852_v36 = vld [vmem:[%s2334_s1 + $0x248] sm:$0xff]   ;;  %v1856_v40 = vld [vmem:[%s2334_s1 + $0x240] sm:$0xff]  }
  0x25   :  { %1647 = vmatpush3.bf16.msra.mxu1 %v1795_v41  ;;  %1626 = vmatprep.subr.bf16.mxu0 %v1796_v42  ;;  %v1857_v41 = vld [vmem:[%s2334_s1 + $0x2c0] sm:$0xff]  }
  0x26   :  { %1648 = vmatprep.subr.bf16.mxu1 %v1797_v43  ;;  %1222 = vmatprep.mubr.bf16.mxu0 %v1441_v8  ;;  %v1858_v42 = vld [vmem:[%s2334_s1 + $0x200] sm:$0xff]   ;;  %v1886_v8 = vld [vmem:[%s2334_s1 + $0x310] sm:$0xff]  }
  0x27   :  { %1262 = vmatprep.mubr.bf16.mxu1 %v1443_v11  ;;  %v1859_v43 = vld [vmem:[%s2334_s1 + $0x280] sm:$0xff]   ;;  %v1889_v11 = vld [vmem:[%s2334_s1 + $0x3c8] sm:$0xff]  }
  0x28   :  { %1627 = vmatpush3.bf16.msra.mxu0 %v1798_v44  ;;  %v19_v44 = vld [vmem:[%s2335_s0 + $0x20] sm:$0xff] }
  0x29   :  { %1649 = vmatpush3.bf16.msra.mxu1 %v1799_v45  ;;  %1628 = vmatprep.subr.bf16.mxu0 %v1800_v46  ;;  %v20_v45 = vld [vmem:[%s2335_s0 + $0x28] sm:$0xff]  ;;  %v1444_v46 = vcombine.low %v19_v44, %v19_v44 }
  0x2a   :  { %1650 = vmatprep.subr.bf16.mxu1 %v1801_v47  ;;  %v1445_v47 = vcombine.high %v19_v44, %v19_v44 }
  0x2c   :  { %1629 = vmatpush3.bf16.msra.mxu0 %v1802_v48  ;;  %v1446_v48 = vcombine.low %v20_v45, %v20_v45 }
  0x2d   :  { %1651 = vmatpush3.bf16.msra.mxu1 %v1803_v49  ;;  %1630 = vmatprep.subr.bf16.mxu0 %v1804_v50  ;;  %v1447_v49 = vcombine.high %v20_v45, %v20_v45  ;;  %v1864_v50 = vld [vmem:[%s2334_s1 + $0x378] sm:$0xff]  }
  0x2e   :  { %1652 = vmatprep.subr.bf16.mxu1 %v1805_v51  ;;  %v1865_v51 = vld [vmem:[%s2334_s1 + $0x3f8] sm:$0xff]  }
  0x30   :  { %1631 = vmatpush3.bf16.msra.mxu0 %v1806_v52  ;;  %v1866_v52 = vld [vmem:[%s2334_s1 + $0x338] sm:$0xff]  }
  0x31   :  { %1653 = vmatpush3.bf16.msra.mxu1 %v1807_v53  ;;  %1632 = vmatprep.subr.bf16.mxu0 %v1808_v54  ;;  %v1867_v53 = vld [vmem:[%s2334_s1 + $0x3b8] sm:$0xff]   ;;  %v1868_v54 = vld [vmem:[%s2334_s1 + $0x370] sm:$0xff]  }
  0x32   :  { %1654 = vmatprep.subr.bf16.mxu1 %v1809_v55  ;;  %v1869_v55 = vld [vmem:[%s2334_s1 + $0x3f0] sm:$0xff]  }
  0x34   :  { %1633 = vmatpush3.bf16.msra.mxu0 %v1810_v56  ;;  %v1870_v56 = vld [vmem:[%s2334_s1 + $0x330] sm:$0xff]  }
  0x35   :  { %1655 = vmatpush3.bf16.msra.mxu1 %v1811_v57  ;;  %1634 = vmatprep.subr.bf16.mxu0 %v1812_v58  ;;  %v1871_v57 = vld [vmem:[%s2334_s1 + $0x3b0] sm:$0xff]   ;;  %v1872_v58 = vld [vmem:[%s2334_s1 + $0x368] sm:$0xff]  }
  0x36   :  { %1656 = vmatprep.subr.bf16.mxu1 %v1813_v59  ;;  %v1873_v59 = vld [vmem:[%s2334_s1 + $0x3e8] sm:$0xff]  }
  0x38   :  { %1635 = vmatpush3.bf16.msra.mxu0 %v1814_v60  ;;  %v1874_v60 = vld [vmem:[%s2334_s1 + $0x328] sm:$0xff]  }
  0x39   :  { %1657 = vmatpush3.bf16.msra.mxu1 %v1815_v61  ;;  %1636 = vmatprep.subr.bf16.mxu0 %v1816_v62  ;;  %v1875_v61 = vld [vmem:[%s2334_s1 + $0x3a8] sm:$0xff]   ;;  %v1876_v62 = vld [vmem:[%s2334_s1 + $0x360] sm:$0xff]  }
  0x3a   :  { %1658 = vmatprep.subr.bf16.mxu1 %v1817_v63  ;;  %v1877_v63 = vld [vmem:[%s2334_s1 + $0x3e0] sm:$0xff]  }
  0x3c   :  { %1637 = vmatpush3.bf16.msra.mxu0 %v1818_v0  ;;  %v1878_v0 = vld [vmem:[%s2334_s1 + $0x320] sm:$0xff]  }
  0x3d   :  { %1659 = vmatpush3.bf16.msra.mxu1 %v1819_v1  ;;  %1638 = vmatprep.subr.bf16.mxu0 %v1820_v2  ;;  %v1879_v1 = vld [vmem:[%s2334_s1 + $0x3a0] sm:$0xff]   ;;  %v1880_v2 = vld [vmem:[%s2334_s1 + $0x358] sm:$0xff]  }
  0x3e   :  { %1660 = vmatprep.subr.bf16.mxu1 %v1821_v3  ;;  %v1881_v3 = vld [vmem:[%s2334_s1 + $0x3d8] sm:$0xff]  }
  0x40   :  { %1639 = vmatpush3.bf16.msra.mxu0 %v1822_v4  ;;  %v1882_v4 = vld [vmem:[%s2334_s1 + $0x318] sm:$0xff]  }
  0x41   :  { %1661 = vmatpush3.bf16.msra.mxu1 %v1823_v5  ;;  %1668 = vmatprep.subr.bf16.mxu0 %v1828_v12  ;;  %v1883_v5 = vld [vmem:[%s2334_s1 + $0x398] sm:$0xff]   ;;  %v1890_v12 = vld [vmem:[%s2334_s1 + $0x308] sm:$0xff]  }
  0x42   :  { %1690 = vmatprep.subr.bf16.mxu1 %v1829_v13  ;;  %v1891_v13 = vld [vmem:[%s2334_s1 + $0x388] sm:$0xff]  }
  0x43   :  { %1223 = vmatmul.mubr.bf16.vlgmr.msra.gmra.mxu0 %v1440_v7  ;;  %v1885_v7 = vld [vmem:[%s2334_s1 + $0x3d0] sm:$0xff]  }
  0x44   :  { %1263 = vmatmul.mubr.bf16.vlgmr.msra.gmra.mxu1 %v1442_v10  ;;  %1669 = vmatpush3.bf16.msra.mxu0 %v1830_v14  ;;  %v1888_v10 = vld [vmem:[%s2334_s1 + $0x348] sm:$0xff]   ;;  %v1892_v14 = vld [vmem:[%s2334_s1 + $0x340] sm:$0xff]  }
  0x45   :  { %1691 = vmatpush3.bf16.msra.mxu1 %v1831_v15  ;;  %1670 = vmatprep.subr.bf16.mxu0 %v1832_v16  ;;  %v1893_v15 = vld [vmem:[%s2334_s1 + $0x3c0] sm:$0xff]  }
  0x46   :  { %1692 = vmatprep.subr.bf16.mxu1 %v1833_v17  ;;  %1302 = vmatprep.mubr.bf16.mxu0 %v1445_v47  ;;  %v1894_v16 = vld [vmem:[%s2334_s1 + $0x300] sm:$0xff]  }
  0x47   :  { %1342 = vmatprep.mubr.bf16.mxu1 %v1447_v49  ;;  %v1895_v17 = vld [vmem:[%s2334_s1 + $0x380] sm:$0xff]  }
  0x48   :  { %1671 = vmatpush3.bf16.msra.mxu0 %v1834_v18  ;;  %v21_v18 = vld [vmem:[%s2335_s0 + $0x30] sm:$0xff] }
  0x49   :  { %1693 = vmatpush3.bf16.msra.mxu1 %v1835_v19  ;;  %1672 = vmatprep.subr.bf16.mxu0 %v1836_v20  ;;  %v22_v19 = vld [vmem:[%s2335_s0 + $0x38] sm:$0xff]  ;;  %v1448_v20 = vcombine.low %v21_v18, %v21_v18 }
  0x4a   :  { %1694 = vmatprep.subr.bf16.mxu1 %v1837_v21  ;;  %v1449_v21 = vcombine.high %v21_v18, %v21_v18 }
  0x4c   :  { %1673 = vmatpush3.bf16.msra.mxu0 %v1838_v22  ;;  %v1450_v22 = vcombine.low %v22_v19, %v22_v19 }
  0x4d   :  { %1695 = vmatpush3.bf16.msra.mxu1 %v1839_v23  ;;  %1674 = vmatprep.subr.bf16.mxu0 %v1840_v24  ;;  %v1451_v23 = vcombine.high %v22_v19, %v22_v19 }
  0x4e   :  { %1696 = vmatprep.subr.bf16.mxu1 %v1841_v25 }
  0x50   :  { %1675 = vmatpush3.bf16.msra.mxu0 %v1842_v26  ;;  %v1435_v26 = vld [vmem:[%s2336_s2] ss:$0 sm:$0xff] }
  0x51   :  { %1697 = vmatpush3.bf16.msra.mxu1 %v1843_v27  ;;  %1676 = vmatprep.subr.bf16.mxu0 %v1844_v28 }
  0x52   :  { %1698 = vmatprep.subr.bf16.mxu1 %v1845_v29 }
  0x54   :  { %1677 = vmatpush3.bf16.msra.mxu0 %v1846_v30 }
  0x55   :  { %1699 = vmatpush3.bf16.msra.mxu1 %v1847_v31  ;;  %1678 = vmatprep.subr.bf16.mxu0 %v1848_v32 }
  0x56   :  { %1700 = vmatprep.subr.bf16.mxu1 %v1849_v33 }
  0x58   :  { %1679 = vmatpush3.bf16.msra.mxu0 %v1850_v34 }
  0x59   :  { %1701 = vmatpush3.bf16.msra.mxu1 %v1851_v35  ;;  %1680 = vmatprep.subr.bf16.mxu0 %v1852_v36 }
  0x5a   :  { %1702 = vmatprep.subr.bf16.mxu1 %v1853_v37 }
  0x5c   :  { %1681 = vmatpush3.bf16.msra.mxu0 %v1854_v38 }
  0x5d   :  { %1703 = vmatpush3.bf16.msra.mxu1 %v1855_v39  ;;  %1682 = vmatprep.subr.bf16.mxu0 %v1856_v40 }
  0x5e   :  { %1704 = vmatprep.subr.bf16.mxu1 %v1857_v41 }
  0x60   :  { %1683 = vmatpush3.bf16.msra.mxu0 %v1858_v42 }
  0x61   :  { %1705 = vmatpush3.bf16.msra.mxu1 %v1859_v43  ;;  %1712 = vmatprep.subr.bf16.mxu0 %v1864_v50 }
  0x62   :  { %1734 = vmatprep.subr.bf16.mxu1 %v1865_v51 }
  0x63   :  { %1303 = vmatmul.mubr.bf16.vlgmr.msra.gmra.mxu0 %v1444_v46 }
  0x64   :  { %1343 = vmatmul.mubr.bf16.vlgmr.msra.gmra.mxu1 %v1446_v48  ;;  %1713 = vmatpush3.bf16.msra.mxu0 %v1866_v52 }
  0x65   :  { %1735 = vmatpush3.bf16.msra.mxu1 %v1867_v53  ;;  %1714 = vmatprep.subr.bf16.mxu0 %v1868_v54 }
  0x66   :  { %1736 = vmatprep.subr.bf16.mxu1 %v1869_v55  ;;  %1382 = vmatprep.mubr.bf16.mxu0 %v1449_v21 }
  0x67   :  { %1422 = vmatprep.mubr.bf16.mxu1 %v1451_v23 }
  0x68   :  { %1715 = vmatpush3.bf16.msra.mxu0 %v1870_v56 }
  0x69   :  { %1737 = vmatpush3.bf16.msra.mxu1 %v1871_v57  ;;  %1716 = vmatprep.subr.bf16.mxu0 %v1872_v58 }
  0x6a   :  { %1738 = vmatprep.subr.bf16.mxu1 %v1873_v59 }
  0x6c   :  { %1717 = vmatpush3.bf16.msra.mxu0 %v1874_v60 }
  0x6d   :  { %1739 = vmatpush3.bf16.msra.mxu1 %v1875_v61  ;;  %1718 = vmatprep.subr.bf16.mxu0 %v1876_v62 }
  0x6e   :  { %1740 = vmatprep.subr.bf16.mxu1 %v1877_v63 }
  0x70   :  { %1719 = vmatpush3.bf16.msra.mxu0 %v1878_v0 }
  0x71   :  { %1741 = vmatpush3.bf16.msra.mxu1 %v1879_v1  ;;  %1720 = vmatprep.subr.bf16.mxu0 %v1880_v2 }
  0x72   :  { %1742 = vmatprep.subr.bf16.mxu1 %v1881_v3 }
  0x74   :  { %1721 = vmatpush3.bf16.msra.mxu0 %v1882_v4 }
  0x75   :  { %1743 = vmatpush3.bf16.msra.mxu1 %v1883_v5  ;;  %1722 = vmatprep.subr.bf16.mxu0 %v1884_v6 }
  0x76   :  { %1744 = vmatprep.subr.bf16.mxu1 %v1885_v7 }
  0x78   :  { %1723 = vmatpush3.bf16.msra.mxu0 %v1886_v8 }
  0x79   :  { %1745 = vmatpush3.bf16.msra.mxu1 %v1887_v9  ;;  %1724 = vmatprep.subr.bf16.mxu0 %v1888_v10 }
  0x7a   :  { %1746 = vmatprep.subr.bf16.mxu1 %v1889_v11 }
  0x7c   :  { %1725 = vmatpush3.bf16.msra.mxu0 %v1890_v12 }
  0x7d   :  { %1747 = vmatpush3.bf16.msra.mxu1 %v1891_v13  ;;  %1726 = vmatprep.subr.bf16.mxu0 %v1892_v14 }
  0x7e   :  { %1748 = vmatprep.subr.bf16.mxu1 %v1893_v15 }
  0x80   :  { %1727 = vmatpush3.bf16.msra.mxu0 %v1894_v16 }
  0x81   :  { %1749 = vmatpush3.bf16.msra.mxu1 %v1895_v17 }
  0x83   :  { %1383 = vmatmul.mubr.bf16.vlgmr.msra.gmra.mxu0 %v1448_v20 }
  0x84   :  { %1423 = vmatmul.mubr.bf16.vlgmr.msra.gmra.mxu1 %v1450_v22 }
  0xe3   :  { %v1596_v24 = vpop.f32.mrf.mxu0 }
  0xe4   :  { %v1618_v25 = vpop.f32.mrf.mxu1 }
  0xe5   :  { %v1597_v27 = vpop.f32.mrf.mxu0 }
  0xe6   :  { %v1619_v28 = vpop.f32.mrf.mxu1  ;;  %v1598_v29 = vadd.f32 %v1597_v27, %v1596_v24 }
  0xe7   :  { %v1620_v30 = vadd.f32 %v1619_v28, %v1618_v25  ;;  %v1599_v31 = vpop.f32.mrf.mxu0 }
  0xe8   :  { %v1621_v32 = vpop.f32.mrf.mxu1  ;;  %v1145_v33 = vadd.f32 %v1598_v29, %v1435_v26 }
  0xe9   :  { %v1600_v34 = vpop.f32.mrf.mxu0 }
  0xea   :  { %v1622_v35 = vpop.f32.mrf.mxu1  ;;  %v1185_v36 = vadd.f32 %v1620_v30, %v1145_v33 }
 0x103   :  { %v1640_v37 = vpop.f32.mrf.mxu0 }
 0x104   :  { %v1662_v38 = vpop.f32.mrf.mxu1 }
 0x105   :  { %v1641_v39 = vpop.f32.mrf.mxu0 }
 0x106   :  { %v1663_v40 = vpop.f32.mrf.mxu1  ;;  %v1642_v53 = vadd.f32 %v1641_v39, %v1640_v37 }
 0x107   :  { %v1643_v41 = vpop.f32.mrf.mxu0  ;;  %v1664_v55 = vadd.f32 %v1663_v40, %v1662_v38 }
 0x108   :  { %v1665_v42 = vpop.f32.mrf.mxu1  ;;  %v1225_v54 = vadd.f32 %v1642_v53, %v1185_v36 }
 0x109   :  { %v1644_v43 = vpop.f32.mrf.mxu0 }
 0x10a   :  { %v1666_v44 = vpop.f32.mrf.mxu1  ;;  %v1265_v57 = vadd.f32 %v1664_v55, %v1225_v54 }
 0x123   :  { %v1684_v45 = vpop.f32.mrf.mxu0 }
 0x124   :  { %v1706_v46 = vpop.f32.mrf.mxu1 }
 0x125   :  { %v1685_v47 = vpop.f32.mrf.mxu0 }
 0x126   :  { %v1707_v48 = vpop.f32.mrf.mxu1  ;;  %v1686_v56 = vadd.f32 %v1685_v47, %v1684_v45 }
 0x127   :  { %v1687_v49 = vpop.f32.mrf.mxu0  ;;  %v1708_v59 = vadd.f32 %v1707_v48, %v1706_v46 }
 0x128   :  { %v1709_v50 = vpop.f32.mrf.mxu1  ;;  %v1305_v58 = vadd.f32 %v1686_v56, %v1265_v57 }
 0x129   :  { %v1688_v51 = vpop.f32.mrf.mxu0 }
 0x12a   :  { %v1710_v52 = vpop.f32.mrf.mxu1  ;;  %v1345_v63 = vadd.f32 %v1708_v59, %v1305_v58 }
 0x143   :  { %v1728_v60 = vpop.f32.mrf.mxu0 }
 0x144   :  { %v1750_v61 = vpop.f32.mrf.mxu1 }
 0x145   :  { %v1729_v62 = vpop.f32.mrf.mxu0 }
 0x146   :  { %v1730_v0 = vadd.f32 %v1729_v62, %v1728_v60  ;;  %v1751_v1 = vpop.f32.mrf.mxu1 }
 0x147   :  { %v1731_v2 = vpop.f32.mrf.mxu0  ;;  %v1752_v4 = vadd.f32 %v1751_v1, %v1750_v61 }
 0x148   :  { %v1385_v3 = vadd.f32 %v1730_v0, %v1345_v63  ;;  %v1753_v5 = vpop.f32.mrf.mxu1 }
 0x149   :  { %v1732_v6 = vpop.f32.mrf.mxu0 }
 0x14a   :  { %v1425_v7 = vadd.f32 %v1752_v4, %v1385_v3  ;;  %v1754_v8 = vpop.f32.mrf.mxu1 }
 0x14c   :  { %1430 = vst [vmem:[%s2337_s3] sm:$0xff] %v1425_v7 }

</bundles_post_ra>
